<compile_context>
chip_gen: v7x
topology: tpu7x:2x2x1
jax: 0.10.0
libtpu: 0.0.40
codegen_flags: <defaults>
</compile_context>

<pallas_src>
import functools
import numpy as np
import jax
import jax.numpy as jnp
from jax.experimental import pallas as pl
from jax.experimental.pallas import tpu as pltpu


def _round_up(x, m):
    return (x + m - 1) // m * m


def _k_pad(K):
    Kp = _round_up(K, 128)
    if Kp > 2048:
        Kp = _round_up(K, 1024)
    return Kp


# ----------------------------- Pallas kernels ------------------------------

def _conv_gemm_kernel(a_ref, w_ref, b_ref, *rest, pre_act, post_act,
                      with_stats, out_cols, single_n):
    """Fused conv GEMM: prologue activation, bf16 MXU matmul with fp32 accumulate,
    epilogue bias/tanh/store and (optionally) per-column BN sum/sumsq statistics."""
    if with_stats:
        o_ref, stats_ref, acc_ref = rest
    else:
        o_ref, acc_ref = rest

    i = pl.program_id(0)
    j = pl.program_id(1)
    k = pl.program_id(2)

    @pl.when(k == 0)
    def _():
        acc_ref[...] = jnp.zeros_like(acc_ref)

    if with_stats:
        @pl.when((i == 0) & (j == 0) & (k == 0))
        def _():
            stats_ref[...] = jnp.zeros_like(stats_ref)

    a = a_ref[...]
    if pre_act == "lrelu":
        a = jnp.where(a >= 0, a, a * jnp.asarray(0.2, a.dtype))
    elif pre_act == "relu":
        a = jnp.maximum(a, jnp.asarray(0, a.dtype))

    acc_ref[...] += jnp.dot(a, w_ref[...], preferred_element_type=jnp.float32)

    @pl.when(k == pl.num_programs(2) - 1)
    def _():
        y = acc_ref[...] + b_ref[...]
        if post_act == "tanh":
            y = jnp.tanh(y)
        o_ref[...] = y[:, :out_cols].astype(o_ref.dtype)
        if with_stats:
            cs = jnp.sum(y, axis=0, keepdims=True)
            cs2 = jnp.sum(y * y, axis=0, keepdims=True)
            upd = jnp.concatenate(
                [cs, cs2, jnp.zeros((6,) + cs.shape[1:], jnp.float32)], axis=0)
            if single_n:
                stats_ref[0] = stats_ref[0] + upd
            else:
                stats_ref[j] = stats_ref[j] + upd


def _affine_act_kernel(x_ref, s_ref, t_ref, o_ref, *, act):
    y = x_ref[...].astype(jnp.float32) * s_ref[...] + t_ref[...]
    if act == "relu":
        y = jnp.maximum(y, 0.0)
    elif act == "lrelu":
        y = jnp.where(y >= 0.0, y, 0.2 * y)
    elif act == "tanh":
        y = jnp.tanh(y)
    o_ref[...] = y.astype(o_ref.dtype)


# ------------------------------ Pallas wrappers ----------------------------

def conv_gemm(a, w_mat, bias, *, pre_act, post_act, with_stats, out_dtype, n_out):
    """a: (M, Kp) bf16, w_mat: (Kp, Np) bf16, bias: (Np,) fp32.
    Returns (out[:M, :n_out], per-column sums, per-column sumsq)."""
    M, Kp = a.shape
    Np = w_mat.shape[1]

    tm = 512 if M >= 512 else _round_up(M, 8)
    Mp = _round_up(M, tm)
    if Mp != M:
        a = jnp.pad(a, ((0, Mp - M), (0, 0)))
    tk = Kp if Kp <= 2048 else 1024
    tn = min(512, Np)
    if Np % tn != 0:
        tn = 128
    nm, nn, nk = Mp // tm, Np // tn, Kp // tk

    # Output columns: write only the real channels when possible (no extra slice pass).
    if nn == 1:
        out_w, out_cols, slice_cols = n_out, n_out, False
    elif n_out % tn == 0:               # then Np == n_out automatically
        out_w, out_cols, slice_cols = n_out, tn, False
    else:
        out_w, out_cols, slice_cols = Np, tn, True

    kernel = functools.partial(
        _conv_gemm_kernel, pre_act=pre_act, post_act=post_act,
        with_stats=with_stats, out_cols=out_cols, single_n=(nn == 1))

    in_specs = [pl.BlockSpec((tm, tk), lambda i, j, k: (i, k)),
                pl.BlockSpec((tk, tn), lambda i, j, k: (k, j)),
                pl.BlockSpec((1, tn), lambda i, j, k: (0, j))]
    main_shape = jax.ShapeDtypeStruct((Mp, out_w), out_dtype)
    main_spec = pl.BlockSpec((tm, out_cols), lambda i, j, k: (i, j))

    if with_stats:
        out_shape = (main_shape,
                     jax.ShapeDtypeStruct((nn, 8, tn), jnp.float32))
        out_specs = (main_spec,
                     pl.BlockSpec((nn, 8, tn), lambda i, j, k: (0, 0, 0)))
        # keep the grid sequential so the resident stats block accumulates correctly
        semantics = ("arbitrary", "arbitrary", "arbitrary")
    else:
        out_shape = main_shape
        out_specs = main_spec
        semantics = ("parallel", "parallel", "arbitrary")

    res = pl.pallas_call(
        kernel,
        out_shape=out_shape,
        grid=(nm, nn, nk),
        in_specs=in_specs,
        out_specs=out_specs,
        scratch_shapes=[pltpu.VMEM((tm, tn), jnp.float32)],
        compiler_params=pltpu.CompilerParams(
            dimension_semantics=semantics,
            vmem_limit_bytes=48 * 1024 * 1024),
    )(a.astype(jnp.bfloat16), w_mat, bias.reshape(1, Np))

    if with_stats:
        out, stats = res
        sums = stats[:, 0, :].reshape(nn * tn)[:n_out]
        sqs = stats[:, 1, :].reshape(nn * tn)[:n_out]
    else:
        out = res
        sums = sqs = None

    out = out[:M]
    if slice_cols:
        out = out[:, :n_out]
    return out, sums, sqs


def affine_act(x2, scale, shift, act="none"):
    """y = act(x * scale + shift) per channel, lane-dense (folds C<128 into width 128)."""
    M, C = x2.shape
    if C < 128 and 128 % C == 0 and (M * C) % 128 == 0:
        fold = 128 // C
        rows, width = (M * C) // 128, 128
        xv = x2.reshape(rows, width)
        sv = jnp.tile(scale, fold).astype(jnp.float32).reshape(1, width)
        tv = jnp.tile(shift, fold).astype(jnp.float32).reshape(1, width)
    else:
        rows, width = M, C
        xv = x2
        sv = scale.astype(jnp.float32).reshape(1, width)
        tv = shift.astype(jnp.float32).reshape(1, width)

    tr = 512 if rows >= 512 else _round_up(rows, 8)
    rows_p = _round_up(rows, tr)
    if rows_p != rows:
        xv = jnp.pad(xv, ((0, rows_p - rows), (0, 0)))

    out = pl.pallas_call(
        functools.partial(_affine_act_kernel, act=act),
        out_shape=jax.ShapeDtypeStruct((rows_p, width), x2.dtype),
        grid=(rows_p // tr,),
        in_specs=[pl.BlockSpec((tr, width), lambda i: (i, 0)),
                  pl.BlockSpec((1, width), lambda i: (0, 0)),
                  pl.BlockSpec((1, width), lambda i: (0, 0))],
        out_specs=pl.BlockSpec((tr, width), lambda i: (i, 0)),
        compiler_params=pltpu.CompilerParams(
            dimension_semantics=("parallel",),
            vmem_limit_bytes=48 * 1024 * 1024),
    )(xv, sv, tv)
    out = out[:rows]
    if width != C:
        out = out.reshape(M, C)
    return out


def _bn_scale_shift(sums, sqs, count, gamma, beta, eps=1e-5):
    mean = sums / count
    var = jnp.maximum(sqs / count - mean * mean, 0.0)
    inv = jax.lax.rsqrt(var + eps)
    scale = gamma * inv
    shift = beta - mean * scale
    return scale, shift


# -------------------- conv layers (im2col + fused Pallas GEMM) --------------

def conv3d_down(x, w, b, *, pre_act, with_stats, gamma=None, beta=None):
    """Conv3d(k=4, s=2, p=1).  x: (n,d,h,w,Cin) bf16, w: (Cout,Cin,4,4,4) fp32."""
    n, d, h, wd, c = x.shape
    do, ho, wo = d // 2, h // 2, wd // 2
    cout = w.shape[0]
    K = 64 * c
    Kp = _k_pad(K)
    Np = _round_up(cout, 128)

    xp = jnp.pad(x, ((0, 0), (1, 1), (1, 1), (1, 1), (0, 0)))
    cols = []
    for kd in range(4):
        for kh in range(4):
            for kw in range(4):
                cols.append(xp[:, kd:kd + 2 * do:2,
                               kh:kh + 2 * ho:2,
                               kw:kw + 2 * wo:2, :])
    if Kp > K:
        cols.append(jnp.zeros((n, do, ho, wo, Kp - K), x.dtype))
    a = jnp.concatenate(cols, axis=-1).reshape(n * do * ho * wo, Kp)

    wm = jnp.transpose(w, (2, 3, 4, 1, 0)).reshape(K, cout)
    wm = jnp.pad(wm, ((0, Kp - K), (0, Np - cout))).astype(jnp.bfloat16)
    bias = jnp.pad(b, (0, Np - cout)).astype(jnp.float32)

    out, sums, sqs = conv_gemm(a, wm, bias, pre_act=pre_act, post_act=None,
                               with_stats=with_stats, out_dtype=jnp.bfloat16,
                               n_out=cout)
    M = n * do * ho * wo
    if with_stats:
        scale, shift = _bn_scale_shift(sums, sqs, M, gamma, beta)
        out = affine_act(out, scale, shift, act="none")
    return out.reshape(n, do, ho, wo, cout)


_KMAP = ((3, 1, None), (None, 2, 0))   # _KMAP[parity][tap] -> transposed-conv kernel idx


def conv3d_up(x, w, b, *, with_stats, gamma=None, beta=None, post_act=None,
              out_dtype=jnp.bfloat16):
    """ConvTranspose3d(k=4, s=2, p=1) via sub-pixel decomposition:
    an equivalent k=3,s=1,p=1 conv producing 8*Cout channels + 3D pixel shuffle.
    x: (n,d,h,w,Cin) bf16, w: (Cin,Cout,4,4,4) fp32.  ReLU is fused in the prologue."""
    n, d, h, wd, c = x.shape
    cin, cout = w.shape[0], w.shape[1]
    K = 27 * c
    Kp = _k_pad(K)
    N8 = 8 * cout
    Np = _round_up(N8, 128)

    xp = jnp.pad(x, ((0, 0), (1, 1), (1, 1), (1, 1), (0, 0)))
    cols = []
    for td in range(3):
        for th in range(3):
            for tw in range(3):
                cols.append(xp[:, td:td + d, th:th + h, tw:tw + wd, :])
    if Kp > K:
        cols.append(jnp.zeros((n, d, h, wd, Kp - K), x.dtype))
    a = jnp.concatenate(cols, axis=-1).reshape(n * d * h * wd, Kp)

    # Equivalent stride-1 conv weight: rows = (tap, Cin), cols = (parity, Cout).
    row_blocks = []
    for td in range(3):
        for th in range(3):
            for tw in range(3):
                col_blocks = []
                for pd in range(2):
                    for ph in range(2):
                        for pw in range(2):
                            kd, kh, kw = _KMAP[pd][td], _KMAP[ph][th], _KMAP[pw][tw]
                            if kd is None or kh is None or kw is None:
                                col_blocks.append(jnp.zeros((cin, cout), w.dtype))
                            else:
                                col_blocks.append(w[:, :, kd, kh, kw])
                row_blocks.append(jnp.concatenate(col_blocks, axis=1))
    wm = jnp.concatenate(row_blocks, axis=0)                      # (27*Cin, 8*Cout)
    wm = jnp.pad(wm, ((0, Kp - K), (0, Np - N8))).astype(jnp.bfloat16)
    bias = jnp.pad(jnp.tile(b, 8), (0, Np - N8)).astype(jnp.float32)

    out, sums, sqs = conv_gemm(a, wm, bias, pre_act="relu", post_act=post_act,
                               with_stats=with_stats, out_dtype=out_dtype,
                               n_out=N8)
    M = n * d * h * wd
    if with_stats:
        sums_c = sums.reshape(8, cout).sum(axis=0)
        sqs_c = sqs.reshape(8, cout).sum(axis=0)
        scale, shift = _bn_scale_shift(sums_c, sqs_c, 8 * M, gamma, beta)
        out = affine_act(out, jnp.tile(scale, 8), jnp.tile(shift, 8), act="none")

    # 3D pixel shuffle: (n,d,h,w,(pd,ph,pw,co)) -> (n, 2d, 2h, 2w, co)
    y = out.reshape(n, d, h, wd, 2, 2, 2, cout)
    y = jnp.transpose(y, (0, 1, 4, 2, 5, 3, 6, 7))
    return y.reshape(n, 2 * d, 2 * h, 2 * wd, cout)


# ----------------------------- UnetGenerator --------------------------------

def init_unet_params(key, input_nc, output_nc, num_downs, ngf):
    # Block configs from outermost -> innermost, mirroring UnetGenerator.__init__
    cfgs = [dict(input_nc=input_nc, inner_nc=ngf, outer_nc=output_nc,
                 outermost=True, innermost=False),
            dict(input_nc=ngf, inner_nc=ngf * 2, outer_nc=ngf,
                 outermost=False, innermost=False),
            dict(input_nc=ngf * 2, inner_nc=ngf * 4, outer_nc=ngf * 2,
                 outermost=False, innermost=False),
            dict(input_nc=ngf * 4, inner_nc=ngf * 8, outer_nc=ngf * 4,
                 outermost=False, innermost=False)]
    for _ in range(num_downs - 5):
        cfgs.append(dict(input_nc=ngf * 8, inner_nc=ngf * 8, outer_nc=ngf * 8,
                         outermost=False, innermost=False))
    cfgs.append(dict(input_nc=ngf * 8, inner_nc=ngf * 8, outer_nc=ngf * 8,
                     outermost=False, innermost=True))

    params = []
    for cfg in cfgs:
        key, k1, k2, k3 = jax.random.split(key, 4)
        inner, outer, inp = cfg['inner_nc'], cfg['outer_nc'], cfg['input_nc']
        up_in = inner if cfg['innermost'] else inner * 2
        p = dict(cfg)
        p['down_w'] = 0.02 * jax.random.normal(k1, (inner, inp, 4, 4, 4), jnp.float32)
        p['down_b'] = jnp.zeros((inner,), jnp.float32)   # bias=False (BatchNorm norm layer)
        p['up_w'] = 0.02 * jax.random.normal(k2, (up_in, outer, 4, 4, 4), jnp.float32)
        # Only the outermost ConvTranspose3d has bias=True in the reference module.
        p['up_b'] = (0.02 * jax.random.normal(k3, (outer,), jnp.float32)
                     if cfg['outermost'] else jnp.zeros((outer,), jnp.float32))
        if not cfg['outermost'] and not cfg['innermost']:
            p['down_gamma'] = jnp.ones((inner,), jnp.float32)
            p['down_beta'] = jnp.zeros((inner,), jnp.float32)
        if not cfg['outermost']:
            p['up_gamma'] = jnp.ones((outer,), jnp.float32)
            p['up_beta'] = jnp.zeros((outer,), jnp.float32)
        params.append(p)
    return params


def _run_block(params, idx, x):
    p = params[idx]
    if p['outermost']:
        d = conv3d_down(x, p['down_w'], p['down_b'], pre_act=None, with_stats=False)
        s = _run_block(params, idx + 1, d)
        return conv3d_up(s, p['up_w'], p['up_b'], with_stats=False,
                         post_act="tanh", out_dtype=jnp.float32)
    elif p['innermost']:
        d = conv3d_down(x, p['down_w'], p['down_b'], pre_act="lrelu", with_stats=False)
        u = conv3d_up(d, p['up_w'], p['up_b'], with_stats=True,
                      gamma=p['up_gamma'], beta=p['up_beta'])
        return jnp.concatenate([x, u], axis=-1)
    else:
        d = conv3d_down(x, p['down_w'], p['down_b'], pre_act="lrelu", with_stats=True,
                        gamma=p['down_gamma'], beta=p['down_beta'])
        s = _run_block(params, idx + 1, d)
        u = conv3d_up(s, p['up_w'], p['up_b'], with_stats=True,
                      gamma=p['up_gamma'], beta=p['up_beta'])
        # TODO(synk): nn.Dropout(0.5) branch omitted (use_dropout=False default).
        return jnp.concatenate([x, u], axis=-1)


def unet_generator_forward(params, x_ncdhw):
    # x_ncdhw: (N, C, D, H, W) — PyTorch layout
    x = jnp.transpose(x_ncdhw, (0, 2, 3, 4, 1)).astype(jnp.bfloat16)  # -> NDHWC bf16
    y = _run_block(params, 0, x)
    return jnp.transpose(y, (0, 4, 1, 2, 3)).astype(jnp.float32)      # -> NCDHW fp32


if __name__ == "__main__":
    key = jax.random.PRNGKey(0)
    kx, kp = jax.random.split(key)

    input_nc, output_nc, num_downs, ngf = 2, 1, 5, 4
    N, S = 1, 32  # spatial extent must be divisible by 2**num_downs

    x = jax.random.normal(kx, (N, input_nc, S, S, S), jnp.float32)
    params = init_unet_params(kp, input_nc, output_nc, num_downs, ngf)

    fwd = jax.jit(lambda xx: unet_generator_forward(params, xx))
    y = fwd(x)
    jax.block_until_ready(y)

    assert y.shape == (N, output_nc, S, S, S), y.shape
    assert y.dtype == jnp.float32
    assert bool(jnp.all(jnp.isfinite(y)))
    print("KERNEL_OK")
</pallas_src>

<mosaic_0001>
module attributes {stable_mosaic.version = 11 : i64} {
  func.func @_conv_gemm_kernel(%arg0: i32, %arg1: i32, %arg2: i32, %arg3: memref<512x128xbf16, #tpu.memory_space<vmem>>, %arg4: memref<128x128xbf16, #tpu.memory_space<vmem>>, %arg5: memref<1x128xf32, #tpu.memory_space<vmem>>, %arg6: memref<512x4xbf16, #tpu.memory_space<vmem>>, %arg7: memref<512x128xf32, #tpu.memory_space<vmem>>) attributes {dimension_semantics = [#tpu.dimension_semantics<parallel>, #tpu.dimension_semantics<parallel>, #tpu.dimension_semantics<arbitrary>], iteration_bounds = array<i64: 8, 1, 1>, scalar_prefetch = 0 : i64, scratch_operands = 1 : i64, tpu.core_type = #tpu.core_type<tc>, window_params = [{transform_indices = @transform_0, window_bounds = array<i64: 512, 128>}, {transform_indices = @transform_1, window_bounds = array<i64: 128, 128>}, {transform_indices = @transform_2, window_bounds = array<i64: 1, 128>}, {transform_indices = @transform_3, window_bounds = array<i64: 512, 4>}]} {
    %c0_i32 = arith.constant 0 : i32
    %0 = arith.cmpi eq, %arg2, %c0_i32 : i32
    %1 = arith.extui %0 : i1 to i32
    %c0_i32_0 = arith.constant 0 : i32
    %2 = arith.cmpi ne, %1, %c0_i32_0 : i32
    scf.if %2 {
      %cst_10 = arith.constant 0.000000e+00 : f32
      %12 = vector.broadcast %cst_10 : f32 to vector<512x128xf32>
      %c0_11 = arith.constant 0 : index
      %c0_12 = arith.constant 0 : index
      %13 = vector.load %arg7[%c0_11, %c0_12] : memref<512x128xf32, #tpu.memory_space<vmem>>, vector<512x128xf32>
      tpu.vector_store %arg7[%c0_11, %c0_12], %12 {strides = array<i32>} : memref<512x128xf32, #tpu.memory_space<vmem>>, vector<512x128xf32>,
    } else {
    }
    %c0 = arith.constant 0 : index
    %c0_1 = arith.constant 0 : index
    %3 = vector.load %arg3[%c0, %c0_1] : memref<512x128xbf16, #tpu.memory_space<vmem>>, vector<512x128xbf16>
    %c0_2 = arith.constant 0 : index
    %c0_3 = arith.constant 0 : index
    %4 = vector.load %arg7[%c0_2, %c0_3] : memref<512x128xf32, #tpu.memory_space<vmem>>, vector<512x128xf32>
    %c0_4 = arith.constant 0 : index
    %c0_5 = arith.constant 0 : index
    %5 = vector.load %arg4[%c0_4, %c0_5] : memref<128x128xbf16, #tpu.memory_space<vmem>>, vector<128x128xbf16>
    %cst = arith.constant dense<0.000000e+00> : vector<512x128xf32>
    %6 = tpu.matmul %3, %5, %cst {dimension_numbers = #tpu.dot_dimension_numbers<[1], [0], [0], [1], [0, 0, 1, 1], [], []>} : vector<512x128xbf16>, vector<128x128xbf16>, vector<512x128xf32> -> vector<512x128xf32>
    %7 = arith.addf %4, %6 : vector<512x128xf32>
    %c0_6 = arith.constant 0 : index
    %c0_7 = arith.constant 0 : index
    %8 = vector.load %arg7[%c0_6, %c0_7] : memref<512x128xf32, #tpu.memory_space<vmem>>, vector<512x128xf32>
    tpu.vector_store %arg7[%c0_6, %c0_7], %7 {strides = array<i32>} : memref<512x128xf32, #tpu.memory_space<vmem>>, vector<512x128xf32>,
    %c0_i32_8 = arith.constant 0 : i32
    %9 = arith.cmpi eq, %arg2, %c0_i32_8 : i32
    %10 = arith.extui %9 : i1 to i32
    %c0_i32_9 = arith.constant 0 : i32
    %11 = arith.cmpi ne, %10, %c0_i32_9 : i32
    scf.if %11 {
      %c0_10 = arith.constant 0 : index
      %c0_11 = arith.constant 0 : index
      %12 = vector.load %arg7[%c0_10, %c0_11] : memref<512x128xf32, #tpu.memory_space<vmem>>, vector<512x128xf32>
      %c0_12 = arith.constant 0 : index
      %c0_13 = arith.constant 0 : index
      %13 = vector.load %arg5[%c0_12, %c0_13] : memref<1x128xf32, #tpu.memory_space<vmem>>, vector<1x128xf32>
      %14 = vector.broadcast %13 : vector<1x128xf32> to vector<512x128xf32>
      %15 = arith.addf %12, %14 : vector<512x128xf32>
      %16 = vector.extract_strided_slice %15 {offsets = [0, 0], sizes = [512, 4], strides = [1, 1]} : vector<512x128xf32> to vector<512x4xf32>
      %17 = arith.truncf %16 : vector<512x4xf32> to vector<512x4xbf16>
      %c0_14 = arith.constant 0 : index
      %c0_15 = arith.constant 0 : index
      %18 = vector.load %arg6[%c0_14, %c0_15] : memref<512x4xbf16, #tpu.memory_space<vmem>>, vector<512x4xbf16>
      tpu.vector_store %arg6[%c0_14, %c0_15], %17 {strides = array<i32>} : memref<512x4xbf16, #tpu.memory_space<vmem>>, vector<512x4xbf16>,
    } else {
    }
    return
  }
  func.func @transform_0(%arg0: i32, %arg1: i32, %arg2: i32) -> (i32, i32) {
    %c0_i32 = arith.constant 0 : i32
    return %arg0, %arg2 : i32, i32
  }
  func.func @transform_1(%arg0: i32, %arg1: i32, %arg2: i32) -> (i32, i32) {
    %c0_i32 = arith.constant 0 : i32
    return %arg2, %arg1 : i32, i32
  }
  func.func @transform_2(%arg0: i32, %arg1: i32, %arg2: i32) -> (i32, i32) {
    %c0_i32 = arith.constant 0 : i32
    %c0_i32_0 = arith.constant 0 : i32
    return %c0_i32, %arg1 : i32, i32
  }
  func.func @transform_3(%arg0: i32, %arg1: i32, %arg2: i32) -> (i32, i32) {
    %c0_i32 = arith.constant 0 : i32
    return %arg0, %arg1 : i32, i32
  }
}

module attributes {stable_mosaic.version = 11 : i64} {
  func.func @_conv_gemm_kernel(%arg0: i32, %arg1: i32, %arg2: i32, %arg3: memref<512x256xbf16, #tpu.memory_space<vmem>>, %arg4: memref<256x128xbf16, #tpu.memory_space<vmem>>, %arg5: memref<1x128xf32, #tpu.memory_space<vmem>>, %arg6: memref<512x8xbf16, #tpu.memory_space<vmem>>, %arg7: memref<1x8x128xf32, #tpu.memory_space<vmem>>, %arg8: memref<512x128xf32, #tpu.memory_space<vmem>>) attributes {dimension_semantics = [#tpu.dimension_semantics<arbitrary>, #tpu.dimension_semantics<arbitrary>, #tpu.dimension_semantics<arbitrary>], iteration_bounds = array<i64: 1, 1, 1>, scalar_prefetch = 0 : i64, scratch_operands = 1 : i64, tpu.core_type = #tpu.core_type<tc>, window_params = [{transform_indices = @transform_0, window_bounds = array<i64: 512, 256>}, {transform_indices = @transform_1, window_bounds = array<i64: 256, 128>}, {transform_indices = @transform_2, window_bounds = array<i64: 1, 128>}, {transform_indices = @transform_3, window_bounds = array<i64: 512, 8>}, {pipeline_mode = #tpu.pipeline_mode<synchronous>, transform_indices = @transform_4, window_bounds = array<i64: 1, 8, 128>}]} {
    %c0_i32 = arith.constant 0 : i32
    %0 = arith.cmpi eq, %arg2, %c0_i32 : i32
    %1 = arith.extui %0 : i1 to i32
    %c0_i32_0 = arith.constant 0 : i32
    %2 = arith.cmpi ne, %1, %c0_i32_0 : i32
    scf.if %2 {
      %cst_16 = arith.constant 0.000000e+00 : f32
      %24 = vector.broadcast %cst_16 : f32 to vector<512x128xf32>
      %c0_17 = arith.constant 0 : index
      %c0_18 = arith.constant 0 : index
      %25 = vector.load %arg8[%c0_17, %c0_18] : memref<512x128xf32, #tpu.memory_space<vmem>>, vector<512x128xf32>
      tpu.vector_store %arg8[%c0_17, %c0_18], %24 {strides = array<i32>} : memref<512x128xf32, #tpu.memory_space<vmem>>, vector<512x128xf32>,
    } else {
    }
    %c0_i32_1 = arith.constant 0 : i32
    %3 = arith.cmpi eq, %arg0, %c0_i32_1 : i32
    %c0_i32_2 = arith.constant 0 : i32
    %4 = arith.cmpi eq, %arg1, %c0_i32_2 : i32
    %5 = arith.andi %3, %4 : i1
    %c0_i32_3 = arith.constant 0 : i32
    %6 = arith.cmpi eq, %arg2, %c0_i32_3 : i32
    %7 = arith.andi %5, %6 : i1
    %8 = arith.extui %7 : i1 to i32
    %c0_i32_4 = arith.constant 0 : i32
    %9 = arith.cmpi ne, %8, %c0_i32_4 : i32
    scf.if %9 {
      %cst_16 = arith.constant 0.000000e+00 : f32
      %24 = vector.broadcast %cst_16 : f32 to vector<1x8x128xf32>
      %c0_17 = arith.constant 0 : index
      %c0_18 = arith.constant 0 : index
      %c0_19 = arith.constant 0 : index
      %25 = vector.load %arg7[%c0_17, %c0_18, %c0_19] : memref<1x8x128xf32, #tpu.memory_space<vmem>>, vector<1x8x128xf32>
      tpu.vector_store %arg7[%c0_17, %c0_18, %c0_19], %24 {strides = array<i32>} : memref<1x8x128xf32, #tpu.memory_space<vmem>>, vector<1x8x128xf32>,
    } else {
    }
    %c0 = arith.constant 0 : index
    %c0_5 = arith.constant 0 : index
    %10 = vector.load %arg3[%c0, %c0_5] : memref<512x256xbf16, #tpu.memory_space<vmem>>, vector<512x256xbf16>
    %cst = arith.constant 0.000000e+00 : bf16
    %11 = vector.broadcast %cst : bf16 to vector<512x256xbf16>
    %12 = arith.cmpf oge, %10, %11 : vector<512x256xbf16>
    %cst_6 = arith.constant 2.001950e-01 : bf16
    %13 = vector.broadcast %cst_6 : bf16 to vector<512x256xbf16>
    %14 = arith.mulf %10, %13 : vector<512x256xbf16>
    %15 = arith.select %12, %10, %14 : vector<512x256xi1>, vector<512x256xbf16>
    %c0_7 = arith.constant 0 : index
    %c0_8 = arith.constant 0 : index
    %16 = vector.load %arg8[%c0_7, %c0_8] : memref<512x128xf32, #tpu.memory_space<vmem>>, vector<512x128xf32>
    %c0_9 = arith.constant 0 : index
    %c0_10 = arith.constant 0 : index
    %17 = vector.load %arg4[%c0_9, %c0_10] : memref<256x128xbf16, #tpu.memory_space<vmem>>, vector<256x128xbf16>
    %cst_11 = arith.constant dense<0.000000e+00> : vector<512x128xf32>
    %18 = tpu.matmul %15, %17, %cst_11 {dimension_numbers = #tpu.dot_dimension_numbers<[1], [0], [0], [1], [0, 0, 1, 1], [], []>} : vector<512x256xbf16>, vector<256x128xbf16>, vector<512x128xf32> -> vector<512x128xf32>
    %19 = arith.addf %16, %18 : vector<512x128xf32>
    %c0_12 = arith.constant 0 : index
    %c0_13 = arith.constant 0 : index
    %20 = vector.load %arg8[%c0_12, %c0_13] : memref<512x128xf32, #tpu.memory_space<vmem>>, vector<512x128xf32>
    tpu.vector_store %arg8[%c0_12, %c0_13], %19 {strides = array<i32>} : memref<512x128xf32, #tpu.memory_space<vmem>>, vector<512x128xf32>,
    %c0_i32_14 = arith.constant 0 : i32
    %21 = arith.cmpi eq, %arg2, %c0_i32_14 : i32
    %22 = arith.extui %21 : i1 to i32
    %c0_i32_15 = arith.constant 0 : i32
    %23 = arith.cmpi ne, %22, %c0_i32_15 : i32
    scf.if %23 {
      %c0_16 = arith.constant 0 : index
      %c0_17 = arith.constant 0 : index
      %24 = vector.load %arg8[%c0_16, %c0_17] : memref<512x128xf32, #tpu.memory_space<vmem>>, vector<512x128xf32>
      %c0_18 = arith.constant 0 : index
      %c0_19 = arith.constant 0 : index
      %25 = vector.load %arg5[%c0_18, %c0_19] : memref<1x128xf32, #tpu.memory_space<vmem>>, vector<1x128xf32>
      %26 = vector.broadcast %25 : vector<1x128xf32> to vector<512x128xf32>
      %27 = arith.addf %24, %26 : vector<512x128xf32>
      %28 = vector.extract_strided_slice %27 {offsets = [0, 0], sizes = [512, 8], strides = [1, 1]} : vector<512x128xf32> to vector<512x8xf32>
      %29 = arith.truncf %28 : vector<512x8xf32> to vector<512x8xbf16>
      %c0_20 = arith.constant 0 : index
      %c0_21 = arith.constant 0 : index
      %30 = vector.load %arg6[%c0_20, %c0_21] : memref<512x8xbf16, #tpu.memory_space<vmem>>, vector<512x8xbf16>
      tpu.vector_store %arg6[%c0_20, %c0_21], %29 {strides = array<i32>} : memref<512x8xbf16, #tpu.memory_space<vmem>>, vector<512x8xbf16>,
      %cst_22 = arith.constant dense<0.000000e+00> : vector<128xf32>
      %31 = vector.multi_reduction <add>, %27, %cst_22 [0] : vector<512x128xf32> to vector<128xf32>
      %32 = vector.shape_cast %31 : vector<128xf32> to vector<1x128xf32>
      %33 = arith.mulf %27, %27 : vector<512x128xf32>
      %cst_23 = arith.constant dense<0.000000e+00> : vector<128xf32>
      %34 = vector.multi_reduction <add>, %33, %cst_23 [0] : vector<512x128xf32> to vector<128xf32>
      %35 = vector.shape_cast %34 : vector<128xf32> to vector<1x128xf32>
      %cst_24 = arith.constant 0.000000e+00 : f32
      %36 = vector.broadcast %cst_24 : f32 to vector<6x128xf32>
      %37 = tpu.concatenate %32, %35, %36 in 0 : vector<1x128xf32>, vector<1x128xf32>, vector<6x128xf32> -> vector<8x128xf32>
      %c0_25 = arith.constant 0 : index
      %c0_26 = arith.constant 0 : index
      %c0_27 = arith.constant 0 : index
      %38 = vector.load %arg7[%c0_25, %c0_26, %c0_27] : memref<1x8x128xf32, #tpu.memory_space<vmem>>, vector<1x8x128xf32>
      %39 = vector.shape_cast %38 : vector<1x8x128xf32> to vector<8x128xf32>
      %40 = arith.addf %39, %37 : vector<8x128xf32>
      %c0_28 = arith.constant 0 : index
      %c0_29 = arith.constant 0 : index
      %c0_30 = arith.constant 0 : index
      %41 = vector.load %arg7[%c0_28, %c0_29, %c0_30] : memref<1x8x128xf32, #tpu.memory_space<vmem>>, vector<1x8x128xf32>
      %42 = vector.shape_cast %41 : vector<1x8x128xf32> to vector<8x128xf32>
      %43 = vector.shape_cast %40 : vector<8x128xf32> to vector<1x8x128xf32>
      tpu.vector_store %arg7[%c0_28, %c0_29, %c0_30], %43 {strides = array<i32>} : memref<1x8x128xf32, #tpu.memory_space<vmem>>, vector<1x8x128xf32>,
    } else {
    }
    return
  }
  func.func @transform_0(%arg0: i32, %arg1: i32, %arg2: i32) -> (i32, i32) {
    %c0_i32 = arith.constant 0 : i32
    return %arg0, %arg2 : i32, i32
  }
  func.func @transform_1(%arg0: i32, %arg1: i32, %arg2: i32) -> (i32, i32) {
    %c0_i32 = arith.constant 0 : i32
    return %arg2, %arg1 : i32, i32
  }
  func.func @transform_2(%arg0: i32, %arg1: i32, %arg2: i32) -> (i32, i32) {
    %c0_i32 = arith.constant 0 : i32
    %c0_i32_0 = arith.constant 0 : i32
    return %c0_i32, %arg1 : i32, i32
  }
  func.func @transform_3(%arg0: i32, %arg1: i32, %arg2: i32) -> (i32, i32) {
    %c0_i32 = arith.constant 0 : i32
    return %arg0, %arg1 : i32, i32
  }
  func.func @transform_4(%arg0: i32, %arg1: i32, %arg2: i32) -> (i32, i32, i32) {
    %c0_i32 = arith.constant 0 : i32
    %c0_i32_0 = arith.constant 0 : i32
    %c0_i32_1 = arith.constant 0 : i32
    %c0_i32_2 = arith.constant 0 : i32
    return %c0_i32, %c0_i32_0, %c0_i32_1 : i32, i32, i32
  }
}

module attributes {stable_mosaic.version = 11 : i64} {
  func.func @_affine_act_kernel(%arg0: i32, %arg1: memref<32x128xbf16, #tpu.memory_space<vmem>>, %arg2: memref<1x128xf32, #tpu.memory_space<vmem>>, %arg3: memref<1x128xf32, #tpu.memory_space<vmem>>, %arg4: memref<32x128xbf16, #tpu.memory_space<vmem>>) attributes {dimension_semantics = [#tpu.dimension_semantics<parallel>], iteration_bounds = array<i64: 1>, scalar_prefetch = 0 : i64, scratch_operands = 0 : i64, tpu.core_type = #tpu.core_type<tc>, window_params = [{transform_indices = @transform_0, window_bounds = array<i64: 32, 128>}, {pipeline_mode = #tpu.pipeline_mode<synchronous>, transform_indices = @transform_1, window_bounds = array<i64: 1, 128>}, {pipeline_mode = #tpu.pipeline_mode<synchronous>, transform_indices = @transform_2, window_bounds = array<i64: 1, 128>}, {transform_indices = @transform_3, window_bounds = array<i64: 32, 128>}]} {
    %c0 = arith.constant 0 : index
    %c0_0 = arith.constant 0 : index
    %0 = vector.load %arg1[%c0, %c0_0] : memref<32x128xbf16, #tpu.memory_space<vmem>>, vector<32x128xbf16>
    %1 = arith.extf %0 : vector<32x128xbf16> to vector<32x128xf32>
    %c0_1 = arith.constant 0 : index
    %c0_2 = arith.constant 0 : index
    %2 = vector.load %arg2[%c0_1, %c0_2] : memref<1x128xf32, #tpu.memory_space<vmem>>, vector<1x128xf32>
    %3 = vector.broadcast %2 : vector<1x128xf32> to vector<32x128xf32>
    %4 = arith.mulf %1, %3 : vector<32x128xf32>
    %c0_3 = arith.constant 0 : index
    %c0_4 = arith.constant 0 : index
    %5 = vector.load %arg3[%c0_3, %c0_4] : memref<1x128xf32, #tpu.memory_space<vmem>>, vector<1x128xf32>
    %6 = vector.broadcast %5 : vector<1x128xf32> to vector<32x128xf32>
    %7 = arith.addf %4, %6 : vector<32x128xf32>
    %8 = arith.truncf %7 : vector<32x128xf32> to vector<32x128xbf16>
    %c0_5 = arith.constant 0 : index
    %c0_6 = arith.constant 0 : index
    %9 = vector.load %arg4[%c0_5, %c0_6] : memref<32x128xbf16, #tpu.memory_space<vmem>>, vector<32x128xbf16>
    tpu.vector_store %arg4[%c0_5, %c0_6], %8 {strides = array<i32>} : memref<32x128xbf16, #tpu.memory_space<vmem>>, vector<32x128xbf16>,
    return
  }
  func.func @transform_0(%arg0: i32) -> (i32, i32) {
    %c0_i32 = arith.constant 0 : i32
    %c0_i32_0 = arith.constant 0 : i32
    return %arg0, %c0_i32 : i32, i32
  }
  func.func @transform_1(%arg0: i32) -> (i32, i32) {
    %c0_i32 = arith.constant 0 : i32
    %c0_i32_0 = arith.constant 0 : i32
    %c0_i32_1 = arith.constant 0 : i32
    return %c0_i32, %c0_i32_0 : i32, i32
  }
  func.func @transform_2(%arg0: i32) -> (i32, i32) {
    %c0_i32 = arith.constant 0 : i32
    %c0_i32_0 = arith.constant 0 : i32
    %c0_i32_1 = arith.constant 0 : i32
    return %c0_i32, %c0_i32_0 : i32, i32
  }
  func.func @transform_3(%arg0: i32) -> (i32, i32) {
    %c0_i32 = arith.constant 0 : i32
    %c0_i32_0 = arith.constant 0 : i32
    return %arg0, %c0_i32 : i32, i32
  }
}

module attributes {stable_mosaic.version = 11 : i64} {
  func.func @_conv_gemm_kernel(%arg0: i32, %arg1: i32, %arg2: i32, %arg3: memref<64x512xbf16, #tpu.memory_space<vmem>>, %arg4: memref<512x128xbf16, #tpu.memory_space<vmem>>, %arg5: memref<1x128xf32, #tpu.memory_space<vmem>>, %arg6: memref<64x16xbf16, #tpu.memory_space<vmem>>, %arg7: memref<1x8x128xf32, #tpu.memory_space<vmem>>, %arg8: memref<64x128xf32, #tpu.memory_space<vmem>>) attributes {dimension_semantics = [#tpu.dimension_semantics<arbitrary>, #tpu.dimension_semantics<arbitrary>, #tpu.dimension_semantics<arbitrary>], iteration_bounds = array<i64: 1, 1, 1>, scalar_prefetch = 0 : i64, scratch_operands = 1 : i64, tpu.core_type = #tpu.core_type<tc>, window_params = [{transform_indices = @transform_0, window_bounds = array<i64: 64, 512>}, {transform_indices = @transform_1, window_bounds = array<i64: 512, 128>}, {transform_indices = @transform_2, window_bounds = array<i64: 1, 128>}, {transform_indices = @transform_3, window_bounds = array<i64: 64, 16>}, {pipeline_mode = #tpu.pipeline_mode<synchronous>, transform_indices = @transform_4, window_bounds = array<i64: 1, 8, 128>}]} {
    %c0_i32 = arith.constant 0 : i32
    %0 = arith.cmpi eq, %arg2, %c0_i32 : i32
    %1 = arith.extui %0 : i1 to i32
    %c0_i32_0 = arith.constant 0 : i32
    %2 = arith.cmpi ne, %1, %c0_i32_0 : i32
    scf.if %2 {
      %cst_16 = arith.constant 0.000000e+00 : f32
      %24 = vector.broadcast %cst_16 : f32 to vector<64x128xf32>
      %c0_17 = arith.constant 0 : index
      %c0_18 = arith.constant 0 : index
      %25 = vector.load %arg8[%c0_17, %c0_18] : memref<64x128xf32, #tpu.memory_space<vmem>>, vector<64x128xf32>
      tpu.vector_store %arg8[%c0_17, %c0_18], %24 {strides = array<i32>} : memref<64x128xf32, #tpu.memory_space<vmem>>, vector<64x128xf32>,
    } else {
    }
    %c0_i32_1 = arith.constant 0 : i32
    %3 = arith.cmpi eq, %arg0, %c0_i32_1 : i32
    %c0_i32_2 = arith.constant 0 : i32
    %4 = arith.cmpi eq, %arg1, %c0_i32_2 : i32
    %5 = arith.andi %3, %4 : i1
    %c0_i32_3 = arith.constant 0 : i32
    %6 = arith.cmpi eq, %arg2, %c0_i32_3 : i32
    %7 = arith.andi %5, %6 : i1
    %8 = arith.extui %7 : i1 to i32
    %c0_i32_4 = arith.constant 0 : i32
    %9 = arith.cmpi ne, %8, %c0_i32_4 : i32
    scf.if %9 {
      %cst_16 = arith.constant 0.000000e+00 : f32
      %24 = vector.broadcast %cst_16 : f32 to vector<1x8x128xf32>
      %c0_17 = arith.constant 0 : index
      %c0_18 = arith.constant 0 : index
      %c0_19 = arith.constant 0 : index
      %25 = vector.load %arg7[%c0_17, %c0_18, %c0_19] : memref<1x8x128xf32, #tpu.memory_space<vmem>>, vector<1x8x128xf32>
      tpu.vector_store %arg7[%c0_17, %c0_18, %c0_19], %24 {strides = array<i32>} : memref<1x8x128xf32, #tpu.memory_space<vmem>>, vector<1x8x128xf32>,
    } else {
    }
    %c0 = arith.constant 0 : index
    %c0_5 = arith.constant 0 : index
    %10 = vector.load %arg3[%c0, %c0_5] : memref<64x512xbf16, #tpu.memory_space<vmem>>, vector<64x512xbf16>
    %cst = arith.constant 0.000000e+00 : bf16
    %11 = vector.broadcast %cst : bf16 to vector<64x512xbf16>
    %12 = arith.cmpf oge, %10, %11 : vector<64x512xbf16>
    %cst_6 = arith.constant 2.001950e-01 : bf16
    %13 = vector.broadcast %cst_6 : bf16 to vector<64x512xbf16>
    %14 = arith.mulf %10, %13 : vector<64x512xbf16>
    %15 = arith.select %12, %10, %14 : vector<64x512xi1>, vector<64x512xbf16>
    %c0_7 = arith.constant 0 : index
    %c0_8 = arith.constant 0 : index
    %16 = vector.load %arg8[%c0_7, %c0_8] : memref<64x128xf32, #tpu.memory_space<vmem>>, vector<64x128xf32>
    %c0_9 = arith.constant 0 : index
    %c0_10 = arith.constant 0 : index
    %17 = vector.load %arg4[%c0_9, %c0_10] : memref<512x128xbf16, #tpu.memory_space<vmem>>, vector<512x128xbf16>
    %cst_11 = arith.constant dense<0.000000e+00> : vector<64x128xf32>
    %18 = tpu.matmul %15, %17, %cst_11 {dimension_numbers = #tpu.dot_dimension_numbers<[1], [0], [0], [1], [0, 0, 1, 1], [], []>} : vector<64x512xbf16>, vector<512x128xbf16>, vector<64x128xf32> -> vector<64x128xf32>
    %19 = arith.addf %16, %18 : vector<64x128xf32>
    %c0_12 = arith.constant 0 : index
    %c0_13 = arith.constant 0 : index
    %20 = vector.load %arg8[%c0_12, %c0_13] : memref<64x128xf32, #tpu.memory_space<vmem>>, vector<64x128xf32>
    tpu.vector_store %arg8[%c0_12, %c0_13], %19 {strides = array<i32>} : memref<64x128xf32, #tpu.memory_space<vmem>>, vector<64x128xf32>,
    %c0_i32_14 = arith.constant 0 : i32
    %21 = arith.cmpi eq, %arg2, %c0_i32_14 : i32
    %22 = arith.extui %21 : i1 to i32
    %c0_i32_15 = arith.constant 0 : i32
    %23 = arith.cmpi ne, %22, %c0_i32_15 : i32
    scf.if %23 {
      %c0_16 = arith.constant 0 : index
      %c0_17 = arith.constant 0 : index
      %24 = vector.load %arg8[%c0_16, %c0_17] : memref<64x128xf32, #tpu.memory_space<vmem>>, vector<64x128xf32>
      %c0_18 = arith.constant 0 : index
      %c0_19 = arith.constant 0 : index
      %25 = vector.load %arg5[%c0_18, %c0_19] : memref<1x128xf32, #tpu.memory_space<vmem>>, vector<1x128xf32>
      %26 = vector.broadcast %25 : vector<1x128xf32> to vector<64x128xf32>
      %27 = arith.addf %24, %26 : vector<64x128xf32>
      %28 = vector.extract_strided_slice %27 {offsets = [0, 0], sizes = [64, 16], strides = [1, 1]} : vector<64x128xf32> to vector<64x16xf32>
      %29 = arith.truncf %28 : vector<64x16xf32> to vector<64x16xbf16>
      %c0_20 = arith.constant 0 : index
      %c0_21 = arith.constant 0 : index
      %30 = vector.load %arg6[%c0_20, %c0_21] : memref<64x16xbf16, #tpu.memory_space<vmem>>, vector<64x16xbf16>
      tpu.vector_store %arg6[%c0_20, %c0_21], %29 {strides = array<i32>} : memref<64x16xbf16, #tpu.memory_space<vmem>>, vector<64x16xbf16>,
      %cst_22 = arith.constant dense<0.000000e+00> : vector<128xf32>
      %31 = vector.multi_reduction <add>, %27, %cst_22 [0] : vector<64x128xf32> to vector<128xf32>
      %32 = vector.shape_cast %31 : vector<128xf32> to vector<1x128xf32>
      %33 = arith.mulf %27, %27 : vector<64x128xf32>
      %cst_23 = arith.constant dense<0.000000e+00> : vector<128xf32>
      %34 = vector.multi_reduction <add>, %33, %cst_23 [0] : vector<64x128xf32> to vector<128xf32>
      %35 = vector.shape_cast %34 : vector<128xf32> to vector<1x128xf32>
      %cst_24 = arith.constant 0.000000e+00 : f32
      %36 = vector.broadcast %cst_24 : f32 to vector<6x128xf32>
      %37 = tpu.concatenate %32, %35, %36 in 0 : vector<1x128xf32>, vector<1x128xf32>, vector<6x128xf32> -> vector<8x128xf32>
      %c0_25 = arith.constant 0 : index
      %c0_26 = arith.constant 0 : index
      %c0_27 = arith.constant 0 : index
      %38 = vector.load %arg7[%c0_25, %c0_26, %c0_27] : memref<1x8x128xf32, #tpu.memory_space<vmem>>, vector<1x8x128xf32>
      %39 = vector.shape_cast %38 : vector<1x8x128xf32> to vector<8x128xf32>
      %40 = arith.addf %39, %37 : vector<8x128xf32>
      %c0_28 = arith.constant 0 : index
      %c0_29 = arith.constant 0 : index
      %c0_30 = arith.constant 0 : index
      %41 = vector.load %arg7[%c0_28, %c0_29, %c0_30] : memref<1x8x128xf32, #tpu.memory_space<vmem>>, vector<1x8x128xf32>
      %42 = vector.shape_cast %41 : vector<1x8x128xf32> to vector<8x128xf32>
      %43 = vector.shape_cast %40 : vector<8x128xf32> to vector<1x8x128xf32>
      tpu.vector_store %arg7[%c0_28, %c0_29, %c0_30], %43 {strides = array<i32>} : memref<1x8x128xf32, #tpu.memory_space<vmem>>, vector<1x8x128xf32>,
    } else {
    }
    return
  }
  func.func @transform_0(%arg0: i32, %arg1: i32, %arg2: i32) -> (i32, i32) {
    %c0_i32 = arith.constant 0 : i32
    return %arg0, %arg2 : i32, i32
  }
  func.func @transform_1(%arg0: i32, %arg1: i32, %arg2: i32) -> (i32, i32) {
    %c0_i32 = arith.constant 0 : i32
    return %arg2, %arg1 : i32, i32
  }
  func.func @transform_2(%arg0: i32, %arg1: i32, %arg2: i32) -> (i32, i32) {
    %c0_i32 = arith.constant 0 : i32
    %c0_i32_0 = arith.constant 0 : i32
    return %c0_i32, %arg1 : i32, i32
  }
  func.func @transform_3(%arg0: i32, %arg1: i32, %arg2: i32) -> (i32, i32) {
    %c0_i32 = arith.constant 0 : i32
    return %arg0, %arg1 : i32, i32
  }
  func.func @transform_4(%arg0: i32, %arg1: i32, %arg2: i32) -> (i32, i32, i32) {
    %c0_i32 = arith.constant 0 : i32
    %c0_i32_0 = arith.constant 0 : i32
    %c0_i32_1 = arith.constant 0 : i32
    %c0_i32_2 = arith.constant 0 : i32
    return %c0_i32, %c0_i32_0, %c0_i32_1 : i32, i32, i32
  }
}

module attributes {stable_mosaic.version = 11 : i64} {
  func.func @_affine_act_kernel(%arg0: i32, %arg1: memref<8x128xbf16, #tpu.memory_space<vmem>>, %arg2: memref<1x128xf32, #tpu.memory_space<vmem>>, %arg3: memref<1x128xf32, #tpu.memory_space<vmem>>, %arg4: memref<8x128xbf16, #tpu.memory_space<vmem>>) attributes {dimension_semantics = [#tpu.dimension_semantics<parallel>], iteration_bounds = array<i64: 1>, scalar_prefetch = 0 : i64, scratch_operands = 0 : i64, tpu.core_type = #tpu.core_type<tc>, window_params = [{transform_indices = @transform_0, window_bounds = array<i64: 8, 128>}, {pipeline_mode = #tpu.pipeline_mode<synchronous>, transform_indices = @transform_1, window_bounds = array<i64: 1, 128>}, {pipeline_mode = #tpu.pipeline_mode<synchronous>, transform_indices = @transform_2, window_bounds = array<i64: 1, 128>}, {transform_indices = @transform_3, window_bounds = array<i64: 8, 128>}]} {
    %c0 = arith.constant 0 : index
    %c0_0 = arith.constant 0 : index
    %0 = vector.load %arg1[%c0, %c0_0] : memref<8x128xbf16, #tpu.memory_space<vmem>>, vector<8x128xbf16>
    %1 = arith.extf %0 : vector<8x128xbf16> to vector<8x128xf32>
    %c0_1 = arith.constant 0 : index
    %c0_2 = arith.constant 0 : index
    %2 = vector.load %arg2[%c0_1, %c0_2] : memref<1x128xf32, #tpu.memory_space<vmem>>, vector<1x128xf32>
    %3 = vector.broadcast %2 : vector<1x128xf32> to vector<8x128xf32>
    %4 = arith.mulf %1, %3 : vector<8x128xf32>
    %c0_3 = arith.constant 0 : index
    %c0_4 = arith.constant 0 : index
    %5 = vector.load %arg3[%c0_3, %c0_4] : memref<1x128xf32, #tpu.memory_space<vmem>>, vector<1x128xf32>
    %6 = vector.broadcast %5 : vector<1x128xf32> to vector<8x128xf32>
    %7 = arith.addf %4, %6 : vector<8x128xf32>
    %8 = arith.truncf %7 : vector<8x128xf32> to vector<8x128xbf16>
    %c0_5 = arith.constant 0 : index
    %c0_6 = arith.constant 0 : index
    %9 = vector.load %arg4[%c0_5, %c0_6] : memref<8x128xbf16, #tpu.memory_space<vmem>>, vector<8x128xbf16>
    tpu.vector_store %arg4[%c0_5, %c0_6], %8 {strides = array<i32>} : memref<8x128xbf16, #tpu.memory_space<vmem>>, vector<8x128xbf16>,
    return
  }
  func.func @transform_0(%arg0: i32) -> (i32, i32) {
    %c0_i32 = arith.constant 0 : i32
    %c0_i32_0 = arith.constant 0 : i32
    return %arg0, %c0_i32 : i32, i32
  }
  func.func @transform_1(%arg0: i32) -> (i32, i32) {
    %c0_i32 = arith.constant 0 : i32
    %c0_i32_0 = arith.constant 0 : i32
    %c0_i32_1 = arith.constant 0 : i32
    return %c0_i32, %c0_i32_0 : i32, i32
  }
  func.func @transform_2(%arg0: i32) -> (i32, i32) {
    %c0_i32 = arith.constant 0 : i32
    %c0_i32_0 = arith.constant 0 : i32
    %c0_i32_1 = arith.constant 0 : i32
    return %c0_i32, %c0_i32_0 : i32, i32
  }
  func.func @transform_3(%arg0: i32) -> (i32, i32) {
    %c0_i32 = arith.constant 0 : i32
    %c0_i32_0 = arith.constant 0 : i32
    return %arg0, %c0_i32 : i32, i32
  }
}

module attributes {stable_mosaic.version = 11 : i64} {
  func.func @_conv_gemm_kernel(%arg0: i32, %arg1: i32, %arg2: i32, %arg3: memref<8x2048xbf16, #tpu.memory_space<vmem>>, %arg4: memref<2048x128xbf16, #tpu.memory_space<vmem>>, %arg5: memref<1x128xf32, #tpu.memory_space<vmem>>, %arg6: memref<8x32xbf16, #tpu.memory_space<vmem>>, %arg7: memref<8x128xf32, #tpu.memory_space<vmem>>) attributes {dimension_semantics = [#tpu.dimension_semantics<parallel>, #tpu.dimension_semantics<parallel>, #tpu.dimension_semantics<arbitrary>], iteration_bounds = array<i64: 1, 1, 1>, scalar_prefetch = 0 : i64, scratch_operands = 1 : i64, tpu.core_type = #tpu.core_type<tc>, window_params = [{transform_indices = @transform_0, window_bounds = array<i64: 8, 2048>}, {transform_indices = @transform_1, window_bounds = array<i64: 2048, 128>}, {transform_indices = @transform_2, window_bounds = array<i64: 1, 128>}, {transform_indices = @transform_3, window_bounds = array<i64: 8, 32>}]} {
    %c0_i32 = arith.constant 0 : i32
    %0 = arith.cmpi eq, %arg2, %c0_i32 : i32
    %1 = arith.extui %0 : i1 to i32
    %c0_i32_0 = arith.constant 0 : i32
    %2 = arith.cmpi ne, %1, %c0_i32_0 : i32
    scf.if %2 {
      %cst_12 = arith.constant 0.000000e+00 : f32
      %17 = vector.broadcast %cst_12 : f32 to vector<8x128xf32>
      %c0_13 = arith.constant 0 : index
      %c0_14 = arith.constant 0 : index
      %18 = vector.load %arg7[%c0_13, %c0_14] : memref<8x128xf32, #tpu.memory_space<vmem>>, vector<8x128xf32>
      tpu.vector_store %arg7[%c0_13, %c0_14], %17 {strides = array<i32>} : memref<8x128xf32, #tpu.memory_space<vmem>>, vector<8x128xf32>,
    } else {
    }
    %c0 = arith.constant 0 : index
    %c0_1 = arith.constant 0 : index
    %3 = vector.load %arg3[%c0, %c0_1] : memref<8x2048xbf16, #tpu.memory_space<vmem>>, vector<8x2048xbf16>
    %cst = arith.constant 0.000000e+00 : bf16
    %4 = vector.broadcast %cst : bf16 to vector<8x2048xbf16>
    %5 = arith.cmpf oge, %3, %4 : vector<8x2048xbf16>
    %cst_2 = arith.constant 2.001950e-01 : bf16
    %6 = vector.broadcast %cst_2 : bf16 to vector<8x2048xbf16>
    %7 = arith.mulf %3, %6 : vector<8x2048xbf16>
    %8 = arith.select %5, %3, %7 : vector<8x2048xi1>, vector<8x2048xbf16>
    %c0_3 = arith.constant 0 : index
    %c0_4 = arith.constant 0 : index
    %9 = vector.load %arg7[%c0_3, %c0_4] : memref<8x128xf32, #tpu.memory_space<vmem>>, vector<8x128xf32>
    %c0_5 = arith.constant 0 : index
    %c0_6 = arith.constant 0 : index
    %10 = vector.load %arg4[%c0_5, %c0_6] : memref<2048x128xbf16, #tpu.memory_space<vmem>>, vector<2048x128xbf16>
    %cst_7 = arith.constant dense<0.000000e+00> : vector<8x128xf32>
    %11 = tpu.matmul %8, %10, %cst_7 {dimension_numbers = #tpu.dot_dimension_numbers<[1], [0], [0], [1], [0, 0, 1, 1], [], []>} : vector<8x2048xbf16>, vector<2048x128xbf16>, vector<8x128xf32> -> vector<8x128xf32>
    %12 = arith.addf %9, %11 : vector<8x128xf32>
    %c0_8 = arith.constant 0 : index
    %c0_9 = arith.constant 0 : index
    %13 = vector.load %arg7[%c0_8, %c0_9] : memref<8x128xf32, #tpu.memory_space<vmem>>, vector<8x128xf32>
    tpu.vector_store %arg7[%c0_8, %c0_9], %12 {strides = array<i32>} : memref<8x128xf32, #tpu.memory_space<vmem>>, vector<8x128xf32>,
    %c0_i32_10 = arith.constant 0 : i32
    %14 = arith.cmpi eq, %arg2, %c0_i32_10 : i32
    %15 = arith.extui %14 : i1 to i32
    %c0_i32_11 = arith.constant 0 : i32
    %16 = arith.cmpi ne, %15, %c0_i32_11 : i32
    scf.if %16 {
      %c0_12 = arith.constant 0 : index
      %c0_13 = arith.constant 0 : index
      %17 = vector.load %arg7[%c0_12, %c0_13] : memref<8x128xf32, #tpu.memory_space<vmem>>, vector<8x128xf32>
      %c0_14 = arith.constant 0 : index
      %c0_15 = arith.constant 0 : index
      %18 = vector.load %arg5[%c0_14, %c0_15] : memref<1x128xf32, #tpu.memory_space<vmem>>, vector<1x128xf32>
      %19 = vector.broadcast %18 : vector<1x128xf32> to vector<8x128xf32>
      %20 = arith.addf %17, %19 : vector<8x128xf32>
      %21 = vector.extract_strided_slice %20 {offsets = [0, 0], sizes = [8, 32], strides = [1, 1]} : vector<8x128xf32> to vector<8x32xf32>
      %22 = arith.truncf %21 : vector<8x32xf32> to vector<8x32xbf16>
      %c0_16 = arith.constant 0 : index
      %c0_17 = arith.constant 0 : index
      %23 = vector.load %arg6[%c0_16, %c0_17] : memref<8x32xbf16, #tpu.memory_space<vmem>>, vector<8x32xbf16>
      tpu.vector_store %arg6[%c0_16, %c0_17], %22 {strides = array<i32>} : memref<8x32xbf16, #tpu.memory_space<vmem>>, vector<8x32xbf16>,
    } else {
    }
    return
  }
  func.func @transform_0(%arg0: i32, %arg1: i32, %arg2: i32) -> (i32, i32) {
    %c0_i32 = arith.constant 0 : i32
    return %arg0, %arg2 : i32, i32
  }
  func.func @transform_1(%arg0: i32, %arg1: i32, %arg2: i32) -> (i32, i32) {
    %c0_i32 = arith.constant 0 : i32
    return %arg2, %arg1 : i32, i32
  }
  func.func @transform_2(%arg0: i32, %arg1: i32, %arg2: i32) -> (i32, i32) {
    %c0_i32 = arith.constant 0 : i32
    %c0_i32_0 = arith.constant 0 : i32
    return %c0_i32, %arg1 : i32, i32
  }
  func.func @transform_3(%arg0: i32, %arg1: i32, %arg2: i32) -> (i32, i32) {
    %c0_i32 = arith.constant 0 : i32
    return %arg0, %arg1 : i32, i32
  }
}

module attributes {stable_mosaic.version = 11 : i64} {
  func.func @_conv_gemm_kernel(%arg0: i32, %arg1: i32, %arg2: i32, %arg3: memref<8x1024xbf16, #tpu.memory_space<vmem>>, %arg4: memref<1024x128xbf16, #tpu.memory_space<vmem>>, %arg5: memref<1x128xf32, #tpu.memory_space<vmem>>, %arg6: memref<8x32xbf16, #tpu.memory_space<vmem>>, %arg7: memref<1x8x128xf32, #tpu.memory_space<vmem>>, %arg8: memref<8x128xf32, #tpu.memory_space<vmem>>) attributes {dimension_semantics = [#tpu.dimension_semantics<arbitrary>, #tpu.dimension_semantics<arbitrary>, #tpu.dimension_semantics<arbitrary>], iteration_bounds = array<i64: 1, 1, 1>, scalar_prefetch = 0 : i64, scratch_operands = 1 : i64, tpu.core_type = #tpu.core_type<tc>, window_params = [{transform_indices = @transform_0, window_bounds = array<i64: 8, 1024>}, {transform_indices = @transform_1, window_bounds = array<i64: 1024, 128>}, {transform_indices = @transform_2, window_bounds = array<i64: 1, 128>}, {transform_indices = @transform_3, window_bounds = array<i64: 8, 32>}, {pipeline_mode = #tpu.pipeline_mode<synchronous>, transform_indices = @transform_4, window_bounds = array<i64: 1, 8, 128>}]} {
    %c0_i32 = arith.constant 0 : i32
    %0 = arith.cmpi eq, %arg2, %c0_i32 : i32
    %1 = arith.extui %0 : i1 to i32
    %c0_i32_0 = arith.constant 0 : i32
    %2 = arith.cmpi ne, %1, %c0_i32_0 : i32
    scf.if %2 {
      %cst_16 = arith.constant 0.000000e+00 : f32
      %24 = vector.broadcast %cst_16 : f32 to vector<8x128xf32>
      %c0_17 = arith.constant 0 : index
      %c0_18 = arith.constant 0 : index
      %25 = vector.load %arg8[%c0_17, %c0_18] : memref<8x128xf32, #tpu.memory_space<vmem>>, vector<8x128xf32>
      tpu.vector_store %arg8[%c0_17, %c0_18], %24 {strides = array<i32>} : memref<8x128xf32, #tpu.memory_space<vmem>>, vector<8x128xf32>,
    } else {
    }
    %c0_i32_1 = arith.constant 0 : i32
    %3 = arith.cmpi eq, %arg0, %c0_i32_1 : i32
    %c0_i32_2 = arith.constant 0 : i32
    %4 = arith.cmpi eq, %arg1, %c0_i32_2 : i32
    %5 = arith.andi %3, %4 : i1
    %c0_i32_3 = arith.constant 0 : i32
    %6 = arith.cmpi eq, %arg2, %c0_i32_3 : i32
    %7 = arith.andi %5, %6 : i1
    %8 = arith.extui %7 : i1 to i32
    %c0_i32_4 = arith.constant 0 : i32
    %9 = arith.cmpi ne, %8, %c0_i32_4 : i32
    scf.if %9 {
      %cst_16 = arith.constant 0.000000e+00 : f32
      %24 = vector.broadcast %cst_16 : f32 to vector<1x8x128xf32>
      %c0_17 = arith.constant 0 : index
      %c0_18 = arith.constant 0 : index
      %c0_19 = arith.constant 0 : index
      %25 = vector.load %arg7[%c0_17, %c0_18, %c0_19] : memref<1x8x128xf32, #tpu.memory_space<vmem>>, vector<1x8x128xf32>
      tpu.vector_store %arg7[%c0_17, %c0_18, %c0_19], %24 {strides = array<i32>} : memref<1x8x128xf32, #tpu.memory_space<vmem>>, vector<1x8x128xf32>,
    } else {
    }
    %c0 = arith.constant 0 : index
    %c0_5 = arith.constant 0 : index
    %10 = vector.load %arg3[%c0, %c0_5] : memref<8x1024xbf16, #tpu.memory_space<vmem>>, vector<8x1024xbf16>
    %cst = arith.constant 0.000000e+00 : bf16
    %11 = vector.broadcast %cst : bf16 to vector<8x1024xbf16>
    %12 = arith.cmpf oge, %10, %11 : vector<8x1024xbf16>
    %cst_6 = arith.constant 2.001950e-01 : bf16
    %13 = vector.broadcast %cst_6 : bf16 to vector<8x1024xbf16>
    %14 = arith.mulf %10, %13 : vector<8x1024xbf16>
    %15 = arith.select %12, %10, %14 : vector<8x1024xi1>, vector<8x1024xbf16>
    %c0_7 = arith.constant 0 : index
    %c0_8 = arith.constant 0 : index
    %16 = vector.load %arg8[%c0_7, %c0_8] : memref<8x128xf32, #tpu.memory_space<vmem>>, vector<8x128xf32>
    %c0_9 = arith.constant 0 : index
    %c0_10 = arith.constant 0 : index
    %17 = vector.load %arg4[%c0_9, %c0_10] : memref<1024x128xbf16, #tpu.memory_space<vmem>>, vector<1024x128xbf16>
    %cst_11 = arith.constant dense<0.000000e+00> : vector<8x128xf32>
    %18 = tpu.matmul %15, %17, %cst_11 {dimension_numbers = #tpu.dot_dimension_numbers<[1], [0], [0], [1], [0, 0, 1, 1], [], []>} : vector<8x1024xbf16>, vector<1024x128xbf16>, vector<8x128xf32> -> vector<8x128xf32>
    %19 = arith.addf %16, %18 : vector<8x128xf32>
    %c0_12 = arith.constant 0 : index
    %c0_13 = arith.constant 0 : index
    %20 = vector.load %arg8[%c0_12, %c0_13] : memref<8x128xf32, #tpu.memory_space<vmem>>, vector<8x128xf32>
    tpu.vector_store %arg8[%c0_12, %c0_13], %19 {strides = array<i32>} : memref<8x128xf32, #tpu.memory_space<vmem>>, vector<8x128xf32>,
    %c0_i32_14 = arith.constant 0 : i32
    %21 = arith.cmpi eq, %arg2, %c0_i32_14 : i32
    %22 = arith.extui %21 : i1 to i32
    %c0_i32_15 = arith.constant 0 : i32
    %23 = arith.cmpi ne, %22, %c0_i32_15 : i32
    scf.if %23 {
      %c0_16 = arith.constant 0 : index
      %c0_17 = arith.constant 0 : index
      %24 = vector.load %arg8[%c0_16, %c0_17] : memref<8x128xf32, #tpu.memory_space<vmem>>, vector<8x128xf32>
      %c0_18 = arith.constant 0 : index
      %c0_19 = arith.constant 0 : index
      %25 = vector.load %arg5[%c0_18, %c0_19] : memref<1x128xf32, #tpu.memory_space<vmem>>, vector<1x128xf32>
      %26 = vector.broadcast %25 : vector<1x128xf32> to vector<8x128xf32>
      %27 = arith.addf %24, %26 : vector<8x128xf32>
      %28 = vector.extract_strided_slice %27 {offsets = [0, 0], sizes = [8, 32], strides = [1, 1]} : vector<8x128xf32> to vector<8x32xf32>
      %29 = arith.truncf %28 : vector<8x32xf32> to vector<8x32xbf16>
      %c0_20 = arith.constant 0 : index
      %c0_21 = arith.constant 0 : index
      %30 = vector.load %arg6[%c0_20, %c0_21] : memref<8x32xbf16, #tpu.memory_space<vmem>>, vector<8x32xbf16>
      tpu.vector_store %arg6[%c0_20, %c0_21], %29 {strides = array<i32>} : memref<8x32xbf16, #tpu.memory_space<vmem>>, vector<8x32xbf16>,
      %cst_22 = arith.constant dense<0.000000e+00> : vector<128xf32>
      %31 = vector.multi_reduction <add>, %27, %cst_22 [0] : vector<8x128xf32> to vector<128xf32>
      %32 = vector.shape_cast %31 : vector<128xf32> to vector<1x128xf32>
      %33 = arith.mulf %27, %27 : vector<8x128xf32>
      %cst_23 = arith.constant dense<0.000000e+00> : vector<128xf32>
      %34 = vector.multi_reduction <add>, %33, %cst_23 [0] : vector<8x128xf32> to vector<128xf32>
      %35 = vector.shape_cast %34 : vector<128xf32> to vector<1x128xf32>
      %cst_24 = arith.constant 0.000000e+00 : f32
      %36 = vector.broadcast %cst_24 : f32 to vector<6x128xf32>
      %37 = tpu.concatenate %32, %35, %36 in 0 : vector<1x128xf32>, vector<1x128xf32>, vector<6x128xf32> -> vector<8x128xf32>
      %c0_25 = arith.constant 0 : index
      %c0_26 = arith.constant 0 : index
      %c0_27 = arith.constant 0 : index
      %38 = vector.load %arg7[%c0_25, %c0_26, %c0_27] : memref<1x8x128xf32, #tpu.memory_space<vmem>>, vector<1x8x128xf32>
      %39 = vector.shape_cast %38 : vector<1x8x128xf32> to vector<8x128xf32>
      %40 = arith.addf %39, %37 : vector<8x128xf32>
      %c0_28 = arith.constant 0 : index
      %c0_29 = arith.constant 0 : index
      %c0_30 = arith.constant 0 : index
      %41 = vector.load %arg7[%c0_28, %c0_29, %c0_30] : memref<1x8x128xf32, #tpu.memory_space<vmem>>, vector<1x8x128xf32>
      %42 = vector.shape_cast %41 : vector<1x8x128xf32> to vector<8x128xf32>
      %43 = vector.shape_cast %40 : vector<8x128xf32> to vector<1x8x128xf32>
      tpu.vector_store %arg7[%c0_28, %c0_29, %c0_30], %43 {strides = array<i32>} : memref<1x8x128xf32, #tpu.memory_space<vmem>>, vector<1x8x128xf32>,
    } else {
    }
    return
  }
  func.func @transform_0(%arg0: i32, %arg1: i32, %arg2: i32) -> (i32, i32) {
    %c0_i32 = arith.constant 0 : i32
    return %arg0, %arg2 : i32, i32
  }
  func.func @transform_1(%arg0: i32, %arg1: i32, %arg2: i32) -> (i32, i32) {
    %c0_i32 = arith.constant 0 : i32
    return %arg2, %arg1 : i32, i32
  }
  func.func @transform_2(%arg0: i32, %arg1: i32, %arg2: i32) -> (i32, i32) {
    %c0_i32 = arith.constant 0 : i32
    %c0_i32_0 = arith.constant 0 : i32
    return %c0_i32, %arg1 : i32, i32
  }
  func.func @transform_3(%arg0: i32, %arg1: i32, %arg2: i32) -> (i32, i32) {
    %c0_i32 = arith.constant 0 : i32
    return %arg0, %arg1 : i32, i32
  }
  func.func @transform_4(%arg0: i32, %arg1: i32, %arg2: i32) -> (i32, i32, i32) {
    %c0_i32 = arith.constant 0 : i32
    %c0_i32_0 = arith.constant 0 : i32
    %c0_i32_1 = arith.constant 0 : i32
    %c0_i32_2 = arith.constant 0 : i32
    return %c0_i32, %c0_i32_0, %c0_i32_1 : i32, i32, i32
  }
}

module attributes {stable_mosaic.version = 11 : i64} {
  func.func @_conv_gemm_kernel(%arg0: i32, %arg1: i32, %arg2: i32, %arg3: memref<8x896xbf16, #tpu.memory_space<vmem>>, %arg4: memref<896x256xbf16, #tpu.memory_space<vmem>>, %arg5: memref<1x256xf32, #tpu.memory_space<vmem>>, %arg6: memref<8x256xbf16, #tpu.memory_space<vmem>>, %arg7: memref<1x8x256xf32, #tpu.memory_space<vmem>>, %arg8: memref<8x256xf32, #tpu.memory_space<vmem>>) attributes {dimension_semantics = [#tpu.dimension_semantics<arbitrary>, #tpu.dimension_semantics<arbitrary>, #tpu.dimension_semantics<arbitrary>], iteration_bounds = array<i64: 1, 1, 1>, scalar_prefetch = 0 : i64, scratch_operands = 1 : i64, tpu.core_type = #tpu.core_type<tc>, window_params = [{transform_indices = @transform_0, window_bounds = array<i64: 8, 896>}, {transform_indices = @transform_1, window_bounds = array<i64: 896, 256>}, {transform_indices = @transform_2, window_bounds = array<i64: 1, 256>}, {transform_indices = @transform_3, window_bounds = array<i64: 8, 256>}, {pipeline_mode = #tpu.pipeline_mode<synchronous>, transform_indices = @transform_4, window_bounds = array<i64: 1, 8, 256>}]} {
    %c0_i32 = arith.constant 0 : i32
    %0 = arith.cmpi eq, %arg2, %c0_i32 : i32
    %1 = arith.extui %0 : i1 to i32
    %c0_i32_0 = arith.constant 0 : i32
    %2 = arith.cmpi ne, %1, %c0_i32_0 : i32
    scf.if %2 {
      %cst_15 = arith.constant 0.000000e+00 : f32
      %21 = vector.broadcast %cst_15 : f32 to vector<8x256xf32>
      %c0_16 = arith.constant 0 : index
      %c0_17 = arith.constant 0 : index
      %22 = vector.load %arg8[%c0_16, %c0_17] : memref<8x256xf32, #tpu.memory_space<vmem>>, vector<8x256xf32>
      tpu.vector_store %arg8[%c0_16, %c0_17], %21 {strides = array<i32>} : memref<8x256xf32, #tpu.memory_space<vmem>>, vector<8x256xf32>,
    } else {
    }
    %c0_i32_1 = arith.constant 0 : i32
    %3 = arith.cmpi eq, %arg0, %c0_i32_1 : i32
    %c0_i32_2 = arith.constant 0 : i32
    %4 = arith.cmpi eq, %arg1, %c0_i32_2 : i32
    %5 = arith.andi %3, %4 : i1
    %c0_i32_3 = arith.constant 0 : i32
    %6 = arith.cmpi eq, %arg2, %c0_i32_3 : i32
    %7 = arith.andi %5, %6 : i1
    %8 = arith.extui %7 : i1 to i32
    %c0_i32_4 = arith.constant 0 : i32
    %9 = arith.cmpi ne, %8, %c0_i32_4 : i32
    scf.if %9 {
      %cst_15 = arith.constant 0.000000e+00 : f32
      %21 = vector.broadcast %cst_15 : f32 to vector<1x8x256xf32>
      %c0_16 = arith.constant 0 : index
      %c0_17 = arith.constant 0 : index
      %c0_18 = arith.constant 0 : index
      %22 = vector.load %arg7[%c0_16, %c0_17, %c0_18] : memref<1x8x256xf32, #tpu.memory_space<vmem>>, vector<1x8x256xf32>
      tpu.vector_store %arg7[%c0_16, %c0_17, %c0_18], %21 {strides = array<i32>} : memref<1x8x256xf32, #tpu.memory_space<vmem>>, vector<1x8x256xf32>,
    } else {
    }
    %c0 = arith.constant 0 : index
    %c0_5 = arith.constant 0 : index
    %10 = vector.load %arg3[%c0, %c0_5] : memref<8x896xbf16, #tpu.memory_space<vmem>>, vector<8x896xbf16>
    %cst = arith.constant 0.000000e+00 : bf16
    %11 = vector.broadcast %cst : bf16 to vector<8x896xbf16>
    %12 = arith.maximumf %10, %11 : vector<8x896xbf16>
    %c0_6 = arith.constant 0 : index
    %c0_7 = arith.constant 0 : index
    %13 = vector.load %arg8[%c0_6, %c0_7] : memref<8x256xf32, #tpu.memory_space<vmem>>, vector<8x256xf32>
    %c0_8 = arith.constant 0 : index
    %c0_9 = arith.constant 0 : index
    %14 = vector.load %arg4[%c0_8, %c0_9] : memref<896x256xbf16, #tpu.memory_space<vmem>>, vector<896x256xbf16>
    %cst_10 = arith.constant dense<0.000000e+00> : vector<8x256xf32>
    %15 = tpu.matmul %12, %14, %cst_10 {dimension_numbers = #tpu.dot_dimension_numbers<[1], [0], [0], [1], [0, 0, 1, 1], [], []>} : vector<8x896xbf16>, vector<896x256xbf16>, vector<8x256xf32> -> vector<8x256xf32>
    %16 = arith.addf %13, %15 : vector<8x256xf32>
    %c0_11 = arith.constant 0 : index
    %c0_12 = arith.constant 0 : index
    %17 = vector.load %arg8[%c0_11, %c0_12] : memref<8x256xf32, #tpu.memory_space<vmem>>, vector<8x256xf32>
    tpu.vector_store %arg8[%c0_11, %c0_12], %16 {strides = array<i32>} : memref<8x256xf32, #tpu.memory_space<vmem>>, vector<8x256xf32>,
    %c0_i32_13 = arith.constant 0 : i32
    %18 = arith.cmpi eq, %arg2, %c0_i32_13 : i32
    %19 = arith.extui %18 : i1 to i32
    %c0_i32_14 = arith.constant 0 : i32
    %20 = arith.cmpi ne, %19, %c0_i32_14 : i32
    scf.if %20 {
      %c0_15 = arith.constant 0 : index
      %c0_16 = arith.constant 0 : index
      %21 = vector.load %arg8[%c0_15, %c0_16] : memref<8x256xf32, #tpu.memory_space<vmem>>, vector<8x256xf32>
      %c0_17 = arith.constant 0 : index
      %c0_18 = arith.constant 0 : index
      %22 = vector.load %arg5[%c0_17, %c0_18] : memref<1x256xf32, #tpu.memory_space<vmem>>, vector<1x256xf32>
      %23 = vector.broadcast %22 : vector<1x256xf32> to vector<8x256xf32>
      %24 = arith.addf %21, %23 : vector<8x256xf32>
      %25 = arith.truncf %24 : vector<8x256xf32> to vector<8x256xbf16>
      %c0_19 = arith.constant 0 : index
      %c0_20 = arith.constant 0 : index
      %26 = vector.load %arg6[%c0_19, %c0_20] : memref<8x256xbf16, #tpu.memory_space<vmem>>, vector<8x256xbf16>
      tpu.vector_store %arg6[%c0_19, %c0_20], %25 {strides = array<i32>} : memref<8x256xbf16, #tpu.memory_space<vmem>>, vector<8x256xbf16>,
      %cst_21 = arith.constant dense<0.000000e+00> : vector<256xf32>
      %27 = vector.multi_reduction <add>, %24, %cst_21 [0] : vector<8x256xf32> to vector<256xf32>
      %28 = vector.shape_cast %27 : vector<256xf32> to vector<1x256xf32>
      %29 = arith.mulf %24, %24 : vector<8x256xf32>
      %cst_22 = arith.constant dense<0.000000e+00> : vector<256xf32>
      %30 = vector.multi_reduction <add>, %29, %cst_22 [0] : vector<8x256xf32> to vector<256xf32>
      %31 = vector.shape_cast %30 : vector<256xf32> to vector<1x256xf32>
      %cst_23 = arith.constant 0.000000e+00 : f32
      %32 = vector.broadcast %cst_23 : f32 to vector<6x256xf32>
      %33 = tpu.concatenate %28, %31, %32 in 0 : vector<1x256xf32>, vector<1x256xf32>, vector<6x256xf32> -> vector<8x256xf32>
      %c0_24 = arith.constant 0 : index
      %c0_25 = arith.constant 0 : index
      %c0_26 = arith.constant 0 : index
      %34 = vector.load %arg7[%c0_24, %c0_25, %c0_26] : memref<1x8x256xf32, #tpu.memory_space<vmem>>, vector<1x8x256xf32>
      %35 = vector.shape_cast %34 : vector<1x8x256xf32> to vector<8x256xf32>
      %36 = arith.addf %35, %33 : vector<8x256xf32>
      %c0_27 = arith.constant 0 : index
      %c0_28 = arith.constant 0 : index
      %c0_29 = arith.constant 0 : index
      %37 = vector.load %arg7[%c0_27, %c0_28, %c0_29] : memref<1x8x256xf32, #tpu.memory_space<vmem>>, vector<1x8x256xf32>
      %38 = vector.shape_cast %37 : vector<1x8x256xf32> to vector<8x256xf32>
      %39 = vector.shape_cast %36 : vector<8x256xf32> to vector<1x8x256xf32>
      tpu.vector_store %arg7[%c0_27, %c0_28, %c0_29], %39 {strides = array<i32>} : memref<1x8x256xf32, #tpu.memory_space<vmem>>, vector<1x8x256xf32>,
    } else {
    }
    return
  }
  func.func @transform_0(%arg0: i32, %arg1: i32, %arg2: i32) -> (i32, i32) {
    %c0_i32 = arith.constant 0 : i32
    return %arg0, %arg2 : i32, i32
  }
  func.func @transform_1(%arg0: i32, %arg1: i32, %arg2: i32) -> (i32, i32) {
    %c0_i32 = arith.constant 0 : i32
    return %arg2, %arg1 : i32, i32
  }
  func.func @transform_2(%arg0: i32, %arg1: i32, %arg2: i32) -> (i32, i32) {
    %c0_i32 = arith.constant 0 : i32
    %c0_i32_0 = arith.constant 0 : i32
    return %c0_i32, %arg1 : i32, i32
  }
  func.func @transform_3(%arg0: i32, %arg1: i32, %arg2: i32) -> (i32, i32) {
    %c0_i32 = arith.constant 0 : i32
    return %arg0, %arg1 : i32, i32
  }
  func.func @transform_4(%arg0: i32, %arg1: i32, %arg2: i32) -> (i32, i32, i32) {
    %c0_i32 = arith.constant 0 : i32
    %c0_i32_0 = arith.constant 0 : i32
    %c0_i32_1 = arith.constant 0 : i32
    %c0_i32_2 = arith.constant 0 : i32
    return %c0_i32, %c0_i32_0, %c0_i32_1 : i32, i32, i32
  }
}

module attributes {stable_mosaic.version = 11 : i64} {
  func.func @_affine_act_kernel(%arg0: i32, %arg1: memref<8x256xbf16, #tpu.memory_space<vmem>>, %arg2: memref<1x256xf32, #tpu.memory_space<vmem>>, %arg3: memref<1x256xf32, #tpu.memory_space<vmem>>, %arg4: memref<8x256xbf16, #tpu.memory_space<vmem>>) attributes {dimension_semantics = [#tpu.dimension_semantics<parallel>], iteration_bounds = array<i64: 1>, scalar_prefetch = 0 : i64, scratch_operands = 0 : i64, tpu.core_type = #tpu.core_type<tc>, window_params = [{transform_indices = @transform_0, window_bounds = array<i64: 8, 256>}, {pipeline_mode = #tpu.pipeline_mode<synchronous>, transform_indices = @transform_1, window_bounds = array<i64: 1, 256>}, {pipeline_mode = #tpu.pipeline_mode<synchronous>, transform_indices = @transform_2, window_bounds = array<i64: 1, 256>}, {transform_indices = @transform_3, window_bounds = array<i64: 8, 256>}]} {
    %c0 = arith.constant 0 : index
    %c0_0 = arith.constant 0 : index
    %0 = vector.load %arg1[%c0, %c0_0] : memref<8x256xbf16, #tpu.memory_space<vmem>>, vector<8x256xbf16>
    %1 = arith.extf %0 : vector<8x256xbf16> to vector<8x256xf32>
    %c0_1 = arith.constant 0 : index
    %c0_2 = arith.constant 0 : index
    %2 = vector.load %arg2[%c0_1, %c0_2] : memref<1x256xf32, #tpu.memory_space<vmem>>, vector<1x256xf32>
    %3 = vector.broadcast %2 : vector<1x256xf32> to vector<8x256xf32>
    %4 = arith.mulf %1, %3 : vector<8x256xf32>
    %c0_3 = arith.constant 0 : index
    %c0_4 = arith.constant 0 : index
    %5 = vector.load %arg3[%c0_3, %c0_4] : memref<1x256xf32, #tpu.memory_space<vmem>>, vector<1x256xf32>
    %6 = vector.broadcast %5 : vector<1x256xf32> to vector<8x256xf32>
    %7 = arith.addf %4, %6 : vector<8x256xf32>
    %8 = arith.truncf %7 : vector<8x256xf32> to vector<8x256xbf16>
    %c0_5 = arith.constant 0 : index
    %c0_6 = arith.constant 0 : index
    %9 = vector.load %arg4[%c0_5, %c0_6] : memref<8x256xbf16, #tpu.memory_space<vmem>>, vector<8x256xbf16>
    tpu.vector_store %arg4[%c0_5, %c0_6], %8 {strides = array<i32>} : memref<8x256xbf16, #tpu.memory_space<vmem>>, vector<8x256xbf16>,
    return
  }
  func.func @transform_0(%arg0: i32) -> (i32, i32) {
    %c0_i32 = arith.constant 0 : i32
    %c0_i32_0 = arith.constant 0 : i32
    return %arg0, %c0_i32 : i32, i32
  }
  func.func @transform_1(%arg0: i32) -> (i32, i32) {
    %c0_i32 = arith.constant 0 : i32
    %c0_i32_0 = arith.constant 0 : i32
    %c0_i32_1 = arith.constant 0 : i32
    return %c0_i32, %c0_i32_0 : i32, i32
  }
  func.func @transform_2(%arg0: i32) -> (i32, i32) {
    %c0_i32 = arith.constant 0 : i32
    %c0_i32_0 = arith.constant 0 : i32
    %c0_i32_1 = arith.constant 0 : i32
    return %c0_i32, %c0_i32_0 : i32, i32
  }
  func.func @transform_3(%arg0: i32) -> (i32, i32) {
    %c0_i32 = arith.constant 0 : i32
    %c0_i32_0 = arith.constant 0 : i32
    return %arg0, %c0_i32 : i32, i32
  }
}

module attributes {stable_mosaic.version = 11 : i64} {
  func.func @_conv_gemm_kernel(%arg0: i32, %arg1: i32, %arg2: i32, %arg3: memref<8x1792xbf16, #tpu.memory_space<vmem>>, %arg4: memref<1792x128xbf16, #tpu.memory_space<vmem>>, %arg5: memref<1x128xf32, #tpu.memory_space<vmem>>, %arg6: memref<8x128xbf16, #tpu.memory_space<vmem>>, %arg7: memref<1x8x128xf32, #tpu.memory_space<vmem>>, %arg8: memref<8x128xf32, #tpu.memory_space<vmem>>) attributes {dimension_semantics = [#tpu.dimension_semantics<arbitrary>, #tpu.dimension_semantics<arbitrary>, #tpu.dimension_semantics<arbitrary>], iteration_bounds = array<i64: 1, 1, 1>, scalar_prefetch = 0 : i64, scratch_operands = 1 : i64, tpu.core_type = #tpu.core_type<tc>, window_params = [{transform_indices = @transform_0, window_bounds = array<i64: 8, 1792>}, {transform_indices = @transform_1, window_bounds = array<i64: 1792, 128>}, {transform_indices = @transform_2, window_bounds = array<i64: 1, 128>}, {transform_indices = @transform_3, window_bounds = array<i64: 8, 128>}, {pipeline_mode = #tpu.pipeline_mode<synchronous>, transform_indices = @transform_4, window_bounds = array<i64: 1, 8, 128>}]} {
    %c0_i32 = arith.constant 0 : i32
    %0 = arith.cmpi eq, %arg2, %c0_i32 : i32
    %1 = arith.extui %0 : i1 to i32
    %c0_i32_0 = arith.constant 0 : i32
    %2 = arith.cmpi ne, %1, %c0_i32_0 : i32
    scf.if %2 {
      %cst_15 = arith.constant 0.000000e+00 : f32
      %21 = vector.broadcast %cst_15 : f32 to vector<8x128xf32>
      %c0_16 = arith.constant 0 : index
      %c0_17 = arith.constant 0 : index
      %22 = vector.load %arg8[%c0_16, %c0_17] : memref<8x128xf32, #tpu.memory_space<vmem>>, vector<8x128xf32>
      tpu.vector_store %arg8[%c0_16, %c0_17], %21 {strides = array<i32>} : memref<8x128xf32, #tpu.memory_space<vmem>>, vector<8x128xf32>,
    } else {
    }
    %c0_i32_1 = arith.constant 0 : i32
    %3 = arith.cmpi eq, %arg0, %c0_i32_1 : i32
    %c0_i32_2 = arith.constant 0 : i32
    %4 = arith.cmpi eq, %arg1, %c0_i32_2 : i32
    %5 = arith.andi %3, %4 : i1
    %c0_i32_3 = arith.constant 0 : i32
    %6 = arith.cmpi eq, %arg2, %c0_i32_3 : i32
    %7 = arith.andi %5, %6 : i1
    %8 = arith.extui %7 : i1 to i32
    %c0_i32_4 = arith.constant 0 : i32
    %9 = arith.cmpi ne, %8, %c0_i32_4 : i32
    scf.if %9 {
      %cst_15 = arith.constant 0.000000e+00 : f32
      %21 = vector.broadcast %cst_15 : f32 to vector<1x8x128xf32>
      %c0_16 = arith.constant 0 : index
      %c0_17 = arith.constant 0 : index
      %c0_18 = arith.constant 0 : index
      %22 = vector.load %arg7[%c0_16, %c0_17, %c0_18] : memref<1x8x128xf32, #tpu.memory_space<vmem>>, vector<1x8x128xf32>
      tpu.vector_store %arg7[%c0_16, %c0_17, %c0_18], %21 {strides = array<i32>} : memref<1x8x128xf32, #tpu.memory_space<vmem>>, vector<1x8x128xf32>,
    } else {
    }
    %c0 = arith.constant 0 : index
    %c0_5 = arith.constant 0 : index
    %10 = vector.load %arg3[%c0, %c0_5] : memref<8x1792xbf16, #tpu.memory_space<vmem>>, vector<8x1792xbf16>
    %cst = arith.constant 0.000000e+00 : bf16
    %11 = vector.broadcast %cst : bf16 to vector<8x1792xbf16>
    %12 = arith.maximumf %10, %11 : vector<8x1792xbf16>
    %c0_6 = arith.constant 0 : index
    %c0_7 = arith.constant 0 : index
    %13 = vector.load %arg8[%c0_6, %c0_7] : memref<8x128xf32, #tpu.memory_space<vmem>>, vector<8x128xf32>
    %c0_8 = arith.constant 0 : index
    %c0_9 = arith.constant 0 : index
    %14 = vector.load %arg4[%c0_8, %c0_9] : memref<1792x128xbf16, #tpu.memory_space<vmem>>, vector<1792x128xbf16>
    %cst_10 = arith.constant dense<0.000000e+00> : vector<8x128xf32>
    %15 = tpu.matmul %12, %14, %cst_10 {dimension_numbers = #tpu.dot_dimension_numbers<[1], [0], [0], [1], [0, 0, 1, 1], [], []>} : vector<8x1792xbf16>, vector<1792x128xbf16>, vector<8x128xf32> -> vector<8x128xf32>
    %16 = arith.addf %13, %15 : vector<8x128xf32>
    %c0_11 = arith.constant 0 : index
    %c0_12 = arith.constant 0 : index
    %17 = vector.load %arg8[%c0_11, %c0_12] : memref<8x128xf32, #tpu.memory_space<vmem>>, vector<8x128xf32>
    tpu.vector_store %arg8[%c0_11, %c0_12], %16 {strides = array<i32>} : memref<8x128xf32, #tpu.memory_space<vmem>>, vector<8x128xf32>,
    %c0_i32_13 = arith.constant 0 : i32
    %18 = arith.cmpi eq, %arg2, %c0_i32_13 : i32
    %19 = arith.extui %18 : i1 to i32
    %c0_i32_14 = arith.constant 0 : i32
    %20 = arith.cmpi ne, %19, %c0_i32_14 : i32
    scf.if %20 {
      %c0_15 = arith.constant 0 : index
      %c0_16 = arith.constant 0 : index
      %21 = vector.load %arg8[%c0_15, %c0_16] : memref<8x128xf32, #tpu.memory_space<vmem>>, vector<8x128xf32>
      %c0_17 = arith.constant 0 : index
      %c0_18 = arith.constant 0 : index
      %22 = vector.load %arg5[%c0_17, %c0_18] : memref<1x128xf32, #tpu.memory_space<vmem>>, vector<1x128xf32>
      %23 = vector.broadcast %22 : vector<1x128xf32> to vector<8x128xf32>
      %24 = arith.addf %21, %23 : vector<8x128xf32>
      %25 = arith.truncf %24 : vector<8x128xf32> to vector<8x128xbf16>
      %c0_19 = arith.constant 0 : index
      %c0_20 = arith.constant 0 : index
      %26 = vector.load %arg6[%c0_19, %c0_20] : memref<8x128xbf16, #tpu.memory_space<vmem>>, vector<8x128xbf16>
      tpu.vector_store %arg6[%c0_19, %c0_20], %25 {strides = array<i32>} : memref<8x128xbf16, #tpu.memory_space<vmem>>, vector<8x128xbf16>,
      %cst_21 = arith.constant dense<0.000000e+00> : vector<128xf32>
      %27 = vector.multi_reduction <add>, %24, %cst_21 [0] : vector<8x128xf32> to vector<128xf32>
      %28 = vector.shape_cast %27 : vector<128xf32> to vector<1x128xf32>
      %29 = arith.mulf %24, %24 : vector<8x128xf32>
      %cst_22 = arith.constant dense<0.000000e+00> : vector<128xf32>
      %30 = vector.multi_reduction <add>, %29, %cst_22 [0] : vector<8x128xf32> to vector<128xf32>
      %31 = vector.shape_cast %30 : vector<128xf32> to vector<1x128xf32>
      %cst_23 = arith.constant 0.000000e+00 : f32
      %32 = vector.broadcast %cst_23 : f32 to vector<6x128xf32>
      %33 = tpu.concatenate %28, %31, %32 in 0 : vector<1x128xf32>, vector<1x128xf32>, vector<6x128xf32> -> vector<8x128xf32>
      %c0_24 = arith.constant 0 : index
      %c0_25 = arith.constant 0 : index
      %c0_26 = arith.constant 0 : index
      %34 = vector.load %arg7[%c0_24, %c0_25, %c0_26] : memref<1x8x128xf32, #tpu.memory_space<vmem>>, vector<1x8x128xf32>
      %35 = vector.shape_cast %34 : vector<1x8x128xf32> to vector<8x128xf32>
      %36 = arith.addf %35, %33 : vector<8x128xf32>
      %c0_27 = arith.constant 0 : index
      %c0_28 = arith.constant 0 : index
      %c0_29 = arith.constant 0 : index
      %37 = vector.load %arg7[%c0_27, %c0_28, %c0_29] : memref<1x8x128xf32, #tpu.memory_space<vmem>>, vector<1x8x128xf32>
      %38 = vector.shape_cast %37 : vector<1x8x128xf32> to vector<8x128xf32>
      %39 = vector.shape_cast %36 : vector<8x128xf32> to vector<1x8x128xf32>
      tpu.vector_store %arg7[%c0_27, %c0_28, %c0_29], %39 {strides = array<i32>} : memref<1x8x128xf32, #tpu.memory_space<vmem>>, vector<1x8x128xf32>,
    } else {
    }
    return
  }
  func.func @transform_0(%arg0: i32, %arg1: i32, %arg2: i32) -> (i32, i32) {
    %c0_i32 = arith.constant 0 : i32
    return %arg0, %arg2 : i32, i32
  }
  func.func @transform_1(%arg0: i32, %arg1: i32, %arg2: i32) -> (i32, i32) {
    %c0_i32 = arith.constant 0 : i32
    return %arg2, %arg1 : i32, i32
  }
  func.func @transform_2(%arg0: i32, %arg1: i32, %arg2: i32) -> (i32, i32) {
    %c0_i32 = arith.constant 0 : i32
    %c0_i32_0 = arith.constant 0 : i32
    return %c0_i32, %arg1 : i32, i32
  }
  func.func @transform_3(%arg0: i32, %arg1: i32, %arg2: i32) -> (i32, i32) {
    %c0_i32 = arith.constant 0 : i32
    return %arg0, %arg1 : i32, i32
  }
  func.func @transform_4(%arg0: i32, %arg1: i32, %arg2: i32) -> (i32, i32, i32) {
    %c0_i32 = arith.constant 0 : i32
    %c0_i32_0 = arith.constant 0 : i32
    %c0_i32_1 = arith.constant 0 : i32
    %c0_i32_2 = arith.constant 0 : i32
    return %c0_i32, %c0_i32_0, %c0_i32_1 : i32, i32, i32
  }
}

module attributes {stable_mosaic.version = 11 : i64} {
  func.func @_conv_gemm_kernel(%arg0: i32, %arg1: i32, %arg2: i32, %arg3: memref<64x896xbf16, #tpu.memory_space<vmem>>, %arg4: memref<896x128xbf16, #tpu.memory_space<vmem>>, %arg5: memref<1x128xf32, #tpu.memory_space<vmem>>, %arg6: memref<64x64xbf16, #tpu.memory_space<vmem>>, %arg7: memref<1x8x128xf32, #tpu.memory_space<vmem>>, %arg8: memref<64x128xf32, #tpu.memory_space<vmem>>) attributes {dimension_semantics = [#tpu.dimension_semantics<arbitrary>, #tpu.dimension_semantics<arbitrary>, #tpu.dimension_semantics<arbitrary>], iteration_bounds = array<i64: 1, 1, 1>, scalar_prefetch = 0 : i64, scratch_operands = 1 : i64, tpu.core_type = #tpu.core_type<tc>, window_params = [{transform_indices = @transform_0, window_bounds = array<i64: 64, 896>}, {transform_indices = @transform_1, window_bounds = array<i64: 896, 128>}, {transform_indices = @transform_2, window_bounds = array<i64: 1, 128>}, {transform_indices = @transform_3, window_bounds = array<i64: 64, 64>}, {pipeline_mode = #tpu.pipeline_mode<synchronous>, transform_indices = @transform_4, window_bounds = array<i64: 1, 8, 128>}]} {
    %c0_i32 = arith.constant 0 : i32
    %0 = arith.cmpi eq, %arg2, %c0_i32 : i32
    %1 = arith.extui %0 : i1 to i32
    %c0_i32_0 = arith.constant 0 : i32
    %2 = arith.cmpi ne, %1, %c0_i32_0 : i32
    scf.if %2 {
      %cst_15 = arith.constant 0.000000e+00 : f32
      %21 = vector.broadcast %cst_15 : f32 to vector<64x128xf32>
      %c0_16 = arith.constant 0 : index
      %c0_17 = arith.constant 0 : index
      %22 = vector.load %arg8[%c0_16, %c0_17] : memref<64x128xf32, #tpu.memory_space<vmem>>, vector<64x128xf32>
      tpu.vector_store %arg8[%c0_16, %c0_17], %21 {strides = array<i32>} : memref<64x128xf32, #tpu.memory_space<vmem>>, vector<64x128xf32>,
    } else {
    }
    %c0_i32_1 = arith.constant 0 : i32
    %3 = arith.cmpi eq, %arg0, %c0_i32_1 : i32
    %c0_i32_2 = arith.constant 0 : i32
    %4 = arith.cmpi eq, %arg1, %c0_i32_2 : i32
    %5 = arith.andi %3, %4 : i1
    %c0_i32_3 = arith.constant 0 : i32
    %6 = arith.cmpi eq, %arg2, %c0_i32_3 : i32
    %7 = arith.andi %5, %6 : i1
    %8 = arith.extui %7 : i1 to i32
    %c0_i32_4 = arith.constant 0 : i32
    %9 = arith.cmpi ne, %8, %c0_i32_4 : i32
    scf.if %9 {
      %cst_15 = arith.constant 0.000000e+00 : f32
      %21 = vector.broadcast %cst_15 : f32 to vector<1x8x128xf32>
      %c0_16 = arith.constant 0 : index
      %c0_17 = arith.constant 0 : index
      %c0_18 = arith.constant 0 : index
      %22 = vector.load %arg7[%c0_16, %c0_17, %c0_18] : memref<1x8x128xf32, #tpu.memory_space<vmem>>, vector<1x8x128xf32>
      tpu.vector_store %arg7[%c0_16, %c0_17, %c0_18], %21 {strides = array<i32>} : memref<1x8x128xf32, #tpu.memory_space<vmem>>, vector<1x8x128xf32>,
    } else {
    }
    %c0 = arith.constant 0 : index
    %c0_5 = arith.constant 0 : index
    %10 = vector.load %arg3[%c0, %c0_5] : memref<64x896xbf16, #tpu.memory_space<vmem>>, vector<64x896xbf16>
    %cst = arith.constant 0.000000e+00 : bf16
    %11 = vector.broadcast %cst : bf16 to vector<64x896xbf16>
    %12 = arith.maximumf %10, %11 : vector<64x896xbf16>
    %c0_6 = arith.constant 0 : index
    %c0_7 = arith.constant 0 : index
    %13 = vector.load %arg8[%c0_6, %c0_7] : memref<64x128xf32, #tpu.memory_space<vmem>>, vector<64x128xf32>
    %c0_8 = arith.constant 0 : index
    %c0_9 = arith.constant 0 : index
    %14 = vector.load %arg4[%c0_8, %c0_9] : memref<896x128xbf16, #tpu.memory_space<vmem>>, vector<896x128xbf16>
    %cst_10 = arith.constant dense<0.000000e+00> : vector<64x128xf32>
    %15 = tpu.matmul %12, %14, %cst_10 {dimension_numbers = #tpu.dot_dimension_numbers<[1], [0], [0], [1], [0, 0, 1, 1], [], []>} : vector<64x896xbf16>, vector<896x128xbf16>, vector<64x128xf32> -> vector<64x128xf32>
    %16 = arith.addf %13, %15 : vector<64x128xf32>
    %c0_11 = arith.constant 0 : index
    %c0_12 = arith.constant 0 : index
    %17 = vector.load %arg8[%c0_11, %c0_12] : memref<64x128xf32, #tpu.memory_space<vmem>>, vector<64x128xf32>
    tpu.vector_store %arg8[%c0_11, %c0_12], %16 {strides = array<i32>} : memref<64x128xf32, #tpu.memory_space<vmem>>, vector<64x128xf32>,
    %c0_i32_13 = arith.constant 0 : i32
    %18 = arith.cmpi eq, %arg2, %c0_i32_13 : i32
    %19 = arith.extui %18 : i1 to i32
    %c0_i32_14 = arith.constant 0 : i32
    %20 = arith.cmpi ne, %19, %c0_i32_14 : i32
    scf.if %20 {
      %c0_15 = arith.constant 0 : index
      %c0_16 = arith.constant 0 : index
      %21 = vector.load %arg8[%c0_15, %c0_16] : memref<64x128xf32, #tpu.memory_space<vmem>>, vector<64x128xf32>
      %c0_17 = arith.constant 0 : index
      %c0_18 = arith.constant 0 : index
      %22 = vector.load %arg5[%c0_17, %c0_18] : memref<1x128xf32, #tpu.memory_space<vmem>>, vector<1x128xf32>
      %23 = vector.broadcast %22 : vector<1x128xf32> to vector<64x128xf32>
      %24 = arith.addf %21, %23 : vector<64x128xf32>
      %25 = vector.extract_strided_slice %24 {offsets = [0, 0], sizes = [64, 64], strides = [1, 1]} : vector<64x128xf32> to vector<64x64xf32>
      %26 = arith.truncf %25 : vector<64x64xf32> to vector<64x64xbf16>
      %c0_19 = arith.constant 0 : index
      %c0_20 = arith.constant 0 : index
      %27 = vector.load %arg6[%c0_19, %c0_20] : memref<64x64xbf16, #tpu.memory_space<vmem>>, vector<64x64xbf16>
      tpu.vector_store %arg6[%c0_19, %c0_20], %26 {strides = array<i32>} : memref<64x64xbf16, #tpu.memory_space<vmem>>, vector<64x64xbf16>,
      %cst_21 = arith.constant dense<0.000000e+00> : vector<128xf32>
      %28 = vector.multi_reduction <add>, %24, %cst_21 [0] : vector<64x128xf32> to vector<128xf32>
      %29 = vector.shape_cast %28 : vector<128xf32> to vector<1x128xf32>
      %30 = arith.mulf %24, %24 : vector<64x128xf32>
      %cst_22 = arith.constant dense<0.000000e+00> : vector<128xf32>
      %31 = vector.multi_reduction <add>, %30, %cst_22 [0] : vector<64x128xf32> to vector<128xf32>
      %32 = vector.shape_cast %31 : vector<128xf32> to vector<1x128xf32>
      %cst_23 = arith.constant 0.000000e+00 : f32
      %33 = vector.broadcast %cst_23 : f32 to vector<6x128xf32>
      %34 = tpu.concatenate %29, %32, %33 in 0 : vector<1x128xf32>, vector<1x128xf32>, vector<6x128xf32> -> vector<8x128xf32>
      %c0_24 = arith.constant 0 : index
      %c0_25 = arith.constant 0 : index
      %c0_26 = arith.constant 0 : index
      %35 = vector.load %arg7[%c0_24, %c0_25, %c0_26] : memref<1x8x128xf32, #tpu.memory_space<vmem>>, vector<1x8x128xf32>
      %36 = vector.shape_cast %35 : vector<1x8x128xf32> to vector<8x128xf32>
      %37 = arith.addf %36, %34 : vector<8x128xf32>
      %c0_27 = arith.constant 0 : index
      %c0_28 = arith.constant 0 : index
      %c0_29 = arith.constant 0 : index
      %38 = vector.load %arg7[%c0_27, %c0_28, %c0_29] : memref<1x8x128xf32, #tpu.memory_space<vmem>>, vector<1x8x128xf32>
      %39 = vector.shape_cast %38 : vector<1x8x128xf32> to vector<8x128xf32>
      %40 = vector.shape_cast %37 : vector<8x128xf32> to vector<1x8x128xf32>
      tpu.vector_store %arg7[%c0_27, %c0_28, %c0_29], %40 {strides = array<i32>} : memref<1x8x128xf32, #tpu.memory_space<vmem>>, vector<1x8x128xf32>,
    } else {
    }
    return
  }
  func.func @transform_0(%arg0: i32, %arg1: i32, %arg2: i32) -> (i32, i32) {
    %c0_i32 = arith.constant 0 : i32
    return %arg0, %arg2 : i32, i32
  }
  func.func @transform_1(%arg0: i32, %arg1: i32, %arg2: i32) -> (i32, i32) {
    %c0_i32 = arith.constant 0 : i32
    return %arg2, %arg1 : i32, i32
  }
  func.func @transform_2(%arg0: i32, %arg1: i32, %arg2: i32) -> (i32, i32) {
    %c0_i32 = arith.constant 0 : i32
    %c0_i32_0 = arith.constant 0 : i32
    return %c0_i32, %arg1 : i32, i32
  }
  func.func @transform_3(%arg0: i32, %arg1: i32, %arg2: i32) -> (i32, i32) {
    %c0_i32 = arith.constant 0 : i32
    return %arg0, %arg1 : i32, i32
  }
  func.func @transform_4(%arg0: i32, %arg1: i32, %arg2: i32) -> (i32, i32, i32) {
    %c0_i32 = arith.constant 0 : i32
    %c0_i32_0 = arith.constant 0 : i32
    %c0_i32_1 = arith.constant 0 : i32
    %c0_i32_2 = arith.constant 0 : i32
    return %c0_i32, %c0_i32_0, %c0_i32_1 : i32, i32, i32
  }
}

module attributes {stable_mosaic.version = 11 : i64} {
  func.func @_conv_gemm_kernel(%arg0: i32, %arg1: i32, %arg2: i32, %arg3: memref<512x512xbf16, #tpu.memory_space<vmem>>, %arg4: memref<512x128xbf16, #tpu.memory_space<vmem>>, %arg5: memref<1x128xf32, #tpu.memory_space<vmem>>, %arg6: memref<512x32xbf16, #tpu.memory_space<vmem>>, %arg7: memref<1x8x128xf32, #tpu.memory_space<vmem>>, %arg8: memref<512x128xf32, #tpu.memory_space<vmem>>) attributes {dimension_semantics = [#tpu.dimension_semantics<arbitrary>, #tpu.dimension_semantics<arbitrary>, #tpu.dimension_semantics<arbitrary>], iteration_bounds = array<i64: 1, 1, 1>, scalar_prefetch = 0 : i64, scratch_operands = 1 : i64, tpu.core_type = #tpu.core_type<tc>, window_params = [{transform_indices = @transform_0, window_bounds = array<i64: 512, 512>}, {transform_indices = @transform_1, window_bounds = array<i64: 512, 128>}, {transform_indices = @transform_2, window_bounds = array<i64: 1, 128>}, {transform_indices = @transform_3, window_bounds = array<i64: 512, 32>}, {pipeline_mode = #tpu.pipeline_mode<synchronous>, transform_indices = @transform_4, window_bounds = array<i64: 1, 8, 128>}]} {
    %c0_i32 = arith.constant 0 : i32
    %0 = arith.cmpi eq, %arg2, %c0_i32 : i32
    %1 = arith.extui %0 : i1 to i32
    %c0_i32_0 = arith.constant 0 : i32
    %2 = arith.cmpi ne, %1, %c0_i32_0 : i32
    scf.if %2 {
      %cst_15 = arith.constant 0.000000e+00 : f32
      %21 = vector.broadcast %cst_15 : f32 to vector<512x128xf32>
      %c0_16 = arith.constant 0 : index
      %c0_17 = arith.constant 0 : index
      %22 = vector.load %arg8[%c0_16, %c0_17] : memref<512x128xf32, #tpu.memory_space<vmem>>, vector<512x128xf32>
      tpu.vector_store %arg8[%c0_16, %c0_17], %21 {strides = array<i32>} : memref<512x128xf32, #tpu.memory_space<vmem>>, vector<512x128xf32>,
    } else {
    }
    %c0_i32_1 = arith.constant 0 : i32
    %3 = arith.cmpi eq, %arg0, %c0_i32_1 : i32
    %c0_i32_2 = arith.constant 0 : i32
    %4 = arith.cmpi eq, %arg1, %c0_i32_2 : i32
    %5 = arith.andi %3, %4 : i1
    %c0_i32_3 = arith.constant 0 : i32
    %6 = arith.cmpi eq, %arg2, %c0_i32_3 : i32
    %7 = arith.andi %5, %6 : i1
    %8 = arith.extui %7 : i1 to i32
    %c0_i32_4 = arith.constant 0 : i32
    %9 = arith.cmpi ne, %8, %c0_i32_4 : i32
    scf.if %9 {
      %cst_15 = arith.constant 0.000000e+00 : f32
      %21 = vector.broadcast %cst_15 : f32 to vector<1x8x128xf32>
      %c0_16 = arith.constant 0 : index
      %c0_17 = arith.constant 0 : index
      %c0_18 = arith.constant 0 : index
      %22 = vector.load %arg7[%c0_16, %c0_17, %c0_18] : memref<1x8x128xf32, #tpu.memory_space<vmem>>, vector<1x8x128xf32>
      tpu.vector_store %arg7[%c0_16, %c0_17, %c0_18], %21 {strides = array<i32>} : memref<1x8x128xf32, #tpu.memory_space<vmem>>, vector<1x8x128xf32>,
    } else {
    }
    %c0 = arith.constant 0 : index
    %c0_5 = arith.constant 0 : index
    %10 = vector.load %arg3[%c0, %c0_5] : memref<512x512xbf16, #tpu.memory_space<vmem>>, vector<512x512xbf16>
    %cst = arith.constant 0.000000e+00 : bf16
    %11 = vector.broadcast %cst : bf16 to vector<512x512xbf16>
    %12 = arith.maximumf %10, %11 : vector<512x512xbf16>
    %c0_6 = arith.constant 0 : index
    %c0_7 = arith.constant 0 : index
    %13 = vector.load %arg8[%c0_6, %c0_7] : memref<512x128xf32, #tpu.memory_space<vmem>>, vector<512x128xf32>
    %c0_8 = arith.constant 0 : index
    %c0_9 = arith.constant 0 : index
    %14 = vector.load %arg4[%c0_8, %c0_9] : memref<512x128xbf16, #tpu.memory_space<vmem>>, vector<512x128xbf16>
    %cst_10 = arith.constant dense<0.000000e+00> : vector<512x128xf32>
    %15 = tpu.matmul %12, %14, %cst_10 {dimension_numbers = #tpu.dot_dimension_numbers<[1], [0], [0], [1], [0, 0, 1, 1], [], []>} : vector<512x512xbf16>, vector<512x128xbf16>, vector<512x128xf32> -> vector<512x128xf32>
    %16 = arith.addf %13, %15 : vector<512x128xf32>
    %c0_11 = arith.constant 0 : index
    %c0_12 = arith.constant 0 : index
    %17 = vector.load %arg8[%c0_11, %c0_12] : memref<512x128xf32, #tpu.memory_space<vmem>>, vector<512x128xf32>
    tpu.vector_store %arg8[%c0_11, %c0_12], %16 {strides = array<i32>} : memref<512x128xf32, #tpu.memory_space<vmem>>, vector<512x128xf32>,
    %c0_i32_13 = arith.constant 0 : i32
    %18 = arith.cmpi eq, %arg2, %c0_i32_13 : i32
    %19 = arith.extui %18 : i1 to i32
    %c0_i32_14 = arith.constant 0 : i32
    %20 = arith.cmpi ne, %19, %c0_i32_14 : i32
    scf.if %20 {
      %c0_15 = arith.constant 0 : index
      %c0_16 = arith.constant 0 : index
      %21 = vector.load %arg8[%c0_15, %c0_16] : memref<512x128xf32, #tpu.memory_space<vmem>>, vector<512x128xf32>
      %c0_17 = arith.constant 0 : index
      %c0_18 = arith.constant 0 : index
      %22 = vector.load %arg5[%c0_17, %c0_18] : memref<1x128xf32, #tpu.memory_space<vmem>>, vector<1x128xf32>
      %23 = vector.broadcast %22 : vector<1x128xf32> to vector<512x128xf32>
      %24 = arith.addf %21, %23 : vector<512x128xf32>
      %25 = vector.extract_strided_slice %24 {offsets = [0, 0], sizes = [512, 32], strides = [1, 1]} : vector<512x128xf32> to vector<512x32xf32>
      %26 = arith.truncf %25 : vector<512x32xf32> to vector<512x32xbf16>
      %c0_19 = arith.constant 0 : index
      %c0_20 = arith.constant 0 : index
      %27 = vector.load %arg6[%c0_19, %c0_20] : memref<512x32xbf16, #tpu.memory_space<vmem>>, vector<512x32xbf16>
      tpu.vector_store %arg6[%c0_19, %c0_20], %26 {strides = array<i32>} : memref<512x32xbf16, #tpu.memory_space<vmem>>, vector<512x32xbf16>,
      %cst_21 = arith.constant dense<0.000000e+00> : vector<128xf32>
      %28 = vector.multi_reduction <add>, %24, %cst_21 [0] : vector<512x128xf32> to vector<128xf32>
      %29 = vector.shape_cast %28 : vector<128xf32> to vector<1x128xf32>
      %30 = arith.mulf %24, %24 : vector<512x128xf32>
      %cst_22 = arith.constant dense<0.000000e+00> : vector<128xf32>
      %31 = vector.multi_reduction <add>, %30, %cst_22 [0] : vector<512x128xf32> to vector<128xf32>
      %32 = vector.shape_cast %31 : vector<128xf32> to vector<1x128xf32>
      %cst_23 = arith.constant 0.000000e+00 : f32
      %33 = vector.broadcast %cst_23 : f32 to vector<6x128xf32>
      %34 = tpu.concatenate %29, %32, %33 in 0 : vector<1x128xf32>, vector<1x128xf32>, vector<6x128xf32> -> vector<8x128xf32>
      %c0_24 = arith.constant 0 : index
      %c0_25 = arith.constant 0 : index
      %c0_26 = arith.constant 0 : index
      %35 = vector.load %arg7[%c0_24, %c0_25, %c0_26] : memref<1x8x128xf32, #tpu.memory_space<vmem>>, vector<1x8x128xf32>
      %36 = vector.shape_cast %35 : vector<1x8x128xf32> to vector<8x128xf32>
      %37 = arith.addf %36, %34 : vector<8x128xf32>
      %c0_27 = arith.constant 0 : index
      %c0_28 = arith.constant 0 : index
      %c0_29 = arith.constant 0 : index
      %38 = vector.load %arg7[%c0_27, %c0_28, %c0_29] : memref<1x8x128xf32, #tpu.memory_space<vmem>>, vector<1x8x128xf32>
      %39 = vector.shape_cast %38 : vector<1x8x128xf32> to vector<8x128xf32>
      %40 = vector.shape_cast %37 : vector<8x128xf32> to vector<1x8x128xf32>
      tpu.vector_store %arg7[%c0_27, %c0_28, %c0_29], %40 {strides = array<i32>} : memref<1x8x128xf32, #tpu.memory_space<vmem>>, vector<1x8x128xf32>,
    } else {
    }
    return
  }
  func.func @transform_0(%arg0: i32, %arg1: i32, %arg2: i32) -> (i32, i32) {
    %c0_i32 = arith.constant 0 : i32
    return %arg0, %arg2 : i32, i32
  }
  func.func @transform_1(%arg0: i32, %arg1: i32, %arg2: i32) -> (i32, i32) {
    %c0_i32 = arith.constant 0 : i32
    return %arg2, %arg1 : i32, i32
  }
  func.func @transform_2(%arg0: i32, %arg1: i32, %arg2: i32) -> (i32, i32) {
    %c0_i32 = arith.constant 0 : i32
    %c0_i32_0 = arith.constant 0 : i32
    return %c0_i32, %arg1 : i32, i32
  }
  func.func @transform_3(%arg0: i32, %arg1: i32, %arg2: i32) -> (i32, i32) {
    %c0_i32 = arith.constant 0 : i32
    return %arg0, %arg1 : i32, i32
  }
  func.func @transform_4(%arg0: i32, %arg1: i32, %arg2: i32) -> (i32, i32, i32) {
    %c0_i32 = arith.constant 0 : i32
    %c0_i32_0 = arith.constant 0 : i32
    %c0_i32_1 = arith.constant 0 : i32
    %c0_i32_2 = arith.constant 0 : i32
    return %c0_i32, %c0_i32_0, %c0_i32_1 : i32, i32, i32
  }
}

module attributes {stable_mosaic.version = 11 : i64} {
  func.func @_affine_act_kernel(%arg0: i32, %arg1: memref<128x128xbf16, #tpu.memory_space<vmem>>, %arg2: memref<1x128xf32, #tpu.memory_space<vmem>>, %arg3: memref<1x128xf32, #tpu.memory_space<vmem>>, %arg4: memref<128x128xbf16, #tpu.memory_space<vmem>>) attributes {dimension_semantics = [#tpu.dimension_semantics<parallel>], iteration_bounds = array<i64: 1>, scalar_prefetch = 0 : i64, scratch_operands = 0 : i64, tpu.core_type = #tpu.core_type<tc>, window_params = [{transform_indices = @transform_0, window_bounds = array<i64: 128, 128>}, {pipeline_mode = #tpu.pipeline_mode<synchronous>, transform_indices = @transform_1, window_bounds = array<i64: 1, 128>}, {pipeline_mode = #tpu.pipeline_mode<synchronous>, transform_indices = @transform_2, window_bounds = array<i64: 1, 128>}, {transform_indices = @transform_3, window_bounds = array<i64: 128, 128>}]} {
    %c0 = arith.constant 0 : index
    %c0_0 = arith.constant 0 : index
    %0 = vector.load %arg1[%c0, %c0_0] : memref<128x128xbf16, #tpu.memory_space<vmem>>, vector<128x128xbf16>
    %1 = arith.extf %0 : vector<128x128xbf16> to vector<128x128xf32>
    %c0_1 = arith.constant 0 : index
    %c0_2 = arith.constant 0 : index
    %2 = vector.load %arg2[%c0_1, %c0_2] : memref<1x128xf32, #tpu.memory_space<vmem>>, vector<1x128xf32>
    %3 = vector.broadcast %2 : vector<1x128xf32> to vector<128x128xf32>
    %4 = arith.mulf %1, %3 : vector<128x128xf32>
    %c0_3 = arith.constant 0 : index
    %c0_4 = arith.constant 0 : index
    %5 = vector.load %arg3[%c0_3, %c0_4] : memref<1x128xf32, #tpu.memory_space<vmem>>, vector<1x128xf32>
    %6 = vector.broadcast %5 : vector<1x128xf32> to vector<128x128xf32>
    %7 = arith.addf %4, %6 : vector<128x128xf32>
    %8 = arith.truncf %7 : vector<128x128xf32> to vector<128x128xbf16>
    %c0_5 = arith.constant 0 : index
    %c0_6 = arith.constant 0 : index
    %9 = vector.load %arg4[%c0_5, %c0_6] : memref<128x128xbf16, #tpu.memory_space<vmem>>, vector<128x128xbf16>
    tpu.vector_store %arg4[%c0_5, %c0_6], %8 {strides = array<i32>} : memref<128x128xbf16, #tpu.memory_space<vmem>>, vector<128x128xbf16>,
    return
  }
  func.func @transform_0(%arg0: i32) -> (i32, i32) {
    %c0_i32 = arith.constant 0 : i32
    %c0_i32_0 = arith.constant 0 : i32
    return %arg0, %c0_i32 : i32, i32
  }
  func.func @transform_1(%arg0: i32) -> (i32, i32) {
    %c0_i32 = arith.constant 0 : i32
    %c0_i32_0 = arith.constant 0 : i32
    %c0_i32_1 = arith.constant 0 : i32
    return %c0_i32, %c0_i32_0 : i32, i32
  }
  func.func @transform_2(%arg0: i32) -> (i32, i32) {
    %c0_i32 = arith.constant 0 : i32
    %c0_i32_0 = arith.constant 0 : i32
    %c0_i32_1 = arith.constant 0 : i32
    return %c0_i32, %c0_i32_0 : i32, i32
  }
  func.func @transform_3(%arg0: i32) -> (i32, i32) {
    %c0_i32 = arith.constant 0 : i32
    %c0_i32_0 = arith.constant 0 : i32
    return %arg0, %c0_i32 : i32, i32
  }
}

module attributes {stable_mosaic.version = 11 : i64} {
  func.func @_conv_gemm_kernel(%arg0: i32, %arg1: i32, %arg2: i32, %arg3: memref<512x256xbf16, #tpu.memory_space<vmem>>, %arg4: memref<256x128xbf16, #tpu.memory_space<vmem>>, %arg5: memref<1x128xf32, #tpu.memory_space<vmem>>, %arg6: memref<512x8xf32, #tpu.memory_space<vmem>>, %arg7: memref<512x128xf32, #tpu.memory_space<vmem>>) attributes {dimension_semantics = [#tpu.dimension_semantics<parallel>, #tpu.dimension_semantics<parallel>, #tpu.dimension_semantics<arbitrary>], iteration_bounds = array<i64: 8, 1, 1>, scalar_prefetch = 0 : i64, scratch_operands = 1 : i64, tpu.core_type = #tpu.core_type<tc>, window_params = [{transform_indices = @transform_0, window_bounds = array<i64: 512, 256>}, {transform_indices = @transform_1, window_bounds = array<i64: 256, 128>}, {transform_indices = @transform_2, window_bounds = array<i64: 1, 128>}, {transform_indices = @transform_3, window_bounds = array<i64: 512, 8>}]} {
    %c0_i32 = arith.constant 0 : i32
    %0 = arith.cmpi eq, %arg2, %c0_i32 : i32
    %1 = arith.extui %0 : i1 to i32
    %c0_i32_0 = arith.constant 0 : i32
    %2 = arith.cmpi ne, %1, %c0_i32_0 : i32
    scf.if %2 {
      %cst_11 = arith.constant 0.000000e+00 : f32
      %14 = vector.broadcast %cst_11 : f32 to vector<512x128xf32>
      %c0_12 = arith.constant 0 : index
      %c0_13 = arith.constant 0 : index
      %15 = vector.load %arg7[%c0_12, %c0_13] : memref<512x128xf32, #tpu.memory_space<vmem>>, vector<512x128xf32>
      tpu.vector_store %arg7[%c0_12, %c0_13], %14 {strides = array<i32>} : memref<512x128xf32, #tpu.memory_space<vmem>>, vector<512x128xf32>,
    } else {
    }
    %c0 = arith.constant 0 : index
    %c0_1 = arith.constant 0 : index
    %3 = vector.load %arg3[%c0, %c0_1] : memref<512x256xbf16, #tpu.memory_space<vmem>>, vector<512x256xbf16>
    %cst = arith.constant 0.000000e+00 : bf16
    %4 = vector.broadcast %cst : bf16 to vector<512x256xbf16>
    %5 = arith.maximumf %3, %4 : vector<512x256xbf16>
    %c0_2 = arith.constant 0 : index
    %c0_3 = arith.constant 0 : index
    %6 = vector.load %arg7[%c0_2, %c0_3] : memref<512x128xf32, #tpu.memory_space<vmem>>, vector<512x128xf32>
    %c0_4 = arith.constant 0 : index
    %c0_5 = arith.constant 0 : index
    %7 = vector.load %arg4[%c0_4, %c0_5] : memref<256x128xbf16, #tpu.memory_space<vmem>>, vector<256x128xbf16>
    %cst_6 = arith.constant dense<0.000000e+00> : vector<512x128xf32>
    %8 = tpu.matmul %5, %7, %cst_6 {dimension_numbers = #tpu.dot_dimension_numbers<[1], [0], [0], [1], [0, 0, 1, 1], [], []>} : vector<512x256xbf16>, vector<256x128xbf16>, vector<512x128xf32> -> vector<512x128xf32>
    %9 = arith.addf %6, %8 : vector<512x128xf32>
    %c0_7 = arith.constant 0 : index
    %c0_8 = arith.constant 0 : index
    %10 = vector.load %arg7[%c0_7, %c0_8] : memref<512x128xf32, #tpu.memory_space<vmem>>, vector<512x128xf32>
    tpu.vector_store %arg7[%c0_7, %c0_8], %9 {strides = array<i32>} : memref<512x128xf32, #tpu.memory_space<vmem>>, vector<512x128xf32>,
    %c0_i32_9 = arith.constant 0 : i32
    %11 = arith.cmpi eq, %arg2, %c0_i32_9 : i32
    %12 = arith.extui %11 : i1 to i32
    %c0_i32_10 = arith.constant 0 : i32
    %13 = arith.cmpi ne, %12, %c0_i32_10 : i32
    scf.if %13 {
      %c0_11 = arith.constant 0 : index
      %c0_12 = arith.constant 0 : index
      %14 = vector.load %arg7[%c0_11, %c0_12] : memref<512x128xf32, #tpu.memory_space<vmem>>, vector<512x128xf32>
      %c0_13 = arith.constant 0 : index
      %c0_14 = arith.constant 0 : index
      %15 = vector.load %arg5[%c0_13, %c0_14] : memref<1x128xf32, #tpu.memory_space<vmem>>, vector<1x128xf32>
      %16 = vector.broadcast %15 : vector<1x128xf32> to vector<512x128xf32>
      %17 = arith.addf %14, %16 : vector<512x128xf32>
      %18 = math.tanh %17 : vector<512x128xf32>
      %19 = vector.extract_strided_slice %18 {offsets = [0, 0], sizes = [512, 8], strides = [1, 1]} : vector<512x128xf32> to vector<512x8xf32>
      %c0_15 = arith.constant 0 : index
      %c0_16 = arith.constant 0 : index
      %20 = vector.load %arg6[%c0_15, %c0_16] : memref<512x8xf32, #tpu.memory_space<vmem>>, vector<512x8xf32>
      tpu.vector_store %arg6[%c0_15, %c0_16], %19 {strides = array<i32>} : memref<512x8xf32, #tpu.memory_space<vmem>>, vector<512x8xf32>,
    } else {
    }
    return
  }
  func.func @transform_0(%arg0: i32, %arg1: i32, %arg2: i32) -> (i32, i32) {
    %c0_i32 = arith.constant 0 : i32
    return %arg0, %arg2 : i32, i32
  }
  func.func @transform_1(%arg0: i32, %arg1: i32, %arg2: i32) -> (i32, i32) {
    %c0_i32 = arith.constant 0 : i32
    return %arg2, %arg1 : i32, i32
  }
  func.func @transform_2(%arg0: i32, %arg1: i32, %arg2: i32) -> (i32, i32) {
    %c0_i32 = arith.constant 0 : i32
    %c0_i32_0 = arith.constant 0 : i32
    return %c0_i32, %arg1 : i32, i32
  }
  func.func @transform_3(%arg0: i32, %arg1: i32, %arg2: i32) -> (i32, i32) {
    %c0_i32 = arith.constant 0 : i32
    return %arg0, %arg1 : i32, i32
  }
}

</mosaic_0001>

<bundles_post_ra>
// kernel: _lambda_.17
= control target key start
LH: loop header
LB: loop body
LE: loop exit
PB: predicated region body
PF: predicated region fallthrough
CT: control target
= control target key end

     0   :  { %s2125_s12 = smov 0   ;;  %s2127_s13 = smov 0   ;;  %s2422_s0 = inlined_call_operand.vmem [shape: bf16[4096,128], index: 0, kind: input, shape index: {}]   ;;  %s2423_s1 = inlined_call_operand.vmem [shape: bf16[128,128], index: 1, kind: input, shape index: {}]   ;;  %s2424_s2 = inlined_call_operand.vmem [shape: f32[1,128], index: 2, kind: input, shape index: {}]   ;;  %s2425_s3 = inlined_call_operand.vmem [shape: bf16[4096,4], index: 3, kind: output, shape index: {}]  }
   0x1   :  { %s2129_s14 = smov 0  }
   0x2 LB: > { %s32_s15 = sadd.s32 1, %s2099_s13  ;;  %p1705_p0 = scmp.ge.s32.totalorder %s2103_s14, 1  ;;  %s2103_s14 = sphi %s2129_s14, %s13_s14   ;;  %s2099_s13 = sphi %s2127_s13, %s2427_s13   ;;  %s2095_s12 = sphi %s2125_s12, %s2426_s12  }
   0x3   : > { %p34_p1 = scmp.ge.s32.totalorder %s32_s15, 8  ;;  %p188_p2 = scmp.lt.s32.totalorder %s2103_s14, 9 }
   0x5   : > { %s2429_s15 = smov (%p34_p1, %s32_s15), 0  ;;  %p189_p3 = pnand %p1705_p0, %p188_p2 }
   0x6   : > { %v2041_v0 = vld [vmem:[%s2423_s1] sm:$0xff] (!%p189_p3)   ;;  %s1706_s18 = sshll.u32 (!%p189_p3), %s2095_s12, 6  ;;  %v2042_v1 = vld [vmem:[%s2423_s1 + $0x8] sm:$0xff] (!%p189_p3)   ;;  %v2043_v2 = vld [vmem:[%s2423_s1 + $0x10] sm:$0xff] (!%p189_p3)   ;;  %vm1523_vm0 = vcmask (!%p189_p3), 27648  }
   0x7   : > { %192 = sbr.rel (%p189_p3) target bundleno = 315 (0x13b), region = 32  ;;  %p230_p4 = scmp.lt.s32.totalorder (!%p189_p3), %s1706_s18, 511  ;;  %1921 = vmatprep.subr.bf16.mxu0 (!%p189_p3), %v2041_v0  ;;  %2001 = vmatprep.subr.bf16.mxu1 (!%p189_p3), %v2041_v0  ;;  %v2044_v3 = vld [vmem:[%s2423_s1 + $0x18] sm:$0xff] (!%p189_p3)   ;;  %v2045_v6 = vld [vmem:[%s2423_s1 + $0x20] sm:$0xff] (!%p189_p3)   ;;  %v2046_v7 = vld [vmem:[%s2423_s1 + $0x28] sm:$0xff] (!%p189_p3)  }
   0x8   : > { %1922 = vmatpush3.bf16.msra.mxu0 (!%p189_p3), %v2041_v0  ;;  %2009 = vmatpush3.bf16.msra.mxu1 (!%p189_p3), %v2041_v0  ;;  %v2047_v8 = vld [vmem:[%s2423_s1 + $0x30] sm:$0xff] (!%p189_p3)   ;;  %v2048_v9 = vld [vmem:[%s2423_s1 + $0x38] sm:$0xff] (!%p189_p3)   ;;  %v2212_v40 = vld [vmem:[%s2424_s2] ss:$0 sm:$0xff] (!%p189_p3) }
   0x9   : > { %1923 = vmatprep.subr.bf16.mxu0 (!%p189_p3), %v2042_v1  ;;  %2002 = vmatprep.subr.bf16.mxu1 (!%p189_p3), %v2042_v1 }
   0xc   : > { %1924 = vmatpush3.bf16.msra.mxu0 (!%p189_p3), %v2042_v1  ;;  %2010 = vmatpush3.bf16.msra.mxu1 (!%p189_p3), %v2042_v1 }
   0xd   : > { %1925 = vmatprep.subr.bf16.mxu0 (!%p189_p3), %v2043_v2  ;;  %2003 = vmatprep.subr.bf16.mxu1 (!%p189_p3), %v2043_v2 }
   0xe   : > { %s2431_s18 = smov (!%p230_p4, %s1706_s18), 511 }
   0xf   : > { %s1707_s23 = sshll.u32 %s2431_s18, 2 }
  0x10   : > { %s2160_s26 = scalar_lea.vmem %s2422_s0, %s1707_s23  ;;  %1926 = vmatpush3.bf16.msra.mxu0 %v2043_v2  ;;  %2011 = vmatpush3.bf16.msra.mxu1 %v2043_v2  ;;  %s2221_s17 = scalar_lea.vmem %s2425_s3, %s1707_s23 }
  0x11   : > { %v2049_v4 = vld [vmem:[%s2160_s26] sm:$0xff]   ;;  %1927 = vmatprep.subr.bf16.mxu0 %v2044_v3  ;;  %2004 = vmatprep.subr.bf16.mxu1 %v2044_v3  ;;  %v2051_v10 = vld [vmem:[%s2160_s26 + $0x8] sm:$0xff]   ;;  %v2053_v12 = vld [vmem:[%s2160_s26 + $0x10] sm:$0xff]  }
  0x12   : > { %v2050_v5 = vld [vmem:[%s2160_s26 + $0x80] sm:$0xff]   ;;  %1937 = vmatprep.mubr.bf16.mxu0 %v2049_v4  ;;  %v2052_v11 = vld [vmem:[%s2160_s26 + $0x88] sm:$0xff]   ;;  %v2054_v13 = vld [vmem:[%s2160_s26 + $0x90] sm:$0xff]  }
  0x13   : > { %1969 = vmatprep.mubr.bf16.mxu1 %v2050_v5  ;;  %v2055_v14 = vld [vmem:[%s2160_s26 + $0x18] sm:$0xff]   ;;  %v2057_v16 = vld [vmem:[%s2160_s26 + $0x20] sm:$0xff]   ;;  %v2059_v18 = vld [vmem:[%s2160_s26 + $0x28] sm:$0xff]  }
  0x14   : > { %1928 = vmatpush3.bf16.msra.mxu0 %v2044_v3  ;;  %2012 = vmatpush3.bf16.msra.mxu1 %v2044_v3  ;;  %v2056_v15 = vld [vmem:[%s2160_s26 + $0x98] sm:$0xff]   ;;  %v2058_v17 = vld [vmem:[%s2160_s26 + $0xa0] sm:$0xff]   ;;  %v2060_v19 = vld [vmem:[%s2160_s26 + $0xa8] sm:$0xff]  }
  0x15   : > { %1929 = vmatprep.subr.bf16.mxu0 %v2045_v6  ;;  %2005 = vmatprep.subr.bf16.mxu1 %v2045_v6  ;;  %v2061_v20 = vld [vmem:[%s2160_s26 + $0x30] sm:$0xff]   ;;  %v2063_v22 = vld [vmem:[%s2160_s26 + $0x38] sm:$0xff]   ;;  %v2065_v24 = vld [vmem:[%s2160_s26 + $0x40] sm:$0xff]  }
  0x16   : > { %v2062_v21 = vld [vmem:[%s2160_s26 + $0xb0] sm:$0xff]   ;;  %v2064_v23 = vld [vmem:[%s2160_s26 + $0xb8] sm:$0xff]   ;;  %v2066_v25 = vld [vmem:[%s2160_s26 + $0xc0] sm:$0xff]  }
  0x17   : > { %v2067_v26 = vld [vmem:[%s2160_s26 + $0x48] sm:$0xff]   ;;  %v2069_v28 = vld [vmem:[%s2160_s26 + $0x50] sm:$0xff]   ;;  %v2071_v30 = vld [vmem:[%s2160_s26 + $0x58] sm:$0xff]  }
  0x18   : > { %1930 = vmatpush3.bf16.msra.mxu0 %v2045_v6  ;;  %2013 = vmatpush3.bf16.msra.mxu1 %v2045_v6  ;;  %v2068_v27 = vld [vmem:[%s2160_s26 + $0xc8] sm:$0xff]   ;;  %v2070_v29 = vld [vmem:[%s2160_s26 + $0xd0] sm:$0xff]   ;;  %v2072_v31 = vld [vmem:[%s2160_s26 + $0xd8] sm:$0xff]  }
  0x19   : > { %1931 = vmatprep.subr.bf16.mxu0 %v2046_v7  ;;  %2006 = vmatprep.subr.bf16.mxu1 %v2046_v7  ;;  %v2073_v32 = vld [vmem:[%s2160_s26 + $0x60] sm:$0xff]   ;;  %v2075_v34 = vld [vmem:[%s2160_s26 + $0x68] sm:$0xff]   ;;  %v2077_v36 = vld [vmem:[%s2160_s26 + $0x70] sm:$0xff]  }
  0x1a   : > { %v2074_v33 = vld [vmem:[%s2160_s26 + $0xe0] sm:$0xff]   ;;  %v2076_v35 = vld [vmem:[%s2160_s26 + $0xe8] sm:$0xff]   ;;  %v2078_v37 = vld [vmem:[%s2160_s26 + $0xf0] sm:$0xff]  }
  0x1b   : > { %v2079_v38 = vld [vmem:[%s2160_s26 + $0x78] sm:$0xff]  }
  0x1c   : > { %1932 = vmatpush3.bf16.msra.mxu0 %v2046_v7  ;;  %2014 = vmatpush3.bf16.msra.mxu1 %v2046_v7  ;;  %v2080_v39 = vld [vmem:[%s2160_s26 + $0xf8] sm:$0xff]  }
  0x1d   : > { %1933 = vmatprep.subr.bf16.mxu0 %v2047_v8  ;;  %2007 = vmatprep.subr.bf16.mxu1 %v2047_v8 }
  0x20   : > { %1934 = vmatpush3.bf16.msra.mxu0 %v2047_v8  ;;  %2015 = vmatpush3.bf16.msra.mxu1 %v2047_v8 }
  0x21   : > { %1935 = vmatprep.subr.bf16.mxu0 %v2048_v9  ;;  %2008 = vmatprep.subr.bf16.mxu1 %v2048_v9 }
  0x24   : > { %1936 = vmatpush3.bf16.msra.mxu0 %v2048_v9  ;;  %2016 = vmatpush3.bf16.msra.mxu1 %v2048_v9 }
  0x27   : > { %1938 = vmatmul.mubr.bf16.vlgmr.msra.gmra.mrb[0].mxu0 %v2051_v10  ;;  %1970 = vmatmul.mubr.bf16.vlgmr.msra.gmra.mrb[0].mxu1 %v2052_v11 }
  0x28   : > { %1941 = vmatprep.mubr.bf16.mxu0 %v2053_v12  ;;  %1973 = vmatprep.mubr.bf16.mxu1 %v2054_v13 }
  0x2f   : > { %1942 = vmatmul.mubr.bf16.gmra.mrb[4].mxu0 %v2055_v14  ;;  %1974 = vmatmul.mubr.bf16.gmra.mrb[4].mxu1 %v2056_v15 }
  0x30   : > { %1945 = vmatprep.mubr.bf16.mxu0 %v2057_v16  ;;  %1977 = vmatprep.mubr.bf16.mxu1 %v2058_v17 }
  0x37   : > { %1946 = vmatmul.mubr.bf16.gmra.mrb[8].mxu0 %v2059_v18  ;;  %1978 = vmatmul.mubr.bf16.gmra.mrb[8].mxu1 %v2060_v19 }
  0x38   : > { %1949 = vmatprep.mubr.bf16.mxu0 %v2061_v20  ;;  %1981 = vmatprep.mubr.bf16.mxu1 %v2062_v21 }
  0x3f   : > { %1950 = vmatmul.mubr.bf16.gmra.mrb[12].mxu0 %v2063_v22  ;;  %1982 = vmatmul.mubr.bf16.gmra.mrb[12].mxu1 %v2064_v23 }
  0x40   : > { %1953 = vmatprep.mubr.bf16.mxu0 %v2065_v24  ;;  %1985 = vmatprep.mubr.bf16.mxu1 %v2066_v25 }
  0x47   : > { %1954 = vmatmul.mubr.bf16.gmra.mrb[16].mxu0 %v2067_v26  ;;  %1986 = vmatmul.mubr.bf16.gmra.mrb[16].mxu1 %v2068_v27 }
  0x48   : > { %1957 = vmatprep.mubr.bf16.mxu0 %v2069_v28  ;;  %1989 = vmatprep.mubr.bf16.mxu1 %v2070_v29 }
  0x4f   : > { %1958 = vmatmul.mubr.bf16.gmra.mrb[20].mxu0 %v2071_v30  ;;  %1990 = vmatmul.mubr.bf16.gmra.mrb[20].mxu1 %v2072_v31 }
  0x50   : > { %1961 = vmatprep.mubr.bf16.mxu0 %v2073_v32  ;;  %1993 = vmatprep.mubr.bf16.mxu1 %v2074_v33 }
  0x57   : > { %1962 = vmatmul.mubr.bf16.gmra.mrb[24].mxu0 %v2075_v34  ;;  %1994 = vmatmul.mubr.bf16.gmra.mrb[24].mxu1 %v2076_v35 }
  0x58   : > { %1965 = vmatprep.mubr.bf16.mxu0 %v2077_v36  ;;  %1997 = vmatprep.mubr.bf16.mxu1 %v2078_v37 }
  0x5f   : > { %1966 = vmatmul.mubr.bf16.gmra.mrb[28].mxu0 %v2079_v38  ;;  %1998 = vmatmul.mubr.bf16.gmra.mrb[28].mxu1 %v2080_v39 }
  0xfa   : > { %v1939_v41 = vpop.f32.mrb[0].mxu0  ;;  %v1971_v42 = vpop.f32.mrb[0].mxu1 }
  0xfb   : > { %v1205_v43 = vadd.f32 %v1939_v41, %v2212_v40  ;;  %v1237_v44 = vadd.f32 %v1971_v42, %v2212_v40  ;;  %v746_v45 = vpop.f32.mrb[1].mxu0  ;;  %v874_v46 = vpop.f32.mrb[1].mxu1 }
  0xfc   : > { %v1203_v47 = vadd.f32 %v2212_v40, %v746_v45  ;;  %v1235_v48 = vadd.f32 %v2212_v40, %v874_v46  ;;  %v1940_v49 = vpop.f32.mrb[2].mxu0  ;;  %v1972_v50 = vpop.f32.mrb[2].mxu1 }
  0xfd   : > { %v1819_v51 = vpack.c.bf16 %v1205_v43, %v1205_v43  ;;  %v1851_v52 = vpack.c.bf16 %v1237_v44, %v1237_v44  ;;  %v1206_v53 = vadd.f32 %v1940_v49, %v2212_v40  ;;  %v1238_v54 = vadd.f32 %v1972_v50, %v2212_v40  ;;  %v749_v55 = vpop.f32.mrb[3].mxu0  ;;  %v877_v56 = vpop.f32.mrb[3].mxu1 }
  0xfe   : > { %v1817_v57 = vpack.c.bf16 %v1203_v47, %v1203_v47  ;;  %v1849_v58 = vpack.c.bf16 %v1235_v48, %v1235_v48  ;;  %v1204_v59 = vadd.f32 %v2212_v40, %v749_v55  ;;  %v1236_v60 = vadd.f32 %v2212_v40, %v877_v56 }
  0xff   : > { %1526 = vst.msk [vmem:[%s2221_s17 + $0x8] sm:$0xf] %vm1523_vm0, %v1819_v51  ;;  %1558 = vst.msk [vmem:[%s2221_s17 + $0x88] sm:$0xf] %vm1523_vm0, %v1851_v52  ;;  %v1820_v61 = vpack.c.bf16 %v1206_v53, %v1206_v53  ;;  %v1852_v62 = vpack.c.bf16 %v1238_v54, %v1238_v54 }
 0x100   : > { %1524 = vst.msk [vmem:[%s2221_s17] sm:$0xf] %vm1523_vm0, %v1817_v57  ;;  %1556 = vst.msk [vmem:[%s2221_s17 + $0x80] sm:$0xf] %vm1523_vm0, %v1849_v58  ;;  %v1818_v63 = vpack.c.bf16 %v1204_v59, %v1204_v59  ;;  %v1850_v0 = vpack.c.bf16 %v1236_v60, %v1236_v60 }
 0x101   : > { %1527 = vst.msk [vmem:[%s2221_s17 + $0xc] sm:$0xf] %vm1523_vm0, %v1820_v61  ;;  %1559 = vst.msk [vmem:[%s2221_s17 + $0x8c] sm:$0xf] %vm1523_vm0, %v1852_v62 }
 0x102   : > { %1525 = vst.msk [vmem:[%s2221_s17 + $0x4] sm:$0xf] %vm1523_vm0, %v1818_v63  ;;  %1557 = vst.msk [vmem:[%s2221_s17 + $0x84] sm:$0xf] %vm1523_vm0, %v1850_v0  ;;  %v1943_v1 = vpop.f32.mrb[4].mxu0  ;;  %v1975_v2 = vpop.f32.mrb[4].mxu1 }
 0x103   : > { %v1209_v3 = vadd.f32 %v1943_v1, %v2212_v40  ;;  %v1241_v4 = vadd.f32 %v1975_v2, %v2212_v40  ;;  %v762_v5 = vpop.f32.mrb[5].mxu0  ;;  %v890_v6 = vpop.f32.mrb[5].mxu1 }
 0x104   : > { %v1207_v7 = vadd.f32 %v2212_v40, %v762_v5  ;;  %v1239_v8 = vadd.f32 %v2212_v40, %v890_v6  ;;  %v1944_v9 = vpop.f32.mrb[6].mxu0  ;;  %v1976_v10 = vpop.f32.mrb[6].mxu1 }
 0x105   : > { %v1823_v11 = vpack.c.bf16 %v1209_v3, %v1209_v3  ;;  %v1855_v12 = vpack.c.bf16 %v1241_v4, %v1241_v4  ;;  %v1210_v13 = vadd.f32 %v1944_v9, %v2212_v40  ;;  %v1242_v14 = vadd.f32 %v1976_v10, %v2212_v40  ;;  %v765_v15 = vpop.f32.mrb[7].mxu0  ;;  %v893_v16 = vpop.f32.mrb[7].mxu1 }
 0x106   : > { %v1821_v17 = vpack.c.bf16 %v1207_v7, %v1207_v7  ;;  %v1853_v18 = vpack.c.bf16 %v1239_v8, %v1239_v8  ;;  %v1208_v19 = vadd.f32 %v2212_v40, %v765_v15  ;;  %v1240_v20 = vadd.f32 %v2212_v40, %v893_v16 }
 0x107   : > { %1530 = vst.msk [vmem:[%s2221_s17 + $0x18] sm:$0xf] %vm1523_vm0, %v1823_v11  ;;  %1562 = vst.msk [vmem:[%s2221_s17 + $0x98] sm:$0xf] %vm1523_vm0, %v1855_v12  ;;  %v1824_v21 = vpack.c.bf16 %v1210_v13, %v1210_v13  ;;  %v1856_v22 = vpack.c.bf16 %v1242_v14, %v1242_v14 }
 0x108   : > { %1528 = vst.msk [vmem:[%s2221_s17 + $0x10] sm:$0xf] %vm1523_vm0, %v1821_v17  ;;  %1560 = vst.msk [vmem:[%s2221_s17 + $0x90] sm:$0xf] %vm1523_vm0, %v1853_v18  ;;  %v1822_v23 = vpack.c.bf16 %v1208_v19, %v1208_v19  ;;  %v1854_v24 = vpack.c.bf16 %v1240_v20, %v1240_v20 }
 0x109   : > { %1531 = vst.msk [vmem:[%s2221_s17 + $0x1c] sm:$0xf] %vm1523_vm0, %v1824_v21  ;;  %1563 = vst.msk [vmem:[%s2221_s17 + $0x9c] sm:$0xf] %vm1523_vm0, %v1856_v22 }
 0x10a   : > { %1529 = vst.msk [vmem:[%s2221_s17 + $0x14] sm:$0xf] %vm1523_vm0, %v1822_v23  ;;  %1561 = vst.msk [vmem:[%s2221_s17 + $0x94] sm:$0xf] %vm1523_vm0, %v1854_v24  ;;  %v1947_v25 = vpop.f32.mrb[8].mxu0  ;;  %v1979_v26 = vpop.f32.mrb[8].mxu1 }
 0x10b   : > { %v1213_v27 = vadd.f32 %v1947_v25, %v2212_v40  ;;  %v1245_v28 = vadd.f32 %v1979_v26, %v2212_v40  ;;  %v778_v29 = vpop.f32.mrb[9].mxu0  ;;  %v906_v30 = vpop.f32.mrb[9].mxu1 }
 0x10c   : > { %v1211_v31 = vadd.f32 %v2212_v40, %v778_v29  ;;  %v1243_v32 = vadd.f32 %v2212_v40, %v906_v30  ;;  %v1948_v33 = vpop.f32.mrb[10].mxu0  ;;  %v1980_v34 = vpop.f32.mrb[10].mxu1 }
 0x10d   : > { %v1827_v35 = vpack.c.bf16 %v1213_v27, %v1213_v27  ;;  %v1859_v36 = vpack.c.bf16 %v1245_v28, %v1245_v28  ;;  %v1214_v37 = vadd.f32 %v1948_v33, %v2212_v40  ;;  %v1246_v38 = vadd.f32 %v1980_v34, %v2212_v40  ;;  %v781_v39 = vpop.f32.mrb[11].mxu0  ;;  %v909_v41 = vpop.f32.mrb[11].mxu1 }
 0x10e   : > { %v1825_v42 = vpack.c.bf16 %v1211_v31, %v1211_v31  ;;  %v1857_v43 = vpack.c.bf16 %v1243_v32, %v1243_v32  ;;  %v1212_v44 = vadd.f32 %v2212_v40, %v781_v39  ;;  %v1244_v45 = vadd.f32 %v2212_v40, %v909_v41 }
 0x10f   : > { %1534 = vst.msk [vmem:[%s2221_s17 + $0x28] sm:$0xf] %vm1523_vm0, %v1827_v35  ;;  %1566 = vst.msk [vmem:[%s2221_s17 + $0xa8] sm:$0xf] %vm1523_vm0, %v1859_v36  ;;  %v1828_v46 = vpack.c.bf16 %v1214_v37, %v1214_v37  ;;  %v1860_v47 = vpack.c.bf16 %v1246_v38, %v1246_v38 }
 0x110   : > { %1532 = vst.msk [vmem:[%s2221_s17 + $0x20] sm:$0xf] %vm1523_vm0, %v1825_v42  ;;  %1564 = vst.msk [vmem:[%s2221_s17 + $0xa0] sm:$0xf] %vm1523_vm0, %v1857_v43  ;;  %v1826_v48 = vpack.c.bf16 %v1212_v44, %v1212_v44  ;;  %v1858_v49 = vpack.c.bf16 %v1244_v45, %v1244_v45 }
 0x111   : > { %1535 = vst.msk [vmem:[%s2221_s17 + $0x2c] sm:$0xf] %vm1523_vm0, %v1828_v46  ;;  %1567 = vst.msk [vmem:[%s2221_s17 + $0xac] sm:$0xf] %vm1523_vm0, %v1860_v47 }
 0x112   : > { %1533 = vst.msk [vmem:[%s2221_s17 + $0x24] sm:$0xf] %vm1523_vm0, %v1826_v48  ;;  %1565 = vst.msk [vmem:[%s2221_s17 + $0xa4] sm:$0xf] %vm1523_vm0, %v1858_v49  ;;  %v1951_v50 = vpop.f32.mrb[12].mxu0  ;;  %v1983_v51 = vpop.f32.mrb[12].mxu1 }
 0x113   : > { %v1217_v52 = vadd.f32 %v1951_v50, %v2212_v40  ;;  %v1249_v53 = vadd.f32 %v1983_v51, %v2212_v40  ;;  %v794_v54 = vpop.f32.mrb[13].mxu0  ;;  %v922_v55 = vpop.f32.mrb[13].mxu1 }
 0x114   : > { %v1215_v56 = vadd.f32 %v2212_v40, %v794_v54  ;;  %v1247_v57 = vadd.f32 %v2212_v40, %v922_v55  ;;  %v1952_v58 = vpop.f32.mrb[14].mxu0  ;;  %v1984_v59 = vpop.f32.mrb[14].mxu1 }
 0x115   : > { %v1831_v60 = vpack.c.bf16 %v1217_v52, %v1217_v52  ;;  %v1863_v61 = vpack.c.bf16 %v1249_v53, %v1249_v53  ;;  %v1218_v62 = vadd.f32 %v1952_v58, %v2212_v40  ;;  %v1250_v63 = vadd.f32 %v1984_v59, %v2212_v40  ;;  %v797_v0 = vpop.f32.mrb[15].mxu0  ;;  %v925_v1 = vpop.f32.mrb[15].mxu1 }
 0x116   : > { %v1829_v2 = vpack.c.bf16 %v1215_v56, %v1215_v56  ;;  %v1861_v3 = vpack.c.bf16 %v1247_v57, %v1247_v57  ;;  %v1216_v4 = vadd.f32 %v2212_v40, %v797_v0  ;;  %v1248_v5 = vadd.f32 %v2212_v40, %v925_v1 }
 0x117   : > { %1538 = vst.msk [vmem:[%s2221_s17 + $0x38] sm:$0xf] %vm1523_vm0, %v1831_v60  ;;  %1570 = vst.msk [vmem:[%s2221_s17 + $0xb8] sm:$0xf] %vm1523_vm0, %v1863_v61  ;;  %v1832_v6 = vpack.c.bf16 %v1218_v62, %v1218_v62  ;;  %v1864_v7 = vpack.c.bf16 %v1250_v63, %v1250_v63 }
 0x118   : > { %1536 = vst.msk [vmem:[%s2221_s17 + $0x30] sm:$0xf] %vm1523_vm0, %v1829_v2  ;;  %1568 = vst.msk [vmem:[%s2221_s17 + $0xb0] sm:$0xf] %vm1523_vm0, %v1861_v3  ;;  %v1830_v8 = vpack.c.bf16 %v1216_v4, %v1216_v4  ;;  %v1862_v9 = vpack.c.bf16 %v1248_v5, %v1248_v5 }
 0x119   : > { %1539 = vst.msk [vmem:[%s2221_s17 + $0x3c] sm:$0xf] %vm1523_vm0, %v1832_v6  ;;  %1571 = vst.msk [vmem:[%s2221_s17 + $0xbc] sm:$0xf] %vm1523_vm0, %v1864_v7 }
 0x11a   : > { %1537 = vst.msk [vmem:[%s2221_s17 + $0x34] sm:$0xf] %vm1523_vm0, %v1830_v8  ;;  %1569 = vst.msk [vmem:[%s2221_s17 + $0xb4] sm:$0xf] %vm1523_vm0, %v1862_v9  ;;  %v1955_v10 = vpop.f32.mrb[16].mxu0  ;;  %v1987_v11 = vpop.f32.mrb[16].mxu1 }
 0x11b   : > { %v1221_v12 = vadd.f32 %v1955_v10, %v2212_v40  ;;  %v1253_v13 = vadd.f32 %v1987_v11, %v2212_v40  ;;  %v810_v14 = vpop.f32.mrb[17].mxu0  ;;  %v938_v15 = vpop.f32.mrb[17].mxu1 }
 0x11c   : > { %v1219_v16 = vadd.f32 %v2212_v40, %v810_v14  ;;  %v1251_v17 = vadd.f32 %v2212_v40, %v938_v15  ;;  %v1956_v18 = vpop.f32.mrb[18].mxu0  ;;  %v1988_v19 = vpop.f32.mrb[18].mxu1 }
 0x11d   : > { %v1835_v20 = vpack.c.bf16 %v1221_v12, %v1221_v12  ;;  %v1867_v21 = vpack.c.bf16 %v1253_v13, %v1253_v13  ;;  %v1222_v22 = vadd.f32 %v1956_v18, %v2212_v40  ;;  %v1254_v23 = vadd.f32 %v1988_v19, %v2212_v40  ;;  %v813_v24 = vpop.f32.mrb[19].mxu0  ;;  %v941_v25 = vpop.f32.mrb[19].mxu1 }
 0x11e   : > { %v1833_v26 = vpack.c.bf16 %v1219_v16, %v1219_v16  ;;  %v1865_v27 = vpack.c.bf16 %v1251_v17, %v1251_v17  ;;  %v1220_v28 = vadd.f32 %v2212_v40, %v813_v24  ;;  %v1252_v29 = vadd.f32 %v2212_v40, %v941_v25 }
 0x11f   : > { %1542 = vst.msk [vmem:[%s2221_s17 + $0x48] sm:$0xf] %vm1523_vm0, %v1835_v20  ;;  %1574 = vst.msk [vmem:[%s2221_s17 + $0xc8] sm:$0xf] %vm1523_vm0, %v1867_v21  ;;  %v1836_v30 = vpack.c.bf16 %v1222_v22, %v1222_v22  ;;  %v1868_v31 = vpack.c.bf16 %v1254_v23, %v1254_v23 }
 0x120   : > { %1540 = vst.msk [vmem:[%s2221_s17 + $0x40] sm:$0xf] %vm1523_vm0, %v1833_v26  ;;  %1572 = vst.msk [vmem:[%s2221_s17 + $0xc0] sm:$0xf] %vm1523_vm0, %v1865_v27  ;;  %v1834_v32 = vpack.c.bf16 %v1220_v28, %v1220_v28  ;;  %v1866_v33 = vpack.c.bf16 %v1252_v29, %v1252_v29 }
 0x121   : > { %1543 = vst.msk [vmem:[%s2221_s17 + $0x4c] sm:$0xf] %vm1523_vm0, %v1836_v30  ;;  %1575 = vst.msk [vmem:[%s2221_s17 + $0xcc] sm:$0xf] %vm1523_vm0, %v1868_v31 }
 0x122   : > { %1541 = vst.msk [vmem:[%s2221_s17 + $0x44] sm:$0xf] %vm1523_vm0, %v1834_v32  ;;  %1573 = vst.msk [vmem:[%s2221_s17 + $0xc4] sm:$0xf] %vm1523_vm0, %v1866_v33  ;;  %v1959_v34 = vpop.f32.mrb[20].mxu0  ;;  %v1991_v35 = vpop.f32.mrb[20].mxu1 }
 0x123   : > { %v1225_v36 = vadd.f32 %v1959_v34, %v2212_v40  ;;  %v1257_v37 = vadd.f32 %v1991_v35, %v2212_v40  ;;  %v826_v38 = vpop.f32.mrb[21].mxu0  ;;  %v954_v39 = vpop.f32.mrb[21].mxu1 }
 0x124   : > { %v1223_v41 = vadd.f32 %v2212_v40, %v826_v38  ;;  %v1255_v42 = vadd.f32 %v2212_v40, %v954_v39  ;;  %v1960_v43 = vpop.f32.mrb[22].mxu0  ;;  %v1992_v44 = vpop.f32.mrb[22].mxu1 }
 0x125   : > { %v1839_v45 = vpack.c.bf16 %v1225_v36, %v1225_v36  ;;  %v1871_v46 = vpack.c.bf16 %v1257_v37, %v1257_v37  ;;  %v1226_v47 = vadd.f32 %v1960_v43, %v2212_v40  ;;  %v1258_v48 = vadd.f32 %v1992_v44, %v2212_v40  ;;  %v829_v49 = vpop.f32.mrb[23].mxu0  ;;  %v957_v50 = vpop.f32.mrb[23].mxu1 }
 0x126   : > { %v1837_v51 = vpack.c.bf16 %v1223_v41, %v1223_v41  ;;  %v1869_v52 = vpack.c.bf16 %v1255_v42, %v1255_v42  ;;  %v1224_v53 = vadd.f32 %v2212_v40, %v829_v49  ;;  %v1256_v54 = vadd.f32 %v2212_v40, %v957_v50 }
 0x127   : > { %1546 = vst.msk [vmem:[%s2221_s17 + $0x58] sm:$0xf] %vm1523_vm0, %v1839_v45  ;;  %1578 = vst.msk [vmem:[%s2221_s17 + $0xd8] sm:$0xf] %vm1523_vm0, %v1871_v46  ;;  %v1840_v55 = vpack.c.bf16 %v1226_v47, %v1226_v47  ;;  %v1872_v56 = vpack.c.bf16 %v1258_v48, %v1258_v48 }
 0x128   : > { %1544 = vst.msk [vmem:[%s2221_s17 + $0x50] sm:$0xf] %vm1523_vm0, %v1837_v51  ;;  %1576 = vst.msk [vmem:[%s2221_s17 + $0xd0] sm:$0xf] %vm1523_vm0, %v1869_v52  ;;  %v1838_v57 = vpack.c.bf16 %v1224_v53, %v1224_v53  ;;  %v1870_v58 = vpack.c.bf16 %v1256_v54, %v1256_v54 }
 0x129   : > { %1547 = vst.msk [vmem:[%s2221_s17 + $0x5c] sm:$0xf] %vm1523_vm0, %v1840_v55  ;;  %1579 = vst.msk [vmem:[%s2221_s17 + $0xdc] sm:$0xf] %vm1523_vm0, %v1872_v56 }
 0x12a   : > { %1545 = vst.msk [vmem:[%s2221_s17 + $0x54] sm:$0xf] %vm1523_vm0, %v1838_v57  ;;  %1577 = vst.msk [vmem:[%s2221_s17 + $0xd4] sm:$0xf] %vm1523_vm0, %v1870_v58  ;;  %v1963_v59 = vpop.f32.mrb[24].mxu0  ;;  %v1995_v60 = vpop.f32.mrb[24].mxu1 }
 0x12b   : > { %v1229_v61 = vadd.f32 %v1963_v59, %v2212_v40  ;;  %v1261_v62 = vadd.f32 %v1995_v60, %v2212_v40  ;;  %v842_v63 = vpop.f32.mrb[25].mxu0  ;;  %v970_v0 = vpop.f32.mrb[25].mxu1 }
 0x12c   : > { %v1227_v1 = vadd.f32 %v2212_v40, %v842_v63  ;;  %v1259_v2 = vadd.f32 %v2212_v40, %v970_v0  ;;  %v1964_v3 = vpop.f32.mrb[26].mxu0  ;;  %v1996_v4 = vpop.f32.mrb[26].mxu1 }
 0x12d   : > { %v1843_v5 = vpack.c.bf16 %v1229_v61, %v1229_v61  ;;  %v1875_v6 = vpack.c.bf16 %v1261_v62, %v1261_v62  ;;  %v1230_v7 = vadd.f32 %v1964_v3, %v2212_v40  ;;  %v1262_v8 = vadd.f32 %v1996_v4, %v2212_v40  ;;  %v845_v9 = vpop.f32.mrb[27].mxu0  ;;  %v973_v10 = vpop.f32.mrb[27].mxu1 }
 0x12e   : > { %v1841_v11 = vpack.c.bf16 %v1227_v1, %v1227_v1  ;;  %v1873_v12 = vpack.c.bf16 %v1259_v2, %v1259_v2  ;;  %v1228_v13 = vadd.f32 %v2212_v40, %v845_v9  ;;  %v1260_v14 = vadd.f32 %v2212_v40, %v973_v10 }
 0x12f   : > { %1550 = vst.msk [vmem:[%s2221_s17 + $0x68] sm:$0xf] %vm1523_vm0, %v1843_v5  ;;  %1582 = vst.msk [vmem:[%s2221_s17 + $0xe8] sm:$0xf] %vm1523_vm0, %v1875_v6  ;;  %v1844_v15 = vpack.c.bf16 %v1230_v7, %v1230_v7  ;;  %v1876_v16 = vpack.c.bf16 %v1262_v8, %v1262_v8 }
 0x130   : > { %1548 = vst.msk [vmem:[%s2221_s17 + $0x60] sm:$0xf] %vm1523_vm0, %v1841_v11  ;;  %1580 = vst.msk [vmem:[%s2221_s17 + $0xe0] sm:$0xf] %vm1523_vm0, %v1873_v12  ;;  %v1842_v17 = vpack.c.bf16 %v1228_v13, %v1228_v13  ;;  %v1874_v18 = vpack.c.bf16 %v1260_v14, %v1260_v14 }
 0x131   : > { %1551 = vst.msk [vmem:[%s2221_s17 + $0x6c] sm:$0xf] %vm1523_vm0, %v1844_v15  ;;  %1583 = vst.msk [vmem:[%s2221_s17 + $0xec] sm:$0xf] %vm1523_vm0, %v1876_v16 }
 0x132   : > { %1549 = vst.msk [vmem:[%s2221_s17 + $0x64] sm:$0xf] %vm1523_vm0, %v1842_v17  ;;  %1581 = vst.msk [vmem:[%s2221_s17 + $0xe4] sm:$0xf] %vm1523_vm0, %v1874_v18  ;;  %v1967_v19 = vpop.f32.mrb[28].mxu0  ;;  %v1999_v20 = vpop.f32.mrb[28].mxu1 }
 0x133   : > { %v1233_v21 = vadd.f32 %v1967_v19, %v2212_v40  ;;  %v1265_v22 = vadd.f32 %v1999_v20, %v2212_v40  ;;  %v858_v23 = vpop.f32.mrb[29].mxu0  ;;  %v986_v24 = vpop.f32.mrb[29].mxu1 }
 0x134   : > { %v1231_v25 = vadd.f32 %v2212_v40, %v858_v23  ;;  %v1263_v26 = vadd.f32 %v2212_v40, %v986_v24  ;;  %v1968_v27 = vpop.f32.mrb[30].mxu0  ;;  %v2000_v28 = vpop.f32.mrb[30].mxu1 }
 0x135   : > { %v1847_v29 = vpack.c.bf16 %v1233_v21, %v1233_v21  ;;  %v1879_v30 = vpack.c.bf16 %v1265_v22, %v1265_v22  ;;  %v1234_v31 = vadd.f32 %v1968_v27, %v2212_v40  ;;  %v1266_v32 = vadd.f32 %v2000_v28, %v2212_v40  ;;  %v861_v33 = vpop.f32.mrb[31].mxu0  ;;  %v989_v34 = vpop.f32.mrb[31].mxu1 }
 0x136   : > { %v1845_v35 = vpack.c.bf16 %v1231_v25, %v1231_v25  ;;  %v1877_v36 = vpack.c.bf16 %v1263_v26, %v1263_v26  ;;  %v1232_v37 = vadd.f32 %v2212_v40, %v861_v33  ;;  %v1264_v38 = vadd.f32 %v2212_v40, %v989_v34 }
 0x137   : > { %1554 = vst.msk [vmem:[%s2221_s17 + $0x78] sm:$0xf] %vm1523_vm0, %v1847_v29  ;;  %1586 = vst.msk [vmem:[%s2221_s17 + $0xf8] sm:$0xf] %vm1523_vm0, %v1879_v30  ;;  %v1848_v39 = vpack.c.bf16 %v1234_v31, %v1234_v31  ;;  %v1880_v41 = vpack.c.bf16 %v1266_v32, %v1266_v32 }
 0x138   : > { %1552 = vst.msk [vmem:[%s2221_s17 + $0x70] sm:$0xf] %vm1523_vm0, %v1845_v35  ;;  %1584 = vst.msk [vmem:[%s2221_s17 + $0xf0] sm:$0xf] %vm1523_vm0, %v1877_v36  ;;  %v1846_v42 = vpack.c.bf16 %v1232_v37, %v1232_v37  ;;  %v1878_v43 = vpack.c.bf16 %v1264_v38, %v1264_v38 }
 0x139   : > { %1555 = vst.msk [vmem:[%s2221_s17 + $0x7c] sm:$0xf] %vm1523_vm0, %v1848_v39  ;;  %1587 = vst.msk [vmem:[%s2221_s17 + $0xfc] sm:$0xf] %vm1523_vm0, %v1880_v41 }
 0x13a   : > { %1553 = vst.msk [vmem:[%s2221_s17 + $0x74] sm:$0xf] %vm1523_vm0, %v1846_v42  ;;  %1585 = vst.msk [vmem:[%s2221_s17 + $0xf4] sm:$0xf] %vm1523_vm0, %v1878_v43 }
 0x13b PF: > { %s13_s14 = sadd.s32 1, %s2103_s14   ;;  %s2426_s12 = smov %s2099_s13 }
 0x13c   : > { %p10_p5 = scmp.ge.s32.totalorder %s13_s14, 10   ;;  %s2427_s13 = smov %s2429_s15 }
 0x13e   :  { %12 = sbr.rel (!%p10_p5) target bundleno = 2 (0x2), region = 76 }

// kernel: tile.101
= control target key start
LH: loop header
LB: loop body
LE: loop exit
PB: predicated region body
PF: predicated region fallthrough
CT: control target
= control target key end

     0   :  { %s131_s10 = smov 120   ;;  %s132_s11 = smov 104   ;;  %vm3_vm0 = vcmask 64512   ;;  %vm9_vm1 = vcmask 1048512   ;;  %vm15_vm2 = vcmask 982912   ;;  %vm21_vm3 = vcmask 917312   ;;  %s207_s0 = inlined_call_operand.vmem [shape: f32[16,8], index: 0, kind: input, shape index: {}]   ;;  %s208_s1 = inlined_call_operand.vmem [shape: f32[1,128], index: 1, kind: output, shape index: {}]  }
   0x1   :  { %v101_v0 = vld [vmem:[%s207_s0 + $0xf] sm:$0x1]   ;;  %v103_v1 = vld [vmem:[%s207_s0 + $0xd] sm:$0x1]   ;;  %v102_v2 = vld [vmem:[%s207_s0 + $0xe] sm:$0x1]  }
   0x2   :  { %7 = vrot.lane.b32.xlu0 %v101_v0, %s131_s10  ;;  %19 = vrot.lane.b32.xlu1 %v103_v1, %s132_s11  ;;  %v104_v3 = vld [vmem:[%s207_s0 + $0xc] sm:$0x1]   ;;  %s133_s16 = smov 112   ;;  %s134_s17 = smov 96   ;;  %v105_v4 = vld [vmem:[%s207_s0 + $0xb] sm:$0x1]  }
   0x3   :  { %v106_v5 = vld [vmem:[%s207_s0 + $0xa] sm:$0x1]   ;;  %v2_v6 = vld [vmem:[%s207_s0] sm:$0x1]   ;;  %s135_s24 = smov 88   ;;  %s136_s25 = smov 80  }
   0x4   :  { %4 = vst.msk [vmem:[#allocation0] sm:$0x1] %vm3_vm0, %v2_v6   ;;  %v107_v7 = vld [vmem:[%s207_s0 + $0x9] sm:$0x1]   ;;  %v108_v8 = vld [vmem:[%s207_s0 + $0x8] sm:$0x1]  }
   0x5   :  { %s137_s30 = smov 72   ;;  %s138_s2 = smov 64   ;;  %v109_v9 = vld [vmem:[%s207_s0 + $0x7] sm:$0x1]   ;;  %v110_v10 = vld [vmem:[%s207_s0 + $0x6] sm:$0x1]  }
   0x6   :  { %13 = vrot.lane.b32.xlu0 %v102_v2, %s133_s16  ;;  %25 = vrot.lane.b32.xlu1 %v104_v3, %s134_s17  ;;  %s139_s7 = smov 56   ;;  %s140_s8 = smov 48   ;;  %v111_v11 = vld [vmem:[%s207_s0 + $0x5] sm:$0x1]   ;;  %v112_v12 = vld [vmem:[%s207_s0 + $0x4] sm:$0x1]  }
   0x7   :  { %s141_s13 = smov 40   ;;  %s142_s14 = smov 32   ;;  %v113_v13 = vld [vmem:[%s207_s0 + $0x3] sm:$0x1]   ;;  %v114_v14 = vld [vmem:[%s207_s0 + $0x2] sm:$0x1]  }
   0x8   :  { %s143_s19 = smov 24   ;;  %s144_s20 = smov 16   ;;  %v115_v15 = vld [vmem:[%s207_s0 + $0x1] sm:$0x1]   ;;  %vm27_vm4 = vcmask 851712   ;;  %vm33_vm5 = vcmask 786112  }
   0x9   :  { %s145_s0 = smov 8   ;;  %vm39_vm6 = vcmask 720512   ;;  %vm45_vm7 = vcmask 654912   ;;  %vm51_vm8 = vcmask 589312   ;;  %vm57_vm9 = vcmask 523712  }
   0xa   :  { %31 = vrot.lane.b32.xlu0 %v105_v4, %s135_s24  ;;  %37 = vrot.lane.b32.xlu1 %v106_v5, %s136_s25  ;;  %vm63_vm10 = vcmask 458112   ;;  %vm69_vm11 = vcmask 392512   ;;  %vm75_vm12 = vcmask 326912   ;;  %vm81_vm13 = vcmask 261312  }
   0xb   :  { %vm87_vm14 = vcmask 195712   ;;  %vm93_vm15 = vcmask 130112  }
   0xe   :  { %43 = vrot.lane.b32.xlu0 %v107_v7, %s137_s30  ;;  %49 = vrot.lane.b32.xlu1 %v108_v8, %s138_s2 }
  0x12   :  { %55 = vrot.lane.b32.xlu0 %v109_v9, %s139_s7  ;;  %61 = vrot.lane.b32.xlu1 %v110_v10, %s140_s8 }
  0x16   :  { %67 = vrot.lane.b32.xlu0 %v111_v11, %s141_s13  ;;  %73 = vrot.lane.b32.xlu1 %v112_v12, %s142_s14 }
  0x1a   :  { %79 = vrot.lane.b32.xlu0 %v113_v13, %s143_s19  ;;  %85 = vrot.lane.b32.xlu1 %v114_v14, %s144_s20 }
  0x1e   :  { %91 = vrot.lane.b32.xlu0 %v115_v15, %s145_s0 }
  0x74   :  { %v8_v16 = vpop.permute.xlu0 %7   ;;  %v20_v17 = vpop.permute.xlu1 %19  }
  0x75   :  { %10 = vst.msk [vmem:[#allocation0] sm:$0x1] %vm9_vm1, %v8_v16  }
  0x78   :  { %v14_v18 = vpop.permute.xlu0 %13   ;;  %v26_v19 = vpop.permute.xlu1 %25  }
  0x79   :  { %16 = vst.msk [vmem:[#allocation0] sm:$0x1] %vm15_vm2, %v14_v18  }
  0x7a   :  { %22 = vst.msk [vmem:[#allocation0] sm:$0x1] %vm21_vm3, %v20_v17  }
  0x7b   :  { %28 = vst.msk [vmem:[#allocation0] sm:$0x1] %vm27_vm4, %v26_v19  }
  0x7c   :  { %v32_v20 = vpop.permute.xlu0 %31   ;;  %v38_v21 = vpop.permute.xlu1 %37  }
  0x7d   :  { %34 = vst.msk [vmem:[#allocation0] sm:$0x1] %vm33_vm5, %v32_v20  }
  0x7e   :  { %40 = vst.msk [vmem:[#allocation0] sm:$0x1] %vm39_vm6, %v38_v21  }
  0x80   :  { %v44_v22 = vpop.permute.xlu0 %43   ;;  %v50_v23 = vpop.permute.xlu1 %49  }
  0x81   :  { %46 = vst.msk [vmem:[#allocation0] sm:$0x1] %vm45_vm7, %v44_v22  }
  0x82   :  { %52 = vst.msk [vmem:[#allocation0] sm:$0x1] %vm51_vm8, %v50_v23  }
  0x84   :  { %v56_v24 = vpop.permute.xlu0 %55   ;;  %v62_v25 = vpop.permute.xlu1 %61  }
  0x85   :  { %58 = vst.msk [vmem:[#allocation0] sm:$0x1] %vm57_vm9, %v56_v24  }
  0x86   :  { %64 = vst.msk [vmem:[#allocation0] sm:$0x1] %vm63_vm10, %v62_v25  }
  0x88   :  { %v68_v26 = vpop.permute.xlu0 %67   ;;  %v74_v27 = vpop.permute.xlu1 %73  }
  0x89   :  { %70 = vst.msk [vmem:[#allocation0] sm:$0x1] %vm69_vm11, %v68_v26  }
  0x8a   :  { %76 = vst.msk [vmem:[#allocation0] sm:$0x1] %vm75_vm12, %v74_v27  }
  0x8c   :  { %v80_v28 = vpop.permute.xlu0 %79   ;;  %v86_v29 = vpop.permute.xlu1 %85  }
  0x8d   :  { %82 = vst.msk [vmem:[#allocation0] sm:$0x1] %vm81_vm13, %v80_v28  }
  0x8e   :  { %88 = vst.msk [vmem:[#allocation0] sm:$0x1] %vm87_vm14, %v86_v29  }
  0x90   :  { %v92_v30 = vpop.permute.xlu0 %91  }
  0x91   :  { %94 = vst.msk [vmem:[#allocation0] sm:$0x1] %vm93_vm15, %v92_v30  }
  0x98   :  { %v98_v31 = vld [vmem:[#allocation0] sm:$0x1] }
  0x99   :  { %100 = vst [vmem:[%s208_s1] sm:$0x1] %v98_v31 }

// kernel: tile.100
= control target key start
LH: loop header
LB: loop body
LE: loop exit
PB: predicated region body
PF: predicated region fallthrough
CT: control target
= control target key end

     0   :  { %s28_s0 = inlined_call_operand.vmem [shape: f32[8], index: 0, kind: input, shape index: {}]   ;;  %s29_s1 = inlined_call_operand.vmem [shape: f32[16,8], index: 1, kind: output, shape index: {}]  }
   0x1   :  { %v4_v0 = vld [vmem:[%s28_s0] ss:$0 sm:$0xff] }
   0x2   :  { %5 = vst [vmem:[%s29_s1] sm:$0xff] %v4_v0  ;;  %8 = vst [vmem:[%s29_s1 + $0x8] sm:$0xff] %v4_v0 }

// kernel: _lambda_.19
= control target key start
LH: loop header
LB: loop body
LE: loop exit
PB: predicated region body
PF: predicated region fallthrough
CT: control target
= control target key end

     0   :  { %s136_s0 = inlined_call_operand.vmem [shape: bf16[32,128], index: 0, kind: input, shape index: {}]   ;;  %s137_s1 = inlined_call_operand.vmem [shape: f32[1,128], index: 1, kind: input, shape index: {}]   ;;  %s138_s2 = inlined_call_operand.vmem [shape: f32[1,128], index: 2, kind: input, shape index: {}]   ;;  %s139_s3 = inlined_call_operand.vmem [shape: bf16[32,128], index: 3, kind: output, shape index: {}]  }
   0x1   :  { %v79_v0 = vld [vmem:[%s136_s0] sm:$0xff]   ;;  %v96_v4 = vld [vmem:[%s136_s0 + $0x8] sm:$0xff]  }
   0x2   :  { %v68_v1 = vld [vmem:[%s137_s1] ss:$0 sm:$0xff]  ;;  %v80_v2 = vunpack.c.l.bf16 %v79_v0  ;;  %v81_v3 = vunpack.c.h.bf16 %v79_v0  ;;  %v84_v6 = vunpack.c.l.bf16 %v96_v4  ;;  %v85_v7 = vunpack.c.h.bf16 %v96_v4 }
   0x3   :  { %v69_v5 = vld [vmem:[%s138_s2] ss:$0 sm:$0xff] }
   0x4   :  { %v29_v8 = vmul.f32 %v80_v2, %v68_v1  ;;  %v30_v9 = vmul.f32 %v81_v3, %v68_v1  ;;  %v31_v10 = vmul.f32 %v84_v6, %v68_v1  ;;  %v32_v11 = vmul.f32 %v85_v7, %v68_v1 }
   0x6   :  { %v40_v12 = vadd.f32 %v69_v5, %v29_v8  ;;  %v41_v13 = vadd.f32 %v69_v5, %v30_v9  ;;  %v42_v14 = vadd.f32 %v69_v5, %v31_v10  ;;  %v43_v15 = vadd.f32 %v69_v5, %v32_v11 }
   0x8   :  { %v89_v16 = vpack.c.bf16 %v41_v13, %v40_v12  ;;  %v94_v17 = vpack.c.bf16 %v43_v15, %v42_v14 }
   0xa   :  { %90 = vst [vmem:[%s139_s3] sm:$0xff] %v89_v16   ;;  %97 = vst [vmem:[%s139_s3 + $0x8] sm:$0xff] %v94_v17  }

// kernel: _lambda_.18
= control target key start
LH: loop header
LB: loop body
LE: loop exit
PB: predicated region body
PF: predicated region fallthrough
CT: control target
= control target key end

     0   :  { %v2215_v0 = vmov 0   ;;  %s3081_s1 = inlined_call_operand.vmem [shape: bf16[256,128], index: 1, kind: input, shape index: {}]   ;;  %s3082_s0 = inlined_call_operand.vmem [shape: bf16[512,256], index: 0, kind: input, shape index: {}]   ;;  %s3083_s2 = inlined_call_operand.vmem [shape: f32[1,128], index: 2, kind: input, shape index: {}]   ;;  %s3084_s3 = inlined_call_operand.vmem [shape: bf16[512,8], index: 3, kind: output, shape index: {0}]   ;;  %s3085_s4 = inlined_call_operand.vmem [shape: f32[1,8,128], index: 4, kind: output, shape index: {1}]  }
   0x1   :  { %863 = vmatprep.subr.bf16.mxu0 %v2215_v0  ;;  %v2199_v1 = vld [vmem:[%s3081_s1] sm:$0xff]   ;;  %2165 = vmatprep.subr.bf16.mxu1 %v2215_v0  ;;  %v2200_v2 = vld [vmem:[%s3081_s1 + $0x8] sm:$0xff]   ;;  %v2201_v3 = vld [vmem:[%s3081_s1 + $0x10] sm:$0xff]  }
   0x2   :  { %864 = vmatpush1.bf16.msra.mxu0 %v2199_v1  ;;  %2181 = vmatpush1.bf16.msra.mxu1 %v2199_v1  ;;  %v2202_v4 = vld [vmem:[%s3081_s1 + $0x18] sm:$0xff]   ;;  %v2203_v5 = vld [vmem:[%s3081_s1 + $0x20] sm:$0xff]   ;;  %v96_v7 = vld [vmem:[%s3082_s0 + $0x8] sm:$0xff] }
   0x3   :  { %865 = vmatprep.subr.bf16.mxu0 %v2215_v0  ;;  %2166 = vmatprep.subr.bf16.mxu1 %v2215_v0  ;;  %v95_v6 = vld [vmem:[%s3082_s0] sm:$0xff]  ;;  %vm160_vm1 = vcmp.ge.bf16.partialorder %v96_v7, 0  ;;  %v224_v9 = vmul.bf16 1045249613, %v96_v7  ;;  %v2204_v10 = vld [vmem:[%s3081_s1 + $0x28] sm:$0xff]   ;;  %v2205_v14 = vld [vmem:[%s3081_s1 + $0x30] sm:$0xff]  }
   0x4   :  { %vm159_vm0 = vcmp.ge.bf16.partialorder %v95_v6, 0  ;;  %v223_v8 = vmul.bf16 1045249613, %v95_v6  ;;  %v2206_v15 = vld [vmem:[%s3081_s1 + $0x38] sm:$0xff]   ;;  %v127_v16 = vld [vmem:[%s3082_s0 + $0x100] sm:$0xff]  ;;  %v128_v17 = vld [vmem:[%s3082_s0 + $0x108] sm:$0xff] }
   0x5   :  { %v2278_v12 = vsel %vm160_vm1, %v96_v7, %v224_v9  ;;  %v2207_v18 = vld [vmem:[%s3081_s1 + $0x40] sm:$0xff]   ;;  %vm191_vm2 = vcmp.ge.bf16.partialorder %v127_v16, 0  ;;  %vm192_vm3 = vcmp.ge.bf16.partialorder %v128_v17, 0  ;;  %v255_v19 = vmul.bf16 1045249613, %v127_v16  ;;  %v2208_v21 = vld [vmem:[%s3081_s1 + $0x48] sm:$0xff]  }
   0x6   :  { %866 = vmatpush1.bf16.msra.mxu0 %v2200_v2  ;;  %2182 = vmatpush1.bf16.msra.mxu1 %v2200_v2  ;;  %v2276_v11 = vsel %vm159_vm0, %v95_v6, %v223_v8  ;;  %v256_v20 = vmul.bf16 1045249613, %v128_v17  ;;  %v2209_v25 = vld [vmem:[%s3081_s1 + $0x50] sm:$0xff]   ;;  %v2210_v26 = vld [vmem:[%s3081_s1 + $0x58] sm:$0xff]   ;;  %v2211_v27 = vld [vmem:[%s3081_s1 + $0x60] sm:$0xff]  }
   0x7   :  { %867 = vmatprep.subr.bf16.mxu0 %v2215_v0  ;;  %2167 = vmatprep.subr.bf16.mxu1 %v2215_v0  ;;  %v1957_v13 = vcombine.high %v2276_v11, %v2278_v12  ;;  %v2308_v22 = vsel %vm191_vm2, %v127_v16, %v255_v19  ;;  %v2212_v28 = vld [vmem:[%s3081_s1 + $0x68] sm:$0xff]   ;;  %v97_v29 = vld [vmem:[%s3082_s0 + $0x10] sm:$0xff]  ;;  %v98_v30 = vld [vmem:[%s3082_s0 + $0x18] sm:$0xff]  ;;  %v1956_v45 = vcombine.low %v2276_v11, %v2278_v12 }
   0x8   :  { %v2310_v23 = vsel %vm192_vm3, %v128_v17, %v256_v20  ;;  %v129_v31 = vld [vmem:[%s3082_s0 + $0x110] sm:$0xff]  ;;  %v130_v32 = vld [vmem:[%s3082_s0 + $0x118] sm:$0xff]  ;;  %v225_v34 = vmul.bf16 1045249613, %v97_v29  ;;  %v226_v35 = vmul.bf16 1045249613, %v98_v30 }
   0x9   :  { %895 = vmatprep.mubr.bf16.mxu0 %v1957_v13  ;;  %v1989_v24 = vcombine.high %v2308_v22, %v2310_v23  ;;  %v2213_v33 = vld [vmem:[%s3081_s1 + $0x70] sm:$0xff]   ;;  %vm161_vm4 = vcmp.ge.bf16.partialorder %v97_v29, 0  ;;  %vm162_vm5 = vcmp.ge.bf16.partialorder %v98_v30, 0  ;;  %v257_v36 = vmul.bf16 1045249613, %v129_v31  ;;  %v2214_v38 = vld [vmem:[%s3081_s1 + $0x78] sm:$0xff]  }
   0xa   :  { %868 = vmatpush1.bf16.msra.mxu0 %v2201_v3  ;;  %2183 = vmatpush1.bf16.msra.mxu1 %v2201_v3  ;;  %v258_v37 = vmul.bf16 1045249613, %v130_v32  ;;  %vm193_vm6 = vcmp.ge.bf16.partialorder %v129_v31, 0  ;;  %vm194_vm7 = vcmp.ge.bf16.partialorder %v130_v32, 0  ;;  %v289_v39 = vsel %vm161_vm4, %v97_v29, %v225_v34  ;;  %v99_v41 = vld [vmem:[%s3082_s0 + $0x20] sm:$0xff]  ;;  %v100_v42 = vld [vmem:[%s3082_s0 + $0x28] sm:$0xff] }
   0xb   :  { %869 = vmatprep.subr.bf16.mxu0 %v2215_v0  ;;  %2168 = vmatprep.subr.bf16.mxu1 %v2215_v0  ;;  %v290_v40 = vsel %vm162_vm5, %v98_v30, %v226_v35  ;;  %v321_v43 = vsel %vm193_vm6, %v129_v31, %v257_v36  ;;  %v131_v46 = vld [vmem:[%s3082_s0 + $0x120] sm:$0xff]  ;;  %v132_v47 = vld [vmem:[%s3082_s0 + $0x128] sm:$0xff]  ;;  %v1988_v49 = vcombine.low %v2308_v22, %v2310_v23  ;;  %v227_v50 = vmul.bf16 1045249613, %v99_v41  ;;  %v101_v57 = vld [vmem:[%s3082_s0 + $0x30] sm:$0xff] }
   0xc   :  { %1023 = vmatprep.mubr.bf16.mxu1 %v1989_v24  ;;  %v322_v44 = vsel %vm194_vm7, %v130_v32, %v258_v37  ;;  %v1959_v48 = vcombine.high %v289_v39, %v290_v40  ;;  %v228_v51 = vmul.bf16 1045249613, %v100_v42  ;;  %vm163_vm8 = vcmp.ge.bf16.partialorder %v99_v41, 0  ;;  %v102_v58 = vld [vmem:[%s3082_s0 + $0x38] sm:$0xff]  ;;  %v133_v62 = vld [vmem:[%s3082_s0 + $0x130] sm:$0xff]  ;;  %v103_v9 = vld [vmem:[%s3082_s0 + $0x40] sm:$0xff] }
   0xd   :  { %v1991_v52 = vcombine.high %v321_v43, %v322_v44  ;;  %vm164_vm9 = vcmp.ge.bf16.partialorder %v100_v42, 0  ;;  %v259_v53 = vmul.bf16 1045249613, %v131_v46  ;;  %v260_v54 = vmul.bf16 1045249613, %v132_v47  ;;  %v134_v63 = vld [vmem:[%s3082_s0 + $0x138] sm:$0xff] }
   0xe   :  { %870 = vmatpush1.bf16.msra.mxu0 %v2202_v4  ;;  %2184 = vmatpush1.bf16.msra.mxu1 %v2202_v4  ;;  %vm195_vm10 = vcmp.ge.bf16.partialorder %v131_v46, 0  ;;  %vm196_vm11 = vcmp.ge.bf16.partialorder %v132_v47, 0  ;;  %v291_v55 = vsel %vm163_vm8, %v99_v41, %v227_v50  ;;  %v292_v56 = vsel %vm164_vm9, %v100_v42, %v228_v51  ;;  %v137_v30 = vld [vmem:[%s3082_s0 + $0x150] sm:$0xff]  ;;  %v138_v31 = vld [vmem:[%s3082_s0 + $0x158] sm:$0xff]  ;;  %v107_v41 = vld [vmem:[%s3082_s0 + $0x60] sm:$0xff] }
   0xf   :  { %871 = vmatprep.subr.bf16.mxu0 %v2215_v0  ;;  %2169 = vmatprep.subr.bf16.mxu1 %v2215_v0  ;;  %v323_v59 = vsel %vm195_vm10, %v131_v46, %v259_v53  ;;  %v324_v60 = vsel %vm196_vm11, %v132_v47, %v260_v54  ;;  %v1958_v61 = vcombine.low %v289_v39, %v290_v40  ;;  %v229_v2 = vmul.bf16 1045249613, %v101_v57  ;;  %v108_v42 = vld [vmem:[%s3082_s0 + $0x68] sm:$0xff]  ;;  %v139_v46 = vld [vmem:[%s3082_s0 + $0x160] sm:$0xff] }
  0x10   :  { %v1990_v1 = vcombine.low %v321_v43, %v322_v44  ;;  %v230_v3 = vmul.bf16 1045249613, %v102_v58  ;;  %v1993_v4 = vcombine.high %v323_v59, %v324_v60  ;;  %vm165_vm12 = vcmp.ge.bf16.partialorder %v101_v57, 0  ;;  %v140_v47 = vld [vmem:[%s3082_s0 + $0x168] sm:$0xff] }
  0x11   :  { %vm166_vm13 = vcmp.ge.bf16.partialorder %v102_v58, 0  ;;  %v262_v6 = vmul.bf16 1045249613, %v134_v63  ;;  %vm197_vm14 = vcmp.ge.bf16.partialorder %v133_v62, 0  ;;  %vm198_vm15 = vcmp.ge.bf16.partialorder %v134_v63, 0 }
  0x12   :  { %872 = vmatpush1.bf16.msra.mxu0 %v2203_v5  ;;  %2185 = vmatpush1.bf16.msra.mxu1 %v2203_v5  ;;  %v261_v5 = vmul.bf16 1045249613, %v133_v62  ;;  %v293_v7 = vsel %vm165_vm12, %v101_v57, %v229_v2  ;;  %v294_v8 = vsel %vm166_vm13, %v102_v58, %v230_v3  ;;  %v1960_v13 = vcombine.low %v291_v55, %v292_v56  ;;  %v109_v57 = vld [vmem:[%s3082_s0 + $0x70] sm:$0xff]  ;;  %v110_v58 = vld [vmem:[%s3082_s0 + $0x78] sm:$0xff] }
  0x13   :  { %873 = vmatprep.subr.bf16.mxu0 %v2215_v0  ;;  %2170 = vmatprep.subr.bf16.mxu1 %v2215_v0  ;;  %v326_v12 = vsel %vm198_vm15, %v134_v63, %v262_v6  ;;  %v1963_v16 = vcombine.high %v293_v7, %v294_v8  ;;  %v1992_v17 = vcombine.low %v323_v59, %v324_v60  ;;  %vm167_vm0 = vcmp.ge.bf16.partialorder %v103_v9, 0  ;;  %v142_v63 = vld [vmem:[%s3082_s0 + $0x178] sm:$0xff] }
  0x14   :  { %v325_v11 = vsel %vm197_vm14, %v133_v62, %v261_v5  ;;  %v1962_v29 = vcombine.low %v293_v7, %v294_v8  ;;  %v265_v37 = vmul.bf16 1045249613, %v137_v30  ;;  %vm201_vm6 = vcmp.ge.bf16.partialorder %v137_v30, 0  ;;  %v141_v62 = vld [vmem:[%s3082_s0 + $0x170] sm:$0xff] }
  0x15   :  { %v1995_v20 = vcombine.high %v325_v11, %v326_v12  ;;  %vm202_vm7 = vcmp.ge.bf16.partialorder %v138_v31, 0  ;;  %v235_v50 = vmul.bf16 1045249613, %v107_v41  ;;  %v236_v51 = vmul.bf16 1045249613, %v108_v42 }
  0x16   :  { %874 = vmatpush1.bf16.msra.mxu0 %v2204_v10  ;;  %2186 = vmatpush1.bf16.msra.mxu1 %v2204_v10  ;;  %v104_v10 = vld [vmem:[%s3082_s0 + $0x48] sm:$0xff]  ;;  %v329_v43 = vsel %vm201_vm6, %v137_v30, %v265_v37  ;;  %vm171_vm8 = vcmp.ge.bf16.partialorder %v107_v41, 0  ;;  %vm172_vm9 = vcmp.ge.bf16.partialorder %v108_v42, 0  ;;  %v267_v53 = vmul.bf16 1045249613, %v139_v46  ;;  %v145_v30 = vld [vmem:[%s3082_s0 + $0x190] sm:$0xff] }
  0x17   :  { %875 = vmatprep.subr.bf16.mxu0 %v2215_v0  ;;  %2171 = vmatprep.subr.bf16.mxu1 %v2215_v0  ;;  %v232_v19 = vmul.bf16 1045249613, %v104_v10  ;;  %vm168_vm1 = vcmp.ge.bf16.partialorder %v104_v10, 0  ;;  %v268_v54 = vmul.bf16 1045249613, %v140_v47  ;;  %vm203_vm10 = vcmp.ge.bf16.partialorder %v139_v46, 0 }
  0x18   :  { %vm204_vm11 = vcmp.ge.bf16.partialorder %v140_v47, 0  ;;  %v331_v59 = vsel %vm203_vm10, %v139_v46, %v267_v53  ;;  %v237_v2 = vmul.bf16 1045249613, %v109_v57  ;;  %v238_v3 = vmul.bf16 1045249613, %v110_v58  ;;  %v147_v46 = vld [vmem:[%s3082_s0 + $0x1a0] sm:$0xff] }
  0x19   :  { %v296_v24 = vsel %vm168_vm1, %v104_v10, %v232_v19  ;;  %v332_v60 = vsel %vm204_vm11, %v140_v47, %v268_v54  ;;  %vm173_vm12 = vcmp.ge.bf16.partialorder %v109_v57, 0  ;;  %vm174_vm13 = vcmp.ge.bf16.partialorder %v110_v58, 0  ;;  %v112_v10 = vld [vmem:[%s3082_s0 + $0x88] sm:$0xff] }
  0x1a   :  { %876 = vmatpush1.bf16.msra.mxu0 %v2205_v14  ;;  %2187 = vmatpush1.bf16.msra.mxu1 %v2205_v14  ;;  %v135_v14 = vld [vmem:[%s3082_s0 + $0x140] sm:$0xff]  ;;  %v269_v5 = vmul.bf16 1045249613, %v141_v62  ;;  %v270_v6 = vmul.bf16 1045249613, %v142_v63  ;;  %vm205_vm14 = vcmp.ge.bf16.partialorder %v141_v62, 0  ;;  %v301_v7 = vsel %vm173_vm12, %v109_v57, %v237_v2 }
  0x1b   :  { %877 = vmatprep.subr.bf16.mxu0 %v2215_v0  ;;  %2172 = vmatprep.subr.bf16.mxu1 %v2215_v0  ;;  %vm199_vm2 = vcmp.ge.bf16.partialorder %v135_v14, 0  ;;  %vm206_vm15 = vcmp.ge.bf16.partialorder %v142_v63, 0  ;;  %v302_v8 = vsel %vm174_vm13, %v110_v58, %v238_v3  ;;  %v240_v19 = vmul.bf16 1045249613, %v112_v10  ;;  %v148_v47 = vld [vmem:[%s3082_s0 + $0x1a8] sm:$0xff]  ;;  %v117_v57 = vld [vmem:[%s3082_s0 + $0xb0] sm:$0xff] }
  0x1c   :  { %vm176_vm1 = vcmp.ge.bf16.partialorder %v112_v10, 0  ;;  %v273_v37 = vmul.bf16 1045249613, %v145_v30  ;;  %vm209_vm6 = vcmp.ge.bf16.partialorder %v145_v30, 0  ;;  %v275_v53 = vmul.bf16 1045249613, %v147_v46 }
  0x1d   :  { %v276_v54 = vmul.bf16 1045249613, %v148_v47  ;;  %vm211_vm10 = vcmp.ge.bf16.partialorder %v147_v46, 0  ;;  %vm212_vm11 = vcmp.ge.bf16.partialorder %v148_v47, 0  ;;  %v118_v58 = vld [vmem:[%s3082_s0 + $0xb8] sm:$0xff]  ;;  %vm181_vm12 = vcmp.ge.bf16.partialorder %v117_v57, 0 }
  0x1e   :  { %878 = vmatpush1.bf16.msra.mxu0 %v2206_v15  ;;  %2188 = vmatpush1.bf16.msra.mxu1 %v2206_v15  ;;  %v136_v15 = vld [vmem:[%s3082_s0 + $0x148] sm:$0xff]  ;;  %v245_v2 = vmul.bf16 1045249613, %v117_v57  ;;  %v246_v3 = vmul.bf16 1045249613, %v118_v58  ;;  %vm182_vm13 = vcmp.ge.bf16.partialorder %v118_v58, 0 }
  0x1f   :  { %879 = vmatprep.subr.bf16.mxu0 %v2215_v0  ;;  %2173 = vmatprep.subr.bf16.mxu1 %v2215_v0  ;;  %v264_v22 = vmul.bf16 1045249613, %v136_v15  ;;  %vm200_vm3 = vcmp.ge.bf16.partialorder %v136_v15, 0 }
  0x22   :  { %880 = vmatpush1.bf16.msra.mxu0 %v2207_v18  ;;  %2189 = vmatpush1.bf16.msra.mxu1 %v2207_v18  ;;  %v231_v18 = vmul.bf16 1045249613, %v103_v9 }
  0x23   :  { %881 = vmatprep.subr.bf16.mxu0 %v2215_v0  ;;  %2174 = vmatprep.subr.bf16.mxu1 %v2215_v0 }
  0x24   :  { %v295_v23 = vsel %vm167_vm0, %v103_v9, %v231_v18  ;;  %v111_v9 = vld [vmem:[%s3082_s0 + $0x80] sm:$0xff] }
  0x25   :  { %v1965_v32 = vcombine.high %v295_v23, %v296_v24  ;;  %v239_v18 = vmul.bf16 1045249613, %v111_v9  ;;  %vm175_vm0 = vcmp.ge.bf16.partialorder %v111_v9, 0 }
  0x26   :  { %882 = vmatpush1.bf16.msra.mxu0 %v2208_v21  ;;  %2190 = vmatpush1.bf16.msra.mxu1 %v2208_v21  ;;  %v263_v21 = vmul.bf16 1045249613, %v135_v14 }
  0x27   :  { %883 = vmatprep.subr.bf16.mxu0 %v2215_v0  ;;  %2175 = vmatprep.subr.bf16.mxu1 %v2215_v0 }
  0x2a   :  { %884 = vmatpush1.bf16.msra.mxu0 %v2209_v25  ;;  %2191 = vmatpush1.bf16.msra.mxu1 %v2209_v25  ;;  %v105_v25 = vld [vmem:[%s3082_s0 + $0x50] sm:$0xff] }
  0x2b   :  { %885 = vmatprep.subr.bf16.mxu0 %v2215_v0  ;;  %2176 = vmatprep.subr.bf16.mxu1 %v2215_v0  ;;  %v233_v34 = vmul.bf16 1045249613, %v105_v25  ;;  %vm169_vm4 = vcmp.ge.bf16.partialorder %v105_v25, 0 }
  0x2d   :  { %v297_v39 = vsel %vm169_vm4, %v105_v25, %v233_v34  ;;  %v113_v25 = vld [vmem:[%s3082_s0 + $0x90] sm:$0xff] }
  0x2e   :  { %886 = vmatpush1.bf16.msra.mxu0 %v2210_v26  ;;  %2192 = vmatpush1.bf16.msra.mxu1 %v2210_v26  ;;  %v106_v26 = vld [vmem:[%s3082_s0 + $0x58] sm:$0xff]  ;;  %v241_v34 = vmul.bf16 1045249613, %v113_v25  ;;  %vm177_vm4 = vcmp.ge.bf16.partialorder %v113_v25, 0 }
  0x2f   :  { %887 = vmatprep.subr.bf16.mxu0 %v2215_v0  ;;  %2177 = vmatprep.subr.bf16.mxu1 %v2215_v0  ;;  %v234_v35 = vmul.bf16 1045249613, %v106_v26  ;;  %vm170_vm5 = vcmp.ge.bf16.partialorder %v106_v26, 0 }
  0x31   :  { %v298_v40 = vsel %vm170_vm5, %v106_v26, %v234_v35  ;;  %v114_v26 = vld [vmem:[%s3082_s0 + $0x98] sm:$0xff] }
  0x32   :  { %888 = vmatpush1.bf16.msra.mxu0 %v2211_v27  ;;  %2193 = vmatpush1.bf16.msra.mxu1 %v2211_v27  ;;  %v327_v27 = vsel %vm199_vm2, %v135_v14, %v263_v21  ;;  %v143_v14 = vld [vmem:[%s3082_s0 + $0x180] sm:$0xff]  ;;  %v242_v35 = vmul.bf16 1045249613, %v114_v26  ;;  %vm178_vm5 = vcmp.ge.bf16.partialorder %v114_v26, 0 }
  0x33   :  { %889 = vmatprep.subr.bf16.mxu0 %v2215_v0  ;;  %2178 = vmatprep.subr.bf16.mxu1 %v2215_v0  ;;  %v271_v21 = vmul.bf16 1045249613, %v143_v14  ;;  %vm207_vm2 = vcmp.ge.bf16.partialorder %v143_v14, 0 }
  0x36   :  { %890 = vmatpush1.bf16.msra.mxu0 %v2212_v28  ;;  %2194 = vmatpush1.bf16.msra.mxu1 %v2212_v28  ;;  %v328_v28 = vsel %vm200_vm3, %v136_v15, %v264_v22  ;;  %v144_v15 = vld [vmem:[%s3082_s0 + $0x188] sm:$0xff] }
  0x37   :  { %891 = vmatprep.subr.bf16.mxu0 %v2215_v0  ;;  %2179 = vmatprep.subr.bf16.mxu1 %v2215_v0  ;;  %v1997_v36 = vcombine.high %v327_v27, %v328_v28  ;;  %v272_v22 = vmul.bf16 1045249613, %v144_v15  ;;  %vm208_vm3 = vcmp.ge.bf16.partialorder %v144_v15, 0 }
  0x3a   :  { %892 = vmatpush1.bf16.msra.mxu0 %v2213_v33  ;;  %2195 = vmatpush1.bf16.msra.mxu1 %v2213_v33  ;;  %v1994_v33 = vcombine.low %v325_v11, %v326_v12  ;;  %v333_v11 = vsel %vm205_vm14, %v141_v62, %v269_v5  ;;  %v334_v12 = vsel %vm206_vm15, %v142_v63, %v270_v6  ;;  %v149_v62 = vld [vmem:[%s3082_s0 + $0x1b0] sm:$0xff]  ;;  %v150_v63 = vld [vmem:[%s3082_s0 + $0x1b8] sm:$0xff] }
  0x3b   :  { %893 = vmatprep.subr.bf16.mxu0 %v2215_v0  ;;  %2180 = vmatprep.subr.bf16.mxu1 %v2215_v0  ;;  %v1961_v0 = vcombine.high %v291_v55, %v292_v56  ;;  %v299_v55 = vsel %vm171_vm8, %v107_v41, %v235_v50  ;;  %v300_v56 = vsel %vm172_vm9, %v108_v42, %v236_v51  ;;  %v115_v41 = vld [vmem:[%s3082_s0 + $0xa0] sm:$0xff]  ;;  %v116_v42 = vld [vmem:[%s3082_s0 + $0xa8] sm:$0xff]  ;;  %v277_v5 = vmul.bf16 1045249613, %v149_v62 }
  0x3c   :  { %v243_v50 = vmul.bf16 1045249613, %v115_v41  ;;  %v244_v51 = vmul.bf16 1045249613, %v116_v42  ;;  %vm179_vm8 = vcmp.ge.bf16.partialorder %v115_v41, 0  ;;  %vm180_vm9 = vcmp.ge.bf16.partialorder %v116_v42, 0 }
  0x3d   :  { %v278_v6 = vmul.bf16 1045249613, %v150_v63  ;;  %vm213_vm14 = vcmp.ge.bf16.partialorder %v149_v62, 0  ;;  %vm214_vm15 = vcmp.ge.bf16.partialorder %v150_v63, 0 }
  0x3e   :  { %894 = vmatpush1.bf16.msra.mxu0 %v2214_v38  ;;  %2196 = vmatpush1.bf16.msra.mxu1 %v2214_v38  ;;  %v266_v38 = vmul.bf16 1045249613, %v138_v31 }
  0x40   :  { %v330_v44 = vsel %vm202_vm7, %v138_v31, %v266_v38  ;;  %v146_v31 = vld [vmem:[%s3082_s0 + $0x198] sm:$0xff] }
  0x41   :  { %896 = vmatmul.mubr.bf16.vlgmr.msra.gmra.mrb[0].mxu0 %v1956_v45  ;;  %1024 = vmatmul.mubr.bf16.vlgmr.msra.gmra.mrb[0].mxu1 %v1988_v49  ;;  %v1964_v45 = vcombine.low %v295_v23, %v296_v24  ;;  %v1996_v49 = vcombine.low %v327_v27, %v328_v28  ;;  %v303_v23 = vsel %vm175_vm0, %v111_v9, %v239_v18  ;;  %v274_v38 = vmul.bf16 1045249613, %v146_v31  ;;  %v119_v9 = vld [vmem:[%s3082_s0 + $0xc0] sm:$0xff] }
  0x42   :  { %903 = vmatprep.mubr.bf16.mxu0 %v1959_v48  ;;  %1031 = vmatprep.mubr.bf16.mxu1 %v1991_v52  ;;  %v1967_v48 = vcombine.high %v297_v39, %v298_v40  ;;  %v1999_v52 = vcombine.high %v329_v43, %v330_v44  ;;  %v304_v24 = vsel %vm176_vm1, %v112_v10, %v240_v19  ;;  %vm210_vm7 = vcmp.ge.bf16.partialorder %v146_v31, 0  ;;  %v120_v10 = vld [vmem:[%s3082_s0 + $0xc8] sm:$0xff] }
  0x43   :  { %v335_v27 = vsel %vm207_vm2, %v143_v14, %v271_v21  ;;  %v336_v28 = vsel %vm208_vm3, %v144_v15, %v272_v22  ;;  %v151_v14 = vld [vmem:[%s3082_s0 + $0x1c0] sm:$0xff]  ;;  %v152_v15 = vld [vmem:[%s3082_s0 + $0x1c8] sm:$0xff]  ;;  %v247_v18 = vmul.bf16 1045249613, %v119_v9  ;;  %v248_v19 = vmul.bf16 1045249613, %v120_v10 }
  0x44   :  { %vm183_vm0 = vcmp.ge.bf16.partialorder %v119_v9, 0  ;;  %vm184_vm1 = vcmp.ge.bf16.partialorder %v120_v10, 0  ;;  %v279_v21 = vmul.bf16 1045249613, %v151_v14  ;;  %v280_v22 = vmul.bf16 1045249613, %v152_v15 }
  0x45   :  { %vm215_vm2 = vcmp.ge.bf16.partialorder %v151_v14, 0  ;;  %vm216_vm3 = vcmp.ge.bf16.partialorder %v152_v15, 0 }
  0x49   :  { %904 = vmatmul.mubr.bf16.gmra.mrb[4].mxu0 %v1958_v61  ;;  %1032 = vmatmul.mubr.bf16.gmra.mrb[4].mxu1 %v1990_v1  ;;  %v1966_v61 = vcombine.low %v297_v39, %v298_v40  ;;  %v1998_v1 = vcombine.low %v329_v43, %v330_v44  ;;  %v305_v39 = vsel %vm177_vm4, %v113_v25, %v241_v34  ;;  %v121_v25 = vld [vmem:[%s3082_s0 + $0xd0] sm:$0xff] }
  0x4a   :  { %911 = vmatprep.mubr.bf16.mxu0 %v1961_v0  ;;  %1039 = vmatprep.mubr.bf16.mxu1 %v1993_v4  ;;  %v1969_v0 = vcombine.high %v299_v55, %v300_v56  ;;  %v2001_v4 = vcombine.high %v331_v59, %v332_v60  ;;  %v306_v40 = vsel %vm178_vm5, %v114_v26, %v242_v35  ;;  %v122_v26 = vld [vmem:[%s3082_s0 + $0xd8] sm:$0xff]  ;;  %v249_v34 = vmul.bf16 1045249613, %v121_v25 }
  0x4b   :  { %v337_v43 = vsel %vm209_vm6, %v145_v30, %v273_v37  ;;  %v338_v44 = vsel %vm210_vm7, %v146_v31, %v274_v38  ;;  %v153_v30 = vld [vmem:[%s3082_s0 + $0x1d0] sm:$0xff]  ;;  %v154_v31 = vld [vmem:[%s3082_s0 + $0x1d8] sm:$0xff]  ;;  %v250_v35 = vmul.bf16 1045249613, %v122_v26  ;;  %vm185_vm4 = vcmp.ge.bf16.partialorder %v121_v25, 0 }
  0x4c   :  { %vm186_vm5 = vcmp.ge.bf16.partialorder %v122_v26, 0  ;;  %v281_v37 = vmul.bf16 1045249613, %v153_v30  ;;  %v282_v38 = vmul.bf16 1045249613, %v154_v31  ;;  %vm217_vm6 = vcmp.ge.bf16.partialorder %v153_v30, 0 }
  0x4d   :  { %vm218_vm7 = vcmp.ge.bf16.partialorder %v154_v31, 0 }
  0x51   :  { %912 = vmatmul.mubr.bf16.gmra.mrb[8].mxu0 %v1960_v13  ;;  %1040 = vmatmul.mubr.bf16.gmra.mrb[8].mxu1 %v1992_v17  ;;  %v1968_v13 = vcombine.low %v299_v55, %v300_v56  ;;  %v2000_v17 = vcombine.low %v331_v59, %v332_v60  ;;  %v307_v55 = vsel %vm179_vm8, %v115_v41, %v243_v50  ;;  %v123_v41 = vld [vmem:[%s3082_s0 + $0xe0] sm:$0xff] }
  0x52   :  { %919 = vmatprep.mubr.bf16.mxu0 %v1963_v16  ;;  %1047 = vmatprep.mubr.bf16.mxu1 %v1995_v20  ;;  %v1971_v16 = vcombine.high %v301_v7, %v302_v8  ;;  %v2003_v20 = vcombine.high %v333_v11, %v334_v12  ;;  %v308_v56 = vsel %vm180_vm9, %v116_v42, %v244_v51  ;;  %v124_v42 = vld [vmem:[%s3082_s0 + $0xe8] sm:$0xff]  ;;  %v251_v50 = vmul.bf16 1045249613, %v123_v41 }
  0x53   :  { %v339_v59 = vsel %vm211_vm10, %v147_v46, %v275_v53  ;;  %v340_v60 = vsel %vm212_vm11, %v148_v47, %v276_v54  ;;  %v155_v46 = vld [vmem:[%s3082_s0 + $0x1e0] sm:$0xff]  ;;  %v156_v47 = vld [vmem:[%s3082_s0 + $0x1e8] sm:$0xff]  ;;  %v252_v51 = vmul.bf16 1045249613, %v124_v42  ;;  %vm187_vm8 = vcmp.ge.bf16.partialorder %v123_v41, 0 }
  0x54   :  { %vm188_vm9 = vcmp.ge.bf16.partialorder %v124_v42, 0  ;;  %v283_v53 = vmul.bf16 1045249613, %v155_v46  ;;  %v284_v54 = vmul.bf16 1045249613, %v156_v47  ;;  %vm219_vm10 = vcmp.ge.bf16.partialorder %v155_v46, 0 }
  0x55   :  { %vm220_vm11 = vcmp.ge.bf16.partialorder %v156_v47, 0 }
  0x59   :  { %920 = vmatmul.mubr.bf16.gmra.mrb[12].mxu0 %v1962_v29  ;;  %1048 = vmatmul.mubr.bf16.gmra.mrb[12].mxu1 %v1994_v33  ;;  %v1970_v29 = vcombine.low %v301_v7, %v302_v8  ;;  %v2002_v33 = vcombine.low %v333_v11, %v334_v12  ;;  %v309_v7 = vsel %vm181_vm12, %v117_v57, %v245_v2  ;;  %v125_v57 = vld [vmem:[%s3082_s0 + $0xf0] sm:$0xff] }
  0x5a   :  { %927 = vmatprep.mubr.bf16.mxu0 %v1965_v32  ;;  %1055 = vmatprep.mubr.bf16.mxu1 %v1997_v36  ;;  %v1973_v32 = vcombine.high %v303_v23, %v304_v24  ;;  %v2005_v36 = vcombine.high %v335_v27, %v336_v28  ;;  %v310_v8 = vsel %vm182_vm13, %v118_v58, %v246_v3  ;;  %v126_v58 = vld [vmem:[%s3082_s0 + $0xf8] sm:$0xff]  ;;  %v253_v2 = vmul.bf16 1045249613, %v125_v57 }
  0x5b   :  { %v341_v11 = vsel %vm213_vm14, %v149_v62, %v277_v5  ;;  %v342_v12 = vsel %vm214_vm15, %v150_v63, %v278_v6  ;;  %v157_v62 = vld [vmem:[%s3082_s0 + $0x1f0] sm:$0xff]  ;;  %v158_v63 = vld [vmem:[%s3082_s0 + $0x1f8] sm:$0xff]  ;;  %v254_v3 = vmul.bf16 1045249613, %v126_v58  ;;  %vm189_vm12 = vcmp.ge.bf16.partialorder %v125_v57, 0 }
  0x5c   :  { %vm190_vm13 = vcmp.ge.bf16.partialorder %v126_v58, 0  ;;  %v285_v5 = vmul.bf16 1045249613, %v157_v62  ;;  %v286_v6 = vmul.bf16 1045249613, %v158_v63  ;;  %vm221_vm14 = vcmp.ge.bf16.partialorder %v157_v62, 0 }
  0x5d   :  { %vm222_vm15 = vcmp.ge.bf16.partialorder %v158_v63, 0 }
  0x61   :  { %928 = vmatmul.mubr.bf16.gmra.mrb[16].mxu0 %v1964_v45  ;;  %1056 = vmatmul.mubr.bf16.gmra.mrb[16].mxu1 %v1996_v49  ;;  %v1972_v45 = vcombine.low %v303_v23, %v304_v24  ;;  %v2004_v49 = vcombine.low %v335_v27, %v336_v28  ;;  %v311_v23 = vsel %vm183_vm0, %v119_v9, %v247_v18  ;;  %vm1674_vm0 = vcmask 60416  }
  0x62   :  { %935 = vmatprep.mubr.bf16.mxu0 %v1967_v48  ;;  %1063 = vmatprep.mubr.bf16.mxu1 %v1999_v52  ;;  %v1975_v48 = vcombine.high %v305_v39, %v306_v40  ;;  %v2007_v52 = vcombine.high %v337_v43, %v338_v44  ;;  %v312_v24 = vsel %vm184_vm1, %v120_v10, %v248_v19  ;;  %vm1941_vm1 = vcmask 1040384  }
  0x63   :  { %v343_v27 = vsel %vm215_vm2, %v151_v14, %v279_v21  ;;  %v344_v28 = vsel %vm216_vm3, %v152_v15, %v280_v22  ;;  %v349_v9 = vsel %vm221_vm14, %v157_v62, %v285_v5  ;;  %v350_v10 = vsel %vm222_vm15, %v158_v63, %v286_v6 }
  0x64   :  { %v2019_v14 = vcombine.high %v349_v9, %v350_v10  ;;  %vm1943_vm2 = vcmask 1041408  }
  0x69   :  { %936 = vmatmul.mubr.bf16.gmra.mrb[20].mxu0 %v1966_v61  ;;  %1064 = vmatmul.mubr.bf16.gmra.mrb[20].mxu1 %v1998_v1  ;;  %v1974_v61 = vcombine.low %v305_v39, %v306_v40  ;;  %v2006_v1 = vcombine.low %v337_v43, %v338_v44  ;;  %v313_v39 = vsel %vm185_vm4, %v121_v25, %v249_v34 }
  0x6a   :  { %943 = vmatprep.mubr.bf16.mxu0 %v1969_v0  ;;  %1071 = vmatprep.mubr.bf16.mxu1 %v2001_v4  ;;  %v1977_v0 = vcombine.high %v307_v55, %v308_v56  ;;  %v2009_v4 = vcombine.high %v339_v59, %v340_v60  ;;  %v314_v40 = vsel %vm186_vm5, %v122_v26, %v250_v35 }
  0x6b   :  { %v345_v43 = vsel %vm217_vm6, %v153_v30, %v281_v37  ;;  %v346_v44 = vsel %vm218_vm7, %v154_v31, %v282_v38 }
  0x71   :  { %944 = vmatmul.mubr.bf16.gmra.mrb[24].mxu0 %v1968_v13  ;;  %1072 = vmatmul.mubr.bf16.gmra.mrb[24].mxu1 %v2000_v17  ;;  %v1976_v13 = vcombine.low %v307_v55, %v308_v56  ;;  %v2008_v17 = vcombine.low %v339_v59, %v340_v60  ;;  %v315_v55 = vsel %vm187_vm8, %v123_v41, %v251_v50 }
  0x72   :  { %951 = vmatprep.mubr.bf16.mxu0 %v1971_v16  ;;  %1079 = vmatprep.mubr.bf16.mxu1 %v2003_v20  ;;  %v1979_v16 = vcombine.high %v309_v7, %v310_v8  ;;  %v2011_v20 = vcombine.high %v341_v11, %v342_v12  ;;  %v316_v56 = vsel %vm188_vm9, %v124_v42, %v252_v51 }
  0x73   :  { %v347_v59 = vsel %vm219_vm10, %v155_v46, %v283_v53  ;;  %v348_v60 = vsel %vm220_vm11, %v156_v47, %v284_v54 }
  0x79   :  { %952 = vmatmul.mubr.bf16.gmra.mrb[28].mxu0 %v1970_v29  ;;  %1080 = vmatmul.mubr.bf16.gmra.mrb[28].mxu1 %v2002_v33  ;;  %v1978_v29 = vcombine.low %v309_v7, %v310_v8  ;;  %v2010_v33 = vcombine.low %v341_v11, %v342_v12  ;;  %v317_v7 = vsel %vm189_vm12, %v125_v57, %v253_v2 }
  0x7a   :  { %959 = vmatprep.mubr.bf16.mxu0 %v1973_v32  ;;  %1087 = vmatprep.mubr.bf16.mxu1 %v2005_v36  ;;  %v1981_v32 = vcombine.high %v311_v23, %v312_v24  ;;  %v2013_v36 = vcombine.high %v343_v27, %v344_v28  ;;  %v318_v8 = vsel %vm190_vm13, %v126_v58, %v254_v3 }
  0x7b   :  { %v1984_v11 = vcombine.low %v315_v55, %v316_v56  ;;  %v1987_v12 = vcombine.high %v317_v7, %v318_v8  ;;  %v1986_v15 = vcombine.low %v317_v7, %v318_v8 }
  0x81   :  { %960 = vmatmul.mubr.bf16.gmra.mrb[32].mxu0 %v1972_v45  ;;  %1088 = vmatmul.mubr.bf16.gmra.mrb[32].mxu1 %v2004_v49  ;;  %v1980_v45 = vcombine.low %v311_v23, %v312_v24  ;;  %v2012_v49 = vcombine.low %v343_v27, %v344_v28 }
  0x82   :  { %967 = vmatprep.mubr.bf16.mxu0 %v1975_v48  ;;  %1095 = vmatprep.mubr.bf16.mxu1 %v2007_v52  ;;  %v1983_v48 = vcombine.high %v313_v39, %v314_v40  ;;  %v2015_v52 = vcombine.high %v345_v43, %v346_v44 }
  0x89   :  { %968 = vmatmul.mubr.bf16.gmra.mrb[36].mxu0 %v1974_v61  ;;  %1096 = vmatmul.mubr.bf16.gmra.mrb[36].mxu1 %v2006_v1  ;;  %v1982_v61 = vcombine.low %v313_v39, %v314_v40  ;;  %v2014_v1 = vcombine.low %v345_v43, %v346_v44 }
  0x8a   :  { %975 = vmatprep.mubr.bf16.mxu0 %v1977_v0  ;;  %1103 = vmatprep.mubr.bf16.mxu1 %v2009_v4  ;;  %v1985_v0 = vcombine.high %v315_v55, %v316_v56  ;;  %v2017_v4 = vcombine.high %v347_v59, %v348_v60 }
  0x91   :  { %976 = vmatmul.mubr.bf16.gmra.mrb[40].mxu0 %v1976_v13  ;;  %1104 = vmatmul.mubr.bf16.gmra.mrb[40].mxu1 %v2008_v17  ;;  %v2016_v13 = vcombine.low %v347_v59, %v348_v60  ;;  %v2532_v17 = vld [vmem:[%s3083_s2] ss:$0 sm:$0xff] }
  0x92   :  { %983 = vmatprep.mubr.bf16.mxu0 %v1979_v16  ;;  %1111 = vmatprep.mubr.bf16.mxu1 %v2011_v20  ;;  %v2018_v16 = vcombine.low %v349_v9, %v350_v10 }
  0x99   :  { %984 = vmatmul.mubr.bf16.gmra.mrb[44].mxu0 %v1978_v29  ;;  %1112 = vmatmul.mubr.bf16.gmra.mrb[44].mxu1 %v2010_v33 }
  0x9a   :  { %991 = vmatprep.mubr.bf16.mxu0 %v1981_v32  ;;  %1119 = vmatprep.mubr.bf16.mxu1 %v2013_v36 }
  0xa1   :  { %992 = vmatmul.mubr.bf16.gmra.mrb[48].mxu0 %v1980_v45  ;;  %1120 = vmatmul.mubr.bf16.gmra.mrb[48].mxu1 %v2012_v49 }
  0xa2   :  { %999 = vmatprep.mubr.bf16.mxu0 %v1983_v48  ;;  %1127 = vmatprep.mubr.bf16.mxu1 %v2015_v52 }
  0xa9   :  { %1000 = vmatmul.mubr.bf16.gmra.mrb[52].mxu0 %v1982_v61  ;;  %1128 = vmatmul.mubr.bf16.gmra.mrb[52].mxu1 %v2014_v1 }
  0xaa   :  { %1007 = vmatprep.mubr.bf16.mxu0 %v1985_v0  ;;  %1135 = vmatprep.mubr.bf16.mxu1 %v2017_v4 }
  0xb1   :  { %1008 = vmatmul.mubr.bf16.gmra.mrb[56].mxu0 %v1984_v11  ;;  %1136 = vmatmul.mubr.bf16.gmra.mrb[56].mxu1 %v2016_v13 }
  0xb2   :  { %1015 = vmatprep.mubr.bf16.mxu0 %v1987_v12  ;;  %1143 = vmatprep.mubr.bf16.mxu1 %v2019_v14 }
  0xb9   :  { %1016 = vmatmul.mubr.bf16.gmra.mrb[60].mxu0 %v1986_v15  ;;  %1144 = vmatmul.mubr.bf16.gmra.mrb[60].mxu1 %v2018_v16 }
 0x114   :  { %v897_v18 = vpop.f32.mrb[0].mxu0  ;;  %v1025_v21 = vpop.f32.mrb[0].mxu1 }
 0x115   :  { %v1354_v19 = vadd.f32 %v2532_v17, %v897_v18  ;;  %v899_v20 = vpop.f32.mrb[1].mxu0  ;;  %v2536_v23 = vadd.f32 %v2532_v17, %v1025_v21  ;;  %v1027_v24 = vpop.f32.mrb[1].mxu1 }
 0x116   :  { %v900_v22 = vpop.f32.mrb[2].mxu0  ;;  %v1028_v28 = vpop.f32.mrb[2].mxu1 }
 0x117   :  { %v2101_v25 = vpack.c.bf16 %v1354_v19, %v1354_v19  ;;  %v1355_v26 = vadd.f32 %v2532_v17, %v900_v22  ;;  %v902_v27 = vpop.f32.mrb[3].mxu0  ;;  %v2133_v29 = vpack.c.bf16 %v2536_v23, %v2536_v23  ;;  %v2542_v30 = vadd.f32 %v2532_v17, %v1028_v28  ;;  %v1030_v31 = vpop.f32.mrb[3].mxu1 }
 0x118   :  { %v1808_v32 = vmul.f32 %v1354_v19, %v1354_v19 }
 0x119   :  { %1675 = vst.msk [vmem:[%s3084_s3] sm:$0xf] %vm1674_vm0, %v2101_v25  ;;  %v2102_v33 = vpack.c.bf16 %v1355_v26, %v1355_v26  ;;  %v1739_v34 = vadd.f32 %v1355_v26, %v1354_v19  ;;  %v1809_v35 = vmul.f32 %v1355_v26, %v1355_v26  ;;  %1707 = vst.msk [vmem:[%s3084_s3 + $0x80] sm:$0xf] %vm1674_vm0, %v2133_v29 }
 0x11a   :  { %v2134_v36 = vpack.c.bf16 %v2542_v30, %v2542_v30 }
 0x11b   :  { %1676 = vst.msk [vmem:[%s3084_s3 + $0x4] sm:$0xf] %vm1674_vm0, %v2102_v33  ;;  %v1872_v37 = vadd.f32 %v1809_v35, %v1808_v32 }
 0x11c   :  { %v905_v38 = vpop.f32.mrb[4].mxu0  ;;  %1708 = vst.msk [vmem:[%s3084_s3 + $0x84] sm:$0xf] %vm1674_vm0, %v2134_v36  ;;  %v1033_v41 = vpop.f32.mrb[4].mxu1 }
 0x11d   :  { %v1356_v39 = vadd.f32 %v2532_v17, %v905_v38  ;;  %v907_v40 = vpop.f32.mrb[5].mxu0  ;;  %v2564_v43 = vadd.f32 %v2532_v17, %v1033_v41  ;;  %v1035_v44 = vpop.f32.mrb[5].mxu1 }
 0x11e   :  { %v908_v42 = vpop.f32.mrb[6].mxu0  ;;  %v1036_v50 = vpop.f32.mrb[6].mxu1 }
 0x11f   :  { %v2103_v45 = vpack.c.bf16 %v1356_v39, %v1356_v39  ;;  %v1740_v46 = vadd.f32 %v1739_v34, %v1356_v39  ;;  %v1810_v47 = vmul.f32 %v1356_v39, %v1356_v39  ;;  %v1357_v48 = vadd.f32 %v2532_v17, %v908_v42  ;;  %v910_v49 = vpop.f32.mrb[7].mxu0  ;;  %v1038_v53 = vpop.f32.mrb[7].mxu1 }
 0x120   :  { %v2135_v51 = vpack.c.bf16 %v2564_v43, %v2564_v43  ;;  %v2570_v52 = vadd.f32 %v2532_v17, %v1036_v50 }
 0x121   :  { %1677 = vst.msk [vmem:[%s3084_s3 + $0x8] sm:$0xf] %vm1674_vm0, %v2103_v45  ;;  %v1873_v54 = vadd.f32 %v1872_v37, %v1810_v47  ;;  %v2104_v55 = vpack.c.bf16 %v1357_v48, %v1357_v48  ;;  %v1741_v56 = vadd.f32 %v1740_v46, %v1357_v48  ;;  %v1811_v57 = vmul.f32 %v1357_v48, %v1357_v48 }
 0x122   :  { %1709 = vst.msk [vmem:[%s3084_s3 + $0x88] sm:$0xf] %vm1674_vm0, %v2135_v51  ;;  %v2136_v58 = vpack.c.bf16 %v2570_v52, %v2570_v52 }
 0x123   :  { %1678 = vst.msk [vmem:[%s3084_s3 + $0xc] sm:$0xf] %vm1674_vm0, %v2104_v55  ;;  %v1874_v59 = vadd.f32 %v1873_v54, %v1811_v57 }
 0x124   :  { %v913_v60 = vpop.f32.mrb[8].mxu0  ;;  %1710 = vst.msk [vmem:[%s3084_s3 + $0x8c] sm:$0xf] %vm1674_vm0, %v2136_v58  ;;  %v1041_v63 = vpop.f32.mrb[8].mxu1 }
 0x125   :  { %v1358_v61 = vadd.f32 %v2532_v17, %v913_v60  ;;  %v915_v62 = vpop.f32.mrb[9].mxu0  ;;  %v2592_v1 = vadd.f32 %v2532_v17, %v1041_v63  ;;  %v1043_v2 = vpop.f32.mrb[9].mxu1 }
 0x126   :  { %v916_v0 = vpop.f32.mrb[10].mxu0  ;;  %v1044_v8 = vpop.f32.mrb[10].mxu1 }
 0x127   :  { %v2105_v3 = vpack.c.bf16 %v1358_v61, %v1358_v61  ;;  %v1742_v4 = vadd.f32 %v1741_v56, %v1358_v61  ;;  %v1812_v5 = vmul.f32 %v1358_v61, %v1358_v61  ;;  %v1359_v6 = vadd.f32 %v2532_v17, %v916_v0  ;;  %v918_v7 = vpop.f32.mrb[11].mxu0  ;;  %v1046_v11 = vpop.f32.mrb[11].mxu1 }
 0x128   :  { %v2137_v9 = vpack.c.bf16 %v2592_v1, %v2592_v1  ;;  %v2598_v10 = vadd.f32 %v2532_v17, %v1044_v8 }
 0x129   :  { %1679 = vst.msk [vmem:[%s3084_s3 + $0x10] sm:$0xf] %vm1674_vm0, %v2105_v3  ;;  %v1875_v12 = vadd.f32 %v1874_v59, %v1812_v5  ;;  %v2106_v13 = vpack.c.bf16 %v1359_v6, %v1359_v6  ;;  %v1743_v14 = vadd.f32 %v1742_v4, %v1359_v6  ;;  %v1813_v15 = vmul.f32 %v1359_v6, %v1359_v6 }
 0x12a   :  { %1711 = vst.msk [vmem:[%s3084_s3 + $0x90] sm:$0xf] %vm1674_vm0, %v2137_v9  ;;  %v2138_v16 = vpack.c.bf16 %v2598_v10, %v2598_v10 }
 0x12b   :  { %1680 = vst.msk [vmem:[%s3084_s3 + $0x14] sm:$0xf] %vm1674_vm0, %v2106_v13  ;;  %v1876_v18 = vadd.f32 %v1875_v12, %v1813_v15 }
 0x12c   :  { %v921_v19 = vpop.f32.mrb[12].mxu0  ;;  %1712 = vst.msk [vmem:[%s3084_s3 + $0x94] sm:$0xf] %vm1674_vm0, %v2138_v16  ;;  %v1049_v22 = vpop.f32.mrb[12].mxu1 }
 0x12d   :  { %v1360_v20 = vadd.f32 %v2532_v17, %v921_v19  ;;  %v923_v21 = vpop.f32.mrb[13].mxu0  ;;  %v2620_v25 = vadd.f32 %v2532_v17, %v1049_v22  ;;  %v1051_v26 = vpop.f32.mrb[13].mxu1 }
 0x12e   :  { %v924_v24 = vpop.f32.mrb[14].mxu0  ;;  %v1052_v33 = vpop.f32.mrb[14].mxu1 }
 0x12f   :  { %v2107_v27 = vpack.c.bf16 %v1360_v20, %v1360_v20  ;;  %v1744_v28 = vadd.f32 %v1743_v14, %v1360_v20  ;;  %v1814_v29 = vmul.f32 %v1360_v20, %v1360_v20  ;;  %v1361_v31 = vadd.f32 %v2532_v17, %v924_v24  ;;  %v926_v32 = vpop.f32.mrb[15].mxu0  ;;  %v1054_v36 = vpop.f32.mrb[15].mxu1 }
 0x130   :  { %v2139_v34 = vpack.c.bf16 %v2620_v25, %v2620_v25  ;;  %v2626_v35 = vadd.f32 %v2532_v17, %v1052_v33 }
 0x131   :  { %1681 = vst.msk [vmem:[%s3084_s3 + $0x18] sm:$0xf] %vm1674_vm0, %v2107_v27  ;;  %v1877_v37 = vadd.f32 %v1876_v18, %v1814_v29  ;;  %v2108_v38 = vpack.c.bf16 %v1361_v31, %v1361_v31  ;;  %v1745_v39 = vadd.f32 %v1744_v28, %v1361_v31  ;;  %v1815_v40 = vmul.f32 %v1361_v31, %v1361_v31 }
 0x132   :  { %1713 = vst.msk [vmem:[%s3084_s3 + $0x98] sm:$0xf] %vm1674_vm0, %v2139_v34  ;;  %v2140_v41 = vpack.c.bf16 %v2626_v35, %v2626_v35 }
 0x133   :  { %1682 = vst.msk [vmem:[%s3084_s3 + $0x1c] sm:$0xf] %vm1674_vm0, %v2108_v38  ;;  %v1878_v42 = vadd.f32 %v1877_v37, %v1815_v40 }
 0x134   :  { %v929_v44 = vpop.f32.mrb[16].mxu0  ;;  %1714 = vst.msk [vmem:[%s3084_s3 + $0x9c] sm:$0xf] %vm1674_vm0, %v2140_v41  ;;  %v1057_v47 = vpop.f32.mrb[16].mxu1 }
 0x135   :  { %v1362_v45 = vadd.f32 %v2532_v17, %v929_v44  ;;  %v931_v46 = vpop.f32.mrb[17].mxu0  ;;  %v2648_v49 = vadd.f32 %v2532_v17, %v1057_v47  ;;  %v1059_v50 = vpop.f32.mrb[17].mxu1 }
 0x136   :  { %v932_v48 = vpop.f32.mrb[18].mxu0  ;;  %v1060_v57 = vpop.f32.mrb[18].mxu1 }
 0x137   :  { %v2109_v51 = vpack.c.bf16 %v1362_v45, %v1362_v45  ;;  %v1746_v53 = vadd.f32 %v1745_v39, %v1362_v45  ;;  %v1816_v54 = vmul.f32 %v1362_v45, %v1362_v45  ;;  %v1363_v55 = vadd.f32 %v2532_v17, %v932_v48  ;;  %v934_v56 = vpop.f32.mrb[19].mxu0  ;;  %v1062_v60 = vpop.f32.mrb[19].mxu1 }
 0x138   :  { %v2141_v58 = vpack.c.bf16 %v2648_v49, %v2648_v49  ;;  %v2654_v59 = vadd.f32 %v2532_v17, %v1060_v57 }
 0x139   :  { %1683 = vst.msk [vmem:[%s3084_s3 + $0x20] sm:$0xf] %vm1674_vm0, %v2109_v51  ;;  %v1879_v61 = vadd.f32 %v1878_v42, %v1816_v54  ;;  %v2110_v62 = vpack.c.bf16 %v1363_v55, %v1363_v55  ;;  %v1747_v63 = vadd.f32 %v1746_v53, %v1363_v55  ;;  %v1817_v0 = vmul.f32 %v1363_v55, %v1363_v55 }
 0x13a   :  { %1715 = vst.msk [vmem:[%s3084_s3 + $0xa0] sm:$0xf] %vm1674_vm0, %v2141_v58  ;;  %v2142_v2 = vpack.c.bf16 %v2654_v59, %v2654_v59 }
 0x13b   :  { %1684 = vst.msk [vmem:[%s3084_s3 + $0x24] sm:$0xf] %vm1674_vm0, %v2110_v62  ;;  %v1880_v3 = vadd.f32 %v1879_v61, %v1817_v0 }
 0x13c   :  { %v937_v4 = vpop.f32.mrb[20].mxu0  ;;  %1716 = vst.msk [vmem:[%s3084_s3 + $0xa4] sm:$0xf] %vm1674_vm0, %v2142_v2  ;;  %v1065_v7 = vpop.f32.mrb[20].mxu1 }
 0x13d   :  { %v1364_v5 = vadd.f32 %v2532_v17, %v937_v4  ;;  %v939_v6 = vpop.f32.mrb[21].mxu0  ;;  %v2676_v9 = vadd.f32 %v2532_v17, %v1065_v7  ;;  %v1067_v11 = vpop.f32.mrb[21].mxu1 }
 0x13e   :  { %v940_v8 = vpop.f32.mrb[22].mxu0  ;;  %v1068_v18 = vpop.f32.mrb[22].mxu1 }
 0x13f   :  { %v2111_v12 = vpack.c.bf16 %v1364_v5, %v1364_v5  ;;  %v1748_v13 = vadd.f32 %v1747_v63, %v1364_v5  ;;  %v1818_v14 = vmul.f32 %v1364_v5, %v1364_v5  ;;  %v1365_v15 = vadd.f32 %v2532_v17, %v940_v8  ;;  %v942_v16 = vpop.f32.mrb[23].mxu0  ;;  %v1070_v21 = vpop.f32.mrb[23].mxu1 }
 0x140   :  { %v2143_v19 = vpack.c.bf16 %v2676_v9, %v2676_v9  ;;  %v2682_v20 = vadd.f32 %v2532_v17, %v1068_v18 }
 0x141   :  { %1685 = vst.msk [vmem:[%s3084_s3 + $0x28] sm:$0xf] %vm1674_vm0, %v2111_v12  ;;  %v1881_v22 = vadd.f32 %v1880_v3, %v1818_v14  ;;  %v2112_v24 = vpack.c.bf16 %v1365_v15, %v1365_v15  ;;  %v1749_v26 = vadd.f32 %v1748_v13, %v1365_v15  ;;  %v1819_v27 = vmul.f32 %v1365_v15, %v1365_v15 }
 0x142   :  { %1717 = vst.msk [vmem:[%s3084_s3 + $0xa8] sm:$0xf] %vm1674_vm0, %v2143_v19  ;;  %v2144_v28 = vpack.c.bf16 %v2682_v20, %v2682_v20 }
 0x143   :  { %1686 = vst.msk [vmem:[%s3084_s3 + $0x2c] sm:$0xf] %vm1674_vm0, %v2112_v24  ;;  %v1882_v29 = vadd.f32 %v1881_v22, %v1819_v27 }
 0x144   :  { %v945_v31 = vpop.f32.mrb[24].mxu0  ;;  %1718 = vst.msk [vmem:[%s3084_s3 + $0xac] sm:$0xf] %vm1674_vm0, %v2144_v28  ;;  %v1073_v34 = vpop.f32.mrb[24].mxu1 }
 0x145   :  { %v1366_v32 = vadd.f32 %v2532_v17, %v945_v31  ;;  %v947_v33 = vpop.f32.mrb[25].mxu0  ;;  %v2704_v37 = vadd.f32 %v2532_v17, %v1073_v34  ;;  %v1075_v38 = vpop.f32.mrb[25].mxu1 }
 0x146   :  { %v948_v36 = vpop.f32.mrb[26].mxu0  ;;  %v1076_v45 = vpop.f32.mrb[26].mxu1 }
 0x147   :  { %v2113_v39 = vpack.c.bf16 %v1366_v32, %v1366_v32  ;;  %v1750_v40 = vadd.f32 %v1749_v26, %v1366_v32  ;;  %v1820_v41 = vmul.f32 %v1366_v32, %v1366_v32  ;;  %v1367_v42 = vadd.f32 %v2532_v17, %v948_v36  ;;  %v950_v44 = vpop.f32.mrb[27].mxu0  ;;  %v1078_v48 = vpop.f32.mrb[27].mxu1 }
 0x148   :  { %v2145_v46 = vpack.c.bf16 %v2704_v37, %v2704_v37  ;;  %v2710_v47 = vadd.f32 %v2532_v17, %v1076_v45 }
 0x149   :  { %1687 = vst.msk [vmem:[%s3084_s3 + $0x30] sm:$0xf] %vm1674_vm0, %v2113_v39  ;;  %v1883_v50 = vadd.f32 %v1882_v29, %v1820_v41  ;;  %v2114_v51 = vpack.c.bf16 %v1367_v42, %v1367_v42  ;;  %v1751_v53 = vadd.f32 %v1750_v40, %v1367_v42  ;;  %v1821_v54 = vmul.f32 %v1367_v42, %v1367_v42 }
 0x14a   :  { %1719 = vst.msk [vmem:[%s3084_s3 + $0xb0] sm:$0xf] %vm1674_vm0, %v2145_v46  ;;  %v2146_v55 = vpack.c.bf16 %v2710_v47, %v2710_v47 }
 0x14b   :  { %1688 = vst.msk [vmem:[%s3084_s3 + $0x34] sm:$0xf] %vm1674_vm0, %v2114_v51  ;;  %v1884_v56 = vadd.f32 %v1883_v50, %v1821_v54 }
 0x14c   :  { %v953_v57 = vpop.f32.mrb[28].mxu0  ;;  %1720 = vst.msk [vmem:[%s3084_s3 + $0xb4] sm:$0xf] %vm1674_vm0, %v2146_v55  ;;  %v1081_v61 = vpop.f32.mrb[28].mxu1 }
 0x14d   :  { %v1368_v58 = vadd.f32 %v2532_v17, %v953_v57  ;;  %v955_v60 = vpop.f32.mrb[29].mxu0  ;;  %v2732_v63 = vadd.f32 %v2532_v17, %v1081_v61  ;;  %v1083_v0 = vpop.f32.mrb[29].mxu1 }
 0x14e   :  { %v956_v62 = vpop.f32.mrb[30].mxu0  ;;  %v1084_v7 = vpop.f32.mrb[30].mxu1 }
 0x14f   :  { %v2115_v2 = vpack.c.bf16 %v1368_v58, %v1368_v58  ;;  %v1752_v3 = vadd.f32 %v1751_v53, %v1368_v58  ;;  %v1822_v4 = vmul.f32 %v1368_v58, %v1368_v58  ;;  %v1369_v5 = vadd.f32 %v2532_v17, %v956_v62  ;;  %v958_v6 = vpop.f32.mrb[31].mxu0  ;;  %v1086_v12 = vpop.f32.mrb[31].mxu1 }
 0x150   :  { %v2147_v8 = vpack.c.bf16 %v2732_v63, %v2732_v63  ;;  %v2738_v11 = vadd.f32 %v2532_v17, %v1084_v7 }
 0x151   :  { %1689 = vst.msk [vmem:[%s3084_s3 + $0x38] sm:$0xf] %vm1674_vm0, %v2115_v2  ;;  %v1885_v13 = vadd.f32 %v1884_v56, %v1822_v4  ;;  %v2116_v14 = vpack.c.bf16 %v1369_v5, %v1369_v5  ;;  %v1753_v15 = vadd.f32 %v1752_v3, %v1369_v5  ;;  %v1823_v16 = vmul.f32 %v1369_v5, %v1369_v5 }
 0x152   :  { %1721 = vst.msk [vmem:[%s3084_s3 + $0xb8] sm:$0xf] %vm1674_vm0, %v2147_v8  ;;  %v2148_v18 = vpack.c.bf16 %v2738_v11, %v2738_v11 }
 0x153   :  { %1690 = vst.msk [vmem:[%s3084_s3 + $0x3c] sm:$0xf] %vm1674_vm0, %v2116_v14  ;;  %v1886_v19 = vadd.f32 %v1885_v13, %v1823_v16 }
 0x154   :  { %v961_v21 = vpop.f32.mrb[32].mxu0  ;;  %1722 = vst.msk [vmem:[%s3084_s3 + $0xbc] sm:$0xf] %vm1674_vm0, %v2148_v18  ;;  %v1089_v26 = vpop.f32.mrb[32].mxu1 }
 0x155   :  { %v1370_v22 = vadd.f32 %v2532_v17, %v961_v21  ;;  %v963_v24 = vpop.f32.mrb[33].mxu0  ;;  %v2760_v28 = vadd.f32 %v2532_v17, %v1089_v26  ;;  %v1091_v29 = vpop.f32.mrb[33].mxu1 }
 0x156   :  { %v964_v27 = vpop.f32.mrb[34].mxu0  ;;  %v1092_v38 = vpop.f32.mrb[34].mxu1 }
 0x157   :  { %v2117_v31 = vpack.c.bf16 %v1370_v22, %v1370_v22  ;;  %v1754_v32 = vadd.f32 %v1753_v15, %v1370_v22  ;;  %v1824_v33 = vmul.f32 %v1370_v22, %v1370_v22  ;;  %v1371_v34 = vadd.f32 %v2532_v17, %v964_v27  ;;  %v966_v36 = vpop.f32.mrb[35].mxu0  ;;  %v1094_v41 = vpop.f32.mrb[35].mxu1 }
 0x158   :  { %v2149_v39 = vpack.c.bf16 %v2760_v28, %v2760_v28  ;;  %v2766_v40 = vadd.f32 %v2532_v17, %v1092_v38 }
 0x159   :  { %1691 = vst.msk [vmem:[%s3084_s3 + $0x40] sm:$0xf] %vm1674_vm0, %v2117_v31  ;;  %v1887_v42 = vadd.f32 %v1886_v19, %v1824_v33  ;;  %v2118_v44 = vpack.c.bf16 %v1371_v34, %v1371_v34  ;;  %v1755_v45 = vadd.f32 %v1754_v32, %v1371_v34  ;;  %v1825_v46 = vmul.f32 %v1371_v34, %v1371_v34 }
 0x15a   :  { %1723 = vst.msk [vmem:[%s3084_s3 + $0xc0] sm:$0xf] %vm1674_vm0, %v2149_v39  ;;  %v2150_v48 = vpack.c.bf16 %v2766_v40, %v2766_v40 }
 0x15b   :  { %1692 = vst.msk [vmem:[%s3084_s3 + $0x44] sm:$0xf] %vm1674_vm0, %v2118_v44  ;;  %v1888_v50 = vadd.f32 %v1887_v42, %v1825_v46 }
 0x15c   :  { %v969_v51 = vpop.f32.mrb[36].mxu0  ;;  %1724 = vst.msk [vmem:[%s3084_s3 + $0xc4] sm:$0xf] %vm1674_vm0, %v2150_v48  ;;  %v1097_v55 = vpop.f32.mrb[36].mxu1 }
 0x15d   :  { %v1372_v53 = vadd.f32 %v2532_v17, %v969_v51  ;;  %v971_v54 = vpop.f32.mrb[37].mxu0  ;;  %v2788_v57 = vadd.f32 %v2532_v17, %v1097_v55  ;;  %v1099_v58 = vpop.f32.mrb[37].mxu1 }
 0x15e   :  { %v972_v56 = vpop.f32.mrb[38].mxu0  ;;  %v1100_v3 = vpop.f32.mrb[38].mxu1 }
 0x15f   :  { %v2119_v60 = vpack.c.bf16 %v1372_v53, %v1372_v53  ;;  %v1756_v61 = vadd.f32 %v1755_v45, %v1372_v53  ;;  %v1826_v62 = vmul.f32 %v1372_v53, %v1372_v53  ;;  %v1373_v0 = vadd.f32 %v2532_v17, %v972_v56  ;;  %v974_v2 = vpop.f32.mrb[39].mxu0  ;;  %v1102_v6 = vpop.f32.mrb[39].mxu1 }
 0x160   :  { %v2151_v4 = vpack.c.bf16 %v2788_v57, %v2788_v57  ;;  %v2794_v5 = vadd.f32 %v2532_v17, %v1100_v3 }
 0x161   :  { %1693 = vst.msk [vmem:[%s3084_s3 + $0x48] sm:$0xf] %vm1674_vm0, %v2119_v60  ;;  %v1889_v7 = vadd.f32 %v1888_v50, %v1826_v62  ;;  %v2120_v8 = vpack.c.bf16 %v1373_v0, %v1373_v0  ;;  %v1757_v12 = vadd.f32 %v1756_v61, %v1373_v0  ;;  %v1827_v13 = vmul.f32 %v1373_v0, %v1373_v0 }
 0x162   :  { %1725 = vst.msk [vmem:[%s3084_s3 + $0xc8] sm:$0xf] %vm1674_vm0, %v2151_v4  ;;  %v2152_v14 = vpack.c.bf16 %v2794_v5, %v2794_v5 }
 0x163   :  { %1694 = vst.msk [vmem:[%s3084_s3 + $0x4c] sm:$0xf] %vm1674_vm0, %v2120_v8  ;;  %v1890_v15 = vadd.f32 %v1889_v7, %v1827_v13 }
 0x164   :  { %v977_v16 = vpop.f32.mrb[40].mxu0  ;;  %1726 = vst.msk [vmem:[%s3084_s3 + $0xcc] sm:$0xf] %vm1674_vm0, %v2152_v14  ;;  %v1105_v21 = vpop.f32.mrb[40].mxu1 }
 0x165   :  { %v1374_v18 = vadd.f32 %v2532_v17, %v977_v16  ;;  %v979_v19 = vpop.f32.mrb[41].mxu0  ;;  %v2816_v24 = vadd.f32 %v2532_v17, %v1105_v21  ;;  %v1107_v26 = vpop.f32.mrb[41].mxu1 }
 0x166   :  { %v980_v22 = vpop.f32.mrb[42].mxu0  ;;  %v1108_v34 = vpop.f32.mrb[42].mxu1 }
 0x167   :  { %v2121_v27 = vpack.c.bf16 %v1374_v18, %v1374_v18  ;;  %v1758_v29 = vadd.f32 %v1757_v12, %v1374_v18  ;;  %v1828_v31 = vmul.f32 %v1374_v18, %v1374_v18  ;;  %v1375_v32 = vadd.f32 %v2532_v17, %v980_v22  ;;  %v982_v33 = vpop.f32.mrb[43].mxu0  ;;  %v1110_v39 = vpop.f32.mrb[43].mxu1 }
 0x168   :  { %v2153_v36 = vpack.c.bf16 %v2816_v24, %v2816_v24  ;;  %v2822_v38 = vadd.f32 %v2532_v17, %v1108_v34 }
 0x169   :  { %1695 = vst.msk [vmem:[%s3084_s3 + $0x50] sm:$0xf] %vm1674_vm0, %v2121_v27  ;;  %v1891_v41 = vadd.f32 %v1890_v15, %v1828_v31  ;;  %v2122_v42 = vpack.c.bf16 %v1375_v32, %v1375_v32  ;;  %v1759_v44 = vadd.f32 %v1758_v29, %v1375_v32  ;;  %v1829_v45 = vmul.f32 %v1375_v32, %v1375_v32 }
 0x16a   :  { %1727 = vst.msk [vmem:[%s3084_s3 + $0xd0] sm:$0xf] %vm1674_vm0, %v2153_v36  ;;  %v2154_v46 = vpack.c.bf16 %v2822_v38, %v2822_v38 }
 0x16b   :  { %1696 = vst.msk [vmem:[%s3084_s3 + $0x54] sm:$0xf] %vm1674_vm0, %v2122_v42  ;;  %v1892_v48 = vadd.f32 %v1891_v41, %v1829_v45 }
 0x16c   :  { %v985_v50 = vpop.f32.mrb[44].mxu0  ;;  %1728 = vst.msk [vmem:[%s3084_s3 + $0xd4] sm:$0xf] %vm1674_vm0, %v2154_v46  ;;  %v1113_v54 = vpop.f32.mrb[44].mxu1 }
 0x16d   :  { %v1376_v51 = vadd.f32 %v2532_v17, %v985_v50  ;;  %v987_v53 = vpop.f32.mrb[45].mxu0  ;;  %v2844_v56 = vadd.f32 %v2532_v17, %v1113_v54  ;;  %v1115_v58 = vpop.f32.mrb[45].mxu1 }
 0x16e   :  { %v988_v55 = vpop.f32.mrb[46].mxu0  ;;  %v1116_v3 = vpop.f32.mrb[46].mxu1 }
 0x16f   :  { %v2123_v60 = vpack.c.bf16 %v1376_v51, %v1376_v51  ;;  %v1760_v61 = vadd.f32 %v1759_v44, %v1376_v51  ;;  %v1830_v62 = vmul.f32 %v1376_v51, %v1376_v51  ;;  %v1377_v0 = vadd.f32 %v2532_v17, %v988_v55  ;;  %v990_v2 = vpop.f32.mrb[47].mxu0  ;;  %v1118_v7 = vpop.f32.mrb[47].mxu1 }
 0x170   :  { %v2155_v4 = vpack.c.bf16 %v2844_v56, %v2844_v56  ;;  %v2850_v6 = vadd.f32 %v2532_v17, %v1116_v3 }
 0x171   :  { %1697 = vst.msk [vmem:[%s3084_s3 + $0x58] sm:$0xf] %vm1674_vm0, %v2123_v60  ;;  %v1893_v8 = vadd.f32 %v1892_v48, %v1830_v62  ;;  %v2124_v12 = vpack.c.bf16 %v1377_v0, %v1377_v0  ;;  %v1761_v13 = vadd.f32 %v1760_v61, %v1377_v0  ;;  %v1831_v14 = vmul.f32 %v1377_v0, %v1377_v0 }
 0x172   :  { %1729 = vst.msk [vmem:[%s3084_s3 + $0xd8] sm:$0xf] %vm1674_vm0, %v2155_v4  ;;  %v2156_v15 = vpack.c.bf16 %v2850_v6, %v2850_v6 }
 0x173   :  { %1698 = vst.msk [vmem:[%s3084_s3 + $0x5c] sm:$0xf] %vm1674_vm0, %v2124_v12  ;;  %v1894_v16 = vadd.f32 %v1893_v8, %v1831_v14 }
 0x174   :  { %v993_v18 = vpop.f32.mrb[48].mxu0  ;;  %1730 = vst.msk [vmem:[%s3084_s3 + $0xdc] sm:$0xf] %vm1674_vm0, %v2156_v15  ;;  %v1121_v22 = vpop.f32.mrb[48].mxu1 }
 0x175   :  { %v1378_v19 = vadd.f32 %v2532_v17, %v993_v18  ;;  %v995_v21 = vpop.f32.mrb[49].mxu0  ;;  %v2872_v27 = vadd.f32 %v2532_v17, %v1121_v22  ;;  %v1123_v29 = vpop.f32.mrb[49].mxu1 }
 0x176   :  { %v996_v26 = vpop.f32.mrb[50].mxu0  ;;  %v1124_v39 = vpop.f32.mrb[50].mxu1 }
 0x177   :  { %v2125_v31 = vpack.c.bf16 %v1378_v19, %v1378_v19  ;;  %v1762_v32 = vadd.f32 %v1761_v13, %v1378_v19  ;;  %v1832_v33 = vmul.f32 %v1378_v19, %v1378_v19  ;;  %v1379_v34 = vadd.f32 %v2532_v17, %v996_v26  ;;  %v998_v36 = vpop.f32.mrb[51].mxu0  ;;  %v1126_v44 = vpop.f32.mrb[51].mxu1 }
 0x178   :  { %v2157_v41 = vpack.c.bf16 %v2872_v27, %v2872_v27  ;;  %v2878_v42 = vadd.f32 %v2532_v17, %v1124_v39 }
 0x179   :  { %1699 = vst.msk [vmem:[%s3084_s3 + $0x60] sm:$0xf] %vm1674_vm0, %v2125_v31  ;;  %v1895_v45 = vadd.f32 %v1894_v16, %v1832_v33  ;;  %v2126_v46 = vpack.c.bf16 %v1379_v34, %v1379_v34  ;;  %v1763_v48 = vadd.f32 %v1762_v32, %v1379_v34  ;;  %v1833_v50 = vmul.f32 %v1379_v34, %v1379_v34 }
 0x17a   :  { %1731 = vst.msk [vmem:[%s3084_s3 + $0xe0] sm:$0xf] %vm1674_vm0, %v2157_v41  ;;  %v2158_v51 = vpack.c.bf16 %v2878_v42, %v2878_v42 }
 0x17b   :  { %1700 = vst.msk [vmem:[%s3084_s3 + $0x64] sm:$0xf] %vm1674_vm0, %v2126_v46  ;;  %v1896_v53 = vadd.f32 %v1895_v45, %v1833_v50 }
 0x17c   :  { %v1001_v54 = vpop.f32.mrb[52].mxu0  ;;  %1732 = vst.msk [vmem:[%s3084_s3 + $0xe4] sm:$0xf] %vm1674_vm0, %v2158_v51  ;;  %v1129_v60 = vpop.f32.mrb[52].mxu1 }
 0x17d   :  { %v1380_v55 = vadd.f32 %v2532_v17, %v1001_v54  ;;  %v1003_v58 = vpop.f32.mrb[53].mxu0  ;;  %v2900_v62 = vadd.f32 %v2532_v17, %v1129_v60  ;;  %v1131_v0 = vpop.f32.mrb[53].mxu1 }
 0x17e   :  { %v1004_v61 = vpop.f32.mrb[54].mxu0  ;;  %v1132_v12 = vpop.f32.mrb[54].mxu1 }
 0x17f   :  { %v2127_v2 = vpack.c.bf16 %v1380_v55, %v1380_v55  ;;  %v1764_v3 = vadd.f32 %v1763_v48, %v1380_v55  ;;  %v1834_v4 = vmul.f32 %v1380_v55, %v1380_v55  ;;  %v1381_v7 = vadd.f32 %v2532_v17, %v1004_v61  ;;  %v1006_v8 = vpop.f32.mrb[55].mxu0  ;;  %v1134_v15 = vpop.f32.mrb[55].mxu1 }
 0x180   :  { %v2159_v13 = vpack.c.bf16 %v2900_v62, %v2900_v62  ;;  %v2906_v14 = vadd.f32 %v2532_v17, %v1132_v12 }
 0x181   :  { %1701 = vst.msk [vmem:[%s3084_s3 + $0x68] sm:$0xf] %vm1674_vm0, %v2127_v2  ;;  %v1897_v16 = vadd.f32 %v1896_v53, %v1834_v4  ;;  %v2128_v18 = vpack.c.bf16 %v1381_v7, %v1381_v7  ;;  %v1765_v19 = vadd.f32 %v1764_v3, %v1381_v7  ;;  %v1835_v21 = vmul.f32 %v1381_v7, %v1381_v7 }
 0x182   :  { %1733 = vst.msk [vmem:[%s3084_s3 + $0xe8] sm:$0xf] %vm1674_vm0, %v2159_v13  ;;  %v2160_v22 = vpack.c.bf16 %v2906_v14, %v2906_v14 }
 0x183   :  { %1702 = vst.msk [vmem:[%s3084_s3 + $0x6c] sm:$0xf] %vm1674_vm0, %v2128_v18  ;;  %v1898_v26 = vadd.f32 %v1897_v16, %v1835_v21 }
 0x184   :  { %v1009_v29 = vpop.f32.mrb[56].mxu0  ;;  %1734 = vst.msk [vmem:[%s3084_s3 + $0xec] sm:$0xf] %vm1674_vm0, %v2160_v22  ;;  %v1137_v33 = vpop.f32.mrb[56].mxu1 }
 0x185   :  { %v1382_v31 = vadd.f32 %v2532_v17, %v1009_v29  ;;  %v1011_v32 = vpop.f32.mrb[57].mxu0  ;;  %v2928_v36 = vadd.f32 %v2532_v17, %v1137_v33  ;;  %v1139_v39 = vpop.f32.mrb[57].mxu1 }
 0x186   :  { %v1012_v34 = vpop.f32.mrb[58].mxu0  ;;  %v1140_v50 = vpop.f32.mrb[58].mxu1 }
 0x187   :  { %v2129_v41 = vpack.c.bf16 %v1382_v31, %v1382_v31  ;;  %v1766_v44 = vadd.f32 %v1765_v19, %v1382_v31  ;;  %v1836_v45 = vmul.f32 %v1382_v31, %v1382_v31  ;;  %v1383_v46 = vadd.f32 %v2532_v17, %v1012_v34  ;;  %v1014_v48 = vpop.f32.mrb[59].mxu0  ;;  %v1142_v54 = vpop.f32.mrb[59].mxu1 }
 0x188   :  { %v2161_v51 = vpack.c.bf16 %v2928_v36, %v2928_v36  ;;  %v2934_v53 = vadd.f32 %v2532_v17, %v1140_v50  ;;  %v1841_v48 = vmul.f32 %v2542_v30, %v2542_v30  ;;  %v1842_v54 = vmul.f32 %v2564_v43, %v2564_v43 }
 0x189   :  { %1703 = vst.msk [vmem:[%s3084_s3 + $0x70] sm:$0xf] %vm1674_vm0, %v2129_v41  ;;  %v1899_v55 = vadd.f32 %v1898_v26, %v1836_v45  ;;  %v2130_v58 = vpack.c.bf16 %v1383_v46, %v1383_v46  ;;  %v1767_v60 = vadd.f32 %v1766_v44, %v1383_v46  ;;  %v1837_v61 = vmul.f32 %v1383_v46, %v1383_v46 }
 0x18a   :  { %1735 = vst.msk [vmem:[%s3084_s3 + $0xf0] sm:$0xf] %vm1674_vm0, %v2161_v51  ;;  %v2162_v0 = vpack.c.bf16 %v2934_v53, %v2934_v53 }
 0x18b   :  { %1704 = vst.msk [vmem:[%s3084_s3 + $0x74] sm:$0xf] %vm1674_vm0, %v2130_v58  ;;  %v1900_v2 = vadd.f32 %v1899_v55, %v1837_v61 }
 0x18c   :  { %v1017_v3 = vpop.f32.mrb[60].mxu0  ;;  %1736 = vst.msk [vmem:[%s3084_s3 + $0xf4] sm:$0xf] %vm1674_vm0, %v2162_v0  ;;  %v1145_v8 = vpop.f32.mrb[60].mxu1  ;;  %v1844_v0 = vmul.f32 %v2592_v1, %v2592_v1 }
 0x18d   :  { %v1384_v4 = vadd.f32 %v2532_v17, %v1017_v3  ;;  %v1019_v7 = vpop.f32.mrb[61].mxu0  ;;  %v2956_v13 = vadd.f32 %v2532_v17, %v1145_v8  ;;  %v1147_v15 = vpop.f32.mrb[61].mxu1 }
 0x18e   :  { %v1020_v12 = vpop.f32.mrb[62].mxu0  ;;  %v1148_v26 = vpop.f32.mrb[62].mxu1 }
 0x18f   :  { %v2131_v16 = vpack.c.bf16 %v1384_v4, %v1384_v4  ;;  %v1768_v18 = vadd.f32 %v1767_v60, %v1384_v4  ;;  %v1838_v19 = vmul.f32 %v1384_v4, %v1384_v4  ;;  %v1385_v21 = vadd.f32 %v2532_v17, %v1020_v12  ;;  %v1022_v22 = vpop.f32.mrb[63].mxu0  ;;  %v1150_v32 = vpop.f32.mrb[63].mxu1 }
 0x190   :  { %v2163_v29 = vpack.c.bf16 %v2956_v13, %v2956_v13  ;;  %v2962_v31 = vadd.f32 %v2532_v17, %v1148_v26  ;;  %v1840_v17 = vmul.f32 %v2536_v23, %v2536_v23 }
 0x191   :  { %1705 = vst.msk [vmem:[%s3084_s3 + $0x78] sm:$0xf] %vm1674_vm0, %v2131_v16  ;;  %v1901_v33 = vadd.f32 %v1900_v2, %v1838_v19  ;;  %v2132_v34 = vpack.c.bf16 %v1385_v21, %v1385_v21  ;;  %v1769_v39 = vadd.f32 %v1768_v18, %v1385_v21  ;;  %v1839_v41 = vmul.f32 %v1385_v21, %v1385_v21 }
 0x192   :  { %1737 = vst.msk [vmem:[%s3084_s3 + $0xf8] sm:$0xf] %vm1674_vm0, %v2163_v29  ;;  %v2164_v44 = vpack.c.bf16 %v2962_v31, %v2962_v31 }
 0x193   :  { %1706 = vst.msk [vmem:[%s3084_s3 + $0x7c] sm:$0xf] %vm1674_vm0, %v2132_v34  ;;  %v1770_v45 = vadd.f32 %v1769_v39, %v2536_v23  ;;  %v1902_v46 = vadd.f32 %v1901_v33, %v1839_v41  ;;  %v1843_v23 = vmul.f32 %v2570_v52, %v2570_v52 }
 0x194   :  { %1738 = vst.msk [vmem:[%s3084_s3 + $0xfc] sm:$0xf] %vm1674_vm0, %v2164_v44 }
 0x195   :  { %v1771_v50 = vadd.f32 %v1770_v45, %v2542_v30  ;;  %v1903_v51 = vadd.f32 %v1902_v46, %v1840_v17  ;;  %v1845_v30 = vmul.f32 %v2598_v10, %v2598_v10 }
 0x197   :  { %v1772_v55 = vadd.f32 %v1771_v50, %v2564_v43  ;;  %v1904_v58 = vadd.f32 %v1903_v51, %v1841_v48  ;;  %v1846_v43 = vmul.f32 %v2620_v25, %v2620_v25  ;;  %v1856_v50 = vmul.f32 %v2760_v28, %v2760_v28 }
 0x199   :  { %v1773_v60 = vadd.f32 %v1772_v55, %v2570_v52  ;;  %v1905_v61 = vadd.f32 %v1904_v58, %v1842_v54  ;;  %v1847_v52 = vmul.f32 %v2626_v35, %v2626_v35  ;;  %v1857_v55 = vmul.f32 %v2766_v40, %v2766_v40 }
 0x19b   :  { %v1774_v2 = vadd.f32 %v1773_v60, %v2592_v1  ;;  %v1906_v3 = vadd.f32 %v1905_v61, %v1843_v23  ;;  %v1848_v1 = vmul.f32 %v2648_v49, %v2648_v49  ;;  %v1858_v23 = vmul.f32 %v2788_v57, %v2788_v57 }
 0x19c   :  { %v1859_v61 = vmul.f32 %v2794_v5, %v2794_v5 }
 0x19d   :  { %v1775_v4 = vadd.f32 %v1774_v2, %v2598_v10  ;;  %v1907_v7 = vadd.f32 %v1906_v3, %v1844_v0  ;;  %v1849_v10 = vmul.f32 %v2654_v59, %v2654_v59  ;;  %v1860_v2 = vmul.f32 %v2816_v24, %v2816_v24 }
 0x19f   :  { %v1776_v8 = vadd.f32 %v1775_v4, %v2620_v25  ;;  %v1908_v12 = vadd.f32 %v1907_v7, %v1845_v30  ;;  %v1850_v25 = vmul.f32 %v2676_v9, %v2676_v9  ;;  %v1861_v30 = vmul.f32 %v2822_v38, %v2822_v38 }
 0x1a0   :  { %v1862_v7 = vmul.f32 %v2844_v56, %v2844_v56 }
 0x1a1   :  { %v1777_v15 = vadd.f32 %v1776_v8, %v2626_v35  ;;  %v1909_v16 = vadd.f32 %v1908_v12, %v1846_v43  ;;  %v1851_v35 = vmul.f32 %v2682_v20, %v2682_v20  ;;  %v1863_v8 = vmul.f32 %v2850_v6, %v2850_v6 }
 0x1a3   :  { %v1910_v18 = vadd.f32 %v1909_v16, %v1847_v52  ;;  %v1778_v19 = vadd.f32 %v1777_v15, %v2648_v49  ;;  %v1852_v49 = vmul.f32 %v2704_v37, %v2704_v37  ;;  %v1864_v52 = vmul.f32 %v2872_v27, %v2872_v27 }
 0x1a4   :  { %v1865_v16 = vmul.f32 %v2878_v42, %v2878_v42 }
 0x1a5   :  { %v1779_v21 = vadd.f32 %v1778_v19, %v2654_v59  ;;  %v1911_v22 = vadd.f32 %v1910_v18, %v1848_v1  ;;  %v1853_v59 = vmul.f32 %v2710_v47, %v2710_v47  ;;  %v1866_v18 = vmul.f32 %v2900_v62, %v2900_v62 }
 0x1a7   :  { %v1780_v26 = vadd.f32 %v1779_v21, %v2676_v9  ;;  %v1912_v29 = vadd.f32 %v1911_v22, %v1849_v10  ;;  %v1854_v9 = vmul.f32 %v2732_v63, %v2732_v63  ;;  %v1867_v10 = vmul.f32 %v2906_v14, %v2906_v14 }
 0x1a8   :  { %v1868_v22 = vmul.f32 %v2928_v36, %v2928_v36 }
 0x1a9   :  { %v1781_v32 = vadd.f32 %v1780_v26, %v2682_v20  ;;  %v1913_v33 = vadd.f32 %v1912_v29, %v1850_v25  ;;  %v1855_v20 = vmul.f32 %v2738_v11, %v2738_v11  ;;  %v1869_v26 = vmul.f32 %v2934_v53, %v2934_v53 }
 0x1ab   :  { %v1782_v34 = vadd.f32 %v1781_v32, %v2704_v37  ;;  %v1914_v39 = vadd.f32 %v1913_v33, %v1851_v35  ;;  %v1871_v33 = vmul.f32 %v2962_v31, %v2962_v31 }
 0x1ad   :  { %v1783_v41 = vadd.f32 %v1782_v34, %v2710_v47  ;;  %v1915_v44 = vadd.f32 %v1914_v39, %v1852_v49 }
 0x1af   :  { %v1784_v17 = vadd.f32 %v1783_v41, %v2732_v63  ;;  %v1916_v45 = vadd.f32 %v1915_v44, %v1853_v59 }
 0x1b1   :  { %v1785_v46 = vadd.f32 %v1784_v17, %v2738_v11  ;;  %v1917_v48 = vadd.f32 %v1916_v45, %v1854_v9 }
 0x1b3   :  { %v1786_v37 = vadd.f32 %v1785_v46, %v2760_v28  ;;  %v1918_v51 = vadd.f32 %v1917_v48, %v1855_v20 }
 0x1b5   :  { %v1919_v47 = vadd.f32 %v1918_v51, %v1856_v50  ;;  %v1787_v54 = vadd.f32 %v1786_v37, %v2766_v40 }
 0x1b7   :  { %v1920_v63 = vadd.f32 %v1919_v47, %v1857_v55  ;;  %v1788_v58 = vadd.f32 %v1787_v54, %v2788_v57 }
 0x1b9   :  { %v1921_v11 = vadd.f32 %v1920_v63, %v1858_v23  ;;  %v1789_v60 = vadd.f32 %v1788_v58, %v2794_v5 }
 0x1bb   :  { %v1922_v28 = vadd.f32 %v1921_v11, %v1859_v61  ;;  %v1790_v0 = vadd.f32 %v1789_v60, %v2816_v24 }
 0x1bd   :  { %v1923_v3 = vadd.f32 %v1922_v28, %v1860_v2  ;;  %v1791_v40 = vadd.f32 %v1790_v0, %v2822_v38 }
 0x1bf   :  { %v1924_v4 = vadd.f32 %v1923_v3, %v1861_v30  ;;  %v1792_v57 = vadd.f32 %v1791_v40, %v2844_v56 }
 0x1c1   :  { %v1925_v43 = vadd.f32 %v1924_v4, %v1862_v7  ;;  %v1793_v5 = vadd.f32 %v1792_v57, %v2850_v6 }
 0x1c3   :  { %v1926_v12 = vadd.f32 %v1925_v43, %v1863_v8  ;;  %v1794_v24 = vadd.f32 %v1793_v5, %v2872_v27 }
 0x1c5   :  { %v1927_v15 = vadd.f32 %v1926_v12, %v1864_v52  ;;  %v1795_v38 = vadd.f32 %v1794_v24, %v2878_v42 }
 0x1c7   :  { %v1928_v1 = vadd.f32 %v1927_v15, %v1865_v16  ;;  %v1796_v56 = vadd.f32 %v1795_v38, %v2900_v62  ;;  %v1870_v62 = vmul.f32 %v2956_v13, %v2956_v13 }
 0x1c9   :  { %v1929_v19 = vadd.f32 %v1928_v1, %v1866_v18  ;;  %v1797_v6 = vadd.f32 %v1796_v56, %v2906_v14 }
 0x1cb   :  { %v1930_v21 = vadd.f32 %v1929_v19, %v1867_v10  ;;  %v1798_v27 = vadd.f32 %v1797_v6, %v2928_v36 }
 0x1cd   :  { %v1931_v25 = vadd.f32 %v1930_v21, %v1868_v22  ;;  %v1799_v42 = vadd.f32 %v1798_v27, %v2934_v53 }
 0x1cf   :  { %v1932_v29 = vadd.f32 %v1931_v25, %v1869_v26  ;;  %v1800_v35 = vadd.f32 %v1799_v42, %v2956_v13 }
 0x1d1   :  { %v1933_v32 = vadd.f32 %v1932_v29, %v1870_v62  ;;  %v1801_v14 = vadd.f32 %v1800_v35, %v2962_v31 }
 0x1d3   :  { %v1802_v49 = vrot.slane %v1801_v14, 4  ;;  %v1934_v36 = vadd.f32 %v1933_v32, %v1871_v33 }
 0x1d5   :  { %v1803_v34 = vadd.f32 %v1802_v49, %v1801_v14  ;;  %v1935_v39 = vrot.slane %v1934_v36, 4 }
 0x1d7   :  { %v1804_v59 = vrot.slane %v1803_v34, 2  ;;  %v1936_v41 = vadd.f32 %v1935_v39, %v1934_v36 }
 0x1d9   :  { %v1805_v44 = vadd.f32 %v1804_v59, %v1803_v34  ;;  %v1937_v53 = vrot.slane %v1936_v41, 2 }
 0x1db   :  { %v1806_v9 = vrot.slane %v1805_v44, 1  ;;  %v1938_v17 = vadd.f32 %v1937_v53, %v1936_v41 }
 0x1dd   :  { %v1939_v45 = vrot.slane %v1938_v17, 1  ;;  %v1807_v20 = vadd.f32 %v1806_v9, %v1805_v44 }
 0x1df   :  { %v1940_v13 = vadd.f32 %v1939_v45, %v1938_v17 }
 0x1e1   :  { %v1942_v46 = vsel %vm1941_vm1, %v1807_v20, %v1940_v13 }
 0x1e2   :  { %v1944_v48 = vsel %vm1943_vm2, %v1942_v46, 0.0 }
 0x1e3   :  { %1947 = vst [vmem:[%s3085_s4] sm:$0xff] %v1944_v48 }

// kernel: tile.105
= control target key start
LH: loop header
LB: loop body
LE: loop exit
PB: predicated region body
PF: predicated region fallthrough
CT: control target
= control target key end

     0   :  { %s22_s0 = inlined_call_operand.vmem [shape: f32[16], index: 0, kind: input, shape index: {}]   ;;  %s23_s1 = inlined_call_operand.vmem [shape: f32[8,16], index: 1, kind: output, shape index: {}]  }
   0x1   :  { %v4_v0 = vld [vmem:[%s22_s0] ss:$0 sm:$0xff] }
   0x2   :  { %5 = vst [vmem:[%s23_s1] sm:$0xff] %v4_v0 }

// kernel: tile.106
= control target key start
LH: loop header
LB: loop body
LE: loop exit
PB: predicated region body
PF: predicated region fallthrough
CT: control target
= control target key end

     0   :  { %s67_s10 = smov 112   ;;  %s68_s11 = smov 80   ;;  %vm3_vm0 = vcmask 130048   ;;  %vm9_vm1 = vcmask 1048448   ;;  %vm15_vm2 = vcmask 917248   ;;  %vm21_vm3 = vcmask 786048   ;;  %s111_s0 = inlined_call_operand.vmem [shape: f32[8,16], index: 0, kind: input, shape index: {}]   ;;  %s112_s1 = inlined_call_operand.vmem [shape: f32[1,128], index: 1, kind: output, shape index: {}]  }
   0x1   :  { %v53_v0 = vld [vmem:[%s111_s0 + $0x7] sm:$0x1]   ;;  %v55_v1 = vld [vmem:[%s111_s0 + $0x5] sm:$0x1]   ;;  %v54_v2 = vld [vmem:[%s111_s0 + $0x6] sm:$0x1]  }
   0x2   :  { %7 = vrot.lane.b32.xlu0 %v53_v0, %s67_s10  ;;  %19 = vrot.lane.b32.xlu1 %v55_v1, %s68_s11  ;;  %v56_v3 = vld [vmem:[%s111_s0 + $0x4] sm:$0x1]   ;;  %v2_v4 = vld [vmem:[%s111_s0] sm:$0x1]   ;;  %s69_s18 = smov 96   ;;  %s70_s19 = smov 64  }
   0x3   :  { %4 = vst.msk [vmem:[#allocation0] sm:$0x1] %vm3_vm0, %v2_v4   ;;  %v57_v5 = vld [vmem:[%s111_s0 + $0x3] sm:$0x1]   ;;  %v58_v6 = vld [vmem:[%s111_s0 + $0x2] sm:$0x1]  }
   0x4   :  { %s71_s24 = smov 48   ;;  %s72_s25 = smov 32   ;;  %v59_v7 = vld [vmem:[%s111_s0 + $0x1] sm:$0x1]   ;;  %vm27_vm4 = vcmask 654848   ;;  %vm33_vm5 = vcmask 523648  }
   0x5   :  { %s73_s0 = smov 16   ;;  %vm39_vm6 = vcmask 392448   ;;  %vm45_vm7 = vcmask 261248  }
   0x6   :  { %13 = vrot.lane.b32.xlu0 %v54_v2, %s69_s18  ;;  %25 = vrot.lane.b32.xlu1 %v56_v3, %s70_s19 }
   0xa   :  { %31 = vrot.lane.b32.xlu0 %v57_v5, %s71_s24  ;;  %37 = vrot.lane.b32.xlu1 %v58_v6, %s72_s25 }
   0xe   :  { %43 = vrot.lane.b32.xlu0 %v59_v7, %s73_s0 }
  0x74   :  { %v8_v8 = vpop.permute.xlu0 %7   ;;  %v20_v9 = vpop.permute.xlu1 %19  }
  0x75   :  { %10 = vst.msk [vmem:[#allocation0] sm:$0x1] %vm9_vm1, %v8_v8  }
  0x78   :  { %v14_v10 = vpop.permute.xlu0 %13   ;;  %v26_v11 = vpop.permute.xlu1 %25  }
  0x79   :  { %16 = vst.msk [vmem:[#allocation0] sm:$0x1] %vm15_vm2, %v14_v10  }
  0x7a   :  { %22 = vst.msk [vmem:[#allocation0] sm:$0x1] %vm21_vm3, %v20_v9  }
  0x7b   :  { %28 = vst.msk [vmem:[#allocation0] sm:$0x1] %vm27_vm4, %v26_v11  }
  0x7c   :  { %v32_v12 = vpop.permute.xlu0 %31   ;;  %v38_v13 = vpop.permute.xlu1 %37  }
  0x7d   :  { %34 = vst.msk [vmem:[#allocation0] sm:$0x1] %vm33_vm5, %v32_v12  }
  0x7e   :  { %40 = vst.msk [vmem:[#allocation0] sm:$0x1] %vm39_vm6, %v38_v13  }
  0x80   :  { %v44_v14 = vpop.permute.xlu0 %43  }
  0x81   :  { %46 = vst.msk [vmem:[#allocation0] sm:$0x1] %vm45_vm7, %v44_v14  }
  0x88   :  { %v50_v15 = vld [vmem:[#allocation0] sm:$0x1] }
  0x89   :  { %52 = vst [vmem:[%s112_s1] sm:$0x1] %v50_v15 }

// kernel: _lambda_.20
= control target key start
LH: loop header
LB: loop body
LE: loop exit
PB: predicated region body
PF: predicated region fallthrough
CT: control target
= control target key end

     0   :  { %s1104_s1 = inlined_call_operand.vmem [shape: bf16[512,128], index: 1, kind: input, shape index: {}]   ;;  %s1105_s0 = inlined_call_operand.vmem [shape: bf16[64,512], index: 0, kind: input, shape index: {}]   ;;  %s1106_s2 = inlined_call_operand.vmem [shape: f32[1,128], index: 2, kind: input, shape index: {}]   ;;  %s1107_s3 = inlined_call_operand.vmem [shape: bf16[64,16], index: 3, kind: output, shape index: {0}]   ;;  %s1108_s4 = inlined_call_operand.vmem [shape: f32[1,8,128], index: 4, kind: output, shape index: {1}]  }
   0x1   :  { %v855_v0 = vld [vmem:[%s1104_s1 + $0x40] sm:$0xff]   ;;  %v859_v4 = vld [vmem:[%s1104_s1 + $0x48] sm:$0xff]   ;;  %v863_v8 = vld [vmem:[%s1104_s1 + $0x50] sm:$0xff]  }
   0x2   :  { %v856_v1 = vld [vmem:[%s1104_s1 + $0xc0] sm:$0xff]   ;;  %774 = vmatprep.subr.bf16.mxu0 %v855_v0  ;;  %v860_v5 = vld [vmem:[%s1104_s1 + $0xc8] sm:$0xff]   ;;  %v864_v9 = vld [vmem:[%s1104_s1 + $0xd0] sm:$0xff]  }
   0x3   :  { %v857_v2 = vld [vmem:[%s1104_s1] sm:$0xff]   ;;  %814 = vmatprep.subr.bf16.mxu1 %v856_v1  ;;  %v861_v6 = vld [vmem:[%s1104_s1 + $0x8] sm:$0xff]   ;;  %v865_v10 = vld [vmem:[%s1104_s1 + $0x10] sm:$0xff]  }
   0x4   :  { %v858_v3 = vld [vmem:[%s1104_s1 + $0x80] sm:$0xff]   ;;  %775 = vmatpush3.bf16.msra.mxu0 %v857_v2  ;;  %v862_v7 = vld [vmem:[%s1104_s1 + $0x88] sm:$0xff]   ;;  %v866_v11 = vld [vmem:[%s1104_s1 + $0x90] sm:$0xff]  }
   0x5   :  { %815 = vmatpush3.bf16.msra.mxu1 %v858_v3  ;;  %776 = vmatprep.subr.bf16.mxu0 %v859_v4  ;;  %v867_v12 = vld [vmem:[%s1104_s1 + $0x58] sm:$0xff]   ;;  %v871_v16 = vld [vmem:[%s1104_s1 + $0x60] sm:$0xff]   ;;  %v875_v20 = vld [vmem:[%s1104_s1 + $0x68] sm:$0xff]  }
   0x6   :  { %816 = vmatprep.subr.bf16.mxu1 %v860_v5  ;;  %v868_v13 = vld [vmem:[%s1104_s1 + $0xd8] sm:$0xff]   ;;  %v872_v17 = vld [vmem:[%s1104_s1 + $0xe0] sm:$0xff]   ;;  %v876_v21 = vld [vmem:[%s1104_s1 + $0xe8] sm:$0xff]  }
   0x7   :  { %v869_v14 = vld [vmem:[%s1104_s1 + $0x18] sm:$0xff]   ;;  %v873_v18 = vld [vmem:[%s1104_s1 + $0x20] sm:$0xff]   ;;  %v877_v22 = vld [vmem:[%s1104_s1 + $0x28] sm:$0xff]  }
   0x8   :  { %777 = vmatpush3.bf16.msra.mxu0 %v861_v6  ;;  %v870_v15 = vld [vmem:[%s1104_s1 + $0x98] sm:$0xff]   ;;  %v874_v19 = vld [vmem:[%s1104_s1 + $0xa0] sm:$0xff]   ;;  %v878_v23 = vld [vmem:[%s1104_s1 + $0xa8] sm:$0xff]  }
   0x9   :  { %817 = vmatpush3.bf16.msra.mxu1 %v862_v7  ;;  %778 = vmatprep.subr.bf16.mxu0 %v863_v8  ;;  %v879_v24 = vld [vmem:[%s1104_s1 + $0x70] sm:$0xff]   ;;  %v883_v28 = vld [vmem:[%s1104_s1 + $0x78] sm:$0xff]   ;;  %v39_v32 = vld [vmem:[%s1105_s0] sm:$0xff] }
   0xa   :  { %818 = vmatprep.subr.bf16.mxu1 %v864_v9  ;;  %v880_v25 = vld [vmem:[%s1104_s1 + $0xf0] sm:$0xff]   ;;  %v884_v29 = vld [vmem:[%s1104_s1 + $0xf8] sm:$0xff]   ;;  %v40_v34 = vld [vmem:[%s1105_s0 + $0x8] sm:$0xff]  ;;  %vm55_vm0 = vcmp.ge.bf16.partialorder %v39_v32, 0  ;;  %v71_v35 = vmul.bf16 1045249613, %v39_v32 }
   0xb   :  { %v881_v26 = vld [vmem:[%s1104_s1 + $0x30] sm:$0xff]   ;;  %v885_v30 = vld [vmem:[%s1104_s1 + $0x38] sm:$0xff]   ;;  %vm56_vm2 = vcmp.ge.bf16.partialorder %v40_v34, 0  ;;  %v72_v38 = vmul.bf16 1045249613, %v40_v34  ;;  %v43_v39 = vld [vmem:[%s1105_s0 + $0x20] sm:$0xff] }
   0xc   :  { %779 = vmatpush3.bf16.msra.mxu0 %v865_v10  ;;  %v882_v27 = vld [vmem:[%s1104_s1 + $0xb0] sm:$0xff]   ;;  %v886_v31 = vld [vmem:[%s1104_s1 + $0xb8] sm:$0xff]   ;;  %v87_v41 = vsel %vm55_vm0, %v39_v32, %v71_v35  ;;  %v44_v44 = vld [vmem:[%s1105_s0 + $0x28] sm:$0xff]  ;;  %vm59_vm4 = vcmp.ge.bf16.partialorder %v43_v39, 0  ;;  %v75_v51 = vmul.bf16 1045249613, %v43_v39 }
   0xd   :  { %819 = vmatpush3.bf16.msra.mxu1 %v866_v11  ;;  %780 = vmatprep.subr.bf16.mxu0 %v867_v12  ;;  %v41_v33 = vld [vmem:[%s1105_s0 + $0x10] sm:$0xff]  ;;  %v42_v37 = vld [vmem:[%s1105_s0 + $0x18] sm:$0xff]  ;;  %v88_v48 = vsel %vm56_vm2, %v40_v34, %v72_v38  ;;  %v47_v49 = vld [vmem:[%s1105_s0 + $0x40] sm:$0xff]  ;;  %vm60_vm6 = vcmp.ge.bf16.partialorder %v44_v44, 0  ;;  %v76_v58 = vmul.bf16 1045249613, %v44_v44 }
   0xe   :  { %820 = vmatprep.subr.bf16.mxu1 %v868_v13  ;;  %vm57_vm1 = vcmp.ge.bf16.partialorder %v41_v33, 0  ;;  %v73_v36 = vmul.bf16 1045249613, %v41_v33  ;;  %v45_v40 = vld [vmem:[%s1105_s0 + $0x30] sm:$0xff]  ;;  %vm58_vm3 = vcmp.ge.bf16.partialorder %v42_v37, 0  ;;  %v46_v45 = vld [vmem:[%s1105_s0 + $0x38] sm:$0xff]  ;;  %v91_v56 = vsel %vm59_vm4, %v43_v39, %v75_v51 }
   0xf   :  { %v74_v43 = vmul.bf16 1045249613, %v42_v37  ;;  %vm61_vm5 = vcmp.ge.bf16.partialorder %v45_v40, 0  ;;  %v77_v52 = vmul.bf16 1045249613, %v45_v40  ;;  %v49_v53 = vld [vmem:[%s1105_s0 + $0x50] sm:$0xff]  ;;  %v92_v63 = vsel %vm60_vm6, %v44_v44, %v76_v58 }
  0x10   :  { %781 = vmatpush3.bf16.msra.mxu0 %v869_v14  ;;  %v89_v42 = vsel %vm57_vm1, %v41_v33, %v73_v36  ;;  %vm62_vm7 = vcmp.ge.bf16.partialorder %v46_v45, 0  ;;  %v78_v59 = vmul.bf16 1045249613, %v46_v45  ;;  %v48_v60 = vld [vmem:[%s1105_s0 + $0x48] sm:$0xff]  ;;  %v50_v61 = vld [vmem:[%s1105_s0 + $0x58] sm:$0xff]  ;;  %vm63_vm8 = vcmp.ge.bf16.partialorder %v47_v49, 0 }
  0x11   :  { %821 = vmatpush3.bf16.msra.mxu1 %v870_v15  ;;  %782 = vmatprep.subr.bf16.mxu0 %v871_v16  ;;  %v709_v46 = vcombine.low %v87_v41, %v89_v42  ;;  %v710_v47 = vcombine.high %v87_v41, %v89_v42  ;;  %v90_v50 = vsel %vm58_vm3, %v42_v37, %v74_v43  ;;  %vm65_vm9 = vcmp.ge.bf16.partialorder %v49_v53, 0  ;;  %v51_v5 = vld [vmem:[%s1105_s0 + $0x60] sm:$0xff]  ;;  %v53_v6 = vld [vmem:[%s1105_s0 + $0x70] sm:$0xff]  ;;  %v52_v13 = vld [vmem:[%s1105_s0 + $0x68] sm:$0xff] }
  0x12   :  { %822 = vmatprep.subr.bf16.mxu1 %v872_v17  ;;  %v711_v54 = vcombine.low %v88_v48, %v90_v50  ;;  %v712_v55 = vcombine.high %v88_v48, %v90_v50  ;;  %v93_v57 = vsel %vm61_vm5, %v45_v40, %v77_v52  ;;  %v94_v0 = vsel %vm62_vm7, %v46_v45, %v78_v59  ;;  %v54_v14 = vld [vmem:[%s1105_s0 + $0x78] sm:$0xff]  ;;  %v1059_v42 = vld [vmem:[%s1106_s2] ss:$0 sm:$0xff] }
  0x13   :  { %479 = vmatprep.mubr.bf16.mxu0 %v710_v47  ;;  %v714_v62 = vcombine.high %v91_v56, %v93_v57  ;;  %v79_v1 = vmul.bf16 1045249613, %v47_v49  ;;  %v81_v2 = vmul.bf16 1045249613, %v49_v53  ;;  %v716_v3 = vcombine.high %v92_v63, %v94_v0 }
  0x14   :  { %783 = vmatpush3.bf16.msra.mxu0 %v873_v18  ;;  %544 = vmatprep.mubr.bf16.mxu1 %v712_v55  ;;  %v713_v4 = vcombine.low %v91_v56, %v93_v57  ;;  %vm64_vm10 = vcmp.ge.bf16.partialorder %v48_v60, 0  ;;  %vm66_vm11 = vcmp.ge.bf16.partialorder %v50_v61, 0  ;;  %v80_v9 = vmul.bf16 1045249613, %v48_v60 }
  0x15   :  { %823 = vmatpush3.bf16.msra.mxu1 %v874_v19  ;;  %784 = vmatprep.subr.bf16.mxu0 %v875_v20  ;;  %v95_v7 = vsel %vm63_vm8, %v47_v49, %v79_v1  ;;  %v97_v8 = vsel %vm65_vm9, %v49_v53, %v81_v2  ;;  %v82_v10 = vmul.bf16 1045249613, %v50_v61  ;;  %v715_v11 = vcombine.low %v92_v63, %v94_v0 }
  0x16   :  { %824 = vmatprep.subr.bf16.mxu1 %v876_v21  ;;  %v718_v12 = vcombine.high %v95_v7, %v97_v8  ;;  %v96_v15 = vsel %vm64_vm10, %v48_v60, %v80_v9  ;;  %v83_v17 = vmul.bf16 1045249613, %v51_v5  ;;  %v85_v18 = vmul.bf16 1045249613, %v53_v6 }
  0x17   :  { %v98_v16 = vsel %vm66_vm11, %v50_v61, %v82_v10  ;;  %vm67_vm12 = vcmp.ge.bf16.partialorder %v51_v5, 0  ;;  %vm69_vm13 = vcmp.ge.bf16.partialorder %v53_v6, 0  ;;  %v84_v20 = vmul.bf16 1045249613, %v52_v13 }
  0x18   :  { %785 = vmatpush3.bf16.msra.mxu0 %v877_v22  ;;  %v720_v19 = vcombine.high %v96_v15, %v98_v16  ;;  %v86_v21 = vmul.bf16 1045249613, %v54_v14  ;;  %vm68_vm14 = vcmp.ge.bf16.partialorder %v52_v13, 0  ;;  %vm70_vm15 = vcmp.ge.bf16.partialorder %v54_v14, 0 }
  0x19   :  { %825 = vmatpush3.bf16.msra.mxu1 %v878_v23  ;;  %786 = vmatprep.subr.bf16.mxu0 %v879_v24  ;;  %v99_v22 = vsel %vm67_vm12, %v51_v5, %v83_v17  ;;  %v101_v23 = vsel %vm69_vm13, %v53_v6, %v85_v18  ;;  %v717_v24 = vcombine.low %v95_v7, %v97_v8  ;;  %vm651_vm0 = vcmask 125952  }
  0x1a   :  { %826 = vmatprep.subr.bf16.mxu1 %v880_v25  ;;  %v100_v25 = vsel %vm68_vm14, %v52_v13, %v84_v20  ;;  %vm694_vm1 = vcmask 1040384   ;;  %vm696_vm2 = vcmask 1041408  }
  0x1c   :  { %787 = vmatpush3.bf16.msra.mxu0 %v881_v26  ;;  %v102_v26 = vsel %vm70_vm15, %v54_v14, %v86_v21 }
  0x1d   :  { %827 = vmatpush3.bf16.msra.mxu1 %v882_v27  ;;  %788 = vmatprep.subr.bf16.mxu0 %v883_v28  ;;  %v722_v27 = vcombine.high %v99_v22, %v101_v23  ;;  %v719_v28 = vcombine.low %v96_v15, %v98_v16 }
  0x1e   :  { %828 = vmatprep.subr.bf16.mxu1 %v884_v29  ;;  %v724_v29 = vcombine.high %v100_v25, %v102_v26 }
  0x20   :  { %789 = vmatpush3.bf16.msra.mxu0 %v885_v30  ;;  %v721_v30 = vcombine.low %v99_v22, %v101_v23 }
  0x21   :  { %829 = vmatpush3.bf16.msra.mxu1 %v886_v31  ;;  %v723_v31 = vcombine.low %v100_v25, %v102_v26 }
  0x23   :  { %480 = vmatmul.mubr.bf16.vlgmr.msra.gmra.mrb[0].mxu0 %v709_v46 }
  0x24   :  { %545 = vmatmul.mubr.bf16.vlgmr.msra.gmra.mrb[0].mxu1 %v711_v54  ;;  %487 = vmatprep.mubr.bf16.mxu0 %v714_v62 }
  0x25   :  { %552 = vmatprep.mubr.bf16.mxu1 %v716_v3 }
  0x2b   :  { %488 = vmatmul.mubr.bf16.gmra.mrb[4].mxu0 %v713_v4 }
  0x2c   :  { %495 = vmatprep.mubr.bf16.mxu0 %v718_v12  ;;  %553 = vmatmul.mubr.bf16.gmra.mrb[4].mxu1 %v715_v11 }
  0x2d   :  { %560 = vmatprep.mubr.bf16.mxu1 %v720_v19 }
  0x33   :  { %496 = vmatmul.mubr.bf16.gmra.mrb[8].mxu0 %v717_v24 }
  0x34   :  { %503 = vmatprep.mubr.bf16.mxu0 %v722_v27  ;;  %561 = vmatmul.mubr.bf16.gmra.mrb[8].mxu1 %v719_v28 }
  0x35   :  { %568 = vmatprep.mubr.bf16.mxu1 %v724_v29 }
  0x3b   :  { %504 = vmatmul.mubr.bf16.gmra.mrb[12].mxu0 %v721_v30 }
  0x3c   :  { %569 = vmatmul.mubr.bf16.gmra.mrb[12].mxu1 %v723_v31 }
  0xf6   :  { %v790_v32 = vpop.f32.mrb[0].mxu0 }
  0xf7   :  { %v791_v33 = vpop.f32.mrb[1].mxu0  ;;  %v830_v34 = vpop.f32.mrb[0].mxu1 }
  0xf8   :  { %v792_v35 = vadd.f32 %v791_v33, %v790_v32  ;;  %v793_v36 = vpop.f32.mrb[2].mxu0  ;;  %v831_v37 = vpop.f32.mrb[1].mxu1 }
  0xf9   :  { %v794_v38 = vpop.f32.mrb[3].mxu0  ;;  %v832_v39 = vadd.f32 %v831_v37, %v830_v34  ;;  %v833_v40 = vpop.f32.mrb[2].mxu1 }
  0xfa   :  { %v795_v41 = vadd.f32 %v794_v38, %v793_v36  ;;  %v834_v43 = vpop.f32.mrb[3].mxu1 }
  0xfb   :  { %v547_v44 = vadd.f32 %v832_v39, %v792_v35  ;;  %v835_v45 = vadd.f32 %v834_v43, %v833_v40 }
  0xfd   :  { %v611_v46 = vadd.f32 %v1059_v42, %v547_v44  ;;  %v550_v47 = vadd.f32 %v835_v45, %v795_v41 }
  0xfe   :  { %v796_v48 = vpop.f32.mrb[4].mxu0 }
  0xff   :  { %v797_v49 = vpop.f32.mrb[5].mxu0  ;;  %v766_v50 = vpack.c.bf16 %v611_v46, %v611_v46  ;;  %v612_v51 = vadd.f32 %v1059_v42, %v550_v47  ;;  %v836_v52 = vpop.f32.mrb[4].mxu1  ;;  %v673_v55 = vmul.f32 %v611_v46, %v611_v46 }
 0x100   :  { %v798_v53 = vadd.f32 %v797_v49, %v796_v48  ;;  %v799_v54 = vpop.f32.mrb[6].mxu0  ;;  %v837_v56 = vpop.f32.mrb[5].mxu1 }
 0x101   :  { %v800_v57 = vpop.f32.mrb[7].mxu0  ;;  %652 = vst.msk [vmem:[%s1107_s3] sm:$0xf] %vm651_vm0, %v766_v50  ;;  %v767_v58 = vpack.c.bf16 %v612_v51, %v612_v51  ;;  %v660_v59 = vadd.f32 %v612_v51, %v611_v46  ;;  %v674_v60 = vmul.f32 %v612_v51, %v612_v51  ;;  %v838_v61 = vadd.f32 %v837_v56, %v836_v52  ;;  %v839_v62 = vpop.f32.mrb[6].mxu1 }
 0x102   :  { %v801_v63 = vadd.f32 %v800_v57, %v799_v54  ;;  %v840_v0 = vpop.f32.mrb[7].mxu1 }
 0x103   :  { %653 = vst.msk [vmem:[%s1107_s3 + $0x4] sm:$0xf] %vm651_vm0, %v767_v58  ;;  %v681_v1 = vadd.f32 %v674_v60, %v673_v55  ;;  %v555_v2 = vadd.f32 %v838_v61, %v798_v53  ;;  %v841_v3 = vadd.f32 %v840_v0, %v839_v62 }
 0x105   :  { %v613_v4 = vadd.f32 %v1059_v42, %v555_v2  ;;  %v558_v5 = vadd.f32 %v841_v3, %v801_v63 }
 0x106   :  { %v802_v6 = vpop.f32.mrb[8].mxu0 }
 0x107   :  { %v803_v7 = vpop.f32.mrb[9].mxu0  ;;  %v768_v8 = vpack.c.bf16 %v613_v4, %v613_v4  ;;  %v661_v9 = vadd.f32 %v660_v59, %v613_v4  ;;  %v675_v10 = vmul.f32 %v613_v4, %v613_v4  ;;  %v614_v11 = vadd.f32 %v1059_v42, %v558_v5  ;;  %v842_v12 = vpop.f32.mrb[8].mxu1 }
 0x108   :  { %v805_v13 = vpop.f32.mrb[10].mxu0  ;;  %v804_v14 = vadd.f32 %v803_v7, %v802_v6  ;;  %v843_v15 = vpop.f32.mrb[9].mxu1 }
 0x109   :  { %v806_v16 = vpop.f32.mrb[11].mxu0  ;;  %654 = vst.msk [vmem:[%s1107_s3 + $0x8] sm:$0xf] %vm651_vm0, %v768_v8  ;;  %v682_v17 = vadd.f32 %v681_v1, %v675_v10  ;;  %v769_v18 = vpack.c.bf16 %v614_v11, %v614_v11  ;;  %v662_v19 = vadd.f32 %v661_v9, %v614_v11  ;;  %v676_v20 = vmul.f32 %v614_v11, %v614_v11  ;;  %v845_v21 = vpop.f32.mrb[10].mxu1 }
 0x10a   :  { %v844_v22 = vadd.f32 %v843_v15, %v842_v12  ;;  %v807_v23 = vadd.f32 %v806_v16, %v805_v13  ;;  %v846_v24 = vpop.f32.mrb[11].mxu1 }
 0x10b   :  { %655 = vst.msk [vmem:[%s1107_s3 + $0xc] sm:$0xf] %vm651_vm0, %v769_v18  ;;  %v683_v25 = vadd.f32 %v682_v17, %v676_v20  ;;  %v847_v26 = vadd.f32 %v846_v24, %v845_v21 }
 0x10c   :  { %v563_v27 = vadd.f32 %v844_v22, %v804_v14 }
 0x10d   :  { %v566_v28 = vadd.f32 %v847_v26, %v807_v23 }
 0x10e   :  { %v808_v29 = vpop.f32.mrb[12].mxu0  ;;  %v615_v30 = vadd.f32 %v1059_v42, %v563_v27 }
 0x10f   :  { %v809_v31 = vpop.f32.mrb[13].mxu0  ;;  %v616_v32 = vadd.f32 %v1059_v42, %v566_v28  ;;  %v848_v33 = vpop.f32.mrb[12].mxu1 }
 0x110   :  { %v810_v34 = vadd.f32 %v809_v31, %v808_v29  ;;  %v811_v35 = vpop.f32.mrb[14].mxu0  ;;  %v770_v36 = vpack.c.bf16 %v615_v30, %v615_v30  ;;  %v663_v37 = vadd.f32 %v662_v19, %v615_v30  ;;  %v677_v38 = vmul.f32 %v615_v30, %v615_v30  ;;  %v849_v39 = vpop.f32.mrb[13].mxu1 }
 0x111   :  { %v812_v40 = vpop.f32.mrb[15].mxu0  ;;  %v771_v41 = vpack.c.bf16 %v616_v32, %v616_v32  ;;  %v678_v43 = vmul.f32 %v616_v32, %v616_v32  ;;  %v850_v44 = vadd.f32 %v849_v39, %v848_v33  ;;  %v851_v45 = vpop.f32.mrb[14].mxu1 }
 0x112   :  { %v813_v46 = vadd.f32 %v812_v40, %v811_v35  ;;  %656 = vst.msk [vmem:[%s1107_s3 + $0x10] sm:$0xf] %vm651_vm0, %v770_v36  ;;  %v684_v47 = vadd.f32 %v683_v25, %v677_v38  ;;  %v664_v48 = vadd.f32 %v663_v37, %v616_v32  ;;  %v852_v49 = vpop.f32.mrb[15].mxu1 }
 0x113   :  { %657 = vst.msk [vmem:[%s1107_s3 + $0x14] sm:$0xf] %vm651_vm0, %v771_v41  ;;  %v571_v50 = vadd.f32 %v850_v44, %v810_v34  ;;  %v853_v51 = vadd.f32 %v852_v49, %v851_v45 }
 0x114   :  { %v685_v52 = vadd.f32 %v684_v47, %v678_v43 }
 0x115   :  { %v617_v53 = vadd.f32 %v1059_v42, %v571_v50  ;;  %v574_v54 = vadd.f32 %v853_v51, %v813_v46 }
 0x117   :  { %v772_v55 = vpack.c.bf16 %v617_v53, %v617_v53  ;;  %v665_v56 = vadd.f32 %v664_v48, %v617_v53  ;;  %v679_v57 = vmul.f32 %v617_v53, %v617_v53  ;;  %v618_v58 = vadd.f32 %v1059_v42, %v574_v54 }
 0x119   :  { %658 = vst.msk [vmem:[%s1107_s3 + $0x18] sm:$0xf] %vm651_vm0, %v772_v55  ;;  %v686_v59 = vadd.f32 %v685_v52, %v679_v57  ;;  %v773_v60 = vpack.c.bf16 %v618_v58, %v618_v58  ;;  %v666_v61 = vadd.f32 %v665_v56, %v618_v58  ;;  %v680_v62 = vmul.f32 %v618_v58, %v618_v58 }
 0x11b   :  { %659 = vst.msk [vmem:[%s1107_s3 + $0x1c] sm:$0xf] %vm651_vm0, %v773_v60  ;;  %v667_v63 = vrot.slane %v666_v61, 4  ;;  %v687_v0 = vadd.f32 %v686_v59, %v680_v62 }
 0x11d   :  { %v668_v1 = vadd.f32 %v667_v63, %v666_v61  ;;  %v688_v2 = vrot.slane %v687_v0, 4 }
 0x11f   :  { %v669_v3 = vrot.slane %v668_v1, 2  ;;  %v689_v42 = vadd.f32 %v688_v2, %v687_v0 }
 0x121   :  { %v670_v4 = vadd.f32 %v669_v3, %v668_v1  ;;  %v690_v5 = vrot.slane %v689_v42, 2 }
 0x123   :  { %v671_v6 = vrot.slane %v670_v4, 1  ;;  %v691_v7 = vadd.f32 %v690_v5, %v689_v42 }
 0x125   :  { %v692_v8 = vrot.slane %v691_v7, 1  ;;  %v672_v9 = vadd.f32 %v671_v6, %v670_v4 }
 0x127   :  { %v693_v10 = vadd.f32 %v692_v8, %v691_v7 }
 0x129   :  { %v695_v11 = vsel %vm694_vm1, %v672_v9, %v693_v10 }
 0x12a   :  { %v697_v12 = vsel %vm696_vm2, %v695_v11, 0.0 }
 0x12b   :  { %700 = vst [vmem:[%s1108_s4] sm:$0xff] %v697_v12 }

// kernel: _lambda_.21
= control target key start
LH: loop header
LB: loop body
LE: loop exit
PB: predicated region body
PF: predicated region fallthrough
CT: control target
= control target key end

     0   :  { %s72_s0 = inlined_call_operand.vmem [shape: bf16[8,128], index: 0, kind: input, shape index: {}]   ;;  %s73_s1 = inlined_call_operand.vmem [shape: f32[1,128], index: 1, kind: input, shape index: {}]   ;;  %s74_s2 = inlined_call_operand.vmem [shape: f32[1,128], index: 2, kind: input, shape index: {}]   ;;  %s75_s3 = inlined_call_operand.vmem [shape: bf16[8,128], index: 3, kind: output, shape index: {}]  }
   0x1   :  { %v14_v0 = vld [vmem:[%s72_s0] sm:$0xf] }
   0x2   :  { %v38_v1 = vld [vmem:[%s73_s1] ss:$0 sm:$0xff]  ;;  %v15_v2 = vunpack.c.l.bf16 %v14_v0 }
   0x3   :  { %v39_v3 = vld [vmem:[%s74_s2] ss:$0 sm:$0xff] }
   0x4   :  { %v23_v4 = vmul.f32 %v38_v1, %v15_v2 }
   0x6   :  { %v31_v5 = vadd.f32 %v39_v3, %v23_v4 }
   0x8   :  { %v32_v6 = vpack.c.bf16 %v31_v5, %v31_v5 }
   0xa   :  { %33 = vst [vmem:[%s75_s3] sm:$0xf] %v32_v6 }

// kernel: tile.115
= control target key start
LH: loop header
LB: loop body
LE: loop exit
PB: predicated region body
PF: predicated region fallthrough
CT: control target
= control target key end

     0   :  { %s22_s0 = inlined_call_operand.vmem [shape: f32[32], index: 0, kind: input, shape index: {}]   ;;  %s23_s1 = inlined_call_operand.vmem [shape: f32[4,32], index: 1, kind: output, shape index: {}]  }
   0x1   :  { %v4_v0 = vld [vmem:[%s22_s0] ss:$0 sm:$0xff] }
   0x2   :  { %5 = vst [vmem:[%s23_s1] sm:$0xf] %v4_v0 }

// kernel: tile.116
= control target key start
LH: loop header
LB: loop body
LE: loop exit
PB: predicated region body
PF: predicated region fallthrough
CT: control target
= control target key end

     0   :  { %vm7_vm0 = vcmask 261120   ;;  %s37_s8 = smov 32   ;;  %s38_s9 = smov 64   ;;  %vm13_vm1 = vcmask 1048320   ;;  %vm19_vm2 = vcmask 785920   ;;  %vm25_vm3 = vcmask 523520   ;;  %s55_s0 = inlined_call_operand.vmem [shape: f32[4,32], index: 0, kind: input, shape index: {}]   ;;  %s56_s1 = inlined_call_operand.vmem [shape: f32[1,128], index: 1, kind: output, shape index: {}]  }
   0x1   :  { %v4_v0 = vld [vmem:[%s55_s0] sm:$0xf]  ;;  %s36_s0 = smov 96  }
   0x2   :  { %5 = vst [vmem:[#allocation1] sm:$0xf] %v4_v0 }
   0x9   :  { %v10_v1 = vld [vmem:[#allocation1 + $0x3] sm:$0x1]   ;;  %v22_v2 = vld [vmem:[#allocation1 + $0x1] sm:$0x1]   ;;  %v6_v3 = vld [vmem:[#allocation1] sm:$0x1]  }
   0xa   :  { %11 = vrot.lane.b32.xlu0 %v10_v1, %s36_s0  ;;  %23 = vrot.lane.b32.xlu1 %v22_v2, %s37_s8  ;;  %v16_v4 = vld [vmem:[#allocation1 + $0x2] sm:$0x1]   ;;  %8 = vst.msk [vmem:[#allocation0] sm:$0x1] %vm7_vm0, %v6_v3  }
   0xe   :  { %17 = vrot.lane.b32.xlu0 %v16_v4, %s38_s9 }
  0x7c   :  { %v12_v5 = vpop.permute.xlu0 %11   ;;  %v24_v6 = vpop.permute.xlu1 %23  }
  0x7d   :  { %14 = vst.msk [vmem:[#allocation0] sm:$0x1] %vm13_vm1, %v12_v5  }
  0x80   :  { %v18_v7 = vpop.permute.xlu0 %17  }
  0x81   :  { %20 = vst.msk [vmem:[#allocation0] sm:$0x1] %vm19_vm2, %v18_v7  }
  0x82   :  { %26 = vst.msk [vmem:[#allocation0] sm:$0x1] %vm25_vm3, %v24_v6  }
  0x89   :  { %v30_v8 = vld [vmem:[#allocation0] sm:$0x1] }
  0x8a   :  { %32 = vst [vmem:[%s56_s1] sm:$0x1] %v30_v8 }

// kernel: squeeze.20
= control target key start
LH: loop header
LB: loop body
LE: loop exit
PB: predicated region body
PF: predicated region fallthrough
CT: control target
= control target key end

     0   :  { %s34_s8 = smov 32   ;;  %vm7_vm0 = vcmask 261120   ;;  %s35_s11 = smov 64   ;;  %s61_s0 = inlined_call_operand.vmem [shape: f32[256], index: 0, kind: input, shape index: {}]   ;;  %s62_s1 = inlined_call_operand.vmem [shape: f32[8,32], index: 1, kind: output, shape index: {}]  }
   0x1   :  { %v4_v0 = vld [vmem:[%s61_s0] sm:$0x3]  ;;  %s33_s0 = smov 96  }
   0x2   :  { %5 = vst [vmem:[#allocation0] sm:$0x3] %v4_v0 }
   0x9   :  { %v9_v1 = vld [vmem:[#allocation0] sm:$0x3]  }
   0xa   :  { %v21_v2 = vld [vmem:[#allocation0] sm:$0x3]   ;;  %10 = vrot.lane.b32.xlu0 %v9_v1, %s33_s0 }
   0xb   :  { %22 = vrot.lane.b32.xlu1 %v21_v2, %s34_s8  ;;  %v6_v3 = vld [vmem:[#allocation0] sm:$0x3]  }
   0xc   :  { %v15_v4 = vld [vmem:[#allocation0] sm:$0x3]   ;;  %8 = vst.msk [vmem:[%s62_s1] ss:$4 sm:$0x3] %vm7_vm0, %v6_v3  }
   0xe   :  { %16 = vrot.lane.b32.xlu0 %v15_v4, %s35_s11 }
  0x7c   :  { %v11_v5 = vpop.permute.xlu0 %10  }
  0x7d   :  { %v23_v6 = vpop.permute.xlu1 %22   ;;  %27 = vst.msk [vmem:[%s62_s1 + $0x1] ss:$4 sm:$0x3] %vm7_vm0, %v11_v5  }
  0x7e   :  { %29 = vst.msk [vmem:[%s62_s1 + $0x3] ss:$4 sm:$0x3] %vm7_vm0, %v23_v6  }
  0x80   :  { %v17_v7 = vpop.permute.xlu0 %16  }
  0x81   :  { %28 = vst.msk [vmem:[%s62_s1 + $0x2] ss:$4 sm:$0x3] %vm7_vm0, %v17_v7  }

// kernel: tile.125
= control target key start
LH: loop header
LB: loop body
LE: loop exit
PB: predicated region body
PF: predicated region fallthrough
CT: control target
= control target key end

     0   :  { %s22_s0 = inlined_call_operand.vmem [shape: f32[32], index: 0, kind: input, shape index: {}]   ;;  %s23_s1 = inlined_call_operand.vmem [shape: f32[8,32], index: 1, kind: output, shape index: {}]  }
   0x1   :  { %v4_v0 = vld [vmem:[%s22_s0] ss:$0 sm:$0xff] }
   0x2   :  { %5 = vst [vmem:[%s23_s1] sm:$0xff] %v4_v0 }

// kernel: tile.130
= control target key start
LH: loop header
LB: loop body
LE: loop exit
PB: predicated region body
PF: predicated region fallthrough
CT: control target
= control target key end

     0   :  { %s7_s6 = smov 3  ;;  %s14_s9 = smov 3  ;;  %vm4_vm0 = vcmask 261120   ;;  %vm11_vm1 = vcmask 1048320   ;;  %vm18_vm2 = vcmask 785920   ;;  %vm25_vm3 = vcmask 523520   ;;  %s76_s0 = inlined_call_operand.vmem [shape: f32[8,32], index: 0, kind: input, shape index: {}]   ;;  %s77_s1 = inlined_call_operand.vmem [shape: f32[1,256], index: 1, kind: output, shape index: {}]  }
   0x1   :  { %v38_v0 = vld [vmem:[%s76_s0 + $0x3] ss:$4 sm:%s7_s6]   ;;  %s45_s10 = smov 96   ;;  %s21_s11 = smov 3  ;;  %v39_v1 = vld [vmem:[%s76_s0 + $0x2] ss:$4 sm:%s14_s9]  }
   0x2   :  { %9 = vrot.lane.b32.xlu0 %v38_v0, %s45_s10  ;;  %v40_v2 = vld [vmem:[%s76_s0 + $0x1] ss:$4 sm:%s21_s11]   ;;  %s2_s16 = smov 3  ;;  %s46_s17 = smov 32  }
   0x3   :  { %23 = vrot.lane.b32.xlu1 %v40_v2, %s46_s17  ;;  %v3_v3 = vld [vmem:[%s76_s0] ss:$4 sm:%s2_s16]   ;;  %s47_s0 = smov 64  }
   0x4   :  { %5 = vst.msk [vmem:[#allocation0] ss:$8 sm:$0x3] %vm4_vm0, %v3_v3  }
   0x6   :  { %16 = vrot.lane.b32.xlu0 %v39_v1, %s47_s0 }
  0x74   :  { %v10_v4 = vpop.permute.xlu0 %9  }
  0x75   :  { %12 = vst.msk [vmem:[#allocation0] ss:$8 sm:$0x3] %vm11_vm1, %v10_v4   ;;  %v24_v5 = vpop.permute.xlu1 %23  }
  0x78   :  { %v17_v6 = vpop.permute.xlu0 %16  }
  0x79   :  { %19 = vst.msk [vmem:[#allocation0] ss:$8 sm:$0x3] %vm18_vm2, %v17_v6  }
  0x7a   :  { %26 = vst.msk [vmem:[#allocation0] ss:$8 sm:$0x3] %vm25_vm3, %v24_v5  }
  0x81   :  { %v30_v7 = vld [vmem:[#allocation0] sm:$0x1]  ;;  %v34_v8 = vld [vmem:[#allocation0 + $0x8] sm:$0x1] }
  0x82   :  { %32 = vst [vmem:[%s77_s1] sm:$0x1] %v30_v7  ;;  %41 = vst [vmem:[%s77_s1 + $0x1] sm:$0x1] %v34_v8 }

// kernel: _lambda_.24
= control target key start
LH: loop header
LB: loop body
LE: loop exit
PB: predicated region body
PF: predicated region fallthrough
CT: control target
= control target key end

     0   :  { %vm1469_vm8 = vcmask 257024   ;;  %s2358_s1 = inlined_call_operand.vmem [shape: bf16[2048,128], index: 1, kind: input, shape index: {}]   ;;  %s2359_s0 = inlined_call_operand.vmem [shape: bf16[8,2048], index: 0, kind: input, shape index: {}]   ;;  %s2360_s2 = inlined_call_operand.vmem [shape: f32[1,128], index: 2, kind: input, shape index: {}]   ;;  %s2361_s3 = inlined_call_operand.vmem [shape: bf16[8,32], index: 3, kind: output, shape index: {}]  }
   0x1   :  { %v1796_v0 = vld [vmem:[%s2358_s1 + $0x40] sm:$0xff]   ;;  %v1800_v4 = vld [vmem:[%s2358_s1 + $0x48] sm:$0xff]   ;;  %v1804_v8 = vld [vmem:[%s2358_s1 + $0x50] sm:$0xff]  }
   0x2   :  { %v1797_v1 = vld [vmem:[%s2358_s1 + $0xc0] sm:$0xff]   ;;  %1620 = vmatprep.subr.bf16.mxu0 %v1796_v0  ;;  %v1801_v5 = vld [vmem:[%s2358_s1 + $0xc8] sm:$0xff]   ;;  %v1805_v9 = vld [vmem:[%s2358_s1 + $0xd0] sm:$0xff]  }
   0x3   :  { %v1798_v2 = vld [vmem:[%s2358_s1] sm:$0xff]   ;;  %1642 = vmatprep.subr.bf16.mxu1 %v1797_v1  ;;  %v1802_v6 = vld [vmem:[%s2358_s1 + $0x8] sm:$0xff]   ;;  %v1806_v10 = vld [vmem:[%s2358_s1 + $0x10] sm:$0xff]  }
   0x4   :  { %v1799_v3 = vld [vmem:[%s2358_s1 + $0x80] sm:$0xff]   ;;  %1621 = vmatpush3.bf16.msra.mxu0 %v1798_v2  ;;  %v1803_v7 = vld [vmem:[%s2358_s1 + $0x88] sm:$0xff]   ;;  %v1807_v11 = vld [vmem:[%s2358_s1 + $0x90] sm:$0xff]  }
   0x5   :  { %1643 = vmatpush3.bf16.msra.mxu1 %v1799_v3  ;;  %1622 = vmatprep.subr.bf16.mxu0 %v1800_v4  ;;  %v1808_v12 = vld [vmem:[%s2358_s1 + $0x58] sm:$0xff]   ;;  %v1812_v16 = vld [vmem:[%s2358_s1 + $0x60] sm:$0xff]   ;;  %v1816_v20 = vld [vmem:[%s2358_s1 + $0x68] sm:$0xff]  }
   0x6   :  { %1644 = vmatprep.subr.bf16.mxu1 %v1801_v5  ;;  %v1809_v13 = vld [vmem:[%s2358_s1 + $0xd8] sm:$0xff]   ;;  %v1813_v17 = vld [vmem:[%s2358_s1 + $0xe0] sm:$0xff]   ;;  %v1817_v21 = vld [vmem:[%s2358_s1 + $0xe8] sm:$0xff]  }
   0x7   :  { %v1810_v14 = vld [vmem:[%s2358_s1 + $0x18] sm:$0xff]   ;;  %v1814_v18 = vld [vmem:[%s2358_s1 + $0x20] sm:$0xff]   ;;  %v1818_v22 = vld [vmem:[%s2358_s1 + $0x28] sm:$0xff]  }
   0x8   :  { %1623 = vmatpush3.bf16.msra.mxu0 %v1802_v6  ;;  %v1811_v15 = vld [vmem:[%s2358_s1 + $0x98] sm:$0xff]   ;;  %v1815_v19 = vld [vmem:[%s2358_s1 + $0xa0] sm:$0xff]   ;;  %v1819_v23 = vld [vmem:[%s2358_s1 + $0xa8] sm:$0xff]  }
   0x9   :  { %1645 = vmatpush3.bf16.msra.mxu1 %v1803_v7  ;;  %1624 = vmatprep.subr.bf16.mxu0 %v1804_v8  ;;  %v1820_v24 = vld [vmem:[%s2358_s1 + $0x70] sm:$0xff]   ;;  %v1824_v28 = vld [vmem:[%s2358_s1 + $0x78] sm:$0xff]   ;;  %v21_v32 = vld [vmem:[%s2359_s0] sm:$0xff] }
   0xa   :  { %1646 = vmatprep.subr.bf16.mxu1 %v1805_v9  ;;  %v1821_v25 = vld [vmem:[%s2358_s1 + $0xf0] sm:$0xff]   ;;  %v1825_v29 = vld [vmem:[%s2358_s1 + $0xf8] sm:$0xff]   ;;  %v22_v33 = vld [vmem:[%s2359_s0 + $0x8] sm:$0xff]  ;;  %vm29_vm0 = vcmp.ge.bf16.partialorder %v21_v32, 0  ;;  %v37_v34 = vmul.bf16 1045249613, %v21_v32 }
   0xb   :  { %v1822_v26 = vld [vmem:[%s2358_s1 + $0x30] sm:$0xff]   ;;  %v1826_v30 = vld [vmem:[%s2358_s1 + $0x38] sm:$0xff]   ;;  %vm30_vm1 = vcmp.ge.bf16.partialorder %v22_v33, 0  ;;  %v38_v35 = vmul.bf16 1045249613, %v22_v33  ;;  %v1828_v36 = vld [vmem:[%s2358_s1 + $0x140] sm:$0xff]  }
   0xc   :  { %1625 = vmatpush3.bf16.msra.mxu0 %v1806_v10  ;;  %v1823_v27 = vld [vmem:[%s2358_s1 + $0xb0] sm:$0xff]   ;;  %v1827_v31 = vld [vmem:[%s2358_s1 + $0xb8] sm:$0xff]   ;;  %v45_v37 = vsel %vm29_vm0, %v21_v32, %v37_v34  ;;  %v1829_v39 = vld [vmem:[%s2358_s1 + $0x1c0] sm:$0xff]  }
   0xd   :  { %1647 = vmatpush3.bf16.msra.mxu1 %v1807_v11  ;;  %1626 = vmatprep.subr.bf16.mxu0 %v1808_v12  ;;  %v46_v38 = vsel %vm30_vm1, %v22_v33, %v38_v35  ;;  %v1475_v40 = vcombine.low %v45_v37, %v45_v37  ;;  %v1476_v41 = vcombine.high %v45_v37, %v45_v37  ;;  %v1830_v44 = vld [vmem:[%s2358_s1 + $0x100] sm:$0xff]   ;;  %v1832_v46 = vld [vmem:[%s2358_s1 + $0x148] sm:$0xff]   ;;  %v1836_v50 = vld [vmem:[%s2358_s1 + $0x150] sm:$0xff]  }
   0xe   :  { %1648 = vmatprep.subr.bf16.mxu1 %v1809_v13  ;;  %v1477_v42 = vcombine.low %v46_v38, %v46_v38  ;;  %v1478_v43 = vcombine.high %v46_v38, %v46_v38  ;;  %v1831_v45 = vld [vmem:[%s2358_s1 + $0x180] sm:$0xff]   ;;  %v1833_v47 = vld [vmem:[%s2358_s1 + $0x1c8] sm:$0xff]   ;;  %v1837_v51 = vld [vmem:[%s2358_s1 + $0x1d0] sm:$0xff]  }
   0xf   :  { %1166 = vmatprep.mubr.bf16.mxu0 %v1476_v41  ;;  %v1834_v48 = vld [vmem:[%s2358_s1 + $0x108] sm:$0xff]   ;;  %v1838_v52 = vld [vmem:[%s2358_s1 + $0x110] sm:$0xff]   ;;  %v1840_v54 = vld [vmem:[%s2358_s1 + $0x158] sm:$0xff]  }
  0x10   :  { %1627 = vmatpush3.bf16.msra.mxu0 %v1810_v14  ;;  %1206 = vmatprep.mubr.bf16.mxu1 %v1478_v43  ;;  %v1835_v49 = vld [vmem:[%s2358_s1 + $0x188] sm:$0xff]   ;;  %v1839_v53 = vld [vmem:[%s2358_s1 + $0x190] sm:$0xff]   ;;  %v1841_v55 = vld [vmem:[%s2358_s1 + $0x1d8] sm:$0xff]  }
  0x11   :  { %1649 = vmatpush3.bf16.msra.mxu1 %v1811_v15  ;;  %1628 = vmatprep.subr.bf16.mxu0 %v1812_v16  ;;  %v1842_v56 = vld [vmem:[%s2358_s1 + $0x118] sm:$0xff]   ;;  %v1844_v58 = vld [vmem:[%s2358_s1 + $0x160] sm:$0xff]   ;;  %v1848_v62 = vld [vmem:[%s2358_s1 + $0x168] sm:$0xff]  }
  0x12   :  { %1650 = vmatprep.subr.bf16.mxu1 %v1813_v17  ;;  %v1843_v57 = vld [vmem:[%s2358_s1 + $0x198] sm:$0xff]   ;;  %v1845_v59 = vld [vmem:[%s2358_s1 + $0x1e0] sm:$0xff]   ;;  %v1849_v63 = vld [vmem:[%s2358_s1 + $0x1e8] sm:$0xff]  }
  0x13   :  { %v1846_v60 = vld [vmem:[%s2358_s1 + $0x120] sm:$0xff]   ;;  %v1850_v0 = vld [vmem:[%s2358_s1 + $0x128] sm:$0xff]   ;;  %v1852_v2 = vld [vmem:[%s2358_s1 + $0x170] sm:$0xff]  }
  0x14   :  { %1629 = vmatpush3.bf16.msra.mxu0 %v1814_v18  ;;  %v1847_v61 = vld [vmem:[%s2358_s1 + $0x1a0] sm:$0xff]   ;;  %v1851_v1 = vld [vmem:[%s2358_s1 + $0x1a8] sm:$0xff]   ;;  %v1853_v3 = vld [vmem:[%s2358_s1 + $0x1f0] sm:$0xff]  }
  0x15   :  { %1651 = vmatpush3.bf16.msra.mxu1 %v1815_v19  ;;  %1630 = vmatprep.subr.bf16.mxu0 %v1816_v20  ;;  %v1854_v4 = vld [vmem:[%s2358_s1 + $0x130] sm:$0xff]   ;;  %v1856_v6 = vld [vmem:[%s2358_s1 + $0x178] sm:$0xff]   ;;  %v1860_v14 = vld [vmem:[%s2358_s1 + $0x240] sm:$0xff]  }
  0x16   :  { %1652 = vmatprep.subr.bf16.mxu1 %v1817_v21  ;;  %v1855_v5 = vld [vmem:[%s2358_s1 + $0x1b0] sm:$0xff]   ;;  %v1857_v7 = vld [vmem:[%s2358_s1 + $0x1f8] sm:$0xff]   ;;  %v1861_v16 = vld [vmem:[%s2358_s1 + $0x2c0] sm:$0xff]  }
  0x17   :  { %v1858_v8 = vld [vmem:[%s2358_s1 + $0x138] sm:$0xff]   ;;  %v23_v10 = vld [vmem:[%s2359_s0 + $0x10] sm:$0xff]  ;;  %v1862_v20 = vld [vmem:[%s2358_s1 + $0x200] sm:$0xff]  }
  0x18   :  { %1631 = vmatpush3.bf16.msra.mxu0 %v1818_v22  ;;  %v1859_v9 = vld [vmem:[%s2358_s1 + $0x1b8] sm:$0xff]   ;;  %vm31_vm2 = vcmp.ge.bf16.partialorder %v23_v10, 0  ;;  %v39_v11 = vmul.bf16 1045249613, %v23_v10  ;;  %v1877_v37 = vld [vmem:[%s2358_s1 + $0x2e0] sm:$0xff]   ;;  %v1881_v41 = vld [vmem:[%s2358_s1 + $0x2e8] sm:$0xff]  }
  0x19   :  { %1653 = vmatpush3.bf16.msra.mxu1 %v1819_v23  ;;  %1632 = vmatprep.subr.bf16.mxu0 %v1820_v24  ;;  %v24_v12 = vld [vmem:[%s2359_s0 + $0x18] sm:$0xff]  ;;  %v1863_v23 = vld [vmem:[%s2358_s1 + $0x280] sm:$0xff]   ;;  %v1864_v24 = vld [vmem:[%s2358_s1 + $0x248] sm:$0xff]  }
  0x1a   :  { %1654 = vmatprep.subr.bf16.mxu1 %v1821_v25  ;;  %vm32_vm3 = vcmp.ge.bf16.partialorder %v24_v12, 0  ;;  %v40_v13 = vmul.bf16 1045249613, %v24_v12  ;;  %v47_v15 = vsel %vm31_vm2, %v23_v10, %v39_v11  ;;  %v1865_v25 = vld [vmem:[%s2358_s1 + $0x2c8] sm:$0xff]   ;;  %v1872_v32 = vld [vmem:[%s2358_s1 + $0x258] sm:$0xff]   ;;  %v1878_v38 = vld [vmem:[%s2358_s1 + $0x220] sm:$0xff]  }
  0x1b   :  { %v1479_v17 = vcombine.low %v47_v15, %v47_v15  ;;  %v1480_v18 = vcombine.high %v47_v15, %v47_v15  ;;  %v1873_v33 = vld [vmem:[%s2358_s1 + $0x2d8] sm:$0xff]   ;;  %v1883_v43 = vld [vmem:[%s2358_s1 + $0x2a8] sm:$0xff]   ;;  %v1909_v15 = vld [vmem:[%s2358_s1 + $0x3e0] sm:$0xff]  }
  0x1c   :  { %1633 = vmatpush3.bf16.msra.mxu0 %v1822_v26  ;;  %v48_v19 = vsel %vm32_vm3, %v24_v12, %v40_v13  ;;  %v1866_v26 = vld [vmem:[%s2358_s1 + $0x208] sm:$0xff]   ;;  %v1874_v34 = vld [vmem:[%s2358_s1 + $0x218] sm:$0xff]  }
  0x1d   :  { %1655 = vmatpush3.bf16.msra.mxu1 %v1823_v27  ;;  %1634 = vmatprep.subr.bf16.mxu0 %v1824_v28  ;;  %v1481_v21 = vcombine.low %v48_v19, %v48_v19  ;;  %v1482_v22 = vcombine.high %v48_v19, %v48_v19  ;;  %v1867_v27 = vld [vmem:[%s2358_s1 + $0x288] sm:$0xff]   ;;  %v1868_v28 = vld [vmem:[%s2358_s1 + $0x250] sm:$0xff]   ;;  %v1875_v35 = vld [vmem:[%s2358_s1 + $0x298] sm:$0xff]  }
  0x1e   :  { %1656 = vmatprep.subr.bf16.mxu1 %v1825_v29  ;;  %v1869_v29 = vld [vmem:[%s2358_s1 + $0x2d0] sm:$0xff]   ;;  %v1904_v10 = vld [vmem:[%s2358_s1 + $0x358] sm:$0xff]   ;;  %v1913_v19 = vld [vmem:[%s2358_s1 + $0x3e8] sm:$0xff]  }
  0x1f   :  { %v1905_v11 = vld [vmem:[%s2358_s1 + $0x3d8] sm:$0xff]  }
  0x20   :  { %1635 = vmatpush3.bf16.msra.mxu0 %v1826_v30  ;;  %v1870_v30 = vld [vmem:[%s2358_s1 + $0x210] sm:$0xff]   ;;  %v1906_v12 = vld [vmem:[%s2358_s1 + $0x318] sm:$0xff]  }
  0x21   :  { %1657 = vmatpush3.bf16.msra.mxu1 %v1827_v31  ;;  %1664 = vmatprep.subr.bf16.mxu0 %v1828_v36  ;;  %v1871_v31 = vld [vmem:[%s2358_s1 + $0x290] sm:$0xff]   ;;  %v1876_v36 = vld [vmem:[%s2358_s1 + $0x260] sm:$0xff]   ;;  %v1907_v13 = vld [vmem:[%s2358_s1 + $0x398] sm:$0xff]  }
  0x22   :  { %1686 = vmatprep.subr.bf16.mxu1 %v1829_v39  ;;  %v1879_v39 = vld [vmem:[%s2358_s1 + $0x2a0] sm:$0xff]  }
  0x23   :  { %1167 = vmatmul.mubr.bf16.vlgmr.msra.gmra.mrb[0].mxu0 %v1475_v40  ;;  %v1880_v40 = vld [vmem:[%s2358_s1 + $0x268] sm:$0xff]  }
  0x24   :  { %1207 = vmatmul.mubr.bf16.vlgmr.msra.gmra.mrb[0].mxu1 %v1477_v42  ;;  %1665 = vmatpush3.bf16.msra.mxu0 %v1830_v44  ;;  %v1882_v42 = vld [vmem:[%s2358_s1 + $0x228] sm:$0xff]   ;;  %v1884_v44 = vld [vmem:[%s2358_s1 + $0x270] sm:$0xff]  }
  0x25   :  { %1687 = vmatpush3.bf16.msra.mxu1 %v1831_v45  ;;  %1666 = vmatprep.subr.bf16.mxu0 %v1832_v46  ;;  %v1885_v45 = vld [vmem:[%s2358_s1 + $0x2f0] sm:$0xff]  }
  0x26   :  { %1688 = vmatprep.subr.bf16.mxu1 %v1833_v47  ;;  %1246 = vmatprep.mubr.bf16.mxu0 %v1480_v18  ;;  %v1886_v46 = vld [vmem:[%s2358_s1 + $0x230] sm:$0xff]   ;;  %v1912_v18 = vld [vmem:[%s2358_s1 + $0x368] sm:$0xff]  }
  0x27   :  { %1286 = vmatprep.mubr.bf16.mxu1 %v1482_v22  ;;  %v1887_v47 = vld [vmem:[%s2358_s1 + $0x2b0] sm:$0xff]  }
  0x28   :  { %1667 = vmatpush3.bf16.msra.mxu0 %v1834_v48  ;;  %v1888_v48 = vld [vmem:[%s2358_s1 + $0x278] sm:$0xff]   ;;  %v1916_v22 = vld [vmem:[%s2358_s1 + $0x370] sm:$0xff]  }
  0x29   :  { %1689 = vmatpush3.bf16.msra.mxu1 %v1835_v49  ;;  %1668 = vmatprep.subr.bf16.mxu0 %v1836_v50  ;;  %v1889_v49 = vld [vmem:[%s2358_s1 + $0x2f8] sm:$0xff]  }
  0x2a   :  { %1690 = vmatprep.subr.bf16.mxu1 %v1837_v51  ;;  %v1890_v50 = vld [vmem:[%s2358_s1 + $0x238] sm:$0xff]  }
  0x2b   :  { %v1891_v51 = vld [vmem:[%s2358_s1 + $0x2b8] sm:$0xff]  }
  0x2c   :  { %1669 = vmatpush3.bf16.msra.mxu0 %v1838_v52  ;;  %v25_v52 = vld [vmem:[%s2359_s0 + $0x20] sm:$0xff] }
  0x2d   :  { %1691 = vmatpush3.bf16.msra.mxu1 %v1839_v53  ;;  %1670 = vmatprep.subr.bf16.mxu0 %v1840_v54  ;;  %v26_v53 = vld [vmem:[%s2359_s0 + $0x28] sm:$0xff]  ;;  %vm33_vm4 = vcmp.ge.bf16.partialorder %v25_v52, 0  ;;  %v41_v54 = vmul.bf16 1045249613, %v25_v52 }
  0x2e   :  { %1692 = vmatprep.subr.bf16.mxu1 %v1841_v55  ;;  %vm34_vm5 = vcmp.ge.bf16.partialorder %v26_v53, 0  ;;  %v42_v55 = vmul.bf16 1045249613, %v26_v53 }
  0x30   :  { %1671 = vmatpush3.bf16.msra.mxu0 %v1842_v56  ;;  %v1892_v56 = vld [vmem:[%s2358_s1 + $0x340] sm:$0xff]  }
  0x31   :  { %1693 = vmatpush3.bf16.msra.mxu1 %v1843_v57  ;;  %1672 = vmatprep.subr.bf16.mxu0 %v1844_v58  ;;  %v49_v57 = vsel %vm33_vm4, %v25_v52, %v41_v54  ;;  %v50_v58 = vsel %vm34_vm5, %v26_v53, %v42_v55 }
  0x32   :  { %1694 = vmatprep.subr.bf16.mxu1 %v1845_v59  ;;  %v1893_v59 = vld [vmem:[%s2358_s1 + $0x3c0] sm:$0xff]  }
  0x34   :  { %1673 = vmatpush3.bf16.msra.mxu0 %v1846_v60  ;;  %v1483_v60 = vcombine.low %v49_v57, %v49_v57 }
  0x35   :  { %1695 = vmatpush3.bf16.msra.mxu1 %v1847_v61  ;;  %1674 = vmatprep.subr.bf16.mxu0 %v1848_v62  ;;  %v1484_v61 = vcombine.high %v49_v57, %v49_v57  ;;  %v1485_v62 = vcombine.low %v50_v58, %v50_v58 }
  0x36   :  { %1696 = vmatprep.subr.bf16.mxu1 %v1849_v63  ;;  %v1486_v63 = vcombine.high %v50_v58, %v50_v58 }
  0x38   :  { %1675 = vmatpush3.bf16.msra.mxu0 %v1850_v0  ;;  %v1894_v0 = vld [vmem:[%s2358_s1 + $0x300] sm:$0xff]  }
  0x39   :  { %1697 = vmatpush3.bf16.msra.mxu1 %v1851_v1  ;;  %1676 = vmatprep.subr.bf16.mxu0 %v1852_v2  ;;  %v1895_v1 = vld [vmem:[%s2358_s1 + $0x380] sm:$0xff]   ;;  %v1896_v2 = vld [vmem:[%s2358_s1 + $0x348] sm:$0xff]  }
  0x3a   :  { %1698 = vmatprep.subr.bf16.mxu1 %v1853_v3  ;;  %v1897_v3 = vld [vmem:[%s2358_s1 + $0x3c8] sm:$0xff]  }
  0x3c   :  { %1677 = vmatpush3.bf16.msra.mxu0 %v1854_v4  ;;  %v1898_v4 = vld [vmem:[%s2358_s1 + $0x308] sm:$0xff]  }
  0x3d   :  { %1699 = vmatpush3.bf16.msra.mxu1 %v1855_v5  ;;  %1678 = vmatprep.subr.bf16.mxu0 %v1856_v6  ;;  %v1899_v5 = vld [vmem:[%s2358_s1 + $0x388] sm:$0xff]   ;;  %v1900_v6 = vld [vmem:[%s2358_s1 + $0x350] sm:$0xff]  }
  0x3e   :  { %1700 = vmatprep.subr.bf16.mxu1 %v1857_v7  ;;  %v1901_v7 = vld [vmem:[%s2358_s1 + $0x3d0] sm:$0xff]  }
  0x40   :  { %1679 = vmatpush3.bf16.msra.mxu0 %v1858_v8  ;;  %v1902_v8 = vld [vmem:[%s2358_s1 + $0x310] sm:$0xff]  }
  0x41   :  { %1701 = vmatpush3.bf16.msra.mxu1 %v1859_v9  ;;  %1708 = vmatprep.subr.bf16.mxu0 %v1860_v14  ;;  %v1903_v9 = vld [vmem:[%s2358_s1 + $0x390] sm:$0xff]   ;;  %v1908_v14 = vld [vmem:[%s2358_s1 + $0x360] sm:$0xff]  }
  0x42   :  { %1730 = vmatprep.subr.bf16.mxu1 %v1861_v16  ;;  %v1910_v16 = vld [vmem:[%s2358_s1 + $0x320] sm:$0xff]  }
  0x43   :  { %1247 = vmatmul.mubr.bf16.vlgmr.msra.gmra.mrb[4].mxu0 %v1479_v17  ;;  %v1911_v17 = vld [vmem:[%s2358_s1 + $0x3a0] sm:$0xff]  }
  0x44   :  { %1287 = vmatmul.mubr.bf16.vlgmr.msra.gmra.mrb[4].mxu1 %v1481_v21  ;;  %1709 = vmatpush3.bf16.msra.mxu0 %v1862_v20  ;;  %v1914_v20 = vld [vmem:[%s2358_s1 + $0x328] sm:$0xff]  }
  0x45   :  { %1731 = vmatpush3.bf16.msra.mxu1 %v1863_v23  ;;  %1710 = vmatprep.subr.bf16.mxu0 %v1864_v24  ;;  %v1915_v21 = vld [vmem:[%s2358_s1 + $0x3a8] sm:$0xff]   ;;  %v1917_v23 = vld [vmem:[%s2358_s1 + $0x3f0] sm:$0xff]  }
  0x46   :  { %1732 = vmatprep.subr.bf16.mxu1 %v1865_v25  ;;  %1326 = vmatprep.mubr.bf16.mxu0 %v1484_v61  ;;  %v1918_v24 = vld [vmem:[%s2358_s1 + $0x330] sm:$0xff]  }
  0x47   :  { %1366 = vmatprep.mubr.bf16.mxu1 %v1486_v63  ;;  %v1919_v25 = vld [vmem:[%s2358_s1 + $0x3b0] sm:$0xff]  }
  0x48   :  { %1711 = vmatpush3.bf16.msra.mxu0 %v1866_v26  ;;  %v1920_v26 = vld [vmem:[%s2358_s1 + $0x378] sm:$0xff]  }
  0x49   :  { %1733 = vmatpush3.bf16.msra.mxu1 %v1867_v27  ;;  %1712 = vmatprep.subr.bf16.mxu0 %v1868_v28  ;;  %v1921_v27 = vld [vmem:[%s2358_s1 + $0x3f8] sm:$0xff]  }
  0x4a   :  { %1734 = vmatprep.subr.bf16.mxu1 %v1869_v29  ;;  %v1922_v28 = vld [vmem:[%s2358_s1 + $0x338] sm:$0xff]  }
  0x4b   :  { %v1923_v29 = vld [vmem:[%s2358_s1 + $0x3b8] sm:$0xff]  }
  0x4c   :  { %1713 = vmatpush3.bf16.msra.mxu0 %v1870_v30  ;;  %v27_v30 = vld [vmem:[%s2359_s0 + $0x30] sm:$0xff] }
  0x4d   :  { %1735 = vmatpush3.bf16.msra.mxu1 %v1871_v31  ;;  %1714 = vmatprep.subr.bf16.mxu0 %v1872_v32  ;;  %vm35_vm6 = vcmp.ge.bf16.partialorder %v27_v30, 0  ;;  %v43_v31 = vmul.bf16 1045249613, %v27_v30  ;;  %v28_v32 = vld [vmem:[%s2359_s0 + $0x38] sm:$0xff] }
  0x4e   :  { %1736 = vmatprep.subr.bf16.mxu1 %v1873_v33  ;;  %vm36_vm7 = vcmp.ge.bf16.partialorder %v28_v32, 0  ;;  %v44_v33 = vmul.bf16 1045249613, %v28_v32 }
  0x50   :  { %1715 = vmatpush3.bf16.msra.mxu0 %v1874_v34  ;;  %v51_v34 = vsel %vm35_vm6, %v27_v30, %v43_v31 }
  0x51   :  { %1737 = vmatpush3.bf16.msra.mxu1 %v1875_v35  ;;  %1716 = vmatprep.subr.bf16.mxu0 %v1876_v36  ;;  %v1487_v35 = vcombine.low %v51_v34, %v51_v34  ;;  %v1488_v36 = vcombine.high %v51_v34, %v51_v34 }
  0x52   :  { %1738 = vmatprep.subr.bf16.mxu1 %v1877_v37  ;;  %v52_v37 = vsel %vm36_vm7, %v28_v32, %v44_v33 }
  0x54   :  { %1717 = vmatpush3.bf16.msra.mxu0 %v1878_v38  ;;  %v1489_v38 = vcombine.low %v52_v37, %v52_v37 }
  0x55   :  { %1739 = vmatpush3.bf16.msra.mxu1 %v1879_v39  ;;  %1718 = vmatprep.subr.bf16.mxu0 %v1880_v40  ;;  %v1490_v39 = vcombine.high %v52_v37, %v52_v37 }
  0x56   :  { %1740 = vmatprep.subr.bf16.mxu1 %v1881_v41 }
  0x58   :  { %1719 = vmatpush3.bf16.msra.mxu0 %v1882_v42 }
  0x59   :  { %1741 = vmatpush3.bf16.msra.mxu1 %v1883_v43  ;;  %1720 = vmatprep.subr.bf16.mxu0 %v1884_v44 }
  0x5a   :  { %1742 = vmatprep.subr.bf16.mxu1 %v1885_v45 }
  0x5c   :  { %1721 = vmatpush3.bf16.msra.mxu0 %v1886_v46 }
  0x5d   :  { %1743 = vmatpush3.bf16.msra.mxu1 %v1887_v47  ;;  %1722 = vmatprep.subr.bf16.mxu0 %v1888_v48 }
  0x5e   :  { %1744 = vmatprep.subr.bf16.mxu1 %v1889_v49 }
  0x60   :  { %1723 = vmatpush3.bf16.msra.mxu0 %v1890_v50 }
  0x61   :  { %1745 = vmatpush3.bf16.msra.mxu1 %v1891_v51  ;;  %1752 = vmatprep.subr.bf16.mxu0 %v1892_v56 }
  0x62   :  { %1774 = vmatprep.subr.bf16.mxu1 %v1893_v59 }
  0x63   :  { %1327 = vmatmul.mubr.bf16.vlgmr.msra.gmra.mrb[8].mxu0 %v1483_v60 }
  0x64   :  { %1367 = vmatmul.mubr.bf16.vlgmr.msra.gmra.mrb[8].mxu1 %v1485_v62  ;;  %1753 = vmatpush3.bf16.msra.mxu0 %v1894_v0 }
  0x65   :  { %1775 = vmatpush3.bf16.msra.mxu1 %v1895_v1  ;;  %1754 = vmatprep.subr.bf16.mxu0 %v1896_v2 }
  0x66   :  { %1776 = vmatprep.subr.bf16.mxu1 %v1897_v3  ;;  %1406 = vmatprep.mubr.bf16.mxu0 %v1488_v36 }
  0x67   :  { %1446 = vmatprep.mubr.bf16.mxu1 %v1490_v39 }
  0x68   :  { %1755 = vmatpush3.bf16.msra.mxu0 %v1898_v4 }
  0x69   :  { %1777 = vmatpush3.bf16.msra.mxu1 %v1899_v5  ;;  %1756 = vmatprep.subr.bf16.mxu0 %v1900_v6 }
  0x6a   :  { %1778 = vmatprep.subr.bf16.mxu1 %v1901_v7 }
  0x6c   :  { %1757 = vmatpush3.bf16.msra.mxu0 %v1902_v8 }
  0x6d   :  { %1779 = vmatpush3.bf16.msra.mxu1 %v1903_v9  ;;  %1758 = vmatprep.subr.bf16.mxu0 %v1904_v10 }
  0x6e   :  { %1780 = vmatprep.subr.bf16.mxu1 %v1905_v11 }
  0x70   :  { %1759 = vmatpush3.bf16.msra.mxu0 %v1906_v12 }
  0x71   :  { %1781 = vmatpush3.bf16.msra.mxu1 %v1907_v13  ;;  %1760 = vmatprep.subr.bf16.mxu0 %v1908_v14 }
  0x72   :  { %1782 = vmatprep.subr.bf16.mxu1 %v1909_v15 }
  0x74   :  { %1761 = vmatpush3.bf16.msra.mxu0 %v1910_v16 }
  0x75   :  { %1783 = vmatpush3.bf16.msra.mxu1 %v1911_v17  ;;  %1762 = vmatprep.subr.bf16.mxu0 %v1912_v18 }
  0x76   :  { %1784 = vmatprep.subr.bf16.mxu1 %v1913_v19 }
  0x78   :  { %1763 = vmatpush3.bf16.msra.mxu0 %v1914_v20 }
  0x79   :  { %1785 = vmatpush3.bf16.msra.mxu1 %v1915_v21  ;;  %1764 = vmatprep.subr.bf16.mxu0 %v1916_v22  ;;  %v1619_v22 = vld [vmem:[%s2360_s2] ss:$0 sm:$0xff] }
  0x7a   :  { %1786 = vmatprep.subr.bf16.mxu1 %v1917_v23 }
  0x7c   :  { %1765 = vmatpush3.bf16.msra.mxu0 %v1918_v24 }
  0x7d   :  { %1787 = vmatpush3.bf16.msra.mxu1 %v1919_v25  ;;  %1766 = vmatprep.subr.bf16.mxu0 %v1920_v26 }
  0x7e   :  { %1788 = vmatprep.subr.bf16.mxu1 %v1921_v27 }
  0x80   :  { %1767 = vmatpush3.bf16.msra.mxu0 %v1922_v28 }
  0x81   :  { %1789 = vmatpush3.bf16.msra.mxu1 %v1923_v29 }
  0x83   :  { %1407 = vmatmul.mubr.bf16.vlgmr.msra.gmra.mrb[12].mxu0 %v1487_v35 }
  0x84   :  { %1447 = vmatmul.mubr.bf16.vlgmr.msra.gmra.mrb[12].mxu1 %v1489_v38 }
  0xf6   :  { %v1636_v40 = vpop.f32.mrb[0].mxu0 }
  0xf7   :  { %v1658_v41 = vpop.f32.mrb[0].mxu1  ;;  %v1637_v42 = vpop.f32.mrb[1].mxu0 }
  0xf8   :  { %v1659_v43 = vpop.f32.mrb[1].mxu1  ;;  %v1638_v44 = vadd.f32 %v1637_v42, %v1636_v40  ;;  %v1639_v46 = vpop.f32.mrb[2].mxu0 }
  0xf9   :  { %v1660_v45 = vadd.f32 %v1659_v43, %v1658_v41  ;;  %v1661_v47 = vpop.f32.mrb[2].mxu1  ;;  %v1640_v48 = vpop.f32.mrb[3].mxu0 }
  0xfa   :  { %v1662_v49 = vpop.f32.mrb[3].mxu1 }
  0xfb   :  { %v1209_v50 = vadd.f32 %v1660_v45, %v1638_v44 }
 0x116   :  { %v1680_v51 = vpop.f32.mrb[4].mxu0 }
 0x117   :  { %v1702_v52 = vpop.f32.mrb[4].mxu1  ;;  %v1681_v53 = vpop.f32.mrb[5].mxu0 }
 0x118   :  { %v1682_v54 = vadd.f32 %v1681_v53, %v1680_v51  ;;  %v1703_v55 = vpop.f32.mrb[5].mxu1  ;;  %v1683_v56 = vpop.f32.mrb[6].mxu0 }
 0x119   :  { %v1704_v57 = vadd.f32 %v1703_v55, %v1702_v52  ;;  %v1705_v58 = vpop.f32.mrb[6].mxu1  ;;  %v1684_v59 = vpop.f32.mrb[7].mxu0 }
 0x11a   :  { %v1249_v60 = vadd.f32 %v1682_v54, %v1209_v50  ;;  %v1706_v61 = vpop.f32.mrb[7].mxu1 }
 0x11c   :  { %v1289_v62 = vadd.f32 %v1704_v57, %v1249_v60 }
 0x136   :  { %v1724_v63 = vpop.f32.mrb[8].mxu0 }
 0x137   :  { %v1746_v0 = vpop.f32.mrb[8].mxu1  ;;  %v1725_v1 = vpop.f32.mrb[9].mxu0 }
 0x138   :  { %v1747_v2 = vpop.f32.mrb[9].mxu1  ;;  %v1726_v3 = vadd.f32 %v1725_v1, %v1724_v63  ;;  %v1727_v5 = vpop.f32.mrb[10].mxu0 }
 0x139   :  { %v1748_v4 = vadd.f32 %v1747_v2, %v1746_v0  ;;  %v1749_v6 = vpop.f32.mrb[10].mxu1  ;;  %v1728_v7 = vpop.f32.mrb[11].mxu0 }
 0x13a   :  { %v1750_v8 = vpop.f32.mrb[11].mxu1  ;;  %v1329_v9 = vadd.f32 %v1726_v3, %v1289_v62 }
 0x13c   :  { %v1369_v10 = vadd.f32 %v1748_v4, %v1329_v9 }
 0x156   :  { %v1768_v11 = vpop.f32.mrb[12].mxu0 }
 0x157   :  { %v1790_v12 = vpop.f32.mrb[12].mxu1  ;;  %v1769_v13 = vpop.f32.mrb[13].mxu0 }
 0x158   :  { %v1770_v14 = vadd.f32 %v1769_v13, %v1768_v11  ;;  %v1791_v15 = vpop.f32.mrb[13].mxu1  ;;  %v1771_v16 = vpop.f32.mrb[14].mxu0 }
 0x159   :  { %v1792_v17 = vadd.f32 %v1791_v15, %v1790_v12  ;;  %v1793_v18 = vpop.f32.mrb[14].mxu1  ;;  %v1772_v19 = vpop.f32.mrb[15].mxu0 }
 0x15a   :  { %v1409_v20 = vadd.f32 %v1770_v14, %v1369_v10  ;;  %v1794_v21 = vpop.f32.mrb[15].mxu1 }
 0x15c   :  { %v1449_v23 = vadd.f32 %v1792_v17, %v1409_v20 }
 0x15e   :  { %v1467_v24 = vadd.f32 %v1619_v22, %v1449_v23 }
 0x160   :  { %v1468_v25 = vpack.c.bf16 %v1467_v24, %v1467_v24 }
 0x162   :  { %1470 = vst.msk [vmem:[%s2361_s3] sm:$0xf] %vm1469_vm8, %v1468_v25 }

// kernel: _lambda_.22
= control target key start
LH: loop header
LB: loop body
LE: loop exit
PB: predicated region body
PF: predicated region fallthrough
CT: control target
= control target key end

     0   :  { %vm764_vm4 = vcmask 257024   ;;  %vm779_vm5 = vcmask 1040384   ;;  %vm781_vm6 = vcmask 1041408   ;;  %s1258_s1 = inlined_call_operand.vmem [shape: bf16[1024,128], index: 1, kind: input, shape index: {}]   ;;  %s1259_s0 = inlined_call_operand.vmem [shape: bf16[8,1024], index: 0, kind: input, shape index: {}]   ;;  %s1260_s2 = inlined_call_operand.vmem [shape: f32[1,128], index: 2, kind: input, shape index: {}]   ;;  %s1261_s3 = inlined_call_operand.vmem [shape: bf16[8,32], index: 3, kind: output, shape index: {0}]   ;;  %s1262_s4 = inlined_call_operand.vmem [shape: f32[1,8,128], index: 4, kind: output, shape index: {1}]  }
   0x1   :  { %v956_v0 = vld [vmem:[%s1258_s1 + $0x40] sm:$0xff]   ;;  %v960_v4 = vld [vmem:[%s1258_s1 + $0x48] sm:$0xff]   ;;  %v964_v8 = vld [vmem:[%s1258_s1 + $0x50] sm:$0xff]  }
   0x2   :  { %v957_v1 = vld [vmem:[%s1258_s1 + $0xc0] sm:$0xff]   ;;  %867 = vmatprep.subr.bf16.mxu0 %v956_v0  ;;  %v961_v5 = vld [vmem:[%s1258_s1 + $0xc8] sm:$0xff]   ;;  %v965_v9 = vld [vmem:[%s1258_s1 + $0xd0] sm:$0xff]  }
   0x3   :  { %v958_v2 = vld [vmem:[%s1258_s1] sm:$0xff]   ;;  %889 = vmatprep.subr.bf16.mxu1 %v957_v1  ;;  %v962_v6 = vld [vmem:[%s1258_s1 + $0x8] sm:$0xff]   ;;  %v966_v10 = vld [vmem:[%s1258_s1 + $0x10] sm:$0xff]  }
   0x4   :  { %v959_v3 = vld [vmem:[%s1258_s1 + $0x80] sm:$0xff]   ;;  %868 = vmatpush3.bf16.msra.mxu0 %v958_v2  ;;  %v963_v7 = vld [vmem:[%s1258_s1 + $0x88] sm:$0xff]   ;;  %v967_v11 = vld [vmem:[%s1258_s1 + $0x90] sm:$0xff]  }
   0x5   :  { %890 = vmatpush3.bf16.msra.mxu1 %v959_v3  ;;  %869 = vmatprep.subr.bf16.mxu0 %v960_v4  ;;  %v968_v12 = vld [vmem:[%s1258_s1 + $0x58] sm:$0xff]   ;;  %v972_v16 = vld [vmem:[%s1258_s1 + $0x60] sm:$0xff]   ;;  %v976_v20 = vld [vmem:[%s1258_s1 + $0x68] sm:$0xff]  }
   0x6   :  { %891 = vmatprep.subr.bf16.mxu1 %v961_v5  ;;  %v969_v13 = vld [vmem:[%s1258_s1 + $0xd8] sm:$0xff]   ;;  %v973_v17 = vld [vmem:[%s1258_s1 + $0xe0] sm:$0xff]   ;;  %v977_v21 = vld [vmem:[%s1258_s1 + $0xe8] sm:$0xff]  }
   0x7   :  { %v970_v14 = vld [vmem:[%s1258_s1 + $0x18] sm:$0xff]   ;;  %v974_v18 = vld [vmem:[%s1258_s1 + $0x20] sm:$0xff]   ;;  %v978_v22 = vld [vmem:[%s1258_s1 + $0x28] sm:$0xff]  }
   0x8   :  { %870 = vmatpush3.bf16.msra.mxu0 %v962_v6  ;;  %v971_v15 = vld [vmem:[%s1258_s1 + $0x98] sm:$0xff]   ;;  %v975_v19 = vld [vmem:[%s1258_s1 + $0xa0] sm:$0xff]   ;;  %v979_v23 = vld [vmem:[%s1258_s1 + $0xa8] sm:$0xff]  }
   0x9   :  { %892 = vmatpush3.bf16.msra.mxu1 %v963_v7  ;;  %871 = vmatprep.subr.bf16.mxu0 %v964_v8  ;;  %v980_v24 = vld [vmem:[%s1258_s1 + $0x70] sm:$0xff]   ;;  %v984_v28 = vld [vmem:[%s1258_s1 + $0x78] sm:$0xff]   ;;  %v32_v32 = vld [vmem:[%s1259_s0] sm:$0xff] }
   0xa   :  { %893 = vmatprep.subr.bf16.mxu1 %v965_v9  ;;  %v981_v25 = vld [vmem:[%s1258_s1 + $0xf0] sm:$0xff]   ;;  %v985_v29 = vld [vmem:[%s1258_s1 + $0xf8] sm:$0xff]   ;;  %v33_v33 = vld [vmem:[%s1259_s0 + $0x8] sm:$0xff]  ;;  %vm36_vm0 = vcmp.ge.bf16.partialorder %v32_v32, 0  ;;  %v40_v34 = vmul.bf16 1045249613, %v32_v32 }
   0xb   :  { %v982_v26 = vld [vmem:[%s1258_s1 + $0x30] sm:$0xff]   ;;  %v986_v30 = vld [vmem:[%s1258_s1 + $0x38] sm:$0xff]   ;;  %vm37_vm1 = vcmp.ge.bf16.partialorder %v33_v33, 0  ;;  %v41_v35 = vmul.bf16 1045249613, %v33_v33  ;;  %v988_v36 = vld [vmem:[%s1258_s1 + $0x140] sm:$0xff]  }
   0xc   :  { %872 = vmatpush3.bf16.msra.mxu0 %v966_v10  ;;  %v983_v27 = vld [vmem:[%s1258_s1 + $0xb0] sm:$0xff]   ;;  %v987_v31 = vld [vmem:[%s1258_s1 + $0xb8] sm:$0xff]   ;;  %v44_v37 = vsel %vm36_vm0, %v32_v32, %v40_v34  ;;  %v989_v39 = vld [vmem:[%s1258_s1 + $0x1c0] sm:$0xff]  }
   0xd   :  { %894 = vmatpush3.bf16.msra.mxu1 %v967_v11  ;;  %873 = vmatprep.subr.bf16.mxu0 %v968_v12  ;;  %v45_v38 = vsel %vm37_vm1, %v33_v33, %v41_v35  ;;  %v794_v40 = vcombine.low %v44_v37, %v44_v37  ;;  %v795_v41 = vcombine.high %v44_v37, %v44_v37  ;;  %v990_v44 = vld [vmem:[%s1258_s1 + $0x100] sm:$0xff]   ;;  %v992_v46 = vld [vmem:[%s1258_s1 + $0x148] sm:$0xff]   ;;  %v996_v50 = vld [vmem:[%s1258_s1 + $0x150] sm:$0xff]  }
   0xe   :  { %895 = vmatprep.subr.bf16.mxu1 %v969_v13  ;;  %v796_v42 = vcombine.low %v45_v38, %v45_v38  ;;  %v797_v43 = vcombine.high %v45_v38, %v45_v38  ;;  %v991_v45 = vld [vmem:[%s1258_s1 + $0x180] sm:$0xff]   ;;  %v993_v47 = vld [vmem:[%s1258_s1 + $0x1c8] sm:$0xff]   ;;  %v997_v51 = vld [vmem:[%s1258_s1 + $0x1d0] sm:$0xff]  }
   0xf   :  { %621 = vmatprep.mubr.bf16.mxu0 %v795_v41  ;;  %v994_v48 = vld [vmem:[%s1258_s1 + $0x108] sm:$0xff]   ;;  %v998_v52 = vld [vmem:[%s1258_s1 + $0x110] sm:$0xff]   ;;  %v1000_v54 = vld [vmem:[%s1258_s1 + $0x158] sm:$0xff]  }
  0x10   :  { %874 = vmatpush3.bf16.msra.mxu0 %v970_v14  ;;  %661 = vmatprep.mubr.bf16.mxu1 %v797_v43  ;;  %v995_v49 = vld [vmem:[%s1258_s1 + $0x188] sm:$0xff]   ;;  %v999_v53 = vld [vmem:[%s1258_s1 + $0x190] sm:$0xff]   ;;  %v1001_v55 = vld [vmem:[%s1258_s1 + $0x1d8] sm:$0xff]  }
  0x11   :  { %896 = vmatpush3.bf16.msra.mxu1 %v971_v15  ;;  %875 = vmatprep.subr.bf16.mxu0 %v972_v16  ;;  %v1002_v56 = vld [vmem:[%s1258_s1 + $0x118] sm:$0xff]   ;;  %v1004_v58 = vld [vmem:[%s1258_s1 + $0x160] sm:$0xff]   ;;  %v1008_v62 = vld [vmem:[%s1258_s1 + $0x168] sm:$0xff]  }
  0x12   :  { %897 = vmatprep.subr.bf16.mxu1 %v973_v17  ;;  %v1003_v57 = vld [vmem:[%s1258_s1 + $0x198] sm:$0xff]   ;;  %v1005_v59 = vld [vmem:[%s1258_s1 + $0x1e0] sm:$0xff]   ;;  %v1009_v63 = vld [vmem:[%s1258_s1 + $0x1e8] sm:$0xff]  }
  0x13   :  { %v1006_v60 = vld [vmem:[%s1258_s1 + $0x120] sm:$0xff]   ;;  %v1010_v0 = vld [vmem:[%s1258_s1 + $0x128] sm:$0xff]   ;;  %v1012_v2 = vld [vmem:[%s1258_s1 + $0x170] sm:$0xff]  }
  0x14   :  { %876 = vmatpush3.bf16.msra.mxu0 %v974_v18  ;;  %v1007_v61 = vld [vmem:[%s1258_s1 + $0x1a0] sm:$0xff]   ;;  %v1011_v1 = vld [vmem:[%s1258_s1 + $0x1a8] sm:$0xff]   ;;  %v1013_v3 = vld [vmem:[%s1258_s1 + $0x1f0] sm:$0xff]  }
  0x15   :  { %898 = vmatpush3.bf16.msra.mxu1 %v975_v19  ;;  %877 = vmatprep.subr.bf16.mxu0 %v976_v20  ;;  %v1014_v4 = vld [vmem:[%s1258_s1 + $0x130] sm:$0xff]   ;;  %v1016_v6 = vld [vmem:[%s1258_s1 + $0x178] sm:$0xff]  }
  0x16   :  { %899 = vmatprep.subr.bf16.mxu1 %v977_v21  ;;  %v1015_v5 = vld [vmem:[%s1258_s1 + $0x1b0] sm:$0xff]   ;;  %v1017_v7 = vld [vmem:[%s1258_s1 + $0x1f8] sm:$0xff]  }
  0x17   :  { %v1018_v8 = vld [vmem:[%s1258_s1 + $0x138] sm:$0xff]   ;;  %v34_v10 = vld [vmem:[%s1259_s0 + $0x10] sm:$0xff] }
  0x18   :  { %878 = vmatpush3.bf16.msra.mxu0 %v978_v22  ;;  %v1019_v9 = vld [vmem:[%s1258_s1 + $0x1b8] sm:$0xff]   ;;  %vm38_vm2 = vcmp.ge.bf16.partialorder %v34_v10, 0  ;;  %v42_v11 = vmul.bf16 1045249613, %v34_v10 }
  0x19   :  { %900 = vmatpush3.bf16.msra.mxu1 %v979_v23  ;;  %879 = vmatprep.subr.bf16.mxu0 %v980_v24  ;;  %v35_v12 = vld [vmem:[%s1259_s0 + $0x18] sm:$0xff] }
  0x1a   :  { %901 = vmatprep.subr.bf16.mxu1 %v981_v25  ;;  %vm39_vm3 = vcmp.ge.bf16.partialorder %v35_v12, 0  ;;  %v43_v13 = vmul.bf16 1045249613, %v35_v12  ;;  %v46_v14 = vsel %vm38_vm2, %v34_v10, %v42_v11 }
  0x1b   :  { %v798_v15 = vcombine.low %v46_v14, %v46_v14  ;;  %v799_v16 = vcombine.high %v46_v14, %v46_v14 }
  0x1c   :  { %880 = vmatpush3.bf16.msra.mxu0 %v982_v26  ;;  %v47_v17 = vsel %vm39_vm3, %v35_v12, %v43_v13 }
  0x1d   :  { %902 = vmatpush3.bf16.msra.mxu1 %v983_v27  ;;  %881 = vmatprep.subr.bf16.mxu0 %v984_v28  ;;  %v800_v18 = vcombine.low %v47_v17, %v47_v17  ;;  %v801_v19 = vcombine.high %v47_v17, %v47_v17 }
  0x1e   :  { %903 = vmatprep.subr.bf16.mxu1 %v985_v29 }
  0x20   :  { %882 = vmatpush3.bf16.msra.mxu0 %v986_v30 }
  0x21   :  { %904 = vmatpush3.bf16.msra.mxu1 %v987_v31  ;;  %911 = vmatprep.subr.bf16.mxu0 %v988_v36 }
  0x22   :  { %933 = vmatprep.subr.bf16.mxu1 %v989_v39 }
  0x23   :  { %622 = vmatmul.mubr.bf16.vlgmr.msra.gmra.mrb[0].mxu0 %v794_v40 }
  0x24   :  { %662 = vmatmul.mubr.bf16.vlgmr.msra.gmra.mrb[0].mxu1 %v796_v42  ;;  %912 = vmatpush3.bf16.msra.mxu0 %v990_v44  ;;  %v866_v42 = vld [vmem:[%s1260_s2] ss:$0 sm:$0xff] }
  0x25   :  { %934 = vmatpush3.bf16.msra.mxu1 %v991_v45  ;;  %913 = vmatprep.subr.bf16.mxu0 %v992_v46 }
  0x26   :  { %935 = vmatprep.subr.bf16.mxu1 %v993_v47  ;;  %701 = vmatprep.mubr.bf16.mxu0 %v799_v16 }
  0x27   :  { %741 = vmatprep.mubr.bf16.mxu1 %v801_v19 }
  0x28   :  { %914 = vmatpush3.bf16.msra.mxu0 %v994_v48 }
  0x29   :  { %936 = vmatpush3.bf16.msra.mxu1 %v995_v49  ;;  %915 = vmatprep.subr.bf16.mxu0 %v996_v50 }
  0x2a   :  { %937 = vmatprep.subr.bf16.mxu1 %v997_v51 }
  0x2c   :  { %916 = vmatpush3.bf16.msra.mxu0 %v998_v52 }
  0x2d   :  { %938 = vmatpush3.bf16.msra.mxu1 %v999_v53  ;;  %917 = vmatprep.subr.bf16.mxu0 %v1000_v54 }
  0x2e   :  { %939 = vmatprep.subr.bf16.mxu1 %v1001_v55 }
  0x30   :  { %918 = vmatpush3.bf16.msra.mxu0 %v1002_v56 }
  0x31   :  { %940 = vmatpush3.bf16.msra.mxu1 %v1003_v57  ;;  %919 = vmatprep.subr.bf16.mxu0 %v1004_v58 }
  0x32   :  { %941 = vmatprep.subr.bf16.mxu1 %v1005_v59 }
  0x34   :  { %920 = vmatpush3.bf16.msra.mxu0 %v1006_v60 }
  0x35   :  { %942 = vmatpush3.bf16.msra.mxu1 %v1007_v61  ;;  %921 = vmatprep.subr.bf16.mxu0 %v1008_v62 }
  0x36   :  { %943 = vmatprep.subr.bf16.mxu1 %v1009_v63 }
  0x38   :  { %922 = vmatpush3.bf16.msra.mxu0 %v1010_v0 }
  0x39   :  { %944 = vmatpush3.bf16.msra.mxu1 %v1011_v1  ;;  %923 = vmatprep.subr.bf16.mxu0 %v1012_v2 }
  0x3a   :  { %945 = vmatprep.subr.bf16.mxu1 %v1013_v3 }
  0x3c   :  { %924 = vmatpush3.bf16.msra.mxu0 %v1014_v4 }
  0x3d   :  { %946 = vmatpush3.bf16.msra.mxu1 %v1015_v5  ;;  %925 = vmatprep.subr.bf16.mxu0 %v1016_v6 }
  0x3e   :  { %947 = vmatprep.subr.bf16.mxu1 %v1017_v7 }
  0x40   :  { %926 = vmatpush3.bf16.msra.mxu0 %v1018_v8 }
  0x41   :  { %948 = vmatpush3.bf16.msra.mxu1 %v1019_v9 }
  0x43   :  { %702 = vmatmul.mubr.bf16.vlgmr.msra.gmra.mrb[4].mxu0 %v798_v15 }
  0x44   :  { %742 = vmatmul.mubr.bf16.vlgmr.msra.gmra.mrb[4].mxu1 %v800_v18 }
  0xf6   :  { %v883_v20 = vpop.f32.mrb[0].mxu0 }
  0xf7   :  { %v905_v21 = vpop.f32.mrb[0].mxu1  ;;  %v884_v22 = vpop.f32.mrb[1].mxu0 }
  0xf8   :  { %v906_v23 = vpop.f32.mrb[1].mxu1  ;;  %v885_v24 = vadd.f32 %v884_v22, %v883_v20  ;;  %v886_v26 = vpop.f32.mrb[2].mxu0 }
  0xf9   :  { %v907_v25 = vadd.f32 %v906_v23, %v905_v21  ;;  %v908_v27 = vpop.f32.mrb[2].mxu1  ;;  %v887_v28 = vpop.f32.mrb[3].mxu0 }
  0xfa   :  { %v909_v29 = vpop.f32.mrb[3].mxu1 }
  0xfb   :  { %v664_v30 = vadd.f32 %v907_v25, %v885_v24 }
 0x116   :  { %v927_v31 = vpop.f32.mrb[4].mxu0 }
 0x117   :  { %v949_v32 = vpop.f32.mrb[4].mxu1  ;;  %v928_v33 = vpop.f32.mrb[5].mxu0 }
 0x118   :  { %v929_v34 = vadd.f32 %v928_v33, %v927_v31  ;;  %v950_v35 = vpop.f32.mrb[5].mxu1  ;;  %v930_v36 = vpop.f32.mrb[6].mxu0 }
 0x119   :  { %v951_v37 = vadd.f32 %v950_v35, %v949_v32  ;;  %v952_v38 = vpop.f32.mrb[6].mxu1  ;;  %v931_v39 = vpop.f32.mrb[7].mxu0 }
 0x11a   :  { %v704_v40 = vadd.f32 %v929_v34, %v664_v30  ;;  %v953_v41 = vpop.f32.mrb[7].mxu1 }
 0x11c   :  { %v744_v43 = vadd.f32 %v951_v37, %v704_v40 }
 0x11e   :  { %v762_v44 = vadd.f32 %v866_v42, %v744_v43 }
 0x120   :  { %v763_v45 = vpack.c.bf16 %v762_v44, %v762_v44  ;;  %v766_v46 = vrot.slane %v762_v44, 4  ;;  %v772_v47 = vmul.f32 %v762_v44, %v762_v44 }
 0x122   :  { %765 = vst.msk [vmem:[%s1261_s3] sm:$0xf] %vm764_vm4, %v763_v45  ;;  %v767_v48 = vadd.f32 %v766_v46, %v762_v44  ;;  %v773_v49 = vrot.slane %v772_v47, 4 }
 0x124   :  { %v768_v50 = vrot.slane %v767_v48, 2  ;;  %v774_v51 = vadd.f32 %v773_v49, %v772_v47 }
 0x126   :  { %v769_v52 = vadd.f32 %v768_v50, %v767_v48  ;;  %v775_v53 = vrot.slane %v774_v51, 2 }
 0x128   :  { %v770_v54 = vrot.slane %v769_v52, 1  ;;  %v776_v55 = vadd.f32 %v775_v53, %v774_v51 }
 0x12a   :  { %v777_v56 = vrot.slane %v776_v55, 1  ;;  %v771_v57 = vadd.f32 %v770_v54, %v769_v52 }
 0x12c   :  { %v778_v58 = vadd.f32 %v777_v56, %v776_v55 }
 0x12e   :  { %v780_v59 = vsel %vm779_vm5, %v771_v57, %v778_v58 }
 0x12f   :  { %v782_v60 = vsel %vm781_vm6, %v780_v59, 0.0 }
 0x130   :  { %785 = vst [vmem:[%s1262_s4] sm:$0xff] %v782_v60 }

// kernel: _lambda_.25
= control target key start
LH: loop header
LB: loop body
LE: loop exit
PB: predicated region body
PF: predicated region fallthrough
CT: control target
= control target key end

     0   :  { %v1273_v47 = vmov 0   ;;  %vm962_vm0 = vcmask 1040384   ;;  %vm965_vm1 = vcmask 1041408   ;;  %s1670_s1 = inlined_call_operand.vmem [shape: bf16[896,256], index: 1, kind: input, shape index: {}]   ;;  %s1671_s0 = inlined_call_operand.vmem [shape: bf16[8,896], index: 0, kind: input, shape index: {}]   ;;  %s1672_s2 = inlined_call_operand.vmem [shape: f32[1,256], index: 2, kind: input, shape index: {}]   ;;  %s1673_s3 = inlined_call_operand.vmem [shape: bf16[8,256], index: 3, kind: output, shape index: {0}]   ;;  %s1674_s4 = inlined_call_operand.vmem [shape: f32[1,8,256], index: 4, kind: output, shape index: {1}]  }
   0x1   :  { %v1105_v0 = vld [vmem:[%s1670_s1 + $0x4] ss:$8 sps:$4 sm:$0xff]   ;;  %v1109_v2 = vld [vmem:[%s1670_s1] ss:$8 sps:$4 sm:$0xff]   ;;  %v1111_v4 = vld [vmem:[%s1670_s1 + $0x14] ss:$8 sps:$4 sm:$0xff]  }
   0x2   :  { %v1107_v1 = vld [vmem:[%s1670_s1 + $0x104] ss:$8 sps:$4 sm:$0xff]   ;;  %740 = vmatprep.subr.bf16.mxu0 %v1105_v0  ;;  %v1110_v3 = vld [vmem:[%s1670_s1 + $0x100] ss:$8 sps:$4 sm:$0xff]   ;;  %v1113_v5 = vld [vmem:[%s1670_s1 + $0x114] ss:$8 sps:$4 sm:$0xff]  }
   0x3   :  { %781 = vmatprep.subr.bf16.mxu1 %v1107_v1  ;;  %741 = vmatpush1.bf16.msra.mxu0 %v1109_v2  ;;  %v1115_v6 = vld [vmem:[%s1670_s1 + $0x10] ss:$8 sps:$4 sm:$0xff]   ;;  %v1117_v8 = vld [vmem:[%s1670_s1 + $0x24] ss:$8 sps:$4 sm:$0xff]   ;;  %v1121_v10 = vld [vmem:[%s1670_s1 + $0x20] ss:$8 sps:$4 sm:$0xff]  }
   0x4   :  { %782 = vmatpush1.bf16.msra.mxu1 %v1110_v3  ;;  %742 = vmatprep.subr.bf16.mxu0 %v1111_v4  ;;  %v1116_v7 = vld [vmem:[%s1670_s1 + $0x110] ss:$8 sps:$4 sm:$0xff]   ;;  %v1119_v9 = vld [vmem:[%s1670_s1 + $0x124] ss:$8 sps:$4 sm:$0xff]   ;;  %v1122_v11 = vld [vmem:[%s1670_s1 + $0x120] ss:$8 sps:$4 sm:$0xff]  }
   0x5   :  { %783 = vmatprep.subr.bf16.mxu1 %v1113_v5  ;;  %v1123_v12 = vld [vmem:[%s1670_s1 + $0x34] ss:$8 sps:$4 sm:$0xff]   ;;  %v1127_v14 = vld [vmem:[%s1670_s1 + $0x30] ss:$8 sps:$4 sm:$0xff]   ;;  %v1129_v16 = vld [vmem:[%s1670_s1 + $0x44] ss:$8 sps:$4 sm:$0xff]  }
   0x6   :  { %v1125_v13 = vld [vmem:[%s1670_s1 + $0x134] ss:$8 sps:$4 sm:$0xff]   ;;  %v1128_v15 = vld [vmem:[%s1670_s1 + $0x130] ss:$8 sps:$4 sm:$0xff]   ;;  %v1131_v17 = vld [vmem:[%s1670_s1 + $0x144] ss:$8 sps:$4 sm:$0xff]  }
   0x7   :  { %743 = vmatpush1.bf16.msra.mxu0 %v1115_v6  ;;  %v1133_v18 = vld [vmem:[%s1670_s1 + $0x40] ss:$8 sps:$4 sm:$0xff]   ;;  %v1135_v20 = vld [vmem:[%s1670_s1 + $0x54] ss:$8 sps:$4 sm:$0xff]   ;;  %v1139_v22 = vld [vmem:[%s1670_s1 + $0x50] ss:$8 sps:$4 sm:$0xff]  }
   0x8   :  { %784 = vmatpush1.bf16.msra.mxu1 %v1116_v7  ;;  %744 = vmatprep.subr.bf16.mxu0 %v1117_v8  ;;  %v1134_v19 = vld [vmem:[%s1670_s1 + $0x140] ss:$8 sps:$4 sm:$0xff]   ;;  %v1137_v21 = vld [vmem:[%s1670_s1 + $0x154] ss:$8 sps:$4 sm:$0xff]   ;;  %v1140_v23 = vld [vmem:[%s1670_s1 + $0x150] ss:$8 sps:$4 sm:$0xff]  }
   0x9   :  { %785 = vmatprep.subr.bf16.mxu1 %v1119_v9  ;;  %v1141_v24 = vld [vmem:[%s1670_s1 + $0x64] ss:$8 sps:$4 sm:$0xff]   ;;  %v1145_v26 = vld [vmem:[%s1670_s1 + $0x60] ss:$8 sps:$4 sm:$0xff]   ;;  %v1147_v28 = vld [vmem:[%s1670_s1 + $0x74] ss:$8 sps:$4 sm:$0xff]  }
   0xa   :  { %v1143_v25 = vld [vmem:[%s1670_s1 + $0x164] ss:$8 sps:$4 sm:$0xff]   ;;  %v1146_v27 = vld [vmem:[%s1670_s1 + $0x160] ss:$8 sps:$4 sm:$0xff]   ;;  %v1149_v29 = vld [vmem:[%s1670_s1 + $0x174] ss:$8 sps:$4 sm:$0xff]  }
   0xb   :  { %745 = vmatpush1.bf16.msra.mxu0 %v1121_v10  ;;  %v1151_v30 = vld [vmem:[%s1670_s1 + $0x70] ss:$8 sps:$4 sm:$0xff]   ;;  %v1153_v32 = vld [vmem:[%s1670_s1 + $0x84] ss:$8 sps:$4 sm:$0xff]   ;;  %v1157_v34 = vld [vmem:[%s1670_s1 + $0x80] ss:$8 sps:$4 sm:$0xff]  }
   0xc   :  { %786 = vmatpush1.bf16.msra.mxu1 %v1122_v11  ;;  %746 = vmatprep.subr.bf16.mxu0 %v1123_v12  ;;  %v1152_v31 = vld [vmem:[%s1670_s1 + $0x170] ss:$8 sps:$4 sm:$0xff]   ;;  %v1155_v33 = vld [vmem:[%s1670_s1 + $0x184] ss:$8 sps:$4 sm:$0xff]   ;;  %v1158_v35 = vld [vmem:[%s1670_s1 + $0x180] ss:$8 sps:$4 sm:$0xff]  }
   0xd   :  { %787 = vmatprep.subr.bf16.mxu1 %v1125_v13  ;;  %v1159_v36 = vld [vmem:[%s1670_s1 + $0x94] ss:$8 sps:$4 sm:$0xff]   ;;  %v1163_v38 = vld [vmem:[%s1670_s1 + $0x90] ss:$8 sps:$4 sm:$0xff]   ;;  %v1165_v40 = vld [vmem:[%s1670_s1 + $0xa4] ss:$8 sps:$4 sm:$0xff]  }
   0xe   :  { %v1161_v37 = vld [vmem:[%s1670_s1 + $0x194] ss:$8 sps:$4 sm:$0xff]   ;;  %v1164_v39 = vld [vmem:[%s1670_s1 + $0x190] ss:$8 sps:$4 sm:$0xff]   ;;  %v1167_v41 = vld [vmem:[%s1670_s1 + $0x1a4] ss:$8 sps:$4 sm:$0xff]  }
   0xf   :  { %747 = vmatpush1.bf16.msra.mxu0 %v1127_v14  ;;  %v1169_v42 = vld [vmem:[%s1670_s1 + $0xa0] ss:$8 sps:$4 sm:$0xff]   ;;  %v1171_v44 = vld [vmem:[%s1670_s1 + $0xb4] ss:$8 sps:$4 sm:$0xff]   ;;  %v1175_v50 = vld [vmem:[%s1670_s1 + $0xb0] ss:$8 sps:$4 sm:$0xff]  }
  0x10   :  { %788 = vmatpush1.bf16.msra.mxu1 %v1128_v15  ;;  %748 = vmatprep.subr.bf16.mxu0 %v1129_v16  ;;  %v1170_v43 = vld [vmem:[%s1670_s1 + $0x1a0] ss:$8 sps:$4 sm:$0xff]   ;;  %v1173_v45 = vld [vmem:[%s1670_s1 + $0x1b4] ss:$8 sps:$4 sm:$0xff]   ;;  %v1176_v51 = vld [vmem:[%s1670_s1 + $0x1b0] ss:$8 sps:$4 sm:$0xff]  }
  0x11   :  { %789 = vmatprep.subr.bf16.mxu1 %v1131_v17  ;;  %v33_v46 = vld [vmem:[%s1671_s0] sm:$0xff]  ;;  %v34_v49 = vld [vmem:[%s1671_s0 + $0x8] sm:$0xff]  ;;  %v1183_v59 = vld [vmem:[%s1670_s1 + $0xd4] ss:$8 sps:$4 sm:$0xff]  }
  0x12   :  { %v37_v48 = vmax.bf16 %v1273_v47, %v33_v46  ;;  %v38_v52 = vmax.bf16 %v1273_v47, %v34_v49  ;;  %v1177_v53 = vld [vmem:[%s1670_s1 + $0xc4] ss:$8 sps:$4 sm:$0xff]   ;;  %v1181_v57 = vld [vmem:[%s1670_s1 + $0xc0] ss:$8 sps:$4 sm:$0xff]   ;;  %v1185_v60 = vld [vmem:[%s1670_s1 + $0x1d4] ss:$8 sps:$4 sm:$0xff]  }
  0x13   :  { %749 = vmatpush1.bf16.msra.mxu0 %v1133_v18  ;;  %v1179_v54 = vld [vmem:[%s1670_s1 + $0x1c4] ss:$8 sps:$4 sm:$0xff]   ;;  %v1182_v58 = vld [vmem:[%s1670_s1 + $0x1c0] ss:$8 sps:$4 sm:$0xff]   ;;  %v1187_v61 = vld [vmem:[%s1670_s1 + $0xd0] ss:$8 sps:$4 sm:$0xff]  }
  0x14   :  { %790 = vmatpush1.bf16.msra.mxu1 %v1134_v19  ;;  %750 = vmatprep.subr.bf16.mxu0 %v1135_v20  ;;  %v983_v55 = vcombine.high %v37_v48, %v37_v48  ;;  %v985_v56 = vcombine.high %v38_v52, %v38_v52  ;;  %v1188_v62 = vld [vmem:[%s1670_s1 + $0x1d0] ss:$8 sps:$4 sm:$0xff]   ;;  %v1189_v63 = vld [vmem:[%s1670_s1 + $0xe4] ss:$8 sps:$4 sm:$0xff]   ;;  %v1193_v1 = vld [vmem:[%s1670_s1 + $0xe0] ss:$8 sps:$4 sm:$0xff]   ;;  %v982_v9 = vcombine.low %v37_v48, %v37_v48 }
  0x15   :  { %791 = vmatprep.subr.bf16.mxu1 %v1137_v21  ;;  %v1191_v0 = vld [vmem:[%s1670_s1 + $0x1e4] ss:$8 sps:$4 sm:$0xff]   ;;  %v1194_v2 = vld [vmem:[%s1670_s1 + $0x1e0] ss:$8 sps:$4 sm:$0xff]   ;;  %v1195_v3 = vld [vmem:[%s1670_s1 + $0xf4] ss:$8 sps:$4 sm:$0xff]   ;;  %v984_v10 = vcombine.low %v38_v52, %v38_v52 }
  0x16   :  { %772 = vmatprep.mubr.bf16.mxu0 %v983_v55  ;;  %813 = vmatprep.mubr.bf16.mxu1 %v985_v56  ;;  %v1197_v4 = vld [vmem:[%s1670_s1 + $0x1f4] ss:$8 sps:$4 sm:$0xff]   ;;  %v1199_v5 = vld [vmem:[%s1670_s1 + $0xf0] ss:$8 sps:$4 sm:$0xff]   ;;  %v1203_v7 = vld [vmem:[%s1670_s1 + $0x204] ss:$8 sps:$4 sm:$0xff]  }
  0x17   :  { %751 = vmatpush1.bf16.msra.mxu0 %v1139_v22  ;;  %v1200_v6 = vld [vmem:[%s1670_s1 + $0x1f0] ss:$8 sps:$4 sm:$0xff]   ;;  %v1227_v8 = vld [vmem:[%s1670_s1 + $0x304] ss:$8 sps:$4 sm:$0xff]   ;;  %v1201_v11 = vld [vmem:[%s1670_s1 + $0x200] ss:$8 sps:$4 sm:$0xff]  }
  0x18   :  { %792 = vmatpush1.bf16.msra.mxu1 %v1140_v23  ;;  %752 = vmatprep.subr.bf16.mxu0 %v1141_v24  ;;  %v1225_v12 = vld [vmem:[%s1670_s1 + $0x300] ss:$8 sps:$4 sm:$0xff]   ;;  %v1206_v13 = vld [vmem:[%s1670_s1 + $0x214] ss:$8 sps:$4 sm:$0xff]   ;;  %v1204_v15 = vld [vmem:[%s1670_s1 + $0x210] ss:$8 sps:$4 sm:$0xff]  }
  0x19   :  { %793 = vmatprep.subr.bf16.mxu1 %v1143_v25  ;;  %v1233_v14 = vld [vmem:[%s1670_s1 + $0x314] ss:$8 sps:$4 sm:$0xff]   ;;  %v1231_v16 = vld [vmem:[%s1670_s1 + $0x310] ss:$8 sps:$4 sm:$0xff]   ;;  %v1209_v17 = vld [vmem:[%s1670_s1 + $0x224] ss:$8 sps:$4 sm:$0xff]  }
  0x1a   :  { %v1239_v18 = vld [vmem:[%s1670_s1 + $0x324] ss:$8 sps:$4 sm:$0xff]   ;;  %v1207_v19 = vld [vmem:[%s1670_s1 + $0x220] ss:$8 sps:$4 sm:$0xff]   ;;  %v1212_v21 = vld [vmem:[%s1670_s1 + $0x234] ss:$8 sps:$4 sm:$0xff]  }
  0x1b   :  { %753 = vmatpush1.bf16.msra.mxu0 %v1145_v26  ;;  %v1237_v20 = vld [vmem:[%s1670_s1 + $0x320] ss:$8 sps:$4 sm:$0xff]   ;;  %v1245_v22 = vld [vmem:[%s1670_s1 + $0x334] ss:$8 sps:$4 sm:$0xff]   ;;  %v1210_v24 = vld [vmem:[%s1670_s1 + $0x230] ss:$8 sps:$4 sm:$0xff]  }
  0x1c   :  { %794 = vmatpush1.bf16.msra.mxu1 %v1146_v27  ;;  %754 = vmatprep.subr.bf16.mxu0 %v1147_v28  ;;  %v35_v23 = vld [vmem:[%s1671_s0 + $0x10] sm:$0xff]  ;;  %v1215_v27 = vld [vmem:[%s1670_s1 + $0x244] ss:$8 sps:$4 sm:$0xff]   ;;  %v1240_v52 = vld [vmem:[%s1670_s1 + $0x2a0] ss:$8 sps:$4 sm:$0xff]  }
  0x1d   :  { %795 = vmatprep.subr.bf16.mxu1 %v1149_v29  ;;  %v1243_v25 = vld [vmem:[%s1670_s1 + $0x330] ss:$8 sps:$4 sm:$0xff]   ;;  %v1552_v26 = vmax.bf16 %v1273_v47, %v35_v23  ;;  %v1251_v28 = vld [vmem:[%s1670_s1 + $0x344] ss:$8 sps:$4 sm:$0xff]   ;;  %v1236_v49 = vld [vmem:[%s1670_s1 + $0x294] ss:$8 sps:$4 sm:$0xff]  }
  0x1e   :  { %v1230_v46 = vld [vmem:[%s1670_s1 + $0x284] ss:$8 sps:$4 sm:$0xff]   ;;  %v1252_v56 = vld [vmem:[%s1670_s1 + $0x2c0] ss:$8 sps:$4 sm:$0xff]  }
  0x1f   :  { %755 = vmatpush1.bf16.msra.mxu0 %v1151_v30  ;;  %v987_v29 = vcombine.high %v1552_v26, %v1552_v26  ;;  %v1213_v30 = vld [vmem:[%s1670_s1 + $0x240] ss:$8 sps:$4 sm:$0xff]   ;;  %v1254_v55 = vld [vmem:[%s1670_s1 + $0x2c4] ss:$8 sps:$4 sm:$0xff]  }
  0x20   :  { %796 = vmatpush1.bf16.msra.mxu1 %v1152_v31  ;;  %756 = vmatprep.subr.bf16.mxu0 %v1153_v32  ;;  %v1249_v31 = vld [vmem:[%s1670_s1 + $0x340] ss:$8 sps:$4 sm:$0xff]   ;;  %v1218_v32 = vld [vmem:[%s1670_s1 + $0x254] ss:$8 sps:$4 sm:$0xff]  }
  0x21   :  { %797 = vmatprep.subr.bf16.mxu1 %v1155_v33  ;;  %v1257_v33 = vld [vmem:[%s1670_s1 + $0x354] ss:$8 sps:$4 sm:$0xff]  }
  0x23   :  { %757 = vmatpush1.bf16.msra.mxu0 %v1157_v34  ;;  %v1216_v34 = vld [vmem:[%s1670_s1 + $0x250] ss:$8 sps:$4 sm:$0xff]  }
  0x24   :  { %798 = vmatpush1.bf16.msra.mxu1 %v1158_v35  ;;  %758 = vmatprep.subr.bf16.mxu0 %v1159_v36  ;;  %v1255_v35 = vld [vmem:[%s1670_s1 + $0x350] ss:$8 sps:$4 sm:$0xff]   ;;  %v1221_v36 = vld [vmem:[%s1670_s1 + $0x264] ss:$8 sps:$4 sm:$0xff]  }
  0x25   :  { %799 = vmatprep.subr.bf16.mxu1 %v1161_v37  ;;  %v1263_v37 = vld [vmem:[%s1670_s1 + $0x364] ss:$8 sps:$4 sm:$0xff]  }
  0x27   :  { %759 = vmatpush1.bf16.msra.mxu0 %v1163_v38  ;;  %v1219_v38 = vld [vmem:[%s1670_s1 + $0x260] ss:$8 sps:$4 sm:$0xff]  }
  0x28   :  { %800 = vmatpush1.bf16.msra.mxu1 %v1164_v39  ;;  %760 = vmatprep.subr.bf16.mxu0 %v1165_v40  ;;  %v1261_v39 = vld [vmem:[%s1670_s1 + $0x360] ss:$8 sps:$4 sm:$0xff]   ;;  %v36_v40 = vld [vmem:[%s1671_s0 + $0x18] sm:$0xf] }
  0x29   :  { %801 = vmatprep.subr.bf16.mxu1 %v1167_v41  ;;  %v1224_v41 = vld [vmem:[%s1670_s1 + $0x274] ss:$8 sps:$4 sm:$0xff]  }
  0x2b   :  { %761 = vmatpush1.bf16.msra.mxu0 %v1169_v42  ;;  %v1269_v42 = vld [vmem:[%s1670_s1 + $0x374] ss:$8 sps:$4 sm:$0xff]  }
  0x2c   :  { %802 = vmatpush1.bf16.msra.mxu1 %v1170_v43  ;;  %762 = vmatprep.subr.bf16.mxu0 %v1171_v44  ;;  %v40_v43 = vmax.bf16 %v1273_v47, %v36_v40  ;;  %v1222_v44 = vld [vmem:[%s1670_s1 + $0x270] ss:$8 sps:$4 sm:$0xff]  }
  0x2d   :  { %803 = vmatprep.subr.bf16.mxu1 %v1173_v45  ;;  %v1267_v45 = vld [vmem:[%s1670_s1 + $0x370] ss:$8 sps:$4 sm:$0xff]  }
  0x2e   :  { %v988_v48 = vcombine.low %v40_v43, %v40_v43 }
  0x2f   :  { %763 = vmatpush1.bf16.msra.mxu0 %v1175_v50  ;;  %v1234_v50 = vld [vmem:[%s1670_s1 + $0x290] ss:$8 sps:$4 sm:$0xff]  }
  0x30   :  { %804 = vmatpush1.bf16.msra.mxu1 %v1176_v51  ;;  %764 = vmatprep.subr.bf16.mxu0 %v1177_v53  ;;  %v1242_v51 = vld [vmem:[%s1670_s1 + $0x2a4] ss:$8 sps:$4 sm:$0xff]   ;;  %v1248_v53 = vld [vmem:[%s1670_s1 + $0x2b4] ss:$8 sps:$4 sm:$0xff]  }
  0x31   :  { %805 = vmatprep.subr.bf16.mxu1 %v1179_v54  ;;  %v1246_v54 = vld [vmem:[%s1670_s1 + $0x2b0] ss:$8 sps:$4 sm:$0xff]  }
  0x33   :  { %765 = vmatpush1.bf16.msra.mxu0 %v1181_v57  ;;  %v1260_v57 = vld [vmem:[%s1670_s1 + $0x2d4] ss:$8 sps:$4 sm:$0xff]  }
  0x34   :  { %806 = vmatpush1.bf16.msra.mxu1 %v1182_v58  ;;  %766 = vmatprep.subr.bf16.mxu0 %v1183_v59  ;;  %v1258_v58 = vld [vmem:[%s1670_s1 + $0x2d0] ss:$8 sps:$4 sm:$0xff]   ;;  %v1266_v59 = vld [vmem:[%s1670_s1 + $0x2e4] ss:$8 sps:$4 sm:$0xff]  }
  0x35   :  { %807 = vmatprep.subr.bf16.mxu1 %v1185_v60  ;;  %v1264_v60 = vld [vmem:[%s1670_s1 + $0x2e0] ss:$8 sps:$4 sm:$0xff]  }
  0x37   :  { %767 = vmatpush1.bf16.msra.mxu0 %v1187_v61  ;;  %v1272_v61 = vld [vmem:[%s1670_s1 + $0x2f4] ss:$8 sps:$4 sm:$0xff]  }
  0x38   :  { %808 = vmatpush1.bf16.msra.mxu1 %v1188_v62  ;;  %768 = vmatprep.subr.bf16.mxu0 %v1189_v63  ;;  %v1270_v62 = vld [vmem:[%s1670_s1 + $0x2f0] ss:$8 sps:$4 sm:$0xff]   ;;  %v986_v63 = vcombine.low %v1552_v26, %v1552_v26 }
  0x39   :  { %809 = vmatprep.subr.bf16.mxu1 %v1191_v0 }
  0x3b   :  { %769 = vmatpush1.bf16.msra.mxu0 %v1193_v1 }
  0x3c   :  { %810 = vmatpush1.bf16.msra.mxu1 %v1194_v2  ;;  %770 = vmatprep.subr.bf16.mxu0 %v1195_v3 }
  0x3d   :  { %811 = vmatprep.subr.bf16.mxu1 %v1197_v4 }
  0x3f   :  { %771 = vmatpush1.bf16.msra.mxu0 %v1199_v5 }
  0x40   :  { %812 = vmatpush1.bf16.msra.mxu1 %v1200_v6  ;;  %822 = vmatprep.subr.bf16.mxu0 %v1203_v7 }
  0x41   :  { %863 = vmatprep.subr.bf16.mxu1 %v1227_v8 }
  0x42   :  { %773 = vmatmul.mubr.bf16.vlgmr.msra.gmra.mrb[0].mxu0 %v982_v9 }
  0x43   :  { %814 = vmatmul.mubr.bf16.vlgmr.msra.gmra.mrb[0].mxu1 %v984_v10  ;;  %823 = vmatpush1.bf16.msra.mxu0 %v1201_v11 }
  0x44   :  { %864 = vmatpush1.bf16.msra.mxu1 %v1225_v12  ;;  %824 = vmatprep.subr.bf16.mxu0 %v1206_v13 }
  0x45   :  { %865 = vmatprep.subr.bf16.mxu1 %v1233_v14  ;;  %895 = vmatprep.mubr.bf16.mxu1 %v1273_v47  ;;  %v1228_v47 = vld [vmem:[%s1670_s1 + $0x280] ss:$8 sps:$4 sm:$0xff]   ;;  %v915_v14 = vlaneseq }
  0x46   :  { %854 = vmatprep.mubr.bf16.mxu0 %v987_v29 }
  0x47   :  { %825 = vmatpush1.bf16.msra.mxu0 %v1204_v15  ;;  %v916_v15 = vshrl.u32 %v915_v14, 7 }
  0x48   :  { %866 = vmatpush1.bf16.msra.mxu1 %v1231_v16  ;;  %826 = vmatprep.subr.bf16.mxu0 %v1209_v17  ;;  %v913_v17 = vld [vmem:[%s1672_s2] sm:$0x3] }
  0x49   :  { %867 = vmatprep.subr.bf16.mxu1 %v1239_v18  ;;  %v917_v16 = vsub.s32 0, %v916_v15  ;;  %v921_v18 = vsub.s32 1, %v916_v15 }
  0x4b   :  { %827 = vmatpush1.bf16.msra.mxu0 %v1207_v19 }
  0x4c   :  { %868 = vmatpush1.bf16.msra.mxu1 %v1237_v20  ;;  %828 = vmatprep.subr.bf16.mxu0 %v1212_v21  ;;  %v918_v21 = vrot.slane %v913_v17, %v917_v16 }
  0x4d   :  { %869 = vmatprep.subr.bf16.mxu1 %v1245_v22 }
  0x4f   :  { %829 = vmatpush1.bf16.msra.mxu0 %v1210_v24  ;;  %v922_v24 = vrot.slane %v913_v17, %v921_v18 }
  0x50   :  { %870 = vmatpush1.bf16.msra.mxu1 %v1243_v25  ;;  %830 = vmatprep.subr.bf16.mxu0 %v1215_v27 }
  0x51   :  { %871 = vmatprep.subr.bf16.mxu1 %v1251_v28 }
  0x53   :  { %831 = vmatpush1.bf16.msra.mxu0 %v1213_v30 }
  0x54   :  { %872 = vmatpush1.bf16.msra.mxu1 %v1249_v31  ;;  %832 = vmatprep.subr.bf16.mxu0 %v1218_v32 }
  0x55   :  { %873 = vmatprep.subr.bf16.mxu1 %v1257_v33 }
  0x57   :  { %833 = vmatpush1.bf16.msra.mxu0 %v1216_v34 }
  0x58   :  { %874 = vmatpush1.bf16.msra.mxu1 %v1255_v35  ;;  %834 = vmatprep.subr.bf16.mxu0 %v1221_v36 }
  0x59   :  { %875 = vmatprep.subr.bf16.mxu1 %v1263_v37 }
  0x5b   :  { %835 = vmatpush1.bf16.msra.mxu0 %v1219_v38 }
  0x5c   :  { %876 = vmatpush1.bf16.msra.mxu1 %v1261_v39  ;;  %836 = vmatprep.subr.bf16.mxu0 %v1224_v41 }
  0x5d   :  { %877 = vmatprep.subr.bf16.mxu1 %v1269_v42 }
  0x5f   :  { %837 = vmatpush1.bf16.msra.mxu0 %v1222_v44 }
  0x60   :  { %878 = vmatpush1.bf16.msra.mxu1 %v1267_v45  ;;  %838 = vmatprep.subr.bf16.mxu0 %v1230_v46 }
  0x63   :  { %896 = vmatmul.mubr.bf16.vlgmr.msra.gmra.mrb[4].mxu1 %v988_v48  ;;  %839 = vmatpush1.bf16.msra.mxu0 %v1228_v47 }
  0x64   :  { %840 = vmatprep.subr.bf16.mxu0 %v1236_v49 }
  0x67   :  { %841 = vmatpush1.bf16.msra.mxu0 %v1234_v50 }
  0x68   :  { %842 = vmatprep.subr.bf16.mxu0 %v1242_v51 }
  0x6b   :  { %843 = vmatpush1.bf16.msra.mxu0 %v1240_v52 }
  0x6c   :  { %844 = vmatprep.subr.bf16.mxu0 %v1248_v53 }
  0x6f   :  { %845 = vmatpush1.bf16.msra.mxu0 %v1246_v54 }
  0x70   :  { %846 = vmatprep.subr.bf16.mxu0 %v1254_v55 }
  0x73   :  { %847 = vmatpush1.bf16.msra.mxu0 %v1252_v56 }
  0x74   :  { %848 = vmatprep.subr.bf16.mxu0 %v1260_v57 }
  0x77   :  { %849 = vmatpush1.bf16.msra.mxu0 %v1258_v58 }
  0x78   :  { %850 = vmatprep.subr.bf16.mxu0 %v1266_v59 }
  0x7b   :  { %851 = vmatpush1.bf16.msra.mxu0 %v1264_v60 }
  0x7c   :  { %852 = vmatprep.subr.bf16.mxu0 %v1272_v61 }
  0x7f   :  { %853 = vmatpush1.bf16.msra.mxu0 %v1270_v62 }
  0x82   :  { %855 = vmatmul.mubr.bf16.vlgmr.msra.gmra.mrb[4].mxu0 %v986_v63 }
 0x115   :  { %v774_v0 = vpop.f32.mrb[0].mxu0 }
 0x116   :  { %v815_v1 = vpop.f32.mrb[0].mxu1  ;;  %v776_v3 = vpop.f32.mrb[1].mxu0 }
 0x117   :  { %v816_v2 = vadd.f32 %v815_v1, %v774_v0  ;;  %v817_v4 = vpop.f32.mrb[1].mxu1  ;;  %v778_v6 = vpop.f32.mrb[2].mxu0 }
 0x118   :  { %v818_v5 = vadd.f32 %v817_v4, %v776_v3  ;;  %v819_v7 = vpop.f32.mrb[2].mxu1  ;;  %v779_v8 = vpop.f32.mrb[3].mxu0 }
 0x119   :  { %v820_v9 = vpop.f32.mrb[3].mxu1 }
 0x136   :  { %v897_v10 = vpop.f32.mrb[4].mxu1 }
 0x137   :  { %v899_v11 = vpop.f32.mrb[5].mxu1 }
 0x138   :  { %v901_v12 = vpop.f32.mrb[6].mxu1 }
 0x139   :  { %v902_v13 = vpop.f32.mrb[7].mxu1 }
 0x155   :  { %v856_v19 = vpop.f32.mrb[4].mxu0 }
 0x156   :  { %v857_v20 = vadd.f32 %v856_v19, %v816_v2  ;;  %v858_v22 = vpop.f32.mrb[5].mxu0 }
 0x157   :  { %v859_v23 = vadd.f32 %v858_v22, %v818_v5  ;;  %v860_v25 = vpop.f32.mrb[6].mxu0 }
 0x158   :  { %v898_v26 = vadd.f32 %v897_v10, %v857_v20  ;;  %v861_v27 = vpop.f32.mrb[7].mxu0 }
 0x159   :  { %v900_v28 = vadd.f32 %v899_v11, %v859_v23 }
 0x15a   :  { %v925_v29 = vadd.f32 %v918_v21, %v898_v26 }
 0x15b   :  { %v926_v30 = vadd.f32 %v922_v24, %v900_v28 }
 0x15c   :  { %v936_v31 = vrot.slane %v925_v29, 4  ;;  %v948_v32 = vmul.f32 %v925_v29, %v925_v29 }
 0x15d   :  { %v1102_v33 = vpack.c.bf16 %v926_v30, %v925_v29  ;;  %v942_v34 = vrot.slane %v926_v30, 4  ;;  %v949_v35 = vmul.f32 %v926_v30, %v926_v30 }
 0x15e   :  { %v937_v36 = vadd.f32 %v936_v31, %v925_v29  ;;  %v950_v37 = vrot.slane %v948_v32, 4 }
 0x15f   :  { %935 = vst [vmem:[%s1673_s3] sm:$0xff] %v1102_v33  ;;  %v943_v38 = vadd.f32 %v942_v34, %v926_v30  ;;  %v956_v39 = vrot.slane %v949_v35, 4 }
 0x160   :  { %v938_v40 = vrot.slane %v937_v36, 2  ;;  %v951_v41 = vadd.f32 %v950_v37, %v948_v32 }
 0x161   :  { %v944_v42 = vrot.slane %v943_v38, 2  ;;  %v957_v43 = vadd.f32 %v956_v39, %v949_v35 }
 0x162   :  { %v939_v44 = vadd.f32 %v938_v40, %v937_v36  ;;  %v952_v45 = vrot.slane %v951_v41, 2 }
 0x163   :  { %v945_v46 = vadd.f32 %v944_v42, %v943_v38  ;;  %v958_v48 = vrot.slane %v957_v43, 2 }
 0x164   :  { %v940_v47 = vrot.slane %v939_v44, 1  ;;  %v953_v49 = vadd.f32 %v952_v45, %v951_v41 }
 0x165   :  { %v946_v50 = vrot.slane %v945_v46, 1  ;;  %v959_v51 = vadd.f32 %v958_v48, %v957_v43 }
 0x166   :  { %v954_v52 = vrot.slane %v953_v49, 1  ;;  %v941_v54 = vadd.f32 %v940_v47, %v939_v44 }
 0x167   :  { %v960_v53 = vrot.slane %v959_v51, 1  ;;  %v947_v56 = vadd.f32 %v946_v50, %v945_v46 }
 0x168   :  { %v955_v55 = vadd.f32 %v954_v52, %v953_v49 }
 0x169   :  { %v961_v57 = vadd.f32 %v960_v53, %v959_v51 }
 0x16a   :  { %v963_v58 = vsel %vm962_vm0, %v941_v54, %v955_v55 }
 0x16b   :  { %v966_v59 = vsel %vm965_vm1, %v963_v58, 0.0  ;;  %v964_v60 = vsel %vm962_vm0, %v947_v56, %v961_v57 }
 0x16c   :  { %v967_v61 = vsel %vm965_vm1, %v964_v60, 0.0  ;;  %972 = vst [vmem:[%s1674_s4] sm:$0xff] %v966_v59 }
 0x16d   :  { %973 = vst [vmem:[%s1674_s4 + $0x8] sm:$0xff] %v967_v61 }

// kernel: squeeze.22
= control target key start
LH: loop header
LB: loop body
LE: loop exit
PB: predicated region body
PF: predicated region fallthrough
CT: control target
= control target key end

     0   :  { %s66_s8 = smov 80   ;;  %vm7_vm0 = vcmask 130048   ;;  %s67_s11 = smov 96   ;;  %s117_s0 = inlined_call_operand.vmem [shape: f32[128], index: 0, kind: input, shape index: {}]   ;;  %s118_s1 = inlined_call_operand.vmem [shape: f32[8,16], index: 1, kind: output, shape index: {}]  }
   0x1   :  { %v4_v0 = vld [vmem:[%s117_s0] sm:$0x1]  ;;  %s65_s0 = smov 112   ;;  %s68_s12 = smov 64  }
   0x2   :  { %5 = vst [vmem:[#allocation0] sm:$0x1] %v4_v0  ;;  %s69_s13 = smov 48   ;;  %s70_s14 = smov 32  }
   0x3   :  { %s71_s15 = smov 16  }
   0x9   :  { %v9_v1 = vld [vmem:[#allocation0] sm:$0x1]  }
   0xa   :  { %v21_v2 = vld [vmem:[#allocation0] sm:$0x1]   ;;  %10 = vrot.lane.b32.xlu0 %v9_v1, %s65_s0 }
   0xb   :  { %22 = vrot.lane.b32.xlu1 %v21_v2, %s66_s8  ;;  %v15_v3 = vld [vmem:[#allocation0] sm:$0x1]  }
   0xc   :  { %v27_v4 = vld [vmem:[#allocation0] sm:$0x1]  }
   0xd   :  { %v6_v5 = vld [vmem:[#allocation0] sm:$0x1]  }
   0xe   :  { %8 = vst.msk [vmem:[%s118_s1] sm:$0x1] %vm7_vm0, %v6_v5   ;;  %16 = vrot.lane.b32.xlu0 %v15_v3, %s67_s11  ;;  %v33_v6 = vld [vmem:[#allocation0] sm:$0x1]  }
   0xf   :  { %28 = vrot.lane.b32.xlu1 %v27_v4, %s68_s12  ;;  %v39_v7 = vld [vmem:[#allocation0] sm:$0x1]  }
  0x10   :  { %v45_v8 = vld [vmem:[#allocation0] sm:$0x1]  }
  0x12   :  { %34 = vrot.lane.b32.xlu0 %v33_v6, %s69_s13 }
  0x13   :  { %40 = vrot.lane.b32.xlu1 %v39_v7, %s70_s14 }
  0x16   :  { %46 = vrot.lane.b32.xlu0 %v45_v8, %s71_s15 }
  0x7c   :  { %v11_v9 = vpop.permute.xlu0 %10  }
  0x7d   :  { %v23_v10 = vpop.permute.xlu1 %22   ;;  %51 = vst.msk [vmem:[%s118_s1 + $0x1] sm:$0x1] %vm7_vm0, %v11_v9  }
  0x7e   :  { %53 = vst.msk [vmem:[%s118_s1 + $0x3] sm:$0x1] %vm7_vm0, %v23_v10  }
  0x80   :  { %v17_v11 = vpop.permute.xlu0 %16  }
  0x81   :  { %v29_v12 = vpop.permute.xlu1 %28   ;;  %52 = vst.msk [vmem:[%s118_s1 + $0x2] sm:$0x1] %vm7_vm0, %v17_v11  }
  0x82   :  { %54 = vst.msk [vmem:[%s118_s1 + $0x4] sm:$0x1] %vm7_vm0, %v29_v12  }
  0x84   :  { %v35_v13 = vpop.permute.xlu0 %34  }
  0x85   :  { %v41_v14 = vpop.permute.xlu1 %40   ;;  %55 = vst.msk [vmem:[%s118_s1 + $0x5] sm:$0x1] %vm7_vm0, %v35_v13  }
  0x86   :  { %56 = vst.msk [vmem:[%s118_s1 + $0x6] sm:$0x1] %vm7_vm0, %v41_v14  }
  0x88   :  { %v47_v15 = vpop.permute.xlu0 %46  }
  0x89   :  { %57 = vst.msk [vmem:[%s118_s1 + $0x7] sm:$0x1] %vm7_vm0, %v47_v15  }

// kernel: _lambda_.26
= control target key start
LH: loop header
LB: loop body
LE: loop exit
PB: predicated region body
PF: predicated region fallthrough
CT: control target
= control target key end

     0   :  { %v19_v0 = vlaneseq  ;;  %s92_s0 = inlined_call_operand.vmem [shape: bf16[8,256], index: 0, kind: input, shape index: {}]   ;;  %s93_s1 = inlined_call_operand.vmem [shape: f32[1,256], index: 1, kind: input, shape index: {}]   ;;  %s94_s2 = inlined_call_operand.vmem [shape: f32[1,256], index: 2, kind: input, shape index: {}]   ;;  %s95_s3 = inlined_call_operand.vmem [shape: bf16[8,256], index: 3, kind: output, shape index: {}]  }
   0x1   :  { %v14_v1 = vld [vmem:[%s92_s0] sm:$0xff] }
   0x2   :  { %v20_v2 = vshrl.u32 %v19_v0, 7  ;;  %v17_v3 = vld [vmem:[%s93_s1] sm:$0x3]  ;;  %v15_v5 = vunpack.c.l.bf16 %v14_v1  ;;  %v16_v6 = vunpack.c.h.bf16 %v14_v1 }
   0x3   :  { %v31_v4 = vld [vmem:[%s94_s2] sm:$0x3] }
   0x4   :  { %v21_v7 = vsub.s32 0, %v20_v2  ;;  %v25_v8 = vsub.s32 1, %v20_v2 }
   0x6   :  { %v22_v9 = vrot.slane %v17_v3, %v21_v7  ;;  %v26_v10 = vrot.slane %v17_v3, %v25_v8  ;;  %v36_v11 = vrot.slane %v31_v4, %v21_v7  ;;  %v40_v12 = vrot.slane %v31_v4, %v25_v8 }
   0x8   :  { %v29_v13 = vmul.f32 %v22_v9, %v15_v5  ;;  %v30_v14 = vmul.f32 %v26_v10, %v16_v6 }
   0xa   :  { %v43_v15 = vadd.f32 %v36_v11, %v29_v13  ;;  %v44_v16 = vadd.f32 %v40_v12, %v30_v14 }
   0xc   :  { %v59_v17 = vpack.c.bf16 %v44_v16, %v43_v15 }
   0xe   :  { %53 = vst [vmem:[%s95_s3] sm:$0xff] %v59_v17 }

// kernel: tile.89
= control target key start
LH: loop header
LB: loop body
LE: loop exit
PB: predicated region body
PF: predicated region fallthrough
CT: control target
= control target key end

     0   :  { %s20_s0 = inlined_call_operand.<no memory space> [shape: f32[], index: 0, kind: input, shape index: {}]   ;;  %s21_s1 = inlined_call_operand.vmem [shape: f32[64], index: 1, kind: output, shape index: {}]  }
   0x1   :  { %v2_v0 = vstv %s20_s0 }
   0x2   :  { %3 = vst [vmem:[%s21_s1] sm:$0x1] %v2_v0 }

// kernel: tile.145
= control target key start
LH: loop header
LB: loop body
LE: loop exit
PB: predicated region body
PF: predicated region fallthrough
CT: control target
= control target key end

     0   :  { %s22_s0 = inlined_call_operand.vmem [shape: f32[8], index: 0, kind: input, shape index: {}]   ;;  %s23_s1 = inlined_call_operand.vmem [shape: f32[8,8], index: 1, kind: output, shape index: {}]  }
   0x1   :  { %v4_v0 = vld [vmem:[%s22_s0] ss:$0 sm:$0xff] }
   0x2   :  { %5 = vst [vmem:[%s23_s1] sm:$0xff] %v4_v0 }

// kernel: tile.152
= control target key start
LH: loop header
LB: loop body
LE: loop exit
PB: predicated region body
PF: predicated region fallthrough
CT: control target
= control target key end

     0   :  { %s67_s10 = smov 56   ;;  %s68_s11 = smov 40   ;;  %vm3_vm0 = vcmask 64512   ;;  %vm9_vm1 = vcmask 523712   ;;  %vm15_vm2 = vcmask 458112   ;;  %vm21_vm3 = vcmask 392512   ;;  %s111_s0 = inlined_call_operand.vmem [shape: f32[8,8], index: 0, kind: input, shape index: {}]   ;;  %s112_s1 = inlined_call_operand.vmem [shape: f32[64], index: 1, kind: output, shape index: {}]  }
   0x1   :  { %v53_v0 = vld [vmem:[%s111_s0 + $0x7] sm:$0x1]   ;;  %v55_v1 = vld [vmem:[%s111_s0 + $0x5] sm:$0x1]   ;;  %v54_v2 = vld [vmem:[%s111_s0 + $0x6] sm:$0x1]  }
   0x2   :  { %7 = vrot.lane.b32.xlu0 %v53_v0, %s67_s10  ;;  %19 = vrot.lane.b32.xlu1 %v55_v1, %s68_s11  ;;  %v56_v3 = vld [vmem:[%s111_s0 + $0x4] sm:$0x1]   ;;  %v2_v4 = vld [vmem:[%s111_s0] sm:$0x1]   ;;  %s69_s18 = smov 48   ;;  %s70_s19 = smov 32  }
   0x3   :  { %4 = vst.msk [vmem:[#allocation0] sm:$0x1] %vm3_vm0, %v2_v4   ;;  %v57_v5 = vld [vmem:[%s111_s0 + $0x3] sm:$0x1]   ;;  %v58_v6 = vld [vmem:[%s111_s0 + $0x2] sm:$0x1]  }
   0x4   :  { %s71_s24 = smov 24   ;;  %s72_s25 = smov 16   ;;  %v59_v7 = vld [vmem:[%s111_s0 + $0x1] sm:$0x1]   ;;  %vm27_vm4 = vcmask 326912   ;;  %vm33_vm5 = vcmask 261312  }
   0x5   :  { %s73_s0 = smov 8   ;;  %vm39_vm6 = vcmask 195712   ;;  %vm45_vm7 = vcmask 130112  }
   0x6   :  { %13 = vrot.lane.b32.xlu0 %v54_v2, %s69_s18  ;;  %25 = vrot.lane.b32.xlu1 %v56_v3, %s70_s19 }
   0xa   :  { %31 = vrot.lane.b32.xlu0 %v57_v5, %s71_s24  ;;  %37 = vrot.lane.b32.xlu1 %v58_v6, %s72_s25 }
   0xe   :  { %43 = vrot.lane.b32.xlu0 %v59_v7, %s73_s0 }
  0x74   :  { %v8_v8 = vpop.permute.xlu0 %7   ;;  %v20_v9 = vpop.permute.xlu1 %19  }
  0x75   :  { %10 = vst.msk [vmem:[#allocation0] sm:$0x1] %vm9_vm1, %v8_v8  }
  0x78   :  { %v14_v10 = vpop.permute.xlu0 %13   ;;  %v26_v11 = vpop.permute.xlu1 %25  }
  0x79   :  { %16 = vst.msk [vmem:[#allocation0] sm:$0x1] %vm15_vm2, %v14_v10  }
  0x7a   :  { %22 = vst.msk [vmem:[#allocation0] sm:$0x1] %vm21_vm3, %v20_v9  }
  0x7b   :  { %28 = vst.msk [vmem:[#allocation0] sm:$0x1] %vm27_vm4, %v26_v11  }
  0x7c   :  { %v32_v12 = vpop.permute.xlu0 %31   ;;  %v38_v13 = vpop.permute.xlu1 %37  }
  0x7d   :  { %34 = vst.msk [vmem:[#allocation0] sm:$0x1] %vm33_vm5, %v32_v12  }
  0x7e   :  { %40 = vst.msk [vmem:[#allocation0] sm:$0x1] %vm39_vm6, %v38_v13  }
  0x80   :  { %v44_v14 = vpop.permute.xlu0 %43  }
  0x81   :  { %46 = vst.msk [vmem:[#allocation0] sm:$0x1] %vm45_vm7, %v44_v14  }
  0x88   :  { %v50_v15 = vld [vmem:[#allocation0] sm:$0x1] }
  0x89   :  { %52 = vst [vmem:[%s112_s1] sm:$0x1] %v50_v15 }

// kernel: tile.153
= control target key start
LH: loop header
LB: loop body
LE: loop exit
PB: predicated region body
PF: predicated region fallthrough
CT: control target
= control target key end

     0   :  { %s22_s0 = inlined_call_operand.vmem [shape: f32[64], index: 0, kind: input, shape index: {}]   ;;  %s23_s1 = inlined_call_operand.vmem [shape: f32[2,64], index: 1, kind: output, shape index: {}]  }
   0x1   :  { %v4_v0 = vld [vmem:[%s22_s0] ss:$0 sm:$0xff] }
   0x2   :  { %5 = vst [vmem:[%s23_s1] sm:$0x3] %v4_v0 }

// kernel: tile.154
= control target key start
LH: loop header
LB: loop body
LE: loop exit
PB: predicated region body
PF: predicated region fallthrough
CT: control target
= control target key end

     0   :  { %vm7_vm0 = vcmask 523264   ;;  %vm13_vm1 = vcmask 1048064   ;;  %s39_s0 = inlined_call_operand.vmem [shape: f32[2,64], index: 0, kind: input, shape index: {}]   ;;  %s40_s1 = inlined_call_operand.vmem [shape: f32[1,128], index: 1, kind: output, shape index: {}]  }
   0x1   :  { %v4_v0 = vld [vmem:[%s39_s0] sm:$0x3]  ;;  %s22_s0 = smov 64  }
   0x2   :  { %5 = vst [vmem:[#allocation1] sm:$0x3] %v4_v0 }
   0x9   :  { %v10_v1 = vld [vmem:[#allocation1 + $0x1] sm:$0x1]   ;;  %v6_v2 = vld [vmem:[#allocation1] sm:$0x1]  }
   0xa   :  { %11 = vrot.lane.b32.xlu0 %v10_v1, %s22_s0  ;;  %8 = vst.msk [vmem:[#allocation0] sm:$0x1] %vm7_vm0, %v6_v2  }
  0x7c   :  { %v12_v3 = vpop.permute.xlu0 %11  }
  0x7d   :  { %14 = vst.msk [vmem:[#allocation0] sm:$0x1] %vm13_vm1, %v12_v3  }
  0x84   :  { %v18_v4 = vld [vmem:[#allocation0] sm:$0x1] }
  0x85   :  { %20 = vst [vmem:[%s40_s1] sm:$0x1] %v18_v4 }

// kernel: _lambda_.27
= control target key start
LH: loop header
LB: loop body
LE: loop exit
PB: predicated region body
PF: predicated region fallthrough
CT: control target
= control target key end

     0   :  { %v1710_v34 = vmov 0   ;;  %vm1300_vm0 = vcmask 1040384   ;;  %vm1302_vm1 = vcmask 1041408   ;;  %s2109_s1 = inlined_call_operand.vmem [shape: bf16[1792,128], index: 1, kind: input, shape index: {}]   ;;  %s2110_s0 = inlined_call_operand.vmem [shape: bf16[8,1792], index: 0, kind: input, shape index: {}]   ;;  %s2111_s2 = inlined_call_operand.vmem [shape: f32[1,128], index: 2, kind: input, shape index: {}]   ;;  %s2112_s3 = inlined_call_operand.vmem [shape: bf16[8,128], index: 3, kind: output, shape index: {0}]   ;;  %s2113_s4 = inlined_call_operand.vmem [shape: f32[1,8,128], index: 4, kind: output, shape index: {1}]  }
   0x1   :  { %v1598_v0 = vld [vmem:[%s2109_s1 + $0x40] sm:$0xff]   ;;  %v1602_v4 = vld [vmem:[%s2109_s1 + $0x48] sm:$0xff]   ;;  %v1606_v8 = vld [vmem:[%s2109_s1 + $0x50] sm:$0xff]  }
   0x2   :  { %v1599_v1 = vld [vmem:[%s2109_s1 + $0xc0] sm:$0xff]   ;;  %1442 = vmatprep.subr.bf16.mxu0 %v1598_v0  ;;  %v1603_v5 = vld [vmem:[%s2109_s1 + $0xc8] sm:$0xff]   ;;  %v1607_v9 = vld [vmem:[%s2109_s1 + $0xd0] sm:$0xff]  }
   0x3   :  { %v1600_v2 = vld [vmem:[%s2109_s1] sm:$0xff]   ;;  %1464 = vmatprep.subr.bf16.mxu1 %v1599_v1  ;;  %v1604_v6 = vld [vmem:[%s2109_s1 + $0x8] sm:$0xff]   ;;  %v1608_v10 = vld [vmem:[%s2109_s1 + $0x10] sm:$0xff]  }
   0x4   :  { %v1601_v3 = vld [vmem:[%s2109_s1 + $0x80] sm:$0xff]   ;;  %1443 = vmatpush3.bf16.msra.mxu0 %v1600_v2  ;;  %v1605_v7 = vld [vmem:[%s2109_s1 + $0x88] sm:$0xff]   ;;  %v1609_v11 = vld [vmem:[%s2109_s1 + $0x90] sm:$0xff]  }
   0x5   :  { %1465 = vmatpush3.bf16.msra.mxu1 %v1601_v3  ;;  %1444 = vmatprep.subr.bf16.mxu0 %v1602_v4  ;;  %v1610_v12 = vld [vmem:[%s2109_s1 + $0x58] sm:$0xff]   ;;  %v1614_v16 = vld [vmem:[%s2109_s1 + $0x60] sm:$0xff]   ;;  %v1618_v20 = vld [vmem:[%s2109_s1 + $0x68] sm:$0xff]  }
   0x6   :  { %1466 = vmatprep.subr.bf16.mxu1 %v1603_v5  ;;  %v1611_v13 = vld [vmem:[%s2109_s1 + $0xd8] sm:$0xff]   ;;  %v1615_v17 = vld [vmem:[%s2109_s1 + $0xe0] sm:$0xff]   ;;  %v1619_v21 = vld [vmem:[%s2109_s1 + $0xe8] sm:$0xff]  }
   0x7   :  { %v1612_v14 = vld [vmem:[%s2109_s1 + $0x18] sm:$0xff]   ;;  %v1616_v18 = vld [vmem:[%s2109_s1 + $0x20] sm:$0xff]   ;;  %v1620_v22 = vld [vmem:[%s2109_s1 + $0x28] sm:$0xff]  }
   0x8   :  { %1445 = vmatpush3.bf16.msra.mxu0 %v1604_v6  ;;  %v1613_v15 = vld [vmem:[%s2109_s1 + $0x98] sm:$0xff]   ;;  %v1617_v19 = vld [vmem:[%s2109_s1 + $0xa0] sm:$0xff]   ;;  %v1621_v23 = vld [vmem:[%s2109_s1 + $0xa8] sm:$0xff]  }
   0x9   :  { %1467 = vmatpush3.bf16.msra.mxu1 %v1605_v7  ;;  %1446 = vmatprep.subr.bf16.mxu0 %v1606_v8  ;;  %v1622_v24 = vld [vmem:[%s2109_s1 + $0x70] sm:$0xff]   ;;  %v1626_v28 = vld [vmem:[%s2109_s1 + $0x78] sm:$0xff]   ;;  %v31_v32 = vld [vmem:[%s2110_s0] sm:$0xff] }
   0xa   :  { %1468 = vmatprep.subr.bf16.mxu1 %v1607_v9  ;;  %v1623_v25 = vld [vmem:[%s2109_s1 + $0xf0] sm:$0xff]   ;;  %v1627_v29 = vld [vmem:[%s2109_s1 + $0xf8] sm:$0xff]   ;;  %v32_v33 = vld [vmem:[%s2110_s0 + $0x8] sm:$0xff]  ;;  %v38_v35 = vmax.bf16 %v1710_v34, %v31_v32 }
   0xb   :  { %v1624_v26 = vld [vmem:[%s2109_s1 + $0x30] sm:$0xff]   ;;  %v1628_v30 = vld [vmem:[%s2109_s1 + $0x38] sm:$0xff]   ;;  %v39_v36 = vmax.bf16 %v1710_v34, %v32_v33  ;;  %v1630_v37 = vld [vmem:[%s2109_s1 + $0x140] sm:$0xff]  }
   0xc   :  { %1447 = vmatpush3.bf16.msra.mxu0 %v1608_v10  ;;  %v1625_v27 = vld [vmem:[%s2109_s1 + $0xb0] sm:$0xff]   ;;  %v1629_v31 = vld [vmem:[%s2109_s1 + $0xb8] sm:$0xff]   ;;  %v1631_v38 = vld [vmem:[%s2109_s1 + $0x100] sm:$0xff]   ;;  %v1316_v39 = vcombine.high %v38_v35, %v38_v35  ;;  %v1315_v41 = vcombine.low %v38_v35, %v38_v35 }
   0xd   :  { %1469 = vmatpush3.bf16.msra.mxu1 %v1609_v11  ;;  %1448 = vmatprep.subr.bf16.mxu0 %v1610_v12  ;;  %v1318_v40 = vcombine.high %v39_v36, %v39_v36  ;;  %v1317_v42 = vcombine.low %v39_v36, %v39_v36  ;;  %v1632_v43 = vld [vmem:[%s2109_s1 + $0x1c0] sm:$0xff]   ;;  %v1634_v45 = vld [vmem:[%s2109_s1 + $0x148] sm:$0xff]   ;;  %v1638_v49 = vld [vmem:[%s2109_s1 + $0x150] sm:$0xff]  }
   0xe   :  { %1470 = vmatprep.subr.bf16.mxu1 %v1611_v13  ;;  %v1633_v44 = vld [vmem:[%s2109_s1 + $0x180] sm:$0xff]   ;;  %1023 = vmatprep.mubr.bf16.mxu0 %v1316_v39  ;;  %v1635_v46 = vld [vmem:[%s2109_s1 + $0x108] sm:$0xff]   ;;  %v1639_v50 = vld [vmem:[%s2109_s1 + $0x110] sm:$0xff]  }
   0xf   :  { %1063 = vmatprep.mubr.bf16.mxu1 %v1318_v40  ;;  %v1636_v47 = vld [vmem:[%s2109_s1 + $0x1c8] sm:$0xff]   ;;  %v1640_v51 = vld [vmem:[%s2109_s1 + $0x1d0] sm:$0xff]   ;;  %v1642_v53 = vld [vmem:[%s2109_s1 + $0x158] sm:$0xff]  }
  0x10   :  { %1449 = vmatpush3.bf16.msra.mxu0 %v1612_v14  ;;  %v1637_v48 = vld [vmem:[%s2109_s1 + $0x188] sm:$0xff]   ;;  %v1641_v52 = vld [vmem:[%s2109_s1 + $0x190] sm:$0xff]   ;;  %v1643_v54 = vld [vmem:[%s2109_s1 + $0x118] sm:$0xff]  }
  0x11   :  { %1471 = vmatpush3.bf16.msra.mxu1 %v1613_v15  ;;  %1450 = vmatprep.subr.bf16.mxu0 %v1614_v16  ;;  %v1644_v55 = vld [vmem:[%s2109_s1 + $0x1d8] sm:$0xff]   ;;  %v1646_v57 = vld [vmem:[%s2109_s1 + $0x160] sm:$0xff]   ;;  %v1650_v61 = vld [vmem:[%s2109_s1 + $0x168] sm:$0xff]  }
  0x12   :  { %1472 = vmatprep.subr.bf16.mxu1 %v1615_v17  ;;  %v1645_v56 = vld [vmem:[%s2109_s1 + $0x198] sm:$0xff]   ;;  %v1647_v58 = vld [vmem:[%s2109_s1 + $0x120] sm:$0xff]   ;;  %v1651_v62 = vld [vmem:[%s2109_s1 + $0x128] sm:$0xff]  }
  0x13   :  { %v1648_v59 = vld [vmem:[%s2109_s1 + $0x1e0] sm:$0xff]   ;;  %v1652_v63 = vld [vmem:[%s2109_s1 + $0x1e8] sm:$0xff]   ;;  %v1654_v1 = vld [vmem:[%s2109_s1 + $0x170] sm:$0xff]  }
  0x14   :  { %1451 = vmatpush3.bf16.msra.mxu0 %v1616_v18  ;;  %v1649_v60 = vld [vmem:[%s2109_s1 + $0x1a0] sm:$0xff]   ;;  %v1653_v0 = vld [vmem:[%s2109_s1 + $0x1a8] sm:$0xff]   ;;  %v1655_v2 = vld [vmem:[%s2109_s1 + $0x130] sm:$0xff]  }
  0x15   :  { %1473 = vmatpush3.bf16.msra.mxu1 %v1617_v19  ;;  %1452 = vmatprep.subr.bf16.mxu0 %v1618_v20  ;;  %v1656_v3 = vld [vmem:[%s2109_s1 + $0x1f0] sm:$0xff]   ;;  %v1658_v5 = vld [vmem:[%s2109_s1 + $0x178] sm:$0xff]   ;;  %v1662_v11 = vld [vmem:[%s2109_s1 + $0x240] sm:$0xff]  }
  0x16   :  { %1474 = vmatprep.subr.bf16.mxu1 %v1619_v21  ;;  %v1657_v4 = vld [vmem:[%s2109_s1 + $0x1b0] sm:$0xff]   ;;  %v1659_v6 = vld [vmem:[%s2109_s1 + $0x138] sm:$0xff]   ;;  %v1663_v16 = vld [vmem:[%s2109_s1 + $0x200] sm:$0xff]  }
  0x17   :  { %v1660_v7 = vld [vmem:[%s2109_s1 + $0x1f8] sm:$0xff]   ;;  %v33_v8 = vld [vmem:[%s2110_s0 + $0x10] sm:$0xff]  ;;  %v1664_v17 = vld [vmem:[%s2109_s1 + $0x2c0] sm:$0xff]  }
  0x18   :  { %1453 = vmatpush3.bf16.msra.mxu0 %v1620_v22  ;;  %v40_v9 = vmax.bf16 %v1710_v34, %v33_v8  ;;  %v1661_v10 = vld [vmem:[%s2109_s1 + $0x1b8] sm:$0xff]   ;;  %v1665_v20 = vld [vmem:[%s2109_s1 + $0x280] sm:$0xff]   ;;  %v1666_v21 = vld [vmem:[%s2109_s1 + $0x248] sm:$0xff]  }
  0x19   :  { %1475 = vmatpush3.bf16.msra.mxu1 %v1621_v23  ;;  %1454 = vmatprep.subr.bf16.mxu0 %v1622_v24  ;;  %v34_v14 = vld [vmem:[%s2110_s0 + $0x18] sm:$0xff]  ;;  %v1667_v22 = vld [vmem:[%s2109_s1 + $0x208] sm:$0xff]   ;;  %v1678_v33 = vld [vmem:[%s2109_s1 + $0x260] sm:$0xff]  }
  0x1a   :  { %1476 = vmatprep.subr.bf16.mxu1 %v1623_v25  ;;  %v1320_v12 = vcombine.high %v40_v9, %v40_v9  ;;  %v1319_v13 = vcombine.low %v40_v9, %v40_v9  ;;  %v41_v15 = vmax.bf16 %v1710_v34, %v34_v14  ;;  %v1668_v23 = vld [vmem:[%s2109_s1 + $0x2c8] sm:$0xff]   ;;  %v1670_v25 = vld [vmem:[%s2109_s1 + $0x250] sm:$0xff]   ;;  %v1677_v32 = vld [vmem:[%s2109_s1 + $0x298] sm:$0xff]  }
  0x1b   :  { %v1669_v24 = vld [vmem:[%s2109_s1 + $0x288] sm:$0xff]   ;;  %v1679_v35 = vld [vmem:[%s2109_s1 + $0x220] sm:$0xff]   ;;  %v1706_v9 = vld [vmem:[%s2109_s1 + $0x370] sm:$0xff]  }
  0x1c   :  { %1455 = vmatpush3.bf16.msra.mxu0 %v1624_v26  ;;  %v1322_v18 = vcombine.high %v41_v15, %v41_v15  ;;  %v1321_v19 = vcombine.low %v41_v15, %v41_v15  ;;  %v1671_v26 = vld [vmem:[%s2109_s1 + $0x210] sm:$0xff]   ;;  %v1680_v36 = vld [vmem:[%s2109_s1 + $0x2e0] sm:$0xff]   ;;  %v1683_v39 = vld [vmem:[%s2109_s1 + $0x228] sm:$0xff]  }
  0x1d   :  { %1477 = vmatpush3.bf16.msra.mxu1 %v1625_v27  ;;  %1456 = vmatprep.subr.bf16.mxu0 %v1626_v28  ;;  %v1672_v27 = vld [vmem:[%s2109_s1 + $0x2d0] sm:$0xff]   ;;  %v1684_v40 = vld [vmem:[%s2109_s1 + $0x2e8] sm:$0xff]  }
  0x1e   :  { %1478 = vmatprep.subr.bf16.mxu1 %v1627_v29  ;;  %v1673_v28 = vld [vmem:[%s2109_s1 + $0x290] sm:$0xff]   ;;  %v1674_v29 = vld [vmem:[%s2109_s1 + $0x258] sm:$0xff]   ;;  %v1705_v8 = vld [vmem:[%s2109_s1 + $0x328] sm:$0xff]  }
  0x20   :  { %1457 = vmatpush3.bf16.msra.mxu0 %v1628_v30  ;;  %v1675_v30 = vld [vmem:[%s2109_s1 + $0x218] sm:$0xff]  }
  0x21   :  { %1479 = vmatpush3.bf16.msra.mxu1 %v1629_v31  ;;  %1486 = vmatprep.subr.bf16.mxu0 %v1630_v37  ;;  %v1676_v31 = vld [vmem:[%s2109_s1 + $0x2d8] sm:$0xff]   ;;  %v1681_v37 = vld [vmem:[%s2109_s1 + $0x2a0] sm:$0xff]  }
  0x22   :  { %1508 = vmatprep.subr.bf16.mxu1 %v1632_v43  ;;  %v1687_v43 = vld [vmem:[%s2109_s1 + $0x230] sm:$0xff]  }
  0x23   :  { %1024 = vmatmul.mubr.bf16.vlgmr.msra.gmra.mrb[0].mxu0 %v1315_v41  ;;  %v1685_v41 = vld [vmem:[%s2109_s1 + $0x2a8] sm:$0xff]  }
  0x24   :  { %1064 = vmatmul.mubr.bf16.vlgmr.msra.gmra.mrb[0].mxu1 %v1317_v42  ;;  %1487 = vmatpush3.bf16.msra.mxu0 %v1631_v38  ;;  %v1682_v38 = vld [vmem:[%s2109_s1 + $0x268] sm:$0xff]   ;;  %v1686_v42 = vld [vmem:[%s2109_s1 + $0x270] sm:$0xff]  }
  0x25   :  { %1509 = vmatpush3.bf16.msra.mxu1 %v1633_v44  ;;  %1488 = vmatprep.subr.bf16.mxu0 %v1634_v45  ;;  %v1688_v44 = vld [vmem:[%s2109_s1 + $0x2f0] sm:$0xff]  }
  0x26   :  { %1510 = vmatprep.subr.bf16.mxu1 %v1636_v47  ;;  %1103 = vmatprep.mubr.bf16.mxu0 %v1320_v12  ;;  %v1689_v45 = vld [vmem:[%s2109_s1 + $0x2b0] sm:$0xff]   ;;  %v1691_v47 = vld [vmem:[%s2109_s1 + $0x238] sm:$0xff]  }
  0x27   :  { %1143 = vmatprep.mubr.bf16.mxu1 %v1322_v18 }
  0x28   :  { %1489 = vmatpush3.bf16.msra.mxu0 %v1635_v46  ;;  %v1690_v46 = vld [vmem:[%s2109_s1 + $0x278] sm:$0xff]  }
  0x29   :  { %1511 = vmatpush3.bf16.msra.mxu1 %v1637_v48  ;;  %1490 = vmatprep.subr.bf16.mxu0 %v1638_v49  ;;  %v1692_v48 = vld [vmem:[%s2109_s1 + $0x2f8] sm:$0xff]   ;;  %v35_v49 = vld [vmem:[%s2110_s0 + $0x20] sm:$0xff] }
  0x2a   :  { %1512 = vmatprep.subr.bf16.mxu1 %v1640_v51  ;;  %v1693_v51 = vld [vmem:[%s2109_s1 + $0x2b8] sm:$0xff]  }
  0x2c   :  { %1491 = vmatpush3.bf16.msra.mxu0 %v1639_v50  ;;  %v42_v50 = vmax.bf16 %v1710_v34, %v35_v49 }
  0x2d   :  { %1513 = vmatpush3.bf16.msra.mxu1 %v1641_v52  ;;  %1492 = vmatprep.subr.bf16.mxu0 %v1642_v53  ;;  %v1694_v52 = vld [vmem:[%s2109_s1 + $0x340] sm:$0xff]   ;;  %v36_v53 = vld [vmem:[%s2110_s0 + $0x28] sm:$0xff] }
  0x2e   :  { %1514 = vmatprep.subr.bf16.mxu1 %v1644_v55  ;;  %v1323_v55 = vcombine.low %v42_v50, %v42_v50 }
  0x30   :  { %1493 = vmatpush3.bf16.msra.mxu0 %v1643_v54  ;;  %v1324_v54 = vcombine.high %v42_v50, %v42_v50 }
  0x31   :  { %1515 = vmatpush3.bf16.msra.mxu1 %v1645_v56  ;;  %1494 = vmatprep.subr.bf16.mxu0 %v1646_v57  ;;  %v43_v56 = vmax.bf16 %v1710_v34, %v36_v53  ;;  %v1695_v57 = vld [vmem:[%s2109_s1 + $0x300] sm:$0xff]  }
  0x32   :  { %1516 = vmatprep.subr.bf16.mxu1 %v1648_v59  ;;  %v1441_v53 = vld [vmem:[%s2111_s2] ss:$0 sm:$0xff] }
  0x33   :  { %v1326_v59 = vcombine.high %v43_v56, %v43_v56 }
  0x34   :  { %1495 = vmatpush3.bf16.msra.mxu0 %v1647_v58  ;;  %v1696_v58 = vld [vmem:[%s2109_s1 + $0x348] sm:$0xff]  }
  0x35   :  { %1517 = vmatpush3.bf16.msra.mxu1 %v1649_v60  ;;  %1496 = vmatprep.subr.bf16.mxu0 %v1650_v61  ;;  %v1325_v60 = vcombine.low %v43_v56, %v43_v56  ;;  %v1697_v61 = vld [vmem:[%s2109_s1 + $0x308] sm:$0xff]  }
  0x36   :  { %1518 = vmatprep.subr.bf16.mxu1 %v1652_v63  ;;  %v1699_v63 = vld [vmem:[%s2109_s1 + $0x310] sm:$0xff]  }
  0x38   :  { %1497 = vmatpush3.bf16.msra.mxu0 %v1651_v62  ;;  %v1698_v62 = vld [vmem:[%s2109_s1 + $0x350] sm:$0xff]  }
  0x39   :  { %1519 = vmatpush3.bf16.msra.mxu1 %v1653_v0  ;;  %1498 = vmatprep.subr.bf16.mxu0 %v1654_v1  ;;  %v1700_v0 = vld [vmem:[%s2109_s1 + $0x358] sm:$0xff]  }
  0x3a   :  { %1520 = vmatprep.subr.bf16.mxu1 %v1656_v3  ;;  %v1701_v1 = vld [vmem:[%s2109_s1 + $0x318] sm:$0xff]   ;;  %v37_v3 = vld [vmem:[%s2110_s0 + $0x30] sm:$0xff] }
  0x3c   :  { %1499 = vmatpush3.bf16.msra.mxu0 %v1655_v2  ;;  %v1702_v2 = vld [vmem:[%s2109_s1 + $0x360] sm:$0xff]  }
  0x3d   :  { %1521 = vmatpush3.bf16.msra.mxu1 %v1657_v4  ;;  %1500 = vmatprep.subr.bf16.mxu0 %v1658_v5  ;;  %v1703_v4 = vld [vmem:[%s2109_s1 + $0x320] sm:$0xff]   ;;  %v44_v5 = vmax.bf16 %v1710_v34, %v37_v3  ;;  %v1707_v34 = vld [vmem:[%s2109_s1 + $0x330] sm:$0xff]  }
  0x3e   :  { %1522 = vmatprep.subr.bf16.mxu1 %v1660_v7 }
  0x3f   :  { %v1328_v7 = vcombine.high %v44_v5, %v44_v5  ;;  %v1327_v12 = vcombine.low %v44_v5, %v44_v5 }
  0x40   :  { %1501 = vmatpush3.bf16.msra.mxu0 %v1659_v6  ;;  %v1704_v6 = vld [vmem:[%s2109_s1 + $0x368] sm:$0xff]  }
  0x41   :  { %1523 = vmatpush3.bf16.msra.mxu1 %v1661_v10  ;;  %1530 = vmatprep.subr.bf16.mxu0 %v1662_v11  ;;  %v1708_v10 = vld [vmem:[%s2109_s1 + $0x378] sm:$0xff]  }
  0x42   :  { %1552 = vmatprep.subr.bf16.mxu1 %v1664_v17  ;;  %v1709_v11 = vld [vmem:[%s2109_s1 + $0x338] sm:$0xff]  }
  0x43   :  { %1104 = vmatmul.mubr.bf16.vlgmr.msra.gmra.mrb[4].mxu0 %v1319_v13 }
  0x44   :  { %1531 = vmatpush3.bf16.msra.mxu0 %v1663_v16  ;;  %1144 = vmatmul.mubr.bf16.vlgmr.msra.gmra.mrb[4].mxu1 %v1321_v19 }
  0x45   :  { %1532 = vmatprep.subr.bf16.mxu0 %v1666_v21  ;;  %1553 = vmatpush3.bf16.msra.mxu1 %v1665_v20 }
  0x46   :  { %1554 = vmatprep.subr.bf16.mxu1 %v1668_v23  ;;  %1183 = vmatprep.mubr.bf16.mxu0 %v1324_v54 }
  0x47   :  { %1223 = vmatprep.mubr.bf16.mxu1 %v1326_v59 }
  0x48   :  { %1533 = vmatpush3.bf16.msra.mxu0 %v1667_v22 }
  0x49   :  { %1534 = vmatprep.subr.bf16.mxu0 %v1670_v25  ;;  %1555 = vmatpush3.bf16.msra.mxu1 %v1669_v24 }
  0x4a   :  { %1556 = vmatprep.subr.bf16.mxu1 %v1672_v27 }
  0x4c   :  { %1535 = vmatpush3.bf16.msra.mxu0 %v1671_v26 }
  0x4d   :  { %1536 = vmatprep.subr.bf16.mxu0 %v1674_v29  ;;  %1557 = vmatpush3.bf16.msra.mxu1 %v1673_v28 }
  0x4e   :  { %1558 = vmatprep.subr.bf16.mxu1 %v1676_v31 }
  0x50   :  { %1537 = vmatpush3.bf16.msra.mxu0 %v1675_v30 }
  0x51   :  { %1538 = vmatprep.subr.bf16.mxu0 %v1678_v33  ;;  %1559 = vmatpush3.bf16.msra.mxu1 %v1677_v32 }
  0x52   :  { %1560 = vmatprep.subr.bf16.mxu1 %v1680_v36 }
  0x54   :  { %1539 = vmatpush3.bf16.msra.mxu0 %v1679_v35 }
  0x55   :  { %1540 = vmatprep.subr.bf16.mxu0 %v1682_v38  ;;  %1561 = vmatpush3.bf16.msra.mxu1 %v1681_v37 }
  0x56   :  { %1562 = vmatprep.subr.bf16.mxu1 %v1684_v40 }
  0x58   :  { %1541 = vmatpush3.bf16.msra.mxu0 %v1683_v39 }
  0x59   :  { %1542 = vmatprep.subr.bf16.mxu0 %v1686_v42  ;;  %1563 = vmatpush3.bf16.msra.mxu1 %v1685_v41 }
  0x5a   :  { %1564 = vmatprep.subr.bf16.mxu1 %v1688_v44 }
  0x5c   :  { %1543 = vmatpush3.bf16.msra.mxu0 %v1687_v43 }
  0x5d   :  { %1544 = vmatprep.subr.bf16.mxu0 %v1690_v46  ;;  %1565 = vmatpush3.bf16.msra.mxu1 %v1689_v45 }
  0x5e   :  { %1566 = vmatprep.subr.bf16.mxu1 %v1692_v48 }
  0x60   :  { %1545 = vmatpush3.bf16.msra.mxu0 %v1691_v47 }
  0x61   :  { %1574 = vmatprep.subr.bf16.mxu0 %v1694_v52  ;;  %1567 = vmatpush3.bf16.msra.mxu1 %v1693_v51 }
  0x63   :  { %1184 = vmatmul.mubr.bf16.vlgmr.msra.gmra.mrb[8].mxu0 %v1323_v55 }
  0x64   :  { %1575 = vmatpush3.bf16.msra.mxu0 %v1695_v57  ;;  %1224 = vmatmul.mubr.bf16.vlgmr.msra.gmra.mrb[8].mxu1 %v1325_v60 }
  0x65   :  { %1576 = vmatprep.subr.bf16.mxu0 %v1696_v58  ;;  %1263 = vmatprep.mubr.bf16.mxu0 %v1328_v7 }
  0x68   :  { %1577 = vmatpush3.bf16.msra.mxu0 %v1697_v61 }
  0x69   :  { %1578 = vmatprep.subr.bf16.mxu0 %v1698_v62 }
  0x6c   :  { %1579 = vmatpush3.bf16.msra.mxu0 %v1699_v63 }
  0x6d   :  { %1580 = vmatprep.subr.bf16.mxu0 %v1700_v0 }
  0x70   :  { %1581 = vmatpush3.bf16.msra.mxu0 %v1701_v1 }
  0x71   :  { %1582 = vmatprep.subr.bf16.mxu0 %v1702_v2 }
  0x74   :  { %1583 = vmatpush3.bf16.msra.mxu0 %v1703_v4 }
  0x75   :  { %1584 = vmatprep.subr.bf16.mxu0 %v1704_v6 }
  0x78   :  { %1585 = vmatpush3.bf16.msra.mxu0 %v1705_v8 }
  0x79   :  { %1586 = vmatprep.subr.bf16.mxu0 %v1706_v9 }
  0x7c   :  { %1587 = vmatpush3.bf16.msra.mxu0 %v1707_v34 }
  0x7d   :  { %1588 = vmatprep.subr.bf16.mxu0 %v1708_v10 }
  0x80   :  { %1589 = vmatpush3.bf16.msra.mxu0 %v1709_v11 }
  0x83   :  { %1264 = vmatmul.mubr.bf16.vlgmr.msra.gmra.mrb[12].mxu0 %v1327_v12 }
  0xf6   :  { %v1458_v13 = vpop.f32.mrb[0].mxu0 }
  0xf7   :  { %v1480_v14 = vpop.f32.mrb[0].mxu1  ;;  %v1459_v15 = vpop.f32.mrb[1].mxu0 }
  0xf8   :  { %v1481_v16 = vpop.f32.mrb[1].mxu1  ;;  %v1460_v17 = vadd.f32 %v1459_v15, %v1458_v13  ;;  %v1461_v19 = vpop.f32.mrb[2].mxu0 }
  0xf9   :  { %v1482_v18 = vadd.f32 %v1481_v16, %v1480_v14  ;;  %v1483_v20 = vpop.f32.mrb[2].mxu1  ;;  %v1462_v21 = vpop.f32.mrb[3].mxu0 }
  0xfa   :  { %v1484_v22 = vpop.f32.mrb[3].mxu1 }
  0xfb   :  { %v1066_v23 = vadd.f32 %v1482_v18, %v1460_v17 }
 0x116   :  { %v1502_v24 = vpop.f32.mrb[4].mxu0 }
 0x117   :  { %v1503_v25 = vpop.f32.mrb[5].mxu0  ;;  %v1524_v28 = vpop.f32.mrb[4].mxu1 }
 0x118   :  { %v1504_v26 = vadd.f32 %v1503_v25, %v1502_v24  ;;  %v1505_v27 = vpop.f32.mrb[6].mxu0  ;;  %v1525_v30 = vpop.f32.mrb[5].mxu1 }
 0x119   :  { %v1506_v29 = vpop.f32.mrb[7].mxu0  ;;  %v1526_v32 = vadd.f32 %v1525_v30, %v1524_v28  ;;  %v1527_v33 = vpop.f32.mrb[6].mxu1 }
 0x11a   :  { %v1106_v31 = vadd.f32 %v1504_v26, %v1066_v23  ;;  %v1528_v35 = vpop.f32.mrb[7].mxu1 }
 0x11c   :  { %v1146_v36 = vadd.f32 %v1526_v32, %v1106_v31 }
 0x136   :  { %v1546_v37 = vpop.f32.mrb[8].mxu0 }
 0x137   :  { %v1547_v38 = vpop.f32.mrb[9].mxu0  ;;  %v1568_v41 = vpop.f32.mrb[8].mxu1 }
 0x138   :  { %v1548_v39 = vadd.f32 %v1547_v38, %v1546_v37  ;;  %v1549_v40 = vpop.f32.mrb[10].mxu0  ;;  %v1569_v43 = vpop.f32.mrb[9].mxu1 }
 0x139   :  { %v1550_v42 = vpop.f32.mrb[11].mxu0  ;;  %v1570_v45 = vadd.f32 %v1569_v43, %v1568_v41  ;;  %v1571_v46 = vpop.f32.mrb[10].mxu1 }
 0x13a   :  { %v1186_v44 = vadd.f32 %v1548_v39, %v1146_v36  ;;  %v1572_v47 = vpop.f32.mrb[11].mxu1 }
 0x13c   :  { %v1226_v48 = vadd.f32 %v1570_v45, %v1186_v44 }
 0x156   :  { %v1590_v49 = vpop.f32.mrb[12].mxu0 }
 0x157   :  { %v1591_v50 = vpop.f32.mrb[13].mxu0 }
 0x158   :  { %v1592_v51 = vadd.f32 %v1591_v50, %v1590_v49  ;;  %v1593_v52 = vpop.f32.mrb[14].mxu0 }
 0x159   :  { %v1594_v54 = vpop.f32.mrb[15].mxu0 }
 0x15a   :  { %v1266_v55 = vadd.f32 %v1592_v51, %v1226_v48 }
 0x15c   :  { %v1284_v56 = vadd.f32 %v1441_v53, %v1266_v55 }
 0x15e   :  { %v1285_v57 = vpack.c.bf16 %v1284_v56, %v1284_v56  ;;  %v1287_v58 = vrot.slane %v1284_v56, 4  ;;  %v1293_v59 = vmul.f32 %v1284_v56, %v1284_v56 }
 0x160   :  { %1286 = vst [vmem:[%s2112_s3] sm:$0xf] %v1285_v57  ;;  %v1288_v60 = vadd.f32 %v1287_v58, %v1284_v56  ;;  %v1294_v61 = vrot.slane %v1293_v59, 4 }
 0x162   :  { %v1289_v62 = vrot.slane %v1288_v60, 2  ;;  %v1295_v63 = vadd.f32 %v1294_v61, %v1293_v59 }
 0x164   :  { %v1290_v0 = vadd.f32 %v1289_v62, %v1288_v60  ;;  %v1296_v1 = vrot.slane %v1295_v63, 2 }
 0x166   :  { %v1291_v2 = vrot.slane %v1290_v0, 1  ;;  %v1297_v3 = vadd.f32 %v1296_v1, %v1295_v63 }
 0x168   :  { %v1298_v4 = vrot.slane %v1297_v3, 1  ;;  %v1292_v5 = vadd.f32 %v1291_v2, %v1290_v0 }
 0x16a   :  { %v1299_v6 = vadd.f32 %v1298_v4, %v1297_v3 }
 0x16c   :  { %v1301_v7 = vsel %vm1300_vm0, %v1292_v5, %v1299_v6 }
 0x16d   :  { %v1303_v8 = vsel %vm1302_vm1, %v1301_v7, 0.0 }
 0x16e   :  { %1306 = vst [vmem:[%s2113_s4] sm:$0xff] %v1303_v8 }

// kernel: _lambda_.29
= control target key start
LH: loop header
LB: loop body
LE: loop exit
PB: predicated region body
PF: predicated region fallthrough
CT: control target
= control target key end

     0   :  { %v1409_v35 = vmov 0   ;;  %vm1036_vm0 = vcmask 519168   ;;  %vm1079_vm1 = vcmask 1040384   ;;  %vm1081_vm2 = vcmask 1041408   ;;  %s1797_s1 = inlined_call_operand.vmem [shape: bf16[896,128], index: 1, kind: input, shape index: {}]   ;;  %s1798_s0 = inlined_call_operand.vmem [shape: bf16[64,896], index: 0, kind: input, shape index: {}]   ;;  %s1799_s2 = inlined_call_operand.vmem [shape: f32[1,128], index: 2, kind: input, shape index: {}]   ;;  %s1800_s3 = inlined_call_operand.vmem [shape: bf16[64,64], index: 3, kind: output, shape index: {0}]   ;;  %s1801_s4 = inlined_call_operand.vmem [shape: f32[1,8,128], index: 4, kind: output, shape index: {1}]  }
   0x1   :  { %v1353_v0 = vld [vmem:[%s1797_s1 + $0x40] sm:$0xff]   ;;  %v1357_v4 = vld [vmem:[%s1797_s1 + $0x48] sm:$0xff]   ;;  %v1361_v8 = vld [vmem:[%s1797_s1 + $0x50] sm:$0xff]  }
   0x2   :  { %v1354_v1 = vld [vmem:[%s1797_s1 + $0xc0] sm:$0xff]   ;;  %1195 = vmatprep.subr.bf16.mxu0 %v1353_v0  ;;  %v1358_v5 = vld [vmem:[%s1797_s1 + $0xc8] sm:$0xff]   ;;  %v1362_v9 = vld [vmem:[%s1797_s1 + $0xd0] sm:$0xff]  }
   0x3   :  { %v1355_v2 = vld [vmem:[%s1797_s1] sm:$0xff]   ;;  %1235 = vmatprep.subr.bf16.mxu1 %v1354_v1  ;;  %v1359_v6 = vld [vmem:[%s1797_s1 + $0x8] sm:$0xff]   ;;  %v1363_v10 = vld [vmem:[%s1797_s1 + $0x10] sm:$0xff]  }
   0x4   :  { %v1356_v3 = vld [vmem:[%s1797_s1 + $0x80] sm:$0xff]   ;;  %1196 = vmatpush3.bf16.msra.mxu0 %v1355_v2  ;;  %v1360_v7 = vld [vmem:[%s1797_s1 + $0x88] sm:$0xff]   ;;  %v1364_v11 = vld [vmem:[%s1797_s1 + $0x90] sm:$0xff]  }
   0x5   :  { %1236 = vmatpush3.bf16.msra.mxu1 %v1356_v3  ;;  %1197 = vmatprep.subr.bf16.mxu0 %v1357_v4  ;;  %v1365_v12 = vld [vmem:[%s1797_s1 + $0x58] sm:$0xff]   ;;  %v1369_v16 = vld [vmem:[%s1797_s1 + $0x60] sm:$0xff]   ;;  %v1373_v20 = vld [vmem:[%s1797_s1 + $0x68] sm:$0xff]  }
   0x6   :  { %1237 = vmatprep.subr.bf16.mxu1 %v1358_v5  ;;  %v1366_v13 = vld [vmem:[%s1797_s1 + $0xd8] sm:$0xff]   ;;  %v1370_v17 = vld [vmem:[%s1797_s1 + $0xe0] sm:$0xff]   ;;  %v1374_v21 = vld [vmem:[%s1797_s1 + $0xe8] sm:$0xff]  }
   0x7   :  { %v1367_v14 = vld [vmem:[%s1797_s1 + $0x18] sm:$0xff]   ;;  %v1371_v18 = vld [vmem:[%s1797_s1 + $0x20] sm:$0xff]   ;;  %v1375_v22 = vld [vmem:[%s1797_s1 + $0x28] sm:$0xff]  }
   0x8   :  { %1198 = vmatpush3.bf16.msra.mxu0 %v1359_v6  ;;  %v1368_v15 = vld [vmem:[%s1797_s1 + $0x98] sm:$0xff]   ;;  %v1372_v19 = vld [vmem:[%s1797_s1 + $0xa0] sm:$0xff]   ;;  %v1376_v23 = vld [vmem:[%s1797_s1 + $0xa8] sm:$0xff]  }
   0x9   :  { %1238 = vmatpush3.bf16.msra.mxu1 %v1360_v7  ;;  %1199 = vmatprep.subr.bf16.mxu0 %v1361_v8  ;;  %v1377_v24 = vld [vmem:[%s1797_s1 + $0x70] sm:$0xff]   ;;  %v1381_v28 = vld [vmem:[%s1797_s1 + $0x78] sm:$0xff]   ;;  %v38_v32 = vld [vmem:[%s1798_s0] sm:$0xff] }
   0xa   :  { %1239 = vmatprep.subr.bf16.mxu1 %v1362_v9  ;;  %v1378_v25 = vld [vmem:[%s1797_s1 + $0xf0] sm:$0xff]   ;;  %v1382_v29 = vld [vmem:[%s1797_s1 + $0xf8] sm:$0xff]   ;;  %v39_v34 = vld [vmem:[%s1798_s0 + $0x8] sm:$0xff]  ;;  %v70_v36 = vmax.bf16 %v1409_v35, %v38_v32 }
   0xb   :  { %v1379_v26 = vld [vmem:[%s1797_s1 + $0x30] sm:$0xff]   ;;  %v1383_v30 = vld [vmem:[%s1797_s1 + $0x38] sm:$0xff]   ;;  %v43_v38 = vld [vmem:[%s1798_s0 + $0x24] sm:$0xff]  ;;  %v71_v39 = vmax.bf16 %v1409_v35, %v39_v34 }
   0xc   :  { %1200 = vmatpush3.bf16.msra.mxu0 %v1363_v10  ;;  %v1380_v27 = vld [vmem:[%s1797_s1 + $0xb0] sm:$0xff]   ;;  %v1384_v31 = vld [vmem:[%s1797_s1 + $0xb8] sm:$0xff]   ;;  %v75_v40 = vmax.bf16 %v1409_v35, %v43_v38  ;;  %v1385_v41 = vld [vmem:[%s1797_s1 + $0x140] sm:$0xff]  }
   0xd   :  { %1240 = vmatpush3.bf16.msra.mxu1 %v1364_v11  ;;  %1201 = vmatprep.subr.bf16.mxu0 %v1365_v12  ;;  %v42_v33 = vld [vmem:[%s1798_s0 + $0x1c] sm:$0xff]  ;;  %v1387_v47 = vld [vmem:[%s1797_s1 + $0x148] sm:$0xff]   ;;  %v50_v51 = vld [vmem:[%s1798_s0 + $0x54] sm:$0xff] }
   0xe   :  { %1241 = vmatprep.subr.bf16.mxu1 %v1366_v13  ;;  %v74_v37 = vmax.bf16 %v1409_v35, %v42_v33  ;;  %v1386_v44 = vld [vmem:[%s1797_s1 + $0x100] sm:$0xff]   ;;  %v1097_v45 = vcombine.high %v71_v39, %v75_v40  ;;  %v1096_v46 = vcombine.low %v71_v39, %v75_v40  ;;  %v1389_v49 = vld [vmem:[%s1797_s1 + $0x108] sm:$0xff]   ;;  %v46_v50 = vld [vmem:[%s1798_s0 + $0x38] sm:$0xff]  ;;  %v82_v53 = vmax.bf16 %v1409_v35, %v50_v51 }
   0xf   :  { %v1388_v48 = vld [vmem:[%s1797_s1 + $0x180] sm:$0xff]   ;;  %v78_v52 = vmax.bf16 %v1409_v35, %v46_v50  ;;  %v1390_v58 = vld [vmem:[%s1797_s1 + $0x150] sm:$0xff]   ;;  %v1391_v60 = vld [vmem:[%s1797_s1 + $0x188] sm:$0xff]  }
  0x10   :  { %1202 = vmatpush3.bf16.msra.mxu0 %v1367_v14  ;;  %v1095_v42 = vcombine.high %v70_v36, %v74_v37  ;;  %v1094_v43 = vcombine.low %v70_v36, %v74_v37  ;;  %799 = vmatprep.mubr.bf16.mxu1 %v1097_v45  ;;  %v47_v54 = vld [vmem:[%s1798_s0 + $0x40] sm:$0xff]  ;;  %v1392_v63 = vld [vmem:[%s1797_s1 + $0x110] sm:$0xff]   ;;  %v1393_v1 = vld [vmem:[%s1797_s1 + $0x158] sm:$0xff]  }
  0x11   :  { %1242 = vmatpush3.bf16.msra.mxu1 %v1368_v15  ;;  %1203 = vmatprep.subr.bf16.mxu0 %v1369_v16  ;;  %v51_v55 = vld [vmem:[%s1798_s0 + $0x5c] sm:$0xff]  ;;  %v79_v56 = vmax.bf16 %v1409_v35, %v47_v54  ;;  %v1102_v59 = vcombine.high %v78_v52, %v82_v53  ;;  %v1101_v62 = vcombine.low %v78_v52, %v82_v53  ;;  %v1394_v2 = vld [vmem:[%s1797_s1 + $0x190] sm:$0xff]   ;;  %v1403_v32 = vld [vmem:[%s1797_s1 + $0x1a8] sm:$0xff]  }
  0x12   :  { %1243 = vmatprep.subr.bf16.mxu1 %v1370_v17  ;;  %734 = vmatprep.mubr.bf16.mxu0 %v1095_v42  ;;  %v83_v57 = vmax.bf16 %v1409_v35, %v51_v55  ;;  %v54_v3 = vld [vmem:[%s1798_s0 + $0x70] sm:$0xff]  ;;  %v55_v6 = vld [vmem:[%s1798_s0 + $0x78] sm:$0xff]  ;;  %v1396_v12 = vld [vmem:[%s1797_s1 + $0x160] sm:$0xff]  }
  0x13   :  { %v58_v4 = vld [vmem:[%s1798_s0 + $0x8c] sm:$0xff]  ;;  %v86_v5 = vmax.bf16 %v1409_v35, %v54_v3  ;;  %v59_v7 = vld [vmem:[%s1798_s0 + $0x94] sm:$0xff]  ;;  %v87_v10 = vmax.bf16 %v1409_v35, %v55_v6  ;;  %v1398_v17 = vld [vmem:[%s1797_s1 + $0x120] sm:$0xff]  }
  0x14   :  { %1204 = vmatpush3.bf16.msra.mxu0 %v1371_v18  ;;  %v1104_v61 = vcombine.high %v79_v56, %v83_v57  ;;  %v1103_v0 = vcombine.low %v79_v56, %v83_v57  ;;  %v1395_v8 = vld [vmem:[%s1797_s1 + $0x118] sm:$0xff]   ;;  %v90_v9 = vmax.bf16 %v1409_v35, %v58_v4  ;;  %v91_v11 = vmax.bf16 %v1409_v35, %v59_v7  ;;  %v1404_v36 = vld [vmem:[%s1797_s1 + $0x130] sm:$0xff]   ;;  %v53_v51 = vld [vmem:[%s1798_s0 + $0x6c] sm:$0xf] }
  0x15   :  { %1244 = vmatpush3.bf16.msra.mxu1 %v1372_v19  ;;  %1205 = vmatprep.subr.bf16.mxu0 %v1373_v20  ;;  %v1397_v15 = vld [vmem:[%s1797_s1 + $0x198] sm:$0xff]   ;;  %v1399_v19 = vld [vmem:[%s1797_s1 + $0x168] sm:$0xff]   ;;  %v1400_v20 = vld [vmem:[%s1797_s1 + $0x1a0] sm:$0xff]   ;;  %v85_v57 = vmax.bf16 %v1409_v35, %v53_v51 }
  0x16   :  { %1245 = vmatprep.subr.bf16.mxu1 %v1374_v21  ;;  %v1109_v13 = vcombine.high %v86_v5, %v90_v9  ;;  %v1111_v14 = vcombine.high %v87_v10, %v91_v11  ;;  %v1108_v16 = vcombine.low %v86_v5, %v90_v9  ;;  %v1110_v18 = vcombine.low %v87_v10, %v91_v11  ;;  %v1401_v21 = vld [vmem:[%s1797_s1 + $0x128] sm:$0xff]   ;;  %v1405_v38 = vld [vmem:[%s1797_s1 + $0x178] sm:$0xff]   ;;  %v1406_v39 = vld [vmem:[%s1797_s1 + $0x1b0] sm:$0xff]  }
  0x17   :  { %v40_v40 = vld [vmem:[%s1798_s0 + $0x10] sm:$0xff]  ;;  %v1407_v42 = vld [vmem:[%s1797_s1 + $0x138] sm:$0xff]   ;;  %v48_v52 = vld [vmem:[%s1798_s0 + $0x48] sm:$0xff] }
  0x18   :  { %1206 = vmatpush3.bf16.msra.mxu0 %v1375_v22  ;;  %v62_v22 = vld [vmem:[%s1798_s0 + $0xa8] sm:$0xff]  ;;  %v1408_v45 = vld [vmem:[%s1797_s1 + $0x1b8] sm:$0xff]   ;;  %v65_v6 = vld [vmem:[%s1798_s0 + $0xc0] sm:$0xf] }
  0x19   :  { %1246 = vmatpush3.bf16.msra.mxu1 %v1376_v23  ;;  %1207 = vmatprep.subr.bf16.mxu0 %v1377_v24  ;;  %v66_v23 = vld [vmem:[%s1798_s0 + $0xc4] sm:$0xff]  ;;  %v63_v24 = vld [vmem:[%s1798_s0 + $0xb0] sm:$0xff]  ;;  %v60_v3 = vld [vmem:[%s1798_s0 + $0x9c] sm:$0xff]  ;;  %v97_v10 = vmax.bf16 %v1409_v35, %v65_v6 }
  0x1a   :  { %1247 = vmatprep.subr.bf16.mxu1 %v1378_v25  ;;  %v94_v25 = vmax.bf16 %v1409_v35, %v62_v22  ;;  %v52_v53 = vld [vmem:[%s1798_s0 + $0x64] sm:$0xff]  ;;  %v69_v7 = vld [vmem:[%s1798_s0 + $0xdc] sm:$0xf]  ;;  %v92_v9 = vmax.bf16 %v1409_v35, %v60_v3 }
  0x1b   :  { %v57_v55 = vld [vmem:[%s1798_s0 + $0x88] sm:$0xf]  ;;  %v101_v11 = vmax.bf16 %v1409_v35, %v69_v7 }
  0x1c   :  { %1208 = vmatpush3.bf16.msra.mxu0 %v1379_v26  ;;  %v98_v26 = vmax.bf16 %v1409_v35, %v66_v23 }
  0x1d   :  { %1248 = vmatpush3.bf16.msra.mxu1 %v1380_v27  ;;  %1209 = vmatprep.subr.bf16.mxu0 %v1381_v28  ;;  %v67_v27 = vld [vmem:[%s1798_s0 + $0xcc] sm:$0xff]  ;;  %v95_v28 = vmax.bf16 %v1409_v35, %v63_v24 }
  0x1e   :  { %1249 = vmatprep.subr.bf16.mxu1 %v1382_v29  ;;  %v99_v29 = vmax.bf16 %v1409_v35, %v67_v27  ;;  %v1115_v34 = vcombine.low %v94_v25, %v98_v26 }
  0x20   :  { %1210 = vmatpush3.bf16.msra.mxu0 %v1383_v30  ;;  %v1402_v30 = vld [vmem:[%s1797_s1 + $0x170] sm:$0xff]   ;;  %v1118_v33 = vcombine.high %v95_v28, %v99_v29  ;;  %v1117_v37 = vcombine.low %v95_v28, %v99_v29 }
  0x21   :  { %1250 = vmatpush3.bf16.msra.mxu1 %v1384_v31  ;;  %1275 = vmatprep.subr.bf16.mxu0 %v1385_v41  ;;  %v1116_v31 = vcombine.high %v94_v25, %v98_v26  ;;  %v44_v41 = vld [vmem:[%s1798_s0 + $0x2c] sm:$0xff] }
  0x22   :  { %1327 = vmatprep.subr.bf16.mxu1 %v1388_v48 }
  0x23   :  { %735 = vmatmul.mubr.bf16.vlgmr.msra.gmra.mrb[0].mxu0 %v1094_v43  ;;  %v72_v43 = vmax.bf16 %v1409_v35, %v40_v40 }
  0x24   :  { %800 = vmatmul.mubr.bf16.vlgmr.msra.gmra.mrb[0].mxu1 %v1096_v46  ;;  %1276 = vmatpush3.bf16.msra.mxu0 %v1386_v44  ;;  %v76_v44 = vmax.bf16 %v1409_v35, %v44_v41  ;;  %v41_v46 = vld [vmem:[%s1798_s0 + $0x18] sm:$0xf] }
  0x25   :  { %1277 = vmatprep.subr.bf16.mxu0 %v1387_v47  ;;  %1328 = vmatpush3.bf16.msra.mxu1 %v1388_v48  ;;  %v45_v47 = vld [vmem:[%s1798_s0 + $0x34] sm:$0xf]  ;;  %v49_v48 = vld [vmem:[%s1798_s0 + $0x50] sm:$0xf]  ;;  %v73_v50 = vmax.bf16 %v1409_v35, %v41_v46 }
  0x26   :  { %742 = vmatprep.mubr.bf16.mxu0 %v1102_v59  ;;  %807 = vmatprep.mubr.bf16.mxu1 %v1104_v61  ;;  %v77_v54 = vmax.bf16 %v1409_v35, %v45_v47  ;;  %v81_v56 = vmax.bf16 %v1409_v35, %v49_v48  ;;  %v84_v59 = vmax.bf16 %v1409_v35, %v52_v53 }
  0x27   :  { %1329 = vmatprep.subr.bf16.mxu1 %v1391_v60  ;;  %v1098_v61 = vcombine.low %v72_v43, %v76_v44 }
  0x28   :  { %1278 = vmatpush3.bf16.msra.mxu0 %v1389_v49  ;;  %v1099_v49 = vcombine.high %v72_v43, %v76_v44  ;;  %v1107_v4 = vcombine.low %v81_v56, %v85_v57 }
  0x29   :  { %1279 = vmatprep.subr.bf16.mxu0 %v1390_v58  ;;  %1330 = vmatpush3.bf16.msra.mxu1 %v1391_v60  ;;  %v80_v58 = vmax.bf16 %v1409_v35, %v48_v52  ;;  %v61_v60 = vld [vmem:[%s1798_s0 + $0xa4] sm:$0xf] }
  0x2a   :  { %1331 = vmatprep.subr.bf16.mxu1 %v1394_v2 }
  0x2b   :  { %743 = vmatmul.mubr.bf16.gmra.mrb[4].mxu0 %v1101_v62  ;;  %v1100_v62 = vcombine.low %v73_v50, %v77_v54 }
  0x2c   :  { %808 = vmatmul.mubr.bf16.gmra.mrb[4].mxu1 %v1103_v0  ;;  %1280 = vmatpush3.bf16.msra.mxu0 %v1392_v63  ;;  %v89_v63 = vmax.bf16 %v1409_v35, %v57_v55  ;;  %v93_v0 = vmax.bf16 %v1409_v35, %v61_v60 }
  0x2d   :  { %1281 = vmatprep.subr.bf16.mxu0 %v1393_v1  ;;  %1332 = vmatpush3.bf16.msra.mxu1 %v1394_v2  ;;  %v1106_v1 = vcombine.high %v80_v58, %v84_v59  ;;  %v56_v2 = vld [vmem:[%s1798_s0 + $0x80] sm:$0xff] }
  0x2e   :  { %750 = vmatprep.mubr.bf16.mxu0 %v1109_v13  ;;  %815 = vmatprep.mubr.bf16.mxu1 %v1111_v14  ;;  %v1114_v5 = vcombine.low %v89_v63, %v93_v0  ;;  %v64_v14 = vld [vmem:[%s1798_s0 + $0xb8] sm:$0xff] }
  0x2f   :  { %1333 = vmatprep.subr.bf16.mxu1 %v1397_v15 }
  0x30   :  { %1282 = vmatpush3.bf16.msra.mxu0 %v1395_v8  ;;  %v88_v8 = vmax.bf16 %v1409_v35, %v56_v2 }
  0x31   :  { %1283 = vmatprep.subr.bf16.mxu0 %v1396_v12  ;;  %1334 = vmatpush3.bf16.msra.mxu1 %v1397_v15  ;;  %v1105_v12 = vcombine.low %v80_v58, %v84_v59  ;;  %v68_v15 = vld [vmem:[%s1798_s0 + $0xd4] sm:$0xff] }
  0x32   :  { %1335 = vmatprep.subr.bf16.mxu1 %v1400_v20  ;;  %v1113_v13 = vcombine.high %v88_v8, %v92_v9 }
  0x33   :  { %751 = vmatmul.mubr.bf16.gmra.mrb[8].mxu0 %v1108_v16  ;;  %v1121_v16 = vcombine.low %v97_v10, %v101_v11 }
  0x34   :  { %816 = vmatmul.mubr.bf16.gmra.mrb[8].mxu1 %v1110_v18  ;;  %1284 = vmatpush3.bf16.msra.mxu0 %v1398_v17  ;;  %v96_v17 = vmax.bf16 %v1409_v35, %v64_v14  ;;  %v100_v18 = vmax.bf16 %v1409_v35, %v68_v15 }
  0x35   :  { %1285 = vmatprep.subr.bf16.mxu0 %v1399_v19  ;;  %1336 = vmatpush3.bf16.msra.mxu1 %v1400_v20  ;;  %v1112_v19 = vcombine.low %v88_v8, %v92_v9 }
  0x36   :  { %758 = vmatprep.mubr.bf16.mxu0 %v1116_v31  ;;  %823 = vmatprep.mubr.bf16.mxu1 %v1118_v33  ;;  %v1120_v20 = vcombine.high %v96_v17, %v100_v18 }
  0x37   :  { %1337 = vmatprep.subr.bf16.mxu1 %v1403_v32 }
  0x38   :  { %1286 = vmatpush3.bf16.msra.mxu0 %v1401_v21  ;;  %v1119_v21 = vcombine.low %v96_v17, %v100_v18 }
  0x39   :  { %1287 = vmatprep.subr.bf16.mxu0 %v1402_v30  ;;  %1338 = vmatpush3.bf16.msra.mxu1 %v1403_v32 }
  0x3a   :  { %1339 = vmatprep.subr.bf16.mxu1 %v1406_v39 }
  0x3b   :  { %759 = vmatmul.mubr.bf16.gmra.mrb[12].mxu0 %v1115_v34 }
  0x3c   :  { %824 = vmatmul.mubr.bf16.gmra.mrb[12].mxu1 %v1117_v37  ;;  %1288 = vmatpush3.bf16.msra.mxu0 %v1404_v36 }
  0x3d   :  { %1289 = vmatprep.subr.bf16.mxu0 %v1405_v38  ;;  %864 = vmatprep.mubr.bf16.mxu0 %v1099_v49 }
  0x3e   :  { %1340 = vmatpush3.bf16.msra.mxu1 %v1406_v39  ;;  %1343 = vmatprep.mubr.bf16.mxu1 %v1100_v62 }
  0x3f   :  { %1341 = vmatprep.subr.bf16.mxu1 %v1408_v45 }
  0x40   :  { %1290 = vmatpush3.bf16.msra.mxu0 %v1407_v42 }
  0x42   :  { %1342 = vmatpush3.bf16.msra.mxu1 %v1408_v45 }
  0x43   :  { %865 = vmatmul.mubr.bf16.vlgmr.msra.gmra.mrb[16].mxu0 %v1098_v61 }
  0x44   :  { %872 = vmatprep.mubr.bf16.mxu0 %v1106_v1 }
  0x45   :  { %1344 = vmatmul.mubr.bf16.vlgmr.msra.gmra.mrb[16].mxu1 %v1107_v4 }
  0x46   :  { %1347 = vmatprep.mubr.bf16.mxu1 %v1114_v5 }
  0x4b   :  { %873 = vmatmul.mubr.bf16.gmra.mrb[20].mxu0 %v1105_v12 }
  0x4c   :  { %880 = vmatprep.mubr.bf16.mxu0 %v1113_v13 }
  0x4d   :  { %1348 = vmatmul.mubr.bf16.gmra.mrb[20].mxu1 %v1121_v16 }
  0x53   :  { %881 = vmatmul.mubr.bf16.gmra.mrb[24].mxu0 %v1112_v19 }
  0x54   :  { %888 = vmatprep.mubr.bf16.mxu0 %v1120_v20 }
  0x5b   :  { %889 = vmatmul.mubr.bf16.gmra.mrb[28].mxu0 %v1119_v21 }
  0xf6   :  { %v1211_v22 = vpop.f32.mrb[0].mxu0 }
  0xf7   :  { %v1251_v23 = vpop.f32.mrb[0].mxu1  ;;  %v1212_v24 = vpop.f32.mrb[1].mxu0 }
  0xf8   :  { %v1213_v25 = vadd.f32 %v1212_v24, %v1211_v22  ;;  %v1252_v26 = vpop.f32.mrb[1].mxu1  ;;  %v1214_v27 = vpop.f32.mrb[2].mxu0 }
  0xf9   :  { %v1253_v28 = vadd.f32 %v1252_v26, %v1251_v23  ;;  %v1254_v29 = vpop.f32.mrb[2].mxu1  ;;  %v1215_v30 = vpop.f32.mrb[3].mxu0  ;;  %v1746_v23 = vld [vmem:[%s1799_s2] ss:$0 sm:$0xff] }
  0xfa   :  { %v1216_v31 = vadd.f32 %v1215_v30, %v1214_v27  ;;  %v1255_v32 = vpop.f32.mrb[3].mxu1 }
  0xfb   :  { %v802_v33 = vadd.f32 %v1253_v28, %v1213_v25  ;;  %v1256_v35 = vadd.f32 %v1255_v32, %v1254_v29 }
  0xfd   :  { %v805_v34 = vadd.f32 %v1256_v35, %v1216_v31 }
  0xfe   :  { %v1217_v36 = vpop.f32.mrb[4].mxu0 }
  0xff   :  { %v1257_v37 = vpop.f32.mrb[4].mxu1  ;;  %v1218_v38 = vpop.f32.mrb[5].mxu0 }
 0x100   :  { %v1219_v39 = vadd.f32 %v1218_v38, %v1217_v36  ;;  %v1258_v40 = vpop.f32.mrb[5].mxu1  ;;  %v1220_v41 = vpop.f32.mrb[6].mxu0 }
 0x101   :  { %v1259_v42 = vadd.f32 %v1258_v40, %v1257_v37  ;;  %v1260_v43 = vpop.f32.mrb[6].mxu1  ;;  %v1221_v44 = vpop.f32.mrb[7].mxu0 }
 0x102   :  { %v1222_v45 = vadd.f32 %v1221_v44, %v1220_v41  ;;  %v1261_v46 = vpop.f32.mrb[7].mxu1 }
 0x103   :  { %v1731_v47 = vadd.f32 %v1259_v42, %v1219_v39  ;;  %v1262_v48 = vadd.f32 %v1261_v46, %v1260_v43 }
 0x105   :  { %v1733_v49 = vadd.f32 %v1262_v48, %v1222_v45 }
 0x106   :  { %v1223_v50 = vpop.f32.mrb[8].mxu0 }
 0x107   :  { %v1263_v51 = vpop.f32.mrb[8].mxu1  ;;  %v1224_v52 = vpop.f32.mrb[9].mxu0 }
 0x108   :  { %v1225_v53 = vadd.f32 %v1224_v52, %v1223_v50  ;;  %v1264_v54 = vpop.f32.mrb[9].mxu1  ;;  %v1226_v55 = vpop.f32.mrb[10].mxu0 }
 0x109   :  { %v1265_v56 = vadd.f32 %v1264_v54, %v1263_v51  ;;  %v1266_v57 = vpop.f32.mrb[10].mxu1  ;;  %v1227_v58 = vpop.f32.mrb[11].mxu0 }
 0x10a   :  { %v1228_v59 = vadd.f32 %v1227_v58, %v1226_v55  ;;  %v1267_v60 = vpop.f32.mrb[11].mxu1 }
 0x10b   :  { %v1735_v61 = vadd.f32 %v1265_v56, %v1225_v53  ;;  %v1268_v62 = vadd.f32 %v1267_v60, %v1266_v57 }
 0x10d   :  { %v1737_v63 = vadd.f32 %v1268_v62, %v1228_v59 }
 0x10e   :  { %v1229_v0 = vpop.f32.mrb[12].mxu0 }
 0x10f   :  { %v1269_v1 = vpop.f32.mrb[12].mxu1  ;;  %v1230_v2 = vpop.f32.mrb[13].mxu0 }
 0x110   :  { %v1231_v3 = vadd.f32 %v1230_v2, %v1229_v0  ;;  %v1270_v4 = vpop.f32.mrb[13].mxu1  ;;  %v1232_v5 = vpop.f32.mrb[14].mxu0 }
 0x111   :  { %v1271_v6 = vadd.f32 %v1270_v4, %v1269_v1  ;;  %v1272_v7 = vpop.f32.mrb[14].mxu1  ;;  %v1233_v8 = vpop.f32.mrb[15].mxu0 }
 0x112   :  { %v1234_v9 = vadd.f32 %v1233_v8, %v1232_v5  ;;  %v1273_v10 = vpop.f32.mrb[15].mxu1 }
 0x113   :  { %v1739_v11 = vadd.f32 %v1271_v6, %v1231_v3  ;;  %v1274_v12 = vadd.f32 %v1273_v10, %v1272_v7 }
 0x115   :  { %v1741_v13 = vadd.f32 %v1274_v12, %v1234_v9 }
 0x116   :  { %v1291_v14 = vpop.f32.mrb[16].mxu0 }
 0x117   :  { %v1292_v15 = vpop.f32.mrb[17].mxu0 }
 0x118   :  { %v1293_v16 = vadd.f32 %v1292_v15, %v1291_v14  ;;  %v1294_v17 = vpop.f32.mrb[18].mxu0  ;;  %v1345_v19 = vpop.f32.mrb[16].mxu1 }
 0x119   :  { %v1295_v18 = vpop.f32.mrb[19].mxu0  ;;  %v931_v22 = vpop.f32.mrb[17].mxu1 }
 0x11a   :  { %v1296_v20 = vadd.f32 %v1295_v18, %v1294_v17  ;;  %v867_v21 = vadd.f32 %v1293_v16, %v802_v33  ;;  %v1346_v24 = vpop.f32.mrb[18].mxu1 }
 0x11b   :  { %v934_v27 = vpop.f32.mrb[19].mxu1 }
 0x11c   :  { %v932_v25 = vadd.f32 %v931_v22, %v867_v21  ;;  %v870_v26 = vadd.f32 %v1296_v20, %v805_v34 }
 0x11e   :  { %v996_v28 = vadd.f32 %v1746_v23, %v932_v25  ;;  %v935_v29 = vadd.f32 %v934_v27, %v870_v26  ;;  %v1297_v30 = vpop.f32.mrb[20].mxu0 }
 0x11f   :  { %v1298_v31 = vpop.f32.mrb[21].mxu0 }
 0x120   :  { %v1187_v32 = vpack.c.bf16 %v996_v28, %v996_v28  ;;  %v997_v35 = vadd.f32 %v1746_v23, %v935_v29  ;;  %v1299_v33 = vadd.f32 %v1298_v31, %v1297_v30  ;;  %v1300_v36 = vpop.f32.mrb[22].mxu0  ;;  %v1058_v37 = vmul.f32 %v996_v28, %v996_v28  ;;  %v1349_v39 = vpop.f32.mrb[20].mxu1 }
 0x121   :  { %v1301_v38 = vpop.f32.mrb[23].mxu0  ;;  %v947_v43 = vpop.f32.mrb[21].mxu1 }
 0x122   :  { %1037 = vst.msk [vmem:[%s1800_s3] sm:$0xf] %vm1036_vm0, %v1187_v32  ;;  %v1188_v34 = vpack.c.bf16 %v997_v35, %v997_v35  ;;  %v1045_v40 = vadd.f32 %v997_v35, %v996_v28  ;;  %v1059_v41 = vmul.f32 %v997_v35, %v997_v35  ;;  %v875_v42 = vadd.f32 %v1299_v33, %v1731_v47  ;;  %v1350_v45 = vpop.f32.mrb[22].mxu1 }
 0x123   :  { %v1302_v44 = vadd.f32 %v1301_v38, %v1300_v36  ;;  %v950_v50 = vpop.f32.mrb[23].mxu1 }
 0x124   :  { %1038 = vst.msk [vmem:[%s1800_s3 + $0x4] sm:$0xf] %vm1036_vm0, %v1188_v34  ;;  %v1066_v46 = vadd.f32 %v1059_v41, %v1058_v37  ;;  %v940_v48 = vadd.f32 %v1345_v19, %v875_v42 }
 0x125   :  { %v878_v51 = vadd.f32 %v1302_v44, %v1733_v49 }
 0x126   :  { %v998_v52 = vadd.f32 %v1746_v23, %v940_v48  ;;  %v1303_v53 = vpop.f32.mrb[24].mxu0 }
 0x127   :  { %v943_v54 = vadd.f32 %v1346_v24, %v878_v51  ;;  %v1304_v55 = vpop.f32.mrb[25].mxu0 }
 0x128   :  { %v1189_v56 = vpack.c.bf16 %v998_v52, %v998_v52  ;;  %v1060_v47 = vmul.f32 %v998_v52, %v998_v52  ;;  %v1305_v57 = vadd.f32 %v1304_v55, %v1303_v53  ;;  %v1306_v58 = vpop.f32.mrb[26].mxu0  ;;  %v1046_v59 = vadd.f32 %v1045_v40, %v998_v52 }
 0x129   :  { %v999_v60 = vadd.f32 %v1746_v23, %v943_v54  ;;  %v1307_v62 = vpop.f32.mrb[27].mxu0 }
 0x12a   :  { %1039 = vst.msk [vmem:[%s1800_s3 + $0x8] sm:$0xf] %vm1036_vm0, %v1189_v56  ;;  %v1308_v0 = vadd.f32 %v1307_v62, %v1306_v58  ;;  %v883_v49 = vadd.f32 %v1305_v57, %v1735_v61  ;;  %v1067_v1 = vadd.f32 %v1066_v46, %v1060_v47 }
 0x12b   :  { %v1190_v2 = vpack.c.bf16 %v999_v60, %v999_v60  ;;  %v1061_v3 = vmul.f32 %v999_v60, %v999_v60  ;;  %v1047_v4 = vadd.f32 %v1046_v59, %v999_v60 }
 0x12c   :  { %v948_v5 = vadd.f32 %v947_v43, %v883_v49  ;;  %v886_v6 = vadd.f32 %v1308_v0, %v1737_v63 }
 0x12d   :  { %1040 = vst.msk [vmem:[%s1800_s3 + $0xc] sm:$0xf] %vm1036_vm0, %v1190_v2  ;;  %v1068_v7 = vadd.f32 %v1067_v1, %v1061_v3 }
 0x12e   :  { %v1000_v8 = vadd.f32 %v1746_v23, %v948_v5  ;;  %v951_v9 = vadd.f32 %v950_v50, %v886_v6  ;;  %v1309_v10 = vpop.f32.mrb[28].mxu0 }
 0x12f   :  { %v1310_v12 = vpop.f32.mrb[29].mxu0 }
 0x130   :  { %v1191_v14 = vpack.c.bf16 %v1000_v8, %v1000_v8  ;;  %v1048_v61 = vadd.f32 %v1047_v4, %v1000_v8  ;;  %v1062_v15 = vmul.f32 %v1000_v8, %v1000_v8  ;;  %v1001_v16 = vadd.f32 %v1746_v23, %v951_v9  ;;  %v1312_v17 = vpop.f32.mrb[30].mxu0 }
 0x131   :  { %v1311_v18 = vadd.f32 %v1310_v12, %v1309_v10  ;;  %v1313_v19 = vpop.f32.mrb[31].mxu0 }
 0x132   :  { %1041 = vst.msk [vmem:[%s1800_s3 + $0x10] sm:$0xf] %vm1036_vm0, %v1191_v14  ;;  %v1069_v63 = vadd.f32 %v1068_v7, %v1062_v15  ;;  %v1192_v20 = vpack.c.bf16 %v1001_v16, %v1001_v16  ;;  %v1049_v21 = vadd.f32 %v1048_v61, %v1001_v16  ;;  %v1063_v22 = vmul.f32 %v1001_v16, %v1001_v16 }
 0x133   :  { %v891_v24 = vadd.f32 %v1311_v18, %v1739_v11  ;;  %v1314_v25 = vadd.f32 %v1313_v19, %v1312_v17 }
 0x134   :  { %1042 = vst.msk [vmem:[%s1800_s3 + $0x14] sm:$0xf] %vm1036_vm0, %v1192_v20  ;;  %v1070_v26 = vadd.f32 %v1069_v63, %v1063_v22 }
 0x135   :  { %v956_v27 = vadd.f32 %v1349_v39, %v891_v24  ;;  %v894_v28 = vadd.f32 %v1314_v25, %v1741_v13 }
 0x137   :  { %v1002_v29 = vadd.f32 %v1746_v23, %v956_v27  ;;  %v959_v30 = vadd.f32 %v1350_v45, %v894_v28 }
 0x139   :  { %v1193_v31 = vpack.c.bf16 %v1002_v29, %v1002_v29  ;;  %v1050_v32 = vadd.f32 %v1049_v21, %v1002_v29  ;;  %v1064_v35 = vmul.f32 %v1002_v29, %v1002_v29  ;;  %v1003_v33 = vadd.f32 %v1746_v23, %v959_v30 }
 0x13b   :  { %1043 = vst.msk [vmem:[%s1800_s3 + $0x18] sm:$0xf] %vm1036_vm0, %v1193_v31  ;;  %v1071_v11 = vadd.f32 %v1070_v26, %v1064_v35  ;;  %v1194_v36 = vpack.c.bf16 %v1003_v33, %v1003_v33  ;;  %v1051_v37 = vadd.f32 %v1050_v32, %v1003_v33  ;;  %v1065_v38 = vmul.f32 %v1003_v33, %v1003_v33 }
 0x13d   :  { %1044 = vst.msk [vmem:[%s1800_s3 + $0x1c] sm:$0xf] %vm1036_vm0, %v1194_v36  ;;  %v1052_v13 = vrot.slane %v1051_v37, 4  ;;  %v1072_v39 = vadd.f32 %v1071_v11, %v1065_v38 }
 0x13f   :  { %v1053_v34 = vadd.f32 %v1052_v13, %v1051_v37  ;;  %v1073_v40 = vrot.slane %v1072_v39, 4 }
 0x141   :  { %v1054_v41 = vrot.slane %v1053_v34, 2  ;;  %v1074_v23 = vadd.f32 %v1073_v40, %v1072_v39 }
 0x143   :  { %v1055_v42 = vadd.f32 %v1054_v41, %v1053_v34  ;;  %v1075_v43 = vrot.slane %v1074_v23, 2 }
 0x145   :  { %v1056_v44 = vrot.slane %v1055_v42, 1  ;;  %v1076_v45 = vadd.f32 %v1075_v43, %v1074_v23 }
 0x147   :  { %v1077_v46 = vrot.slane %v1076_v45, 1  ;;  %v1057_v48 = vadd.f32 %v1056_v44, %v1055_v42 }
 0x149   :  { %v1078_v50 = vadd.f32 %v1077_v46, %v1076_v45 }
 0x14b   :  { %v1080_v51 = vsel %vm1079_vm1, %v1057_v48, %v1078_v50 }
 0x14c   :  { %v1082_v52 = vsel %vm1081_vm2, %v1080_v51, 0.0 }
 0x14d   :  { %1085 = vst [vmem:[%s1801_s4] sm:$0xff] %v1082_v52 }

// kernel: tile.163
= control target key start
LH: loop header
LB: loop body
LE: loop exit
PB: predicated region body
PF: predicated region fallthrough
CT: control target
= control target key end

     0   :  { %s22_s0 = inlined_call_operand.vmem [shape: f32[4], index: 0, kind: input, shape index: {}]   ;;  %s23_s1 = inlined_call_operand.vmem [shape: f32[8,4], index: 1, kind: output, shape index: {}]  }
   0x1   :  { %v4_v0 = vld [vmem:[%s22_s0] ss:$0 sm:$0xff] }
   0x2   :  { %5 = vst [vmem:[%s23_s1] sm:$0xff] %v4_v0 }

// kernel: tile.170
= control target key start
LH: loop header
LB: loop body
LE: loop exit
PB: predicated region body
PF: predicated region fallthrough
CT: control target
= control target key end

     0   :  { %s67_s10 = smov 28   ;;  %s68_s11 = smov 20   ;;  %vm3_vm0 = vcmask 31744   ;;  %vm9_vm1 = vcmask 261344   ;;  %vm15_vm2 = vcmask 228544   ;;  %vm21_vm3 = vcmask 195744   ;;  %s111_s0 = inlined_call_operand.vmem [shape: f32[8,4], index: 0, kind: input, shape index: {}]   ;;  %s112_s1 = inlined_call_operand.vmem [shape: f32[32], index: 1, kind: output, shape index: {}]  }
   0x1   :  { %v53_v0 = vld [vmem:[%s111_s0 + $0x7] sm:$0x1]   ;;  %v55_v1 = vld [vmem:[%s111_s0 + $0x5] sm:$0x1]   ;;  %v54_v2 = vld [vmem:[%s111_s0 + $0x6] sm:$0x1]  }
   0x2   :  { %7 = vrot.lane.b32.xlu0 %v53_v0, %s67_s10  ;;  %19 = vrot.lane.b32.xlu1 %v55_v1, %s68_s11  ;;  %v56_v3 = vld [vmem:[%s111_s0 + $0x4] sm:$0x1]   ;;  %v2_v4 = vld [vmem:[%s111_s0] sm:$0x1]   ;;  %s69_s18 = smov 24   ;;  %s70_s19 = smov 16  }
   0x3   :  { %4 = vst.msk [vmem:[#allocation0] sm:$0x1] %vm3_vm0, %v2_v4   ;;  %v57_v5 = vld [vmem:[%s111_s0 + $0x3] sm:$0x1]   ;;  %v58_v6 = vld [vmem:[%s111_s0 + $0x2] sm:$0x1]  }
   0x4   :  { %s71_s24 = smov 12   ;;  %s72_s25 = smov 8   ;;  %v59_v7 = vld [vmem:[%s111_s0 + $0x1] sm:$0x1]   ;;  %vm27_vm4 = vcmask 162944   ;;  %vm33_vm5 = vcmask 130144  }
   0x5   :  { %s73_s0 = smov 4   ;;  %vm39_vm6 = vcmask 97344   ;;  %vm45_vm7 = vcmask 64544  }
   0x6   :  { %13 = vrot.lane.b32.xlu0 %v54_v2, %s69_s18  ;;  %25 = vrot.lane.b32.xlu1 %v56_v3, %s70_s19 }
   0xa   :  { %31 = vrot.lane.b32.xlu0 %v57_v5, %s71_s24  ;;  %37 = vrot.lane.b32.xlu1 %v58_v6, %s72_s25 }
   0xe   :  { %43 = vrot.lane.b32.xlu0 %v59_v7, %s73_s0 }
  0x74   :  { %v8_v8 = vpop.permute.xlu0 %7   ;;  %v20_v9 = vpop.permute.xlu1 %19  }
  0x75   :  { %10 = vst.msk [vmem:[#allocation0] sm:$0x1] %vm9_vm1, %v8_v8  }
  0x78   :  { %v14_v10 = vpop.permute.xlu0 %13   ;;  %v26_v11 = vpop.permute.xlu1 %25  }
  0x79   :  { %16 = vst.msk [vmem:[#allocation0] sm:$0x1] %vm15_vm2, %v14_v10  }
  0x7a   :  { %22 = vst.msk [vmem:[#allocation0] sm:$0x1] %vm21_vm3, %v20_v9  }
  0x7b   :  { %28 = vst.msk [vmem:[#allocation0] sm:$0x1] %vm27_vm4, %v26_v11  }
  0x7c   :  { %v32_v12 = vpop.permute.xlu0 %31   ;;  %v38_v13 = vpop.permute.xlu1 %37  }
  0x7d   :  { %34 = vst.msk [vmem:[#allocation0] sm:$0x1] %vm33_vm5, %v32_v12  }
  0x7e   :  { %40 = vst.msk [vmem:[#allocation0] sm:$0x1] %vm39_vm6, %v38_v13  }
  0x80   :  { %v44_v14 = vpop.permute.xlu0 %43  }
  0x81   :  { %46 = vst.msk [vmem:[#allocation0] sm:$0x1] %vm45_vm7, %v44_v14  }
  0x88   :  { %v50_v15 = vld [vmem:[#allocation0] sm:$0x1] }
  0x89   :  { %52 = vst [vmem:[%s112_s1] sm:$0x1] %v50_v15 }

// kernel: _lambda_.32
= control target key start
LH: loop header
LB: loop body
LE: loop exit
PB: predicated region body
PF: predicated region fallthrough
CT: control target
= control target key end

     0   :  { %s370_s0 = inlined_call_operand.vmem [shape: bf16[128,128], index: 0, kind: input, shape index: {}]   ;;  %s371_s1 = inlined_call_operand.vmem [shape: f32[1,128], index: 1, kind: input, shape index: {}]   ;;  %s372_s2 = inlined_call_operand.vmem [shape: f32[1,128], index: 2, kind: input, shape index: {}]   ;;  %s373_s3 = inlined_call_operand.vmem [shape: bf16[128,128], index: 3, kind: output, shape index: {}]  }
   0x1   :  { %v211_v0 = vld [vmem:[%s370_s0] sm:$0xff]   ;;  %v282_v4 = vld [vmem:[%s370_s0 + $0x8] sm:$0xff]   ;;  %v283_v5 = vld [vmem:[%s370_s0 + $0x10] sm:$0xff]  }
   0x2   :  { %v176_v1 = vld [vmem:[%s371_s1] ss:$0 sm:$0xff]  ;;  %v212_v2 = vunpack.c.l.bf16 %v211_v0  ;;  %v213_v3 = vunpack.c.h.bf16 %v211_v0  ;;  %v284_v6 = vld [vmem:[%s370_s0 + $0x18] sm:$0xff]   ;;  %v216_v8 = vunpack.c.l.bf16 %v282_v4  ;;  %v217_v9 = vunpack.c.h.bf16 %v282_v4  ;;  %v286_v25 = vld [vmem:[%s370_s0 + $0x28] sm:$0xff]  }
   0x3   :  { %v177_v7 = vld [vmem:[%s372_s2] ss:$0 sm:$0xff]  ;;  %v220_v10 = vunpack.c.l.bf16 %v283_v5  ;;  %v221_v11 = vunpack.c.h.bf16 %v283_v5  ;;  %v224_v14 = vunpack.c.l.bf16 %v284_v6  ;;  %v225_v15 = vunpack.c.h.bf16 %v284_v6  ;;  %v287_v30 = vld [vmem:[%s370_s0 + $0x30] sm:$0xff]   ;;  %v288_v35 = vld [vmem:[%s370_s0 + $0x38] sm:$0xff]  }
   0x4   :  { %v53_v12 = vmul.f32 %v212_v2, %v176_v1  ;;  %v54_v13 = vmul.f32 %v213_v3, %v176_v1  ;;  %v55_v16 = vmul.f32 %v216_v8, %v176_v1  ;;  %v56_v17 = vmul.f32 %v217_v9, %v176_v1  ;;  %v285_v20 = vld [vmem:[%s370_s0 + $0x20] sm:$0xff]  }
   0x5   :  { %v57_v18 = vmul.f32 %v220_v10, %v176_v1  ;;  %v58_v19 = vmul.f32 %v221_v11, %v176_v1  ;;  %v59_v23 = vmul.f32 %v224_v14, %v176_v1  ;;  %v60_v24 = vmul.f32 %v225_v15, %v176_v1 }
   0x6   :  { %v76_v21 = vadd.f32 %v177_v7, %v53_v12  ;;  %v77_v22 = vadd.f32 %v177_v7, %v54_v13  ;;  %v78_v26 = vadd.f32 %v177_v7, %v55_v16  ;;  %v79_v27 = vadd.f32 %v177_v7, %v56_v17 }
   0x7   :  { %v80_v28 = vadd.f32 %v177_v7, %v57_v18  ;;  %v81_v29 = vadd.f32 %v177_v7, %v58_v19  ;;  %v82_v32 = vadd.f32 %v177_v7, %v59_v23  ;;  %v83_v33 = vadd.f32 %v177_v7, %v60_v24 }
   0x8   :  { %v245_v31 = vpack.c.bf16 %v77_v22, %v76_v21  ;;  %v228_v34 = vunpack.c.l.bf16 %v285_v20  ;;  %v250_v36 = vpack.c.bf16 %v79_v27, %v78_v26  ;;  %v229_v38 = vunpack.c.h.bf16 %v285_v20 }
   0x9   :  { %v255_v37 = vpack.c.bf16 %v81_v29, %v80_v28  ;;  %v232_v39 = vunpack.c.l.bf16 %v286_v25  ;;  %v260_v40 = vpack.c.bf16 %v83_v33, %v82_v32  ;;  %v233_v42 = vunpack.c.h.bf16 %v286_v25 }
   0xa   :  { %246 = vst [vmem:[%s373_s3] sm:$0xff] %v245_v31   ;;  %v61_v41 = vmul.f32 %v228_v34, %v176_v1  ;;  %v236_v43 = vunpack.c.l.bf16 %v287_v30  ;;  %289 = vst [vmem:[%s373_s3 + $0x8] sm:$0xff] %v250_v36   ;;  %v62_v44 = vmul.f32 %v229_v38, %v176_v1  ;;  %v237_v46 = vunpack.c.h.bf16 %v287_v30 }
   0xb   :  { %290 = vst [vmem:[%s373_s3 + $0x10] sm:$0xff] %v255_v37   ;;  %v63_v45 = vmul.f32 %v232_v39, %v176_v1  ;;  %v240_v47 = vunpack.c.l.bf16 %v288_v35  ;;  %291 = vst [vmem:[%s373_s3 + $0x18] sm:$0xff] %v260_v40   ;;  %v64_v49 = vmul.f32 %v233_v42, %v176_v1  ;;  %v241_v51 = vunpack.c.h.bf16 %v288_v35 }
   0xc   :  { %v84_v48 = vadd.f32 %v177_v7, %v61_v41  ;;  %v65_v50 = vmul.f32 %v236_v43, %v176_v1  ;;  %v85_v52 = vadd.f32 %v177_v7, %v62_v44  ;;  %v66_v54 = vmul.f32 %v237_v46, %v176_v1 }
   0xd   :  { %v86_v53 = vadd.f32 %v177_v7, %v63_v45  ;;  %v67_v55 = vmul.f32 %v240_v47, %v176_v1  ;;  %v87_v56 = vadd.f32 %v177_v7, %v64_v49  ;;  %v68_v58 = vmul.f32 %v241_v51, %v176_v1 }
   0xe   :  { %v88_v57 = vadd.f32 %v177_v7, %v65_v50  ;;  %v265_v59 = vpack.c.bf16 %v85_v52, %v84_v48  ;;  %v89_v60 = vadd.f32 %v177_v7, %v66_v54 }
   0xf   :  { %v90_v61 = vadd.f32 %v177_v7, %v67_v55  ;;  %v270_v62 = vpack.c.bf16 %v87_v56, %v86_v53  ;;  %v91_v63 = vadd.f32 %v177_v7, %v68_v58 }
  0x10   :  { %292 = vst [vmem:[%s373_s3 + $0x20] sm:$0xff] %v265_v59   ;;  %v275_v0 = vpack.c.bf16 %v89_v60, %v88_v57 }
  0x11   :  { %293 = vst [vmem:[%s373_s3 + $0x28] sm:$0xff] %v270_v62   ;;  %v280_v2 = vpack.c.bf16 %v91_v63, %v90_v61 }
  0x12   :  { %294 = vst [vmem:[%s373_s3 + $0x30] sm:$0xff] %v275_v0  }
  0x13   :  { %295 = vst [vmem:[%s373_s3 + $0x38] sm:$0xff] %v280_v2  }

// kernel: _lambda_.31
= control target key start
LH: loop header
LB: loop body
LE: loop exit
PB: predicated region body
PF: predicated region fallthrough
CT: control target
= control target key end

     0   :  { %v3016_v0 = vmov 0   ;;  %vm2410_vm0 = vcmask 257024   ;;  %vm2677_vm1 = vcmask 1040384   ;;  %vm2679_vm2 = vcmask 1041408   ;;  %s4075_s1 = inlined_call_operand.vmem [shape: bf16[512,128], index: 1, kind: input, shape index: {}]   ;;  %s4076_s0 = inlined_call_operand.vmem [shape: bf16[512,512], index: 0, kind: input, shape index: {}]   ;;  %s4077_s2 = inlined_call_operand.vmem [shape: f32[1,128], index: 2, kind: input, shape index: {}]   ;;  %s4078_s3 = inlined_call_operand.vmem [shape: bf16[512,32], index: 3, kind: output, shape index: {0}]   ;;  %s4079_s4 = inlined_call_operand.vmem [shape: f32[1,8,128], index: 4, kind: output, shape index: {1}]  }
   0x1   :  { %1310 = vmatprep.subr.bf16.mxu0 %v3016_v0  ;;  %1599 = vmatprep.subr.bf16.mxu1 %v3016_v0  ;;  %v2983_v1 = vld [vmem:[%s4075_s1] sm:$0xff]   ;;  %v2985_v3 = vld [vmem:[%s4075_s1 + $0x8] sm:$0xff]   ;;  %v2987_v5 = vld [vmem:[%s4075_s1 + $0x10] sm:$0xff]  }
   0x2   :  { %v2984_v2 = vld [vmem:[%s4075_s1 + $0x80] sm:$0xff]   ;;  %1311 = vmatpush1.bf16.msra.mxu0 %v2983_v1  ;;  %v2986_v4 = vld [vmem:[%s4075_s1 + $0x88] sm:$0xff]   ;;  %v2988_v6 = vld [vmem:[%s4075_s1 + $0x90] sm:$0xff]  }
   0x3   :  { %1600 = vmatpush1.bf16.msra.mxu1 %v2984_v2  ;;  %1312 = vmatprep.subr.bf16.mxu0 %v3016_v0  ;;  %v2989_v7 = vld [vmem:[%s4075_s1 + $0x18] sm:$0xff]   ;;  %v2991_v9 = vld [vmem:[%s4075_s1 + $0x20] sm:$0xff]   ;;  %v2993_v11 = vld [vmem:[%s4075_s1 + $0x28] sm:$0xff]  }
   0x4   :  { %1601 = vmatprep.subr.bf16.mxu1 %v3016_v0  ;;  %v2990_v8 = vld [vmem:[%s4075_s1 + $0x98] sm:$0xff]   ;;  %v2992_v10 = vld [vmem:[%s4075_s1 + $0xa0] sm:$0xff]   ;;  %v2994_v12 = vld [vmem:[%s4075_s1 + $0xa8] sm:$0xff]  }
   0x5   :  { %v2995_v13 = vld [vmem:[%s4075_s1 + $0x30] sm:$0xff]   ;;  %v2997_v15 = vld [vmem:[%s4075_s1 + $0x38] sm:$0xff]   ;;  %v2999_v17 = vld [vmem:[%s4075_s1 + $0x40] sm:$0xff]  }
   0x6   :  { %1313 = vmatpush1.bf16.msra.mxu0 %v2985_v3  ;;  %v2996_v14 = vld [vmem:[%s4075_s1 + $0xb0] sm:$0xff]   ;;  %v2998_v16 = vld [vmem:[%s4075_s1 + $0xb8] sm:$0xff]   ;;  %v3000_v18 = vld [vmem:[%s4075_s1 + $0xc0] sm:$0xff]  }
   0x7   :  { %1602 = vmatpush1.bf16.msra.mxu1 %v2986_v4  ;;  %1314 = vmatprep.subr.bf16.mxu0 %v3016_v0  ;;  %v94_v19 = vld [vmem:[%s4076_s0] sm:$0xff]  ;;  %v96_v20 = vld [vmem:[%s4076_s0 + $0x10] sm:$0xff]  ;;  %v95_v21 = vld [vmem:[%s4076_s0 + $0x8] sm:$0xff] }
   0x8   :  { %1603 = vmatprep.subr.bf16.mxu1 %v3016_v0  ;;  %v3124_v22 = vmax.bf16 %v3016_v0, %v94_v19  ;;  %v3127_v23 = vmax.bf16 %v3016_v0, %v96_v20  ;;  %v97_v24 = vld [vmem:[%s4076_s0 + $0x18] sm:$0xff]  ;;  %v3133_v25 = vmax.bf16 %v3016_v0, %v95_v21  ;;  %v3001_v26 = vld [vmem:[%s4075_s1 + $0x48] sm:$0xff]   ;;  %v3003_v31 = vld [vmem:[%s4075_s1 + $0x50] sm:$0xff]  }
   0x9   :  { %v3139_v27 = vmax.bf16 %v3016_v0, %v97_v24  ;;  %v3002_v28 = vld [vmem:[%s4075_s1 + $0xc8] sm:$0xff]   ;;  %v3004_v32 = vld [vmem:[%s4075_s1 + $0xd0] sm:$0xff]   ;;  %v3005_v33 = vld [vmem:[%s4075_s1 + $0x58] sm:$0xff]  }
   0xa   :  { %1315 = vmatpush1.bf16.msra.mxu0 %v2987_v5  ;;  %v2693_v29 = vcombine.high %v3124_v22, %v3127_v23  ;;  %v3006_v34 = vld [vmem:[%s4075_s1 + $0xd8] sm:$0xff]   ;;  %v3007_v35 = vld [vmem:[%s4075_s1 + $0x60] sm:$0xff]   ;;  %v3009_v37 = vld [vmem:[%s4075_s1 + $0x68] sm:$0xff]   ;;  %v2692_v51 = vcombine.low %v3124_v22, %v3127_v23 }
   0xb   :  { %1604 = vmatpush1.bf16.msra.mxu1 %v2988_v6  ;;  %1316 = vmatprep.subr.bf16.mxu0 %v3016_v0  ;;  %v2695_v30 = vcombine.high %v3133_v25, %v3139_v27  ;;  %v3008_v36 = vld [vmem:[%s4075_s1 + $0xe0] sm:$0xff]   ;;  %v3010_v38 = vld [vmem:[%s4075_s1 + $0xe8] sm:$0xff]   ;;  %v3011_v39 = vld [vmem:[%s4075_s1 + $0x70] sm:$0xff]   ;;  %v2694_v52 = vcombine.low %v3133_v25, %v3139_v27 }
   0xc   :  { %1605 = vmatprep.subr.bf16.mxu1 %v3016_v0  ;;  %1342 = vmatprep.mubr.bf16.mxu0 %v2693_v29  ;;  %v3012_v40 = vld [vmem:[%s4075_s1 + $0xf0] sm:$0xff]   ;;  %v98_v41 = vld [vmem:[%s4076_s0 + $0x20] sm:$0xff]  ;;  %v99_v43 = vld [vmem:[%s4076_s0 + $0x28] sm:$0xff] }
   0xd   :  { %1631 = vmatprep.mubr.bf16.mxu1 %v2695_v30  ;;  %v100_v42 = vld [vmem:[%s4076_s0 + $0x30] sm:$0xff]  ;;  %v101_v44 = vld [vmem:[%s4076_s0 + $0x38] sm:$0xff]  ;;  %v226_v46 = vmax.bf16 %v3016_v0, %v98_v41  ;;  %v227_v49 = vmax.bf16 %v3016_v0, %v99_v43  ;;  %v102_v55 = vld [vmem:[%s4076_s0 + $0x40] sm:$0xff] }
   0xe   :  { %1317 = vmatpush1.bf16.msra.mxu0 %v2989_v7  ;;  %v3013_v45 = vld [vmem:[%s4075_s1 + $0x78] sm:$0xff]   ;;  %v228_v47 = vmax.bf16 %v3016_v0, %v100_v42  ;;  %v229_v50 = vmax.bf16 %v3016_v0, %v101_v44  ;;  %v104_v56 = vld [vmem:[%s4076_s0 + $0x50] sm:$0xff]  ;;  %v103_v57 = vld [vmem:[%s4076_s0 + $0x48] sm:$0xff]  ;;  %v230_v59 = vmax.bf16 %v3016_v0, %v102_v55 }
   0xf   :  { %1606 = vmatpush1.bf16.msra.mxu1 %v2990_v8  ;;  %1318 = vmatprep.subr.bf16.mxu0 %v3016_v0  ;;  %v3014_v48 = vld [vmem:[%s4075_s1 + $0xf8] sm:$0xff]   ;;  %v232_v60 = vmax.bf16 %v3016_v0, %v104_v56  ;;  %v231_v61 = vmax.bf16 %v3016_v0, %v103_v57  ;;  %v106_v4 = vld [vmem:[%s4076_s0 + $0x60] sm:$0xff]  ;;  %v108_v5 = vld [vmem:[%s4076_s0 + $0x70] sm:$0xff] }
  0x10   :  { %1607 = vmatprep.subr.bf16.mxu1 %v3016_v0  ;;  %v2697_v53 = vcombine.high %v226_v46, %v228_v47  ;;  %v2699_v54 = vcombine.high %v227_v49, %v229_v50  ;;  %v105_v58 = vld [vmem:[%s4076_s0 + $0x58] sm:$0xff]  ;;  %v2696_v63 = vcombine.low %v226_v46, %v228_v47  ;;  %v2698_v1 = vcombine.low %v227_v49, %v229_v50  ;;  %v107_v6 = vld [vmem:[%s4076_s0 + $0x68] sm:$0xff]  ;;  %v116_v29 = vld [vmem:[%s4076_s0 + $0xb0] sm:$0xff] }
  0x11   :  { %v233_v62 = vmax.bf16 %v3016_v0, %v105_v58  ;;  %v2701_v2 = vcombine.high %v230_v59, %v232_v60  ;;  %v109_v7 = vld [vmem:[%s4076_s0 + $0x78] sm:$0xff]  ;;  %v234_v8 = vmax.bf16 %v3016_v0, %v106_v4  ;;  %v115_v30 = vld [vmem:[%s4076_s0 + $0xa8] sm:$0xff]  ;;  %v120_v41 = vld [vmem:[%s4076_s0 + $0xd0] sm:$0xff] }
  0x12   :  { %1319 = vmatpush1.bf16.msra.mxu0 %v2991_v9  ;;  %v236_v9 = vmax.bf16 %v3016_v0, %v108_v5  ;;  %v113_v19 = vld [vmem:[%s4076_s0 + $0x98] sm:$0xff]  ;;  %v119_v42 = vld [vmem:[%s4076_s0 + $0xc8] sm:$0xff] }
  0x13   :  { %1608 = vmatpush1.bf16.msra.mxu1 %v2992_v10  ;;  %1320 = vmatprep.subr.bf16.mxu0 %v3016_v0  ;;  %v2703_v3 = vcombine.high %v231_v61, %v233_v62  ;;  %v235_v10 = vmax.bf16 %v3016_v0, %v107_v6  ;;  %v241_v23 = vmax.bf16 %v3016_v0, %v113_v19  ;;  %v121_v43 = vld [vmem:[%s4076_s0 + $0xd8] sm:$0xff] }
  0x14   :  { %1609 = vmatprep.subr.bf16.mxu1 %v3016_v0  ;;  %v2704_v24 = vcombine.low %v234_v8, %v236_v9  ;;  %v247_v46 = vmax.bf16 %v3016_v0, %v119_v42  ;;  %v249_v47 = vmax.bf16 %v3016_v0, %v121_v43  ;;  %v125_v55 = vld [vmem:[%s4076_s0 + $0xf8] sm:$0xff] }
  0x15   :  { %v129_v4 = vld [vmem:[%s4076_s0 + $0x118] sm:$0xff] }
  0x16   :  { %1321 = vmatpush1.bf16.msra.mxu0 %v2993_v11  ;;  %v237_v11 = vmax.bf16 %v3016_v0, %v109_v7 }
  0x17   :  { %1610 = vmatpush1.bf16.msra.mxu1 %v2994_v12  ;;  %1322 = vmatprep.subr.bf16.mxu0 %v3016_v0  ;;  %v2700_v12 = vcombine.low %v230_v59, %v232_v60  ;;  %v253_v59 = vmax.bf16 %v3016_v0, %v125_v55 }
  0x18   :  { %1611 = vmatprep.subr.bf16.mxu1 %v3016_v0  ;;  %v2706_v25 = vcombine.low %v235_v10, %v237_v11 }
  0x1a   :  { %1323 = vmatpush1.bf16.msra.mxu0 %v2995_v13  ;;  %v2702_v13 = vcombine.low %v231_v61, %v233_v62  ;;  %v2718_v61 = vcombine.low %v247_v46, %v249_v47 }
  0x1b   :  { %1612 = vmatpush1.bf16.msra.mxu1 %v2996_v14  ;;  %1324 = vmatprep.subr.bf16.mxu0 %v3016_v0  ;;  %v2705_v14 = vcombine.high %v234_v8, %v236_v9  ;;  %v257_v8 = vmax.bf16 %v3016_v0, %v129_v4 }
  0x1c   :  { %1613 = vmatprep.subr.bf16.mxu1 %v3016_v0 }
  0x1e   :  { %1325 = vmatpush1.bf16.msra.mxu0 %v2997_v15  ;;  %v2707_v15 = vcombine.high %v235_v10, %v237_v11 }
  0x1f   :  { %1614 = vmatpush1.bf16.msra.mxu1 %v2998_v16  ;;  %1326 = vmatprep.subr.bf16.mxu0 %v3016_v0  ;;  %v110_v16 = vld [vmem:[%s4076_s0 + $0x80] sm:$0xff] }
  0x20   :  { %1615 = vmatprep.subr.bf16.mxu1 %v3016_v0  ;;  %v238_v20 = vmax.bf16 %v3016_v0, %v110_v16  ;;  %v133_v16 = vld [vmem:[%s4076_s0 + $0x138] sm:$0xff] }
  0x22   :  { %1327 = vmatpush1.bf16.msra.mxu0 %v2999_v17  ;;  %v112_v17 = vld [vmem:[%s4076_s0 + $0x90] sm:$0xff] }
  0x23   :  { %1616 = vmatpush1.bf16.msra.mxu1 %v3000_v18  ;;  %1328 = vmatprep.subr.bf16.mxu0 %v3016_v0  ;;  %v111_v18 = vld [vmem:[%s4076_s0 + $0x88] sm:$0xff]  ;;  %v240_v21 = vmax.bf16 %v3016_v0, %v112_v17 }
  0x24   :  { %1617 = vmatprep.subr.bf16.mxu1 %v3016_v0  ;;  %v239_v22 = vmax.bf16 %v3016_v0, %v111_v18 }
  0x26   :  { %1329 = vmatpush1.bf16.msra.mxu0 %v3001_v26  ;;  %v2709_v26 = vcombine.high %v238_v20, %v240_v21  ;;  %v2711_v27 = vcombine.high %v239_v22, %v241_v23 }
  0x27   :  { %1618 = vmatpush1.bf16.msra.mxu1 %v3002_v28  ;;  %1330 = vmatprep.subr.bf16.mxu0 %v3016_v0  ;;  %v114_v28 = vld [vmem:[%s4076_s0 + $0xa0] sm:$0xff] }
  0x28   :  { %1619 = vmatprep.subr.bf16.mxu1 %v3016_v0 }
  0x2a   :  { %1331 = vmatpush1.bf16.msra.mxu0 %v3003_v31  ;;  %v117_v31 = vld [vmem:[%s4076_s0 + $0xb8] sm:$0xff] }
  0x2b   :  { %1620 = vmatpush1.bf16.msra.mxu1 %v3004_v32  ;;  %1332 = vmatprep.subr.bf16.mxu0 %v3016_v0  ;;  %v242_v32 = vmax.bf16 %v3016_v0, %v114_v28  ;;  %v137_v28 = vld [vmem:[%s4076_s0 + $0x158] sm:$0xff] }
  0x2c   :  { %1621 = vmatprep.subr.bf16.mxu1 %v3016_v0 }
  0x2e   :  { %1333 = vmatpush1.bf16.msra.mxu0 %v3005_v33  ;;  %v244_v33 = vmax.bf16 %v3016_v0, %v116_v29 }
  0x2f   :  { %1622 = vmatpush1.bf16.msra.mxu1 %v3006_v34  ;;  %1334 = vmatprep.subr.bf16.mxu0 %v3016_v0  ;;  %v243_v34 = vmax.bf16 %v3016_v0, %v115_v30 }
  0x30   :  { %1623 = vmatprep.subr.bf16.mxu1 %v3016_v0 }
  0x32   :  { %1335 = vmatpush1.bf16.msra.mxu0 %v3007_v35  ;;  %v245_v35 = vmax.bf16 %v3016_v0, %v117_v31 }
  0x33   :  { %1624 = vmatpush1.bf16.msra.mxu1 %v3008_v36  ;;  %1336 = vmatprep.subr.bf16.mxu0 %v3016_v0  ;;  %v2708_v36 = vcombine.low %v238_v20, %v240_v21  ;;  %v261_v20 = vmax.bf16 %v3016_v0, %v133_v16 }
  0x34   :  { %1625 = vmatprep.subr.bf16.mxu1 %v3016_v0  ;;  %v2714_v49 = vcombine.low %v243_v34, %v245_v35 }
  0x36   :  { %1337 = vmatpush1.bf16.msra.mxu0 %v3009_v37  ;;  %v2710_v37 = vcombine.low %v239_v22, %v241_v23 }
  0x37   :  { %1626 = vmatpush1.bf16.msra.mxu1 %v3010_v38  ;;  %1338 = vmatprep.subr.bf16.mxu0 %v3016_v0  ;;  %v2713_v38 = vcombine.high %v242_v32, %v244_v33 }
  0x38   :  { %1627 = vmatprep.subr.bf16.mxu1 %v3016_v0 }
  0x3a   :  { %1339 = vmatpush1.bf16.msra.mxu0 %v3011_v39  ;;  %v2715_v39 = vcombine.high %v243_v34, %v245_v35 }
  0x3b   :  { %1628 = vmatpush1.bf16.msra.mxu1 %v3012_v40  ;;  %1340 = vmatprep.subr.bf16.mxu0 %v3016_v0  ;;  %v118_v40 = vld [vmem:[%s4076_s0 + $0xc0] sm:$0xff] }
  0x3c   :  { %1629 = vmatprep.subr.bf16.mxu1 %v3016_v0  ;;  %v246_v44 = vmax.bf16 %v3016_v0, %v118_v40  ;;  %v141_v40 = vld [vmem:[%s4076_s0 + $0x178] sm:$0xff] }
  0x3e   :  { %1341 = vmatpush1.bf16.msra.mxu0 %v3013_v45  ;;  %v248_v45 = vmax.bf16 %v3016_v0, %v120_v41 }
  0x3f   :  { %1630 = vmatpush1.bf16.msra.mxu1 %v3014_v48  ;;  %v2712_v48 = vcombine.low %v242_v32, %v244_v33  ;;  %v265_v32 = vmax.bf16 %v3016_v0, %v137_v28 }
  0x40   :  { %v2717_v50 = vcombine.high %v246_v44, %v248_v45  ;;  %v2716_v60 = vcombine.low %v246_v44, %v248_v45  ;;  %v269_v44 = vmax.bf16 %v3016_v0, %v141_v40 }
  0x41   :  { %1343 = vmatmul.mubr.bf16.vlgmr.msra.gmra.mrb[0].mxu0 %v2692_v51  ;;  %v2719_v51 = vcombine.high %v247_v46, %v249_v47 }
  0x42   :  { %1632 = vmatmul.mubr.bf16.vlgmr.msra.gmra.mrb[0].mxu1 %v2694_v52  ;;  %1350 = vmatprep.mubr.bf16.mxu0 %v2697_v53  ;;  %v122_v52 = vld [vmem:[%s4076_s0 + $0xe0] sm:$0xff]  ;;  %v124_v53 = vld [vmem:[%s4076_s0 + $0xf0] sm:$0xff] }
  0x43   :  { %1639 = vmatprep.mubr.bf16.mxu1 %v2699_v54  ;;  %v123_v54 = vld [vmem:[%s4076_s0 + $0xe8] sm:$0xff]  ;;  %v250_v56 = vmax.bf16 %v3016_v0, %v122_v52  ;;  %v252_v57 = vmax.bf16 %v3016_v0, %v124_v53  ;;  %v145_v52 = vld [vmem:[%s4076_s0 + $0x198] sm:$0xff] }
  0x44   :  { %v251_v58 = vmax.bf16 %v3016_v0, %v123_v54 }
  0x45   :  { %v2721_v62 = vcombine.high %v250_v56, %v252_v57  ;;  %v2720_v9 = vcombine.low %v250_v56, %v252_v57  ;;  %v273_v56 = vmax.bf16 %v3016_v0, %v145_v52 }
  0x46   :  { %v2722_v10 = vcombine.low %v251_v58, %v253_v59 }
  0x49   :  { %1351 = vmatmul.mubr.bf16.gmra.mrb[4].mxu0 %v2696_v63  ;;  %v2723_v63 = vcombine.high %v251_v58, %v253_v59 }
  0x4a   :  { %1640 = vmatmul.mubr.bf16.gmra.mrb[4].mxu1 %v2698_v1  ;;  %1358 = vmatprep.mubr.bf16.mxu0 %v2701_v2  ;;  %v126_v1 = vld [vmem:[%s4076_s0 + $0x100] sm:$0xff]  ;;  %v128_v2 = vld [vmem:[%s4076_s0 + $0x110] sm:$0xff] }
  0x4b   :  { %1647 = vmatprep.mubr.bf16.mxu1 %v2703_v3  ;;  %v127_v3 = vld [vmem:[%s4076_s0 + $0x108] sm:$0xff]  ;;  %v254_v5 = vmax.bf16 %v3016_v0, %v126_v1  ;;  %v256_v6 = vmax.bf16 %v3016_v0, %v128_v2  ;;  %v149_v1 = vld [vmem:[%s4076_s0 + $0x1b8] sm:$0xff] }
  0x4c   :  { %v255_v7 = vmax.bf16 %v3016_v0, %v127_v3 }
  0x4d   :  { %v2725_v11 = vcombine.high %v254_v5, %v256_v6  ;;  %v2724_v21 = vcombine.low %v254_v5, %v256_v6  ;;  %v277_v5 = vmax.bf16 %v3016_v0, %v149_v1 }
  0x4e   :  { %v2726_v22 = vcombine.low %v255_v7, %v257_v8 }
  0x51   :  { %1359 = vmatmul.mubr.bf16.gmra.mrb[8].mxu0 %v2700_v12  ;;  %v2727_v12 = vcombine.high %v255_v7, %v257_v8 }
  0x52   :  { %1648 = vmatmul.mubr.bf16.gmra.mrb[8].mxu1 %v2702_v13  ;;  %1366 = vmatprep.mubr.bf16.mxu0 %v2705_v14  ;;  %v130_v13 = vld [vmem:[%s4076_s0 + $0x120] sm:$0xff]  ;;  %v132_v14 = vld [vmem:[%s4076_s0 + $0x130] sm:$0xff] }
  0x53   :  { %1655 = vmatprep.mubr.bf16.mxu1 %v2707_v15  ;;  %v131_v15 = vld [vmem:[%s4076_s0 + $0x128] sm:$0xff]  ;;  %v258_v17 = vmax.bf16 %v3016_v0, %v130_v13  ;;  %v260_v18 = vmax.bf16 %v3016_v0, %v132_v14  ;;  %v153_v13 = vld [vmem:[%s4076_s0 + $0x1d8] sm:$0xff] }
  0x54   :  { %v259_v19 = vmax.bf16 %v3016_v0, %v131_v15 }
  0x55   :  { %v2729_v23 = vcombine.high %v258_v17, %v260_v18  ;;  %v2728_v33 = vcombine.low %v258_v17, %v260_v18  ;;  %v281_v17 = vmax.bf16 %v3016_v0, %v153_v13 }
  0x56   :  { %v2730_v34 = vcombine.low %v259_v19, %v261_v20 }
  0x59   :  { %1367 = vmatmul.mubr.bf16.gmra.mrb[12].mxu0 %v2704_v24  ;;  %v2731_v24 = vcombine.high %v259_v19, %v261_v20 }
  0x5a   :  { %1656 = vmatmul.mubr.bf16.gmra.mrb[12].mxu1 %v2706_v25  ;;  %1374 = vmatprep.mubr.bf16.mxu0 %v2709_v26  ;;  %v134_v25 = vld [vmem:[%s4076_s0 + $0x140] sm:$0xff]  ;;  %v136_v26 = vld [vmem:[%s4076_s0 + $0x150] sm:$0xff] }
  0x5b   :  { %1663 = vmatprep.mubr.bf16.mxu1 %v2711_v27  ;;  %v135_v27 = vld [vmem:[%s4076_s0 + $0x148] sm:$0xff]  ;;  %v262_v29 = vmax.bf16 %v3016_v0, %v134_v25  ;;  %v264_v30 = vmax.bf16 %v3016_v0, %v136_v26  ;;  %v157_v25 = vld [vmem:[%s4076_s0 + $0x1f8] sm:$0xff] }
  0x5c   :  { %v263_v31 = vmax.bf16 %v3016_v0, %v135_v27 }
  0x5d   :  { %v2733_v35 = vcombine.high %v262_v29, %v264_v30  ;;  %v2732_v45 = vcombine.low %v262_v29, %v264_v30  ;;  %v285_v29 = vmax.bf16 %v3016_v0, %v157_v25 }
  0x5e   :  { %v2734_v46 = vcombine.low %v263_v31, %v265_v32 }
  0x61   :  { %1375 = vmatmul.mubr.bf16.gmra.mrb[16].mxu0 %v2708_v36  ;;  %v2735_v36 = vcombine.high %v263_v31, %v265_v32 }
  0x62   :  { %1664 = vmatmul.mubr.bf16.gmra.mrb[16].mxu1 %v2710_v37  ;;  %1382 = vmatprep.mubr.bf16.mxu0 %v2713_v38  ;;  %v138_v37 = vld [vmem:[%s4076_s0 + $0x160] sm:$0xff]  ;;  %v140_v38 = vld [vmem:[%s4076_s0 + $0x170] sm:$0xff] }
  0x63   :  { %1671 = vmatprep.mubr.bf16.mxu1 %v2715_v39  ;;  %v139_v39 = vld [vmem:[%s4076_s0 + $0x168] sm:$0xff]  ;;  %v266_v41 = vmax.bf16 %v3016_v0, %v138_v37  ;;  %v268_v42 = vmax.bf16 %v3016_v0, %v140_v38  ;;  %v161_v37 = vld [vmem:[%s4076_s0 + $0x218] sm:$0xff] }
  0x64   :  { %v267_v43 = vmax.bf16 %v3016_v0, %v139_v39 }
  0x65   :  { %v2737_v47 = vcombine.high %v266_v41, %v268_v42  ;;  %v2736_v57 = vcombine.low %v266_v41, %v268_v42  ;;  %v289_v41 = vmax.bf16 %v3016_v0, %v161_v37 }
  0x66   :  { %v2738_v58 = vcombine.low %v267_v43, %v269_v44 }
  0x69   :  { %1383 = vmatmul.mubr.bf16.gmra.mrb[20].mxu0 %v2712_v48  ;;  %v2739_v48 = vcombine.high %v267_v43, %v269_v44 }
  0x6a   :  { %1672 = vmatmul.mubr.bf16.gmra.mrb[20].mxu1 %v2714_v49  ;;  %1390 = vmatprep.mubr.bf16.mxu0 %v2717_v50  ;;  %v142_v49 = vld [vmem:[%s4076_s0 + $0x180] sm:$0xff]  ;;  %v144_v50 = vld [vmem:[%s4076_s0 + $0x190] sm:$0xff] }
  0x6b   :  { %1679 = vmatprep.mubr.bf16.mxu1 %v2719_v51  ;;  %v143_v51 = vld [vmem:[%s4076_s0 + $0x188] sm:$0xff]  ;;  %v270_v53 = vmax.bf16 %v3016_v0, %v142_v49  ;;  %v272_v54 = vmax.bf16 %v3016_v0, %v144_v50  ;;  %v165_v49 = vld [vmem:[%s4076_s0 + $0x238] sm:$0xff] }
  0x6c   :  { %v271_v55 = vmax.bf16 %v3016_v0, %v143_v51 }
  0x6d   :  { %v2741_v59 = vcombine.high %v270_v53, %v272_v54  ;;  %v2740_v6 = vcombine.low %v270_v53, %v272_v54  ;;  %v293_v53 = vmax.bf16 %v3016_v0, %v165_v49 }
  0x6e   :  { %v2742_v7 = vcombine.low %v271_v55, %v273_v56 }
  0x71   :  { %1391 = vmatmul.mubr.bf16.gmra.mrb[24].mxu0 %v2716_v60  ;;  %v2743_v60 = vcombine.high %v271_v55, %v273_v56 }
  0x72   :  { %1680 = vmatmul.mubr.bf16.gmra.mrb[24].mxu1 %v2718_v61  ;;  %1398 = vmatprep.mubr.bf16.mxu0 %v2721_v62  ;;  %v146_v61 = vld [vmem:[%s4076_s0 + $0x1a0] sm:$0xff]  ;;  %v148_v62 = vld [vmem:[%s4076_s0 + $0x1b0] sm:$0xff] }
  0x73   :  { %1687 = vmatprep.mubr.bf16.mxu1 %v2723_v63  ;;  %v147_v63 = vld [vmem:[%s4076_s0 + $0x1a8] sm:$0xff]  ;;  %v274_v2 = vmax.bf16 %v3016_v0, %v146_v61  ;;  %v276_v3 = vmax.bf16 %v3016_v0, %v148_v62  ;;  %v169_v61 = vld [vmem:[%s4076_s0 + $0x258] sm:$0xff] }
  0x74   :  { %v275_v4 = vmax.bf16 %v3016_v0, %v147_v63 }
  0x75   :  { %v2745_v8 = vcombine.high %v274_v2, %v276_v3  ;;  %v2744_v18 = vcombine.low %v274_v2, %v276_v3  ;;  %v297_v2 = vmax.bf16 %v3016_v0, %v169_v61 }
  0x76   :  { %v2746_v19 = vcombine.low %v275_v4, %v277_v5 }
  0x79   :  { %1399 = vmatmul.mubr.bf16.gmra.mrb[28].mxu0 %v2720_v9  ;;  %v2747_v9 = vcombine.high %v275_v4, %v277_v5 }
  0x7a   :  { %1688 = vmatmul.mubr.bf16.gmra.mrb[28].mxu1 %v2722_v10  ;;  %1406 = vmatprep.mubr.bf16.mxu0 %v2725_v11  ;;  %v150_v10 = vld [vmem:[%s4076_s0 + $0x1c0] sm:$0xff]  ;;  %v152_v11 = vld [vmem:[%s4076_s0 + $0x1d0] sm:$0xff] }
  0x7b   :  { %1695 = vmatprep.mubr.bf16.mxu1 %v2727_v12  ;;  %v151_v12 = vld [vmem:[%s4076_s0 + $0x1c8] sm:$0xff]  ;;  %v278_v14 = vmax.bf16 %v3016_v0, %v150_v10  ;;  %v280_v15 = vmax.bf16 %v3016_v0, %v152_v11  ;;  %v173_v10 = vld [vmem:[%s4076_s0 + $0x278] sm:$0xff] }
  0x7c   :  { %v279_v16 = vmax.bf16 %v3016_v0, %v151_v12 }
  0x7d   :  { %v2749_v20 = vcombine.high %v278_v14, %v280_v15  ;;  %v2748_v30 = vcombine.low %v278_v14, %v280_v15  ;;  %v301_v14 = vmax.bf16 %v3016_v0, %v173_v10 }
  0x7e   :  { %v2750_v31 = vcombine.low %v279_v16, %v281_v17 }
  0x81   :  { %1407 = vmatmul.mubr.bf16.gmra.mrb[32].mxu0 %v2724_v21  ;;  %v2751_v21 = vcombine.high %v279_v16, %v281_v17 }
  0x82   :  { %1696 = vmatmul.mubr.bf16.gmra.mrb[32].mxu1 %v2726_v22  ;;  %1414 = vmatprep.mubr.bf16.mxu0 %v2729_v23  ;;  %v154_v22 = vld [vmem:[%s4076_s0 + $0x1e0] sm:$0xff]  ;;  %v156_v23 = vld [vmem:[%s4076_s0 + $0x1f0] sm:$0xff] }
  0x83   :  { %1703 = vmatprep.mubr.bf16.mxu1 %v2731_v24  ;;  %v155_v24 = vld [vmem:[%s4076_s0 + $0x1e8] sm:$0xff]  ;;  %v282_v26 = vmax.bf16 %v3016_v0, %v154_v22  ;;  %v284_v27 = vmax.bf16 %v3016_v0, %v156_v23  ;;  %v177_v22 = vld [vmem:[%s4076_s0 + $0x298] sm:$0xff] }
  0x84   :  { %v283_v28 = vmax.bf16 %v3016_v0, %v155_v24 }
  0x85   :  { %v2753_v32 = vcombine.high %v282_v26, %v284_v27  ;;  %v2752_v42 = vcombine.low %v282_v26, %v284_v27  ;;  %v305_v26 = vmax.bf16 %v3016_v0, %v177_v22 }
  0x86   :  { %v2754_v43 = vcombine.low %v283_v28, %v285_v29 }
  0x89   :  { %1415 = vmatmul.mubr.bf16.gmra.mrb[36].mxu0 %v2728_v33  ;;  %v2755_v33 = vcombine.high %v283_v28, %v285_v29 }
  0x8a   :  { %1704 = vmatmul.mubr.bf16.gmra.mrb[36].mxu1 %v2730_v34  ;;  %1422 = vmatprep.mubr.bf16.mxu0 %v2733_v35  ;;  %v158_v34 = vld [vmem:[%s4076_s0 + $0x200] sm:$0xff]  ;;  %v160_v35 = vld [vmem:[%s4076_s0 + $0x210] sm:$0xff] }
  0x8b   :  { %1711 = vmatprep.mubr.bf16.mxu1 %v2735_v36  ;;  %v159_v36 = vld [vmem:[%s4076_s0 + $0x208] sm:$0xff]  ;;  %v286_v38 = vmax.bf16 %v3016_v0, %v158_v34  ;;  %v288_v39 = vmax.bf16 %v3016_v0, %v160_v35  ;;  %v181_v34 = vld [vmem:[%s4076_s0 + $0x2b8] sm:$0xff] }
  0x8c   :  { %v287_v40 = vmax.bf16 %v3016_v0, %v159_v36 }
  0x8d   :  { %v2757_v44 = vcombine.high %v286_v38, %v288_v39  ;;  %v2756_v54 = vcombine.low %v286_v38, %v288_v39  ;;  %v309_v38 = vmax.bf16 %v3016_v0, %v181_v34 }
  0x8e   :  { %v2758_v55 = vcombine.low %v287_v40, %v289_v41 }
  0x91   :  { %1423 = vmatmul.mubr.bf16.gmra.mrb[40].mxu0 %v2732_v45  ;;  %v2759_v45 = vcombine.high %v287_v40, %v289_v41 }
  0x92   :  { %1712 = vmatmul.mubr.bf16.gmra.mrb[40].mxu1 %v2734_v46  ;;  %1430 = vmatprep.mubr.bf16.mxu0 %v2737_v47  ;;  %v162_v46 = vld [vmem:[%s4076_s0 + $0x220] sm:$0xff]  ;;  %v164_v47 = vld [vmem:[%s4076_s0 + $0x230] sm:$0xff] }
  0x93   :  { %1719 = vmatprep.mubr.bf16.mxu1 %v2739_v48  ;;  %v163_v48 = vld [vmem:[%s4076_s0 + $0x228] sm:$0xff]  ;;  %v290_v50 = vmax.bf16 %v3016_v0, %v162_v46  ;;  %v292_v51 = vmax.bf16 %v3016_v0, %v164_v47  ;;  %v185_v46 = vld [vmem:[%s4076_s0 + $0x2d8] sm:$0xff] }
  0x94   :  { %v291_v52 = vmax.bf16 %v3016_v0, %v163_v48 }
  0x95   :  { %v2761_v56 = vcombine.high %v290_v50, %v292_v51  ;;  %v2760_v3 = vcombine.low %v290_v50, %v292_v51  ;;  %v313_v50 = vmax.bf16 %v3016_v0, %v185_v46 }
  0x96   :  { %v2762_v4 = vcombine.low %v291_v52, %v293_v53 }
  0x99   :  { %1431 = vmatmul.mubr.bf16.gmra.mrb[44].mxu0 %v2736_v57  ;;  %v2763_v57 = vcombine.high %v291_v52, %v293_v53 }
  0x9a   :  { %1720 = vmatmul.mubr.bf16.gmra.mrb[44].mxu1 %v2738_v58  ;;  %1438 = vmatprep.mubr.bf16.mxu0 %v2741_v59  ;;  %v166_v58 = vld [vmem:[%s4076_s0 + $0x240] sm:$0xff]  ;;  %v168_v59 = vld [vmem:[%s4076_s0 + $0x250] sm:$0xff] }
  0x9b   :  { %1727 = vmatprep.mubr.bf16.mxu1 %v2743_v60  ;;  %v167_v60 = vld [vmem:[%s4076_s0 + $0x248] sm:$0xff]  ;;  %v294_v62 = vmax.bf16 %v3016_v0, %v166_v58  ;;  %v296_v63 = vmax.bf16 %v3016_v0, %v168_v59  ;;  %v189_v58 = vld [vmem:[%s4076_s0 + $0x2f8] sm:$0xff] }
  0x9c   :  { %v295_v1 = vmax.bf16 %v3016_v0, %v167_v60 }
  0x9d   :  { %v2765_v5 = vcombine.high %v294_v62, %v296_v63  ;;  %v2764_v15 = vcombine.low %v294_v62, %v296_v63  ;;  %v317_v62 = vmax.bf16 %v3016_v0, %v189_v58 }
  0x9e   :  { %v2766_v16 = vcombine.low %v295_v1, %v297_v2 }
  0xa1   :  { %1439 = vmatmul.mubr.bf16.gmra.mrb[48].mxu0 %v2740_v6  ;;  %v2767_v6 = vcombine.high %v295_v1, %v297_v2 }
  0xa2   :  { %1728 = vmatmul.mubr.bf16.gmra.mrb[48].mxu1 %v2742_v7  ;;  %1446 = vmatprep.mubr.bf16.mxu0 %v2745_v8  ;;  %v170_v7 = vld [vmem:[%s4076_s0 + $0x260] sm:$0xff]  ;;  %v172_v8 = vld [vmem:[%s4076_s0 + $0x270] sm:$0xff] }
  0xa3   :  { %1735 = vmatprep.mubr.bf16.mxu1 %v2747_v9  ;;  %v171_v9 = vld [vmem:[%s4076_s0 + $0x268] sm:$0xff]  ;;  %v298_v11 = vmax.bf16 %v3016_v0, %v170_v7  ;;  %v300_v12 = vmax.bf16 %v3016_v0, %v172_v8  ;;  %v193_v7 = vld [vmem:[%s4076_s0 + $0x318] sm:$0xff] }
  0xa4   :  { %v299_v13 = vmax.bf16 %v3016_v0, %v171_v9 }
  0xa5   :  { %v2769_v17 = vcombine.high %v298_v11, %v300_v12  ;;  %v2768_v27 = vcombine.low %v298_v11, %v300_v12  ;;  %v321_v11 = vmax.bf16 %v3016_v0, %v193_v7 }
  0xa6   :  { %v2770_v28 = vcombine.low %v299_v13, %v301_v14 }
  0xa9   :  { %1447 = vmatmul.mubr.bf16.gmra.mrb[52].mxu0 %v2744_v18  ;;  %v2771_v18 = vcombine.high %v299_v13, %v301_v14 }
  0xaa   :  { %1736 = vmatmul.mubr.bf16.gmra.mrb[52].mxu1 %v2746_v19  ;;  %1454 = vmatprep.mubr.bf16.mxu0 %v2749_v20  ;;  %v174_v19 = vld [vmem:[%s4076_s0 + $0x280] sm:$0xff]  ;;  %v176_v20 = vld [vmem:[%s4076_s0 + $0x290] sm:$0xff] }
  0xab   :  { %1743 = vmatprep.mubr.bf16.mxu1 %v2751_v21  ;;  %v175_v21 = vld [vmem:[%s4076_s0 + $0x288] sm:$0xff]  ;;  %v302_v23 = vmax.bf16 %v3016_v0, %v174_v19  ;;  %v304_v24 = vmax.bf16 %v3016_v0, %v176_v20  ;;  %v197_v19 = vld [vmem:[%s4076_s0 + $0x338] sm:$0xff] }
  0xac   :  { %v303_v25 = vmax.bf16 %v3016_v0, %v175_v21 }
  0xad   :  { %v2773_v29 = vcombine.high %v302_v23, %v304_v24  ;;  %v2772_v39 = vcombine.low %v302_v23, %v304_v24  ;;  %v325_v23 = vmax.bf16 %v3016_v0, %v197_v19 }
  0xae   :  { %v2774_v40 = vcombine.low %v303_v25, %v305_v26 }
  0xb1   :  { %1455 = vmatmul.mubr.bf16.gmra.mrb[56].mxu0 %v2748_v30  ;;  %v2775_v30 = vcombine.high %v303_v25, %v305_v26 }
  0xb2   :  { %1744 = vmatmul.mubr.bf16.gmra.mrb[56].mxu1 %v2750_v31  ;;  %1462 = vmatprep.mubr.bf16.mxu0 %v2753_v32  ;;  %v178_v31 = vld [vmem:[%s4076_s0 + $0x2a0] sm:$0xff]  ;;  %v180_v32 = vld [vmem:[%s4076_s0 + $0x2b0] sm:$0xff] }
  0xb3   :  { %1751 = vmatprep.mubr.bf16.mxu1 %v2755_v33  ;;  %v179_v33 = vld [vmem:[%s4076_s0 + $0x2a8] sm:$0xff]  ;;  %v306_v35 = vmax.bf16 %v3016_v0, %v178_v31  ;;  %v308_v36 = vmax.bf16 %v3016_v0, %v180_v32  ;;  %v201_v31 = vld [vmem:[%s4076_s0 + $0x358] sm:$0xff] }
  0xb4   :  { %v307_v37 = vmax.bf16 %v3016_v0, %v179_v33 }
  0xb5   :  { %v2777_v41 = vcombine.high %v306_v35, %v308_v36  ;;  %v2776_v51 = vcombine.low %v306_v35, %v308_v36  ;;  %v329_v35 = vmax.bf16 %v3016_v0, %v201_v31 }
  0xb6   :  { %v2778_v52 = vcombine.low %v307_v37, %v309_v38 }
  0xb9   :  { %1463 = vmatmul.mubr.bf16.gmra.mrb[60].mxu0 %v2752_v42  ;;  %v2779_v42 = vcombine.high %v307_v37, %v309_v38 }
  0xba   :  { %1752 = vmatmul.mubr.bf16.gmra.mrb[60].mxu1 %v2754_v43  ;;  %1470 = vmatprep.mubr.bf16.mxu0 %v2757_v44  ;;  %v182_v43 = vld [vmem:[%s4076_s0 + $0x2c0] sm:$0xff]  ;;  %v184_v44 = vld [vmem:[%s4076_s0 + $0x2d0] sm:$0xff] }
  0xbb   :  { %1759 = vmatprep.mubr.bf16.mxu1 %v2759_v45  ;;  %v183_v45 = vld [vmem:[%s4076_s0 + $0x2c8] sm:$0xff]  ;;  %v310_v47 = vmax.bf16 %v3016_v0, %v182_v43  ;;  %v312_v48 = vmax.bf16 %v3016_v0, %v184_v44  ;;  %v205_v43 = vld [vmem:[%s4076_s0 + $0x378] sm:$0xff] }
  0xbc   :  { %v311_v49 = vmax.bf16 %v3016_v0, %v183_v45 }
  0xbd   :  { %v2781_v53 = vcombine.high %v310_v47, %v312_v48  ;;  %v2780_v63 = vcombine.low %v310_v47, %v312_v48  ;;  %v333_v47 = vmax.bf16 %v3016_v0, %v205_v43 }
  0xbe   :  { %v2782_v1 = vcombine.low %v311_v49, %v313_v50 }
  0xc1   :  { %1471 = vmatmul.mubr.bf16.gmra.mrb[64].mxu0 %v2756_v54  ;;  %v2783_v54 = vcombine.high %v311_v49, %v313_v50 }
  0xc2   :  { %1760 = vmatmul.mubr.bf16.gmra.mrb[64].mxu1 %v2758_v55  ;;  %1478 = vmatprep.mubr.bf16.mxu0 %v2761_v56  ;;  %v186_v55 = vld [vmem:[%s4076_s0 + $0x2e0] sm:$0xff]  ;;  %v188_v56 = vld [vmem:[%s4076_s0 + $0x2f0] sm:$0xff] }
  0xc3   :  { %1767 = vmatprep.mubr.bf16.mxu1 %v2763_v57  ;;  %v187_v57 = vld [vmem:[%s4076_s0 + $0x2e8] sm:$0xff]  ;;  %v314_v59 = vmax.bf16 %v3016_v0, %v186_v55  ;;  %v316_v60 = vmax.bf16 %v3016_v0, %v188_v56  ;;  %v209_v55 = vld [vmem:[%s4076_s0 + $0x398] sm:$0xff] }
  0xc4   :  { %v315_v61 = vmax.bf16 %v3016_v0, %v187_v57 }
  0xc5   :  { %v2785_v2 = vcombine.high %v314_v59, %v316_v60  ;;  %v2784_v12 = vcombine.low %v314_v59, %v316_v60  ;;  %v3654_v59 = vmax.bf16 %v3016_v0, %v209_v55 }
  0xc6   :  { %v2786_v13 = vcombine.low %v315_v61, %v317_v62 }
  0xc9   :  { %1479 = vmatmul.mubr.bf16.gmra.mrb[68].mxu0 %v2760_v3  ;;  %v2787_v3 = vcombine.high %v315_v61, %v317_v62  ;;  %v3659_v62 = vld [vmem:[%s4077_s2] ss:$0 sm:$0xff] }
  0xca   :  { %1768 = vmatmul.mubr.bf16.gmra.mrb[68].mxu1 %v2762_v4  ;;  %1486 = vmatprep.mubr.bf16.mxu0 %v2765_v5  ;;  %v190_v4 = vld [vmem:[%s4076_s0 + $0x300] sm:$0xff]  ;;  %v192_v5 = vld [vmem:[%s4076_s0 + $0x310] sm:$0xff] }
  0xcb   :  { %1775 = vmatprep.mubr.bf16.mxu1 %v2767_v6  ;;  %v191_v6 = vld [vmem:[%s4076_s0 + $0x308] sm:$0xff]  ;;  %v318_v8 = vmax.bf16 %v3016_v0, %v190_v4  ;;  %v320_v9 = vmax.bf16 %v3016_v0, %v192_v5 }
  0xcc   :  { %v319_v10 = vmax.bf16 %v3016_v0, %v191_v6 }
  0xcd   :  { %v2789_v14 = vcombine.high %v318_v8, %v320_v9  ;;  %v2788_v24 = vcombine.low %v318_v8, %v320_v9 }
  0xce   :  { %v2790_v25 = vcombine.low %v319_v10, %v321_v11 }
  0xd1   :  { %1487 = vmatmul.mubr.bf16.gmra.mrb[72].mxu0 %v2764_v15  ;;  %v2791_v15 = vcombine.high %v319_v10, %v321_v11  ;;  %v210_v10 = vld [vmem:[%s4076_s0 + $0x3a0] sm:$0xff] }
  0xd2   :  { %1776 = vmatmul.mubr.bf16.gmra.mrb[72].mxu1 %v2766_v16  ;;  %1494 = vmatprep.mubr.bf16.mxu0 %v2769_v17  ;;  %v194_v16 = vld [vmem:[%s4076_s0 + $0x320] sm:$0xff]  ;;  %v196_v17 = vld [vmem:[%s4076_s0 + $0x330] sm:$0xff]  ;;  %v3679_v19 = vmax.bf16 %v3016_v0, %v210_v10 }
  0xd3   :  { %1783 = vmatprep.mubr.bf16.mxu1 %v2771_v18  ;;  %v195_v18 = vld [vmem:[%s4076_s0 + $0x328] sm:$0xff]  ;;  %v322_v20 = vmax.bf16 %v3016_v0, %v194_v16  ;;  %v324_v21 = vmax.bf16 %v3016_v0, %v196_v17  ;;  %v213_v16 = vld [vmem:[%s4076_s0 + $0x3b8] sm:$0xff] }
  0xd4   :  { %v323_v22 = vmax.bf16 %v3016_v0, %v195_v18 }
  0xd5   :  { %v2793_v26 = vcombine.high %v322_v20, %v324_v21  ;;  %v2792_v36 = vcombine.low %v322_v20, %v324_v21 }
  0xd6   :  { %v2794_v37 = vcombine.low %v323_v22, %v325_v23 }
  0xd9   :  { %1495 = vmatmul.mubr.bf16.gmra.mrb[76].mxu0 %v2768_v27  ;;  %v2795_v27 = vcombine.high %v323_v22, %v325_v23  ;;  %v3688_v22 = vmax.bf16 %v3016_v0, %v213_v16  ;;  %v221_v16 = vld [vmem:[%s4076_s0 + $0x3f8] sm:$0xff] }
  0xda   :  { %1784 = vmatmul.mubr.bf16.gmra.mrb[76].mxu1 %v2770_v28  ;;  %1502 = vmatprep.mubr.bf16.mxu0 %v2773_v29  ;;  %v198_v28 = vld [vmem:[%s4076_s0 + $0x340] sm:$0xff]  ;;  %v200_v29 = vld [vmem:[%s4076_s0 + $0x350] sm:$0xff] }
  0xdb   :  { %1791 = vmatprep.mubr.bf16.mxu1 %v2775_v30  ;;  %v199_v30 = vld [vmem:[%s4076_s0 + $0x348] sm:$0xff]  ;;  %v326_v32 = vmax.bf16 %v3016_v0, %v198_v28  ;;  %v328_v33 = vmax.bf16 %v3016_v0, %v200_v29 }
  0xdc   :  { %v327_v34 = vmax.bf16 %v3016_v0, %v199_v30 }
  0xdd   :  { %v2797_v38 = vcombine.high %v326_v32, %v328_v33  ;;  %v2796_v48 = vcombine.low %v326_v32, %v328_v33 }
  0xde   :  { %v2798_v49 = vcombine.low %v327_v34, %v329_v35 }
  0xe1   :  { %1503 = vmatmul.mubr.bf16.gmra.mrb[80].mxu0 %v2772_v39  ;;  %v2799_v39 = vcombine.high %v327_v34, %v329_v35 }
  0xe2   :  { %1792 = vmatmul.mubr.bf16.gmra.mrb[80].mxu1 %v2774_v40  ;;  %1510 = vmatprep.mubr.bf16.mxu0 %v2777_v41  ;;  %v202_v40 = vld [vmem:[%s4076_s0 + $0x360] sm:$0xff]  ;;  %v204_v41 = vld [vmem:[%s4076_s0 + $0x370] sm:$0xff] }
  0xe3   :  { %1799 = vmatprep.mubr.bf16.mxu1 %v2779_v42  ;;  %v203_v42 = vld [vmem:[%s4076_s0 + $0x368] sm:$0xff]  ;;  %v330_v44 = vmax.bf16 %v3016_v0, %v202_v40  ;;  %v332_v45 = vmax.bf16 %v3016_v0, %v204_v41 }
  0xe4   :  { %v331_v46 = vmax.bf16 %v3016_v0, %v203_v42 }
  0xe5   :  { %v2801_v50 = vcombine.high %v330_v44, %v332_v45 }
  0xe6   :  { %v2802_v5 = vcombine.low %v331_v46, %v333_v47 }
  0xe9   :  { %1511 = vmatmul.mubr.bf16.gmra.mrb[84].mxu0 %v2776_v51  ;;  %v2803_v51 = vcombine.high %v331_v46, %v333_v47  ;;  %v217_v46 = vld [vmem:[%s4076_s0 + $0x3d8] sm:$0xff] }
  0xea   :  { %1800 = vmatmul.mubr.bf16.gmra.mrb[84].mxu1 %v2778_v52  ;;  %1518 = vmatprep.mubr.bf16.mxu0 %v2781_v53  ;;  %v206_v52 = vld [vmem:[%s4076_s0 + $0x380] sm:$0xff]  ;;  %v208_v53 = vld [vmem:[%s4076_s0 + $0x390] sm:$0xff] }
  0xeb   :  { %1807 = vmatprep.mubr.bf16.mxu1 %v2783_v54  ;;  %v207_v54 = vld [vmem:[%s4076_s0 + $0x388] sm:$0xff]  ;;  %v3647_v56 = vmax.bf16 %v3016_v0, %v206_v52  ;;  %v336_v57 = vmax.bf16 %v3016_v0, %v208_v53 }
  0xec   :  { %v3651_v58 = vmax.bf16 %v3016_v0, %v207_v54  ;;  %v3729_v54 = vmax.bf16 %v3016_v0, %v217_v46 }
  0xed   :  { %v2805_v6 = vcombine.high %v3647_v56, %v336_v57  ;;  %v2804_v30 = vcombine.low %v3647_v56, %v336_v57 }
  0xee   :  { %v2807_v9 = vcombine.high %v3651_v58, %v3654_v59  ;;  %v2806_v35 = vcombine.low %v3651_v58, %v3654_v59 }
  0xf1   :  { %1519 = vmatmul.mubr.bf16.gmra.mrb[88].mxu0 %v2780_v63 }
  0xf2   :  { %1808 = vmatmul.mubr.bf16.gmra.mrb[88].mxu1 %v2782_v1  ;;  %1526 = vmatprep.mubr.bf16.mxu0 %v2785_v2  ;;  %v2800_v1 = vcombine.low %v330_v44, %v332_v45  ;;  %v216_v44 = vld [vmem:[%s4076_s0 + $0x3d0] sm:$0xff]  ;;  %v215_v45 = vld [vmem:[%s4076_s0 + $0x3c8] sm:$0xff] }
  0xf3   :  { %1815 = vmatprep.mubr.bf16.mxu1 %v2787_v3  ;;  %v3723_v52 = vmax.bf16 %v3016_v0, %v216_v44  ;;  %v3726_v53 = vmax.bf16 %v3016_v0, %v215_v45 }
  0xf5   :  { %v2815_v10 = vcombine.high %v3726_v53, %v3729_v54 }
  0xf9   :  { %1527 = vmatmul.mubr.bf16.gmra.mrb[92].mxu0 %v2784_v12 }
  0xfa   :  { %1816 = vmatmul.mubr.bf16.gmra.mrb[92].mxu1 %v2786_v13  ;;  %1534 = vmatprep.mubr.bf16.mxu0 %v2789_v14  ;;  %v212_v14 = vld [vmem:[%s4076_s0 + $0x3b0] sm:$0xff] }
  0xfb   :  { %1823 = vmatprep.mubr.bf16.mxu1 %v2791_v15  ;;  %v211_v15 = vld [vmem:[%s4076_s0 + $0x3a8] sm:$0xff]  ;;  %v3682_v20 = vmax.bf16 %v3016_v0, %v212_v14  ;;  %v220_v14 = vld [vmem:[%s4076_s0 + $0x3f0] sm:$0xff] }
  0xfc   :  { %v3685_v21 = vmax.bf16 %v3016_v0, %v211_v15  ;;  %v219_v15 = vld [vmem:[%s4076_s0 + $0x3e8] sm:$0xff] }
  0xfe   :  { %v2811_v40 = vcombine.high %v3685_v21, %v3688_v22 }
 0x101   :  { %1535 = vmatmul.mubr.bf16.gmra.mrb[96].mxu0 %v2788_v24 }
 0x102   :  { %1824 = vmatmul.mubr.bf16.gmra.mrb[96].mxu1 %v2790_v25  ;;  %1542 = vmatprep.mubr.bf16.mxu0 %v2793_v26 }
 0x103   :  { %1831 = vmatprep.mubr.bf16.mxu1 %v2795_v27 }
 0x109   :  { %1543 = vmatmul.mubr.bf16.gmra.mrb[100].mxu0 %v2792_v36  ;;  %v214_v36 = vld [vmem:[%s4076_s0 + $0x3c0] sm:$0xff] }
 0x10a   :  { %1832 = vmatmul.mubr.bf16.gmra.mrb[100].mxu1 %v2794_v37  ;;  %1550 = vmatprep.mubr.bf16.mxu0 %v2797_v38  ;;  %v3719_v47 = vmax.bf16 %v3016_v0, %v214_v36  ;;  %v2814_v36 = vcombine.low %v3726_v53, %v3729_v54 }
 0x10b   :  { %1839 = vmatprep.mubr.bf16.mxu1 %v2799_v39  ;;  %v2809_v39 = vcombine.high %v3679_v19, %v3682_v20 }
 0x111   :  { %1551 = vmatmul.mubr.bf16.gmra.mrb[104].mxu0 %v2796_v48 }
 0x112   :  { %1840 = vmatmul.mubr.bf16.gmra.mrb[104].mxu1 %v2798_v49  ;;  %1558 = vmatprep.mubr.bf16.mxu0 %v2801_v50 }
 0x113   :  { %1847 = vmatprep.mubr.bf16.mxu1 %v2803_v51 }
 0x114   :  { %v1344_v60 = vpop.f32.mrb[0].mxu0 }
 0x115   :  { %v1633_v61 = vpop.f32.mrb[0].mxu1  ;;  %v1346_v63 = vpop.f32.mrb[1].mxu0 }
 0x116   :  { %v1634_v2 = vadd.f32 %v1633_v61, %v1344_v60  ;;  %v1635_v3 = vpop.f32.mrb[1].mxu1  ;;  %v1347_v4 = vpop.f32.mrb[2].mxu0  ;;  %v2808_v63 = vcombine.low %v3679_v19, %v3682_v20 }
 0x117   :  { %v1636_v7 = vpop.f32.mrb[2].mxu1  ;;  %v1349_v8 = vpop.f32.mrb[3].mxu0 }
 0x118   :  { %v2090_v11 = vadd.f32 %v3659_v62, %v1634_v2  ;;  %v1637_v12 = vadd.f32 %v1636_v7, %v1347_v4  ;;  %v1638_v13 = vpop.f32.mrb[3].mxu1 }
 0x119   :  { %1559 = vmatmul.mubr.bf16.gmra.mrb[108].mxu0 %v2800_v1 }
 0x11a   :  { %v2917_v17 = vpack.c.bf16 %v2090_v11, %v2090_v11  ;;  %v2091_v18 = vadd.f32 %v3659_v62, %v1637_v12  ;;  %1848 = vmatmul.mubr.bf16.gmra.mrb[108].mxu1 %v2802_v5  ;;  %1566 = vmatprep.mubr.bf16.mxu0 %v2805_v6  ;;  %v2544_v23 = vmul.f32 %v2090_v11, %v2090_v11  ;;  %v218_v6 = vld [vmem:[%s4076_s0 + $0x3e0] sm:$0xff] }
 0x11b   :  { %1855 = vmatprep.mubr.bf16.mxu1 %v2807_v9  ;;  %v2810_v5 = vcombine.low %v3685_v21, %v3688_v22  ;;  %v2813_v9 = vcombine.high %v3719_v47, %v3723_v52  ;;  %v348_v22 = vmax.bf16 %v3016_v0, %v220_v14 }
 0x11c   :  { %2411 = vst.msk [vmem:[%s4078_s3] sm:$0xf] %vm2410_vm0, %v2917_v17  ;;  %v2918_v24 = vpack.c.bf16 %v2091_v18, %v2091_v18  ;;  %v2475_v25 = vadd.f32 %v2091_v18, %v2090_v11  ;;  %v2545_v26 = vmul.f32 %v2091_v18, %v2091_v18  ;;  %v1352_v27 = vpop.f32.mrb[4].mxu0  ;;  %v346_v17 = vmax.bf16 %v3016_v0, %v218_v6 }
 0x11d   :  { %v1641_v28 = vpop.f32.mrb[4].mxu1  ;;  %v1354_v29 = vpop.f32.mrb[5].mxu0 }
 0x11e   :  { %2412 = vst.msk [vmem:[%s4078_s3 + $0x4] sm:$0xf] %vm2410_vm0, %v2918_v24  ;;  %v2608_v31 = vadd.f32 %v2545_v26, %v2544_v23  ;;  %v1642_v32 = vadd.f32 %v1641_v28, %v1352_v27  ;;  %v1643_v33 = vpop.f32.mrb[5].mxu1  ;;  %v1355_v34 = vpop.f32.mrb[6].mxu0  ;;  %v347_v23 = vmax.bf16 %v3016_v0, %v219_v15  ;;  %v349_v24 = vmax.bf16 %v3016_v0, %v221_v16 }
 0x11f   :  { %v1644_v37 = vpop.f32.mrb[6].mxu1  ;;  %v1357_v38 = vpop.f32.mrb[7].mxu0 }
 0x120   :  { %v2092_v41 = vadd.f32 %v3659_v62, %v1642_v32  ;;  %v1645_v42 = vadd.f32 %v1644_v37, %v1355_v34  ;;  %v1646_v43 = vpop.f32.mrb[7].mxu1  ;;  %v2812_v32 = vcombine.low %v3719_v47, %v3723_v52 }
 0x121   :  { %1567 = vmatmul.mubr.bf16.gmra.mrb[112].mxu0 %v2804_v30 }
 0x122   :  { %v2919_v48 = vpack.c.bf16 %v2092_v41, %v2092_v41  ;;  %v2476_v49 = vadd.f32 %v2475_v25, %v2092_v41  ;;  %v2546_v50 = vmul.f32 %v2092_v41, %v2092_v41  ;;  %v2093_v51 = vadd.f32 %v3659_v62, %v1645_v42  ;;  %1856 = vmatmul.mubr.bf16.gmra.mrb[112].mxu1 %v2806_v35 }
 0x123   :  { %1574 = vmatprep.mubr.bf16.mxu0 %v2809_v39  ;;  %1863 = vmatprep.mubr.bf16.mxu1 %v2811_v40  ;;  %v2817_v39 = vcombine.high %v346_v17, %v348_v22  ;;  %v2819_v40 = vcombine.high %v347_v23, %v349_v24 }
 0x124   :  { %2413 = vst.msk [vmem:[%s4078_s3 + $0x8] sm:$0xf] %vm2410_vm0, %v2919_v48  ;;  %v2609_v55 = vadd.f32 %v2608_v31, %v2546_v50  ;;  %v2920_v56 = vpack.c.bf16 %v2093_v51, %v2093_v51  ;;  %v2477_v57 = vadd.f32 %v2476_v49, %v2093_v51  ;;  %v2547_v58 = vmul.f32 %v2093_v51, %v2093_v51  ;;  %v1360_v59 = vpop.f32.mrb[8].mxu0 }
 0x125   :  { %v1649_v60 = vpop.f32.mrb[8].mxu1  ;;  %v1362_v61 = vpop.f32.mrb[9].mxu0 }
 0x126   :  { %2414 = vst.msk [vmem:[%s4078_s3 + $0xc] sm:$0xf] %vm2410_vm0, %v2920_v56  ;;  %v2610_v1 = vadd.f32 %v2609_v55, %v2547_v58  ;;  %v1650_v2 = vadd.f32 %v1649_v60, %v1360_v59  ;;  %v1651_v3 = vpop.f32.mrb[9].mxu1  ;;  %v1363_v4 = vpop.f32.mrb[10].mxu0  ;;  %v2816_v55 = vcombine.low %v346_v17, %v348_v22  ;;  %v2818_v60 = vcombine.low %v347_v23, %v349_v24 }
 0x127   :  { %v1652_v7 = vpop.f32.mrb[10].mxu1  ;;  %v1365_v8 = vpop.f32.mrb[11].mxu0 }
 0x128   :  { %v2094_v11 = vadd.f32 %v3659_v62, %v1650_v2  ;;  %v1653_v12 = vadd.f32 %v1652_v7, %v1363_v4  ;;  %v1654_v13 = vpop.f32.mrb[11].mxu1 }
 0x129   :  { %1575 = vmatmul.mubr.bf16.gmra.mrb[116].mxu0 %v2808_v63 }
 0x12a   :  { %v2921_v18 = vpack.c.bf16 %v2094_v11, %v2094_v11  ;;  %v2478_v19 = vadd.f32 %v2477_v57, %v2094_v11  ;;  %v2548_v20 = vmul.f32 %v2094_v11, %v2094_v11  ;;  %v2095_v21 = vadd.f32 %v3659_v62, %v1653_v12  ;;  %1864 = vmatmul.mubr.bf16.gmra.mrb[116].mxu1 %v2810_v5 }
 0x12b   :  { %1582 = vmatprep.mubr.bf16.mxu0 %v2813_v9  ;;  %1871 = vmatprep.mubr.bf16.mxu1 %v2815_v10 }
 0x12c   :  { %2415 = vst.msk [vmem:[%s4078_s3 + $0x10] sm:$0xf] %vm2410_vm0, %v2921_v18  ;;  %v2611_v25 = vadd.f32 %v2610_v1, %v2548_v20  ;;  %v2922_v26 = vpack.c.bf16 %v2095_v21, %v2095_v21  ;;  %v2479_v27 = vadd.f32 %v2478_v19, %v2095_v21  ;;  %v2549_v28 = vmul.f32 %v2095_v21, %v2095_v21  ;;  %v1368_v29 = vpop.f32.mrb[12].mxu0 }
 0x12d   :  { %v1657_v30 = vpop.f32.mrb[12].mxu1  ;;  %v1370_v31 = vpop.f32.mrb[13].mxu0 }
 0x12e   :  { %2416 = vst.msk [vmem:[%s4078_s3 + $0x14] sm:$0xf] %vm2410_vm0, %v2922_v26  ;;  %v2612_v0 = vadd.f32 %v2611_v25, %v2549_v28  ;;  %v1658_v33 = vadd.f32 %v1657_v30, %v1368_v29  ;;  %v1659_v34 = vpop.f32.mrb[13].mxu1  ;;  %v1371_v35 = vpop.f32.mrb[14].mxu0 }
 0x12f   :  { %v1660_v37 = vpop.f32.mrb[14].mxu1  ;;  %v1373_v38 = vpop.f32.mrb[15].mxu0 }
 0x130   :  { %v2096_v41 = vadd.f32 %v3659_v62, %v1658_v33  ;;  %v1661_v42 = vadd.f32 %v1660_v37, %v1371_v35  ;;  %v1662_v43 = vpop.f32.mrb[15].mxu1 }
 0x131   :  { %1583 = vmatmul.mubr.bf16.gmra.mrb[120].mxu0 %v2812_v32 }
 0x132   :  { %v2923_v44 = vpack.c.bf16 %v2096_v41, %v2096_v41  ;;  %v2480_v45 = vadd.f32 %v2479_v27, %v2096_v41  ;;  %v2550_v46 = vmul.f32 %v2096_v41, %v2096_v41  ;;  %v2097_v47 = vadd.f32 %v3659_v62, %v1661_v42  ;;  %1872 = vmatmul.mubr.bf16.gmra.mrb[120].mxu1 %v2814_v36 }
 0x133   :  { %1590 = vmatprep.mubr.bf16.mxu0 %v2817_v39  ;;  %1879 = vmatprep.mubr.bf16.mxu1 %v2819_v40 }
 0x134   :  { %2417 = vst.msk [vmem:[%s4078_s3 + $0x18] sm:$0xf] %vm2410_vm0, %v2923_v44  ;;  %v2613_v48 = vadd.f32 %v2612_v0, %v2550_v46  ;;  %v2924_v49 = vpack.c.bf16 %v2097_v47, %v2097_v47  ;;  %v2481_v50 = vadd.f32 %v2480_v45, %v2097_v47  ;;  %v2551_v51 = vmul.f32 %v2097_v47, %v2097_v47  ;;  %v1376_v52 = vpop.f32.mrb[16].mxu0 }
 0x135   :  { %v1665_v53 = vpop.f32.mrb[16].mxu1  ;;  %v1378_v54 = vpop.f32.mrb[17].mxu0 }
 0x136   :  { %2418 = vst.msk [vmem:[%s4078_s3 + $0x1c] sm:$0xf] %vm2410_vm0, %v2924_v49  ;;  %v2614_v56 = vadd.f32 %v2613_v48, %v2551_v51  ;;  %v1666_v57 = vadd.f32 %v1665_v53, %v1376_v52  ;;  %v1667_v58 = vpop.f32.mrb[17].mxu1  ;;  %v1379_v59 = vpop.f32.mrb[18].mxu0 }
 0x137   :  { %v1668_v61 = vpop.f32.mrb[18].mxu1  ;;  %v1381_v63 = vpop.f32.mrb[19].mxu0 }
 0x138   :  { %v2098_v1 = vadd.f32 %v3659_v62, %v1666_v57  ;;  %v1669_v2 = vadd.f32 %v1668_v61, %v1379_v59  ;;  %v1670_v3 = vpop.f32.mrb[19].mxu1 }
 0x139   :  { %1591 = vmatmul.mubr.bf16.gmra.mrb[124].mxu0 %v2816_v55 }
 0x13a   :  { %v2925_v4 = vpack.c.bf16 %v2098_v1, %v2098_v1  ;;  %v2482_v5 = vadd.f32 %v2481_v50, %v2098_v1  ;;  %v2552_v6 = vmul.f32 %v2098_v1, %v2098_v1  ;;  %v2099_v7 = vadd.f32 %v3659_v62, %v1669_v2  ;;  %1880 = vmatmul.mubr.bf16.gmra.mrb[124].mxu1 %v2818_v60 }
 0x13c   :  { %2419 = vst.msk [vmem:[%s4078_s3 + $0x20] sm:$0xf] %vm2410_vm0, %v2925_v4  ;;  %v2615_v8 = vadd.f32 %v2614_v56, %v2552_v6  ;;  %v2926_v9 = vpack.c.bf16 %v2099_v7, %v2099_v7  ;;  %v2483_v10 = vadd.f32 %v2482_v5, %v2099_v7  ;;  %v2553_v11 = vmul.f32 %v2099_v7, %v2099_v7  ;;  %v1384_v12 = vpop.f32.mrb[20].mxu0 }
 0x13d   :  { %v1673_v13 = vpop.f32.mrb[20].mxu1  ;;  %v1386_v14 = vpop.f32.mrb[21].mxu0 }
 0x13e   :  { %2420 = vst.msk [vmem:[%s4078_s3 + $0x24] sm:$0xf] %vm2410_vm0, %v2926_v9  ;;  %v2616_v15 = vadd.f32 %v2615_v8, %v2553_v11  ;;  %v1674_v16 = vadd.f32 %v1673_v13, %v1384_v12  ;;  %v1675_v17 = vpop.f32.mrb[21].mxu1  ;;  %v1387_v18 = vpop.f32.mrb[22].mxu0 }
 0x13f   :  { %v1676_v19 = vpop.f32.mrb[22].mxu1  ;;  %v1389_v20 = vpop.f32.mrb[23].mxu0 }
 0x140   :  { %v2100_v21 = vadd.f32 %v3659_v62, %v1674_v16  ;;  %v1677_v22 = vadd.f32 %v1676_v19, %v1387_v18  ;;  %v1678_v23 = vpop.f32.mrb[23].mxu1 }
 0x142   :  { %v2927_v24 = vpack.c.bf16 %v2100_v21, %v2100_v21  ;;  %v2484_v25 = vadd.f32 %v2483_v10, %v2100_v21  ;;  %v2554_v26 = vmul.f32 %v2100_v21, %v2100_v21  ;;  %v2101_v27 = vadd.f32 %v3659_v62, %v1677_v22 }
 0x144   :  { %2421 = vst.msk [vmem:[%s4078_s3 + $0x28] sm:$0xf] %vm2410_vm0, %v2927_v24  ;;  %v2617_v28 = vadd.f32 %v2616_v15, %v2554_v26  ;;  %v2928_v29 = vpack.c.bf16 %v2101_v27, %v2101_v27  ;;  %v2485_v30 = vadd.f32 %v2484_v25, %v2101_v27  ;;  %v2555_v31 = vmul.f32 %v2101_v27, %v2101_v27  ;;  %v1392_v32 = vpop.f32.mrb[24].mxu0 }
 0x145   :  { %v1681_v0 = vpop.f32.mrb[24].mxu1  ;;  %v1394_v33 = vpop.f32.mrb[25].mxu0 }
 0x146   :  { %2422 = vst.msk [vmem:[%s4078_s3 + $0x2c] sm:$0xf] %vm2410_vm0, %v2928_v29  ;;  %v2618_v34 = vadd.f32 %v2617_v28, %v2555_v31  ;;  %v1682_v35 = vadd.f32 %v1681_v0, %v1392_v32  ;;  %v1683_v36 = vpop.f32.mrb[25].mxu1  ;;  %v1395_v37 = vpop.f32.mrb[26].mxu0 }
 0x147   :  { %v1684_v38 = vpop.f32.mrb[26].mxu1  ;;  %v1397_v39 = vpop.f32.mrb[27].mxu0 }
 0x148   :  { %v2102_v40 = vadd.f32 %v3659_v62, %v1682_v35  ;;  %v1685_v41 = vadd.f32 %v1684_v38, %v1395_v37  ;;  %v1686_v42 = vpop.f32.mrb[27].mxu1 }
 0x14a   :  { %v2929_v43 = vpack.c.bf16 %v2102_v40, %v2102_v40  ;;  %v2486_v44 = vadd.f32 %v2485_v30, %v2102_v40  ;;  %v2556_v45 = vmul.f32 %v2102_v40, %v2102_v40  ;;  %v2103_v46 = vadd.f32 %v3659_v62, %v1685_v41 }
 0x14c   :  { %2423 = vst.msk [vmem:[%s4078_s3 + $0x30] sm:$0xf] %vm2410_vm0, %v2929_v43  ;;  %v2619_v47 = vadd.f32 %v2618_v34, %v2556_v45  ;;  %v2930_v48 = vpack.c.bf16 %v2103_v46, %v2103_v46  ;;  %v2487_v49 = vadd.f32 %v2486_v44, %v2103_v46  ;;  %v2557_v50 = vmul.f32 %v2103_v46, %v2103_v46  ;;  %v1400_v51 = vpop.f32.mrb[28].mxu0 }
 0x14d   :  { %v1689_v52 = vpop.f32.mrb[28].mxu1  ;;  %v1402_v53 = vpop.f32.mrb[29].mxu0 }
 0x14e   :  { %2424 = vst.msk [vmem:[%s4078_s3 + $0x34] sm:$0xf] %vm2410_vm0, %v2930_v48  ;;  %v2620_v54 = vadd.f32 %v2619_v47, %v2557_v50  ;;  %v1690_v55 = vadd.f32 %v1689_v52, %v1400_v51  ;;  %v1691_v56 = vpop.f32.mrb[29].mxu1  ;;  %v1403_v57 = vpop.f32.mrb[30].mxu0 }
 0x14f   :  { %v1692_v58 = vpop.f32.mrb[30].mxu1  ;;  %v1405_v59 = vpop.f32.mrb[31].mxu0 }
 0x150   :  { %v2104_v60 = vadd.f32 %v3659_v62, %v1690_v55  ;;  %v1693_v61 = vadd.f32 %v1692_v58, %v1403_v57  ;;  %v1694_v63 = vpop.f32.mrb[31].mxu1 }
 0x152   :  { %v2931_v1 = vpack.c.bf16 %v2104_v60, %v2104_v60  ;;  %v2488_v2 = vadd.f32 %v2487_v49, %v2104_v60  ;;  %v2558_v3 = vmul.f32 %v2104_v60, %v2104_v60  ;;  %v2105_v4 = vadd.f32 %v3659_v62, %v1693_v61 }
 0x154   :  { %2425 = vst.msk [vmem:[%s4078_s3 + $0x38] sm:$0xf] %vm2410_vm0, %v2931_v1  ;;  %v2621_v5 = vadd.f32 %v2620_v54, %v2558_v3  ;;  %v2932_v6 = vpack.c.bf16 %v2105_v4, %v2105_v4  ;;  %v2489_v7 = vadd.f32 %v2488_v2, %v2105_v4  ;;  %v2559_v8 = vmul.f32 %v2105_v4, %v2105_v4  ;;  %v1408_v9 = vpop.f32.mrb[32].mxu0 }
 0x155   :  { %v1697_v10 = vpop.f32.mrb[32].mxu1  ;;  %v1410_v11 = vpop.f32.mrb[33].mxu0 }
 0x156   :  { %2426 = vst.msk [vmem:[%s4078_s3 + $0x3c] sm:$0xf] %vm2410_vm0, %v2932_v6  ;;  %v2622_v12 = vadd.f32 %v2621_v5, %v2559_v8  ;;  %v1698_v13 = vadd.f32 %v1697_v10, %v1408_v9  ;;  %v1699_v14 = vpop.f32.mrb[33].mxu1  ;;  %v1411_v15 = vpop.f32.mrb[34].mxu0 }
 0x157   :  { %v1700_v16 = vpop.f32.mrb[34].mxu1  ;;  %v1413_v17 = vpop.f32.mrb[35].mxu0 }
 0x158   :  { %v2106_v18 = vadd.f32 %v3659_v62, %v1698_v13  ;;  %v1701_v19 = vadd.f32 %v1700_v16, %v1411_v15  ;;  %v1702_v20 = vpop.f32.mrb[35].mxu1 }
 0x15a   :  { %v2933_v21 = vpack.c.bf16 %v2106_v18, %v2106_v18  ;;  %v2490_v22 = vadd.f32 %v2489_v7, %v2106_v18  ;;  %v2560_v23 = vmul.f32 %v2106_v18, %v2106_v18  ;;  %v2107_v24 = vadd.f32 %v3659_v62, %v1701_v19 }
 0x15c   :  { %2427 = vst.msk [vmem:[%s4078_s3 + $0x40] sm:$0xf] %vm2410_vm0, %v2933_v21  ;;  %v2623_v25 = vadd.f32 %v2622_v12, %v2560_v23  ;;  %v2934_v26 = vpack.c.bf16 %v2107_v24, %v2107_v24  ;;  %v2491_v27 = vadd.f32 %v2490_v22, %v2107_v24  ;;  %v2561_v28 = vmul.f32 %v2107_v24, %v2107_v24  ;;  %v1416_v29 = vpop.f32.mrb[36].mxu0 }
 0x15d   :  { %v1705_v30 = vpop.f32.mrb[36].mxu1  ;;  %v1418_v31 = vpop.f32.mrb[37].mxu0 }
 0x15e   :  { %2428 = vst.msk [vmem:[%s4078_s3 + $0x44] sm:$0xf] %vm2410_vm0, %v2934_v26  ;;  %v2624_v32 = vadd.f32 %v2623_v25, %v2561_v28  ;;  %v1706_v0 = vadd.f32 %v1705_v30, %v1416_v29  ;;  %v1707_v33 = vpop.f32.mrb[37].mxu1  ;;  %v1419_v34 = vpop.f32.mrb[38].mxu0 }
 0x15f   :  { %v1708_v35 = vpop.f32.mrb[38].mxu1  ;;  %v1421_v36 = vpop.f32.mrb[39].mxu0 }
 0x160   :  { %v2108_v37 = vadd.f32 %v3659_v62, %v1706_v0  ;;  %v1709_v38 = vadd.f32 %v1708_v35, %v1419_v34  ;;  %v1710_v39 = vpop.f32.mrb[39].mxu1 }
 0x162   :  { %v2935_v40 = vpack.c.bf16 %v2108_v37, %v2108_v37  ;;  %v2492_v41 = vadd.f32 %v2491_v27, %v2108_v37  ;;  %v2562_v42 = vmul.f32 %v2108_v37, %v2108_v37  ;;  %v2109_v43 = vadd.f32 %v3659_v62, %v1709_v38 }
 0x164   :  { %2429 = vst.msk [vmem:[%s4078_s3 + $0x48] sm:$0xf] %vm2410_vm0, %v2935_v40  ;;  %v2625_v44 = vadd.f32 %v2624_v32, %v2562_v42  ;;  %v2936_v45 = vpack.c.bf16 %v2109_v43, %v2109_v43  ;;  %v2493_v46 = vadd.f32 %v2492_v41, %v2109_v43  ;;  %v2563_v47 = vmul.f32 %v2109_v43, %v2109_v43  ;;  %v1424_v48 = vpop.f32.mrb[40].mxu0 }
 0x165   :  { %v1713_v49 = vpop.f32.mrb[40].mxu1  ;;  %v1426_v50 = vpop.f32.mrb[41].mxu0 }
 0x166   :  { %2430 = vst.msk [vmem:[%s4078_s3 + $0x4c] sm:$0xf] %vm2410_vm0, %v2936_v45  ;;  %v2626_v51 = vadd.f32 %v2625_v44, %v2563_v47  ;;  %v1714_v52 = vadd.f32 %v1713_v49, %v1424_v48  ;;  %v1715_v53 = vpop.f32.mrb[41].mxu1  ;;  %v1427_v54 = vpop.f32.mrb[42].mxu0 }
 0x167   :  { %v1716_v55 = vpop.f32.mrb[42].mxu1  ;;  %v1429_v56 = vpop.f32.mrb[43].mxu0 }
 0x168   :  { %v2110_v57 = vadd.f32 %v3659_v62, %v1714_v52  ;;  %v1717_v58 = vadd.f32 %v1716_v55, %v1427_v54  ;;  %v1718_v59 = vpop.f32.mrb[43].mxu1 }
 0x16a   :  { %v2937_v60 = vpack.c.bf16 %v2110_v57, %v2110_v57  ;;  %v2494_v61 = vadd.f32 %v2493_v46, %v2110_v57  ;;  %v2564_v63 = vmul.f32 %v2110_v57, %v2110_v57  ;;  %v2111_v1 = vadd.f32 %v3659_v62, %v1717_v58 }
 0x16c   :  { %2431 = vst.msk [vmem:[%s4078_s3 + $0x50] sm:$0xf] %vm2410_vm0, %v2937_v60  ;;  %v2627_v2 = vadd.f32 %v2626_v51, %v2564_v63  ;;  %v2938_v3 = vpack.c.bf16 %v2111_v1, %v2111_v1  ;;  %v2495_v4 = vadd.f32 %v2494_v61, %v2111_v1  ;;  %v2565_v5 = vmul.f32 %v2111_v1, %v2111_v1  ;;  %v1432_v6 = vpop.f32.mrb[44].mxu0 }
 0x16d   :  { %v1721_v7 = vpop.f32.mrb[44].mxu1  ;;  %v1434_v8 = vpop.f32.mrb[45].mxu0 }
 0x16e   :  { %2432 = vst.msk [vmem:[%s4078_s3 + $0x54] sm:$0xf] %vm2410_vm0, %v2938_v3  ;;  %v2628_v9 = vadd.f32 %v2627_v2, %v2565_v5  ;;  %v1722_v10 = vadd.f32 %v1721_v7, %v1432_v6  ;;  %v1723_v11 = vpop.f32.mrb[45].mxu1  ;;  %v1435_v12 = vpop.f32.mrb[46].mxu0 }
 0x16f   :  { %v1724_v13 = vpop.f32.mrb[46].mxu1  ;;  %v1437_v14 = vpop.f32.mrb[47].mxu0 }
 0x170   :  { %v2112_v15 = vadd.f32 %v3659_v62, %v1722_v10  ;;  %v1725_v16 = vadd.f32 %v1724_v13, %v1435_v12  ;;  %v1726_v17 = vpop.f32.mrb[47].mxu1 }
 0x172   :  { %v2939_v18 = vpack.c.bf16 %v2112_v15, %v2112_v15  ;;  %v2496_v19 = vadd.f32 %v2495_v4, %v2112_v15  ;;  %v2566_v20 = vmul.f32 %v2112_v15, %v2112_v15  ;;  %v2113_v21 = vadd.f32 %v3659_v62, %v1725_v16 }
 0x174   :  { %2433 = vst.msk [vmem:[%s4078_s3 + $0x58] sm:$0xf] %vm2410_vm0, %v2939_v18  ;;  %v2629_v22 = vadd.f32 %v2628_v9, %v2566_v20  ;;  %v2940_v23 = vpack.c.bf16 %v2113_v21, %v2113_v21  ;;  %v2497_v24 = vadd.f32 %v2496_v19, %v2113_v21  ;;  %v2567_v25 = vmul.f32 %v2113_v21, %v2113_v21  ;;  %v1440_v26 = vpop.f32.mrb[48].mxu0 }
 0x175   :  { %v1729_v27 = vpop.f32.mrb[48].mxu1  ;;  %v1442_v28 = vpop.f32.mrb[49].mxu0 }
 0x176   :  { %2434 = vst.msk [vmem:[%s4078_s3 + $0x5c] sm:$0xf] %vm2410_vm0, %v2940_v23  ;;  %v2630_v29 = vadd.f32 %v2629_v22, %v2567_v25  ;;  %v1730_v30 = vadd.f32 %v1729_v27, %v1440_v26  ;;  %v1731_v31 = vpop.f32.mrb[49].mxu1  ;;  %v1443_v32 = vpop.f32.mrb[50].mxu0 }
 0x177   :  { %v1732_v0 = vpop.f32.mrb[50].mxu1  ;;  %v1445_v33 = vpop.f32.mrb[51].mxu0 }
 0x178   :  { %v2114_v34 = vadd.f32 %v3659_v62, %v1730_v30  ;;  %v1733_v35 = vadd.f32 %v1732_v0, %v1443_v32  ;;  %v1734_v36 = vpop.f32.mrb[51].mxu1 }
 0x17a   :  { %v2941_v37 = vpack.c.bf16 %v2114_v34, %v2114_v34  ;;  %v2498_v38 = vadd.f32 %v2497_v24, %v2114_v34  ;;  %v2568_v39 = vmul.f32 %v2114_v34, %v2114_v34  ;;  %v2115_v40 = vadd.f32 %v3659_v62, %v1733_v35 }
 0x17c   :  { %2435 = vst.msk [vmem:[%s4078_s3 + $0x60] sm:$0xf] %vm2410_vm0, %v2941_v37  ;;  %v2631_v41 = vadd.f32 %v2630_v29, %v2568_v39  ;;  %v2942_v42 = vpack.c.bf16 %v2115_v40, %v2115_v40  ;;  %v2499_v43 = vadd.f32 %v2498_v38, %v2115_v40  ;;  %v2569_v44 = vmul.f32 %v2115_v40, %v2115_v40  ;;  %v1448_v45 = vpop.f32.mrb[52].mxu0 }
 0x17d   :  { %v1737_v46 = vpop.f32.mrb[52].mxu1  ;;  %v1450_v47 = vpop.f32.mrb[53].mxu0 }
 0x17e   :  { %2436 = vst.msk [vmem:[%s4078_s3 + $0x64] sm:$0xf] %vm2410_vm0, %v2942_v42  ;;  %v2632_v48 = vadd.f32 %v2631_v41, %v2569_v44  ;;  %v1738_v49 = vadd.f32 %v1737_v46, %v1448_v45  ;;  %v1739_v50 = vpop.f32.mrb[53].mxu1  ;;  %v1451_v51 = vpop.f32.mrb[54].mxu0 }
 0x17f   :  { %v1740_v52 = vpop.f32.mrb[54].mxu1  ;;  %v1453_v53 = vpop.f32.mrb[55].mxu0 }
 0x180   :  { %v2116_v54 = vadd.f32 %v3659_v62, %v1738_v49  ;;  %v1741_v55 = vadd.f32 %v1740_v52, %v1451_v51  ;;  %v1742_v56 = vpop.f32.mrb[55].mxu1 }
 0x182   :  { %v2943_v57 = vpack.c.bf16 %v2116_v54, %v2116_v54  ;;  %v2500_v58 = vadd.f32 %v2499_v43, %v2116_v54  ;;  %v2570_v59 = vmul.f32 %v2116_v54, %v2116_v54  ;;  %v2117_v60 = vadd.f32 %v3659_v62, %v1741_v55 }
 0x184   :  { %2437 = vst.msk [vmem:[%s4078_s3 + $0x68] sm:$0xf] %vm2410_vm0, %v2943_v57  ;;  %v2633_v61 = vadd.f32 %v2632_v48, %v2570_v59  ;;  %v2944_v63 = vpack.c.bf16 %v2117_v60, %v2117_v60  ;;  %v2501_v1 = vadd.f32 %v2500_v58, %v2117_v60  ;;  %v2571_v2 = vmul.f32 %v2117_v60, %v2117_v60  ;;  %v1456_v3 = vpop.f32.mrb[56].mxu0 }
 0x185   :  { %v1745_v4 = vpop.f32.mrb[56].mxu1  ;;  %v1458_v5 = vpop.f32.mrb[57].mxu0 }
 0x186   :  { %2438 = vst.msk [vmem:[%s4078_s3 + $0x6c] sm:$0xf] %vm2410_vm0, %v2944_v63  ;;  %v2634_v6 = vadd.f32 %v2633_v61, %v2571_v2  ;;  %v1746_v7 = vadd.f32 %v1745_v4, %v1456_v3  ;;  %v1747_v8 = vpop.f32.mrb[57].mxu1  ;;  %v1459_v9 = vpop.f32.mrb[58].mxu0 }
 0x187   :  { %v1748_v10 = vpop.f32.mrb[58].mxu1  ;;  %v1461_v11 = vpop.f32.mrb[59].mxu0 }
 0x188   :  { %v2118_v12 = vadd.f32 %v3659_v62, %v1746_v7  ;;  %v1749_v13 = vadd.f32 %v1748_v10, %v1459_v9  ;;  %v1750_v14 = vpop.f32.mrb[59].mxu1 }
 0x18a   :  { %v2945_v15 = vpack.c.bf16 %v2118_v12, %v2118_v12  ;;  %v2502_v16 = vadd.f32 %v2501_v1, %v2118_v12  ;;  %v2572_v17 = vmul.f32 %v2118_v12, %v2118_v12  ;;  %v2119_v18 = vadd.f32 %v3659_v62, %v1749_v13 }
 0x18c   :  { %2439 = vst.msk [vmem:[%s4078_s3 + $0x70] sm:$0xf] %vm2410_vm0, %v2945_v15  ;;  %v2635_v19 = vadd.f32 %v2634_v6, %v2572_v17  ;;  %v2946_v20 = vpack.c.bf16 %v2119_v18, %v2119_v18  ;;  %v2503_v21 = vadd.f32 %v2502_v16, %v2119_v18  ;;  %v2573_v22 = vmul.f32 %v2119_v18, %v2119_v18  ;;  %v1464_v23 = vpop.f32.mrb[60].mxu0 }
 0x18d   :  { %v1753_v24 = vpop.f32.mrb[60].mxu1  ;;  %v1466_v25 = vpop.f32.mrb[61].mxu0 }
 0x18e   :  { %2440 = vst.msk [vmem:[%s4078_s3 + $0x74] sm:$0xf] %vm2410_vm0, %v2946_v20  ;;  %v2636_v26 = vadd.f32 %v2635_v19, %v2573_v22  ;;  %v1754_v27 = vadd.f32 %v1753_v24, %v1464_v23  ;;  %v1755_v28 = vpop.f32.mrb[61].mxu1  ;;  %v1467_v29 = vpop.f32.mrb[62].mxu0 }
 0x18f   :  { %v1756_v30 = vpop.f32.mrb[62].mxu1  ;;  %v1469_v31 = vpop.f32.mrb[63].mxu0 }
 0x190   :  { %v2120_v32 = vadd.f32 %v3659_v62, %v1754_v27  ;;  %v1757_v0 = vadd.f32 %v1756_v30, %v1467_v29  ;;  %v1758_v33 = vpop.f32.mrb[63].mxu1 }
 0x192   :  { %v2947_v34 = vpack.c.bf16 %v2120_v32, %v2120_v32  ;;  %v2504_v35 = vadd.f32 %v2503_v21, %v2120_v32  ;;  %v2574_v36 = vmul.f32 %v2120_v32, %v2120_v32  ;;  %v2121_v37 = vadd.f32 %v3659_v62, %v1757_v0 }
 0x194   :  { %2441 = vst.msk [vmem:[%s4078_s3 + $0x78] sm:$0xf] %vm2410_vm0, %v2947_v34  ;;  %v2637_v38 = vadd.f32 %v2636_v26, %v2574_v36  ;;  %v2948_v39 = vpack.c.bf16 %v2121_v37, %v2121_v37  ;;  %v2505_v40 = vadd.f32 %v2504_v35, %v2121_v37  ;;  %v2575_v41 = vmul.f32 %v2121_v37, %v2121_v37  ;;  %v1472_v42 = vpop.f32.mrb[64].mxu0 }
 0x195   :  { %v1761_v43 = vpop.f32.mrb[64].mxu1  ;;  %v1474_v44 = vpop.f32.mrb[65].mxu0 }
 0x196   :  { %2442 = vst.msk [vmem:[%s4078_s3 + $0x7c] sm:$0xf] %vm2410_vm0, %v2948_v39  ;;  %v2638_v45 = vadd.f32 %v2637_v38, %v2575_v41  ;;  %v1762_v46 = vadd.f32 %v1761_v43, %v1472_v42  ;;  %v1763_v47 = vpop.f32.mrb[65].mxu1  ;;  %v1475_v48 = vpop.f32.mrb[66].mxu0 }
 0x197   :  { %v1764_v49 = vpop.f32.mrb[66].mxu1  ;;  %v1477_v50 = vpop.f32.mrb[67].mxu0 }
 0x198   :  { %v2122_v51 = vadd.f32 %v3659_v62, %v1762_v46  ;;  %v1765_v52 = vadd.f32 %v1764_v49, %v1475_v48  ;;  %v1766_v53 = vpop.f32.mrb[67].mxu1 }
 0x19a   :  { %v2949_v54 = vpack.c.bf16 %v2122_v51, %v2122_v51  ;;  %v2506_v55 = vadd.f32 %v2505_v40, %v2122_v51  ;;  %v2576_v56 = vmul.f32 %v2122_v51, %v2122_v51  ;;  %v2123_v57 = vadd.f32 %v3659_v62, %v1765_v52 }
 0x19c   :  { %2443 = vst.msk [vmem:[%s4078_s3 + $0x80] sm:$0xf] %vm2410_vm0, %v2949_v54  ;;  %v2639_v58 = vadd.f32 %v2638_v45, %v2576_v56  ;;  %v2950_v59 = vpack.c.bf16 %v2123_v57, %v2123_v57  ;;  %v2507_v60 = vadd.f32 %v2506_v55, %v2123_v57  ;;  %v2577_v61 = vmul.f32 %v2123_v57, %v2123_v57  ;;  %v1480_v63 = vpop.f32.mrb[68].mxu0 }
 0x19d   :  { %v1769_v1 = vpop.f32.mrb[68].mxu1  ;;  %v1482_v2 = vpop.f32.mrb[69].mxu0 }
 0x19e   :  { %2444 = vst.msk [vmem:[%s4078_s3 + $0x84] sm:$0xf] %vm2410_vm0, %v2950_v59  ;;  %v2640_v3 = vadd.f32 %v2639_v58, %v2577_v61  ;;  %v1770_v4 = vadd.f32 %v1769_v1, %v1480_v63  ;;  %v1771_v5 = vpop.f32.mrb[69].mxu1  ;;  %v1483_v6 = vpop.f32.mrb[70].mxu0 }
 0x19f   :  { %v1772_v7 = vpop.f32.mrb[70].mxu1  ;;  %v1485_v8 = vpop.f32.mrb[71].mxu0 }
 0x1a0   :  { %v2124_v9 = vadd.f32 %v3659_v62, %v1770_v4  ;;  %v1773_v10 = vadd.f32 %v1772_v7, %v1483_v6  ;;  %v1774_v11 = vpop.f32.mrb[71].mxu1 }
 0x1a2   :  { %v2951_v12 = vpack.c.bf16 %v2124_v9, %v2124_v9  ;;  %v2508_v13 = vadd.f32 %v2507_v60, %v2124_v9  ;;  %v2578_v14 = vmul.f32 %v2124_v9, %v2124_v9  ;;  %v2125_v15 = vadd.f32 %v3659_v62, %v1773_v10 }
 0x1a4   :  { %2445 = vst.msk [vmem:[%s4078_s3 + $0x88] sm:$0xf] %vm2410_vm0, %v2951_v12  ;;  %v2641_v16 = vadd.f32 %v2640_v3, %v2578_v14  ;;  %v2952_v17 = vpack.c.bf16 %v2125_v15, %v2125_v15  ;;  %v2509_v18 = vadd.f32 %v2508_v13, %v2125_v15  ;;  %v2579_v19 = vmul.f32 %v2125_v15, %v2125_v15  ;;  %v1488_v20 = vpop.f32.mrb[72].mxu0  ;;  %v3951_v12 = vld [vmem:[%s4077_s2] ss:$0 sm:$0xff] }
 0x1a5   :  { %v1777_v21 = vpop.f32.mrb[72].mxu1  ;;  %v1490_v22 = vpop.f32.mrb[73].mxu0 }
 0x1a6   :  { %2446 = vst.msk [vmem:[%s4078_s3 + $0x8c] sm:$0xf] %vm2410_vm0, %v2952_v17  ;;  %v2642_v23 = vadd.f32 %v2641_v16, %v2579_v19  ;;  %v1778_v24 = vadd.f32 %v1777_v21, %v1488_v20  ;;  %v1779_v25 = vpop.f32.mrb[73].mxu1  ;;  %v1491_v26 = vpop.f32.mrb[74].mxu0 }
 0x1a7   :  { %v1780_v27 = vpop.f32.mrb[74].mxu1  ;;  %v1493_v28 = vpop.f32.mrb[75].mxu0 }
 0x1a8   :  { %v2126_v29 = vadd.f32 %v3659_v62, %v1778_v24  ;;  %v1781_v30 = vadd.f32 %v1780_v27, %v1491_v26  ;;  %v1782_v31 = vpop.f32.mrb[75].mxu1 }
 0x1aa   :  { %v2953_v32 = vpack.c.bf16 %v2126_v29, %v2126_v29  ;;  %v2510_v0 = vadd.f32 %v2509_v18, %v2126_v29  ;;  %v2580_v33 = vmul.f32 %v2126_v29, %v2126_v29  ;;  %v2127_v34 = vadd.f32 %v3659_v62, %v1781_v30 }
 0x1ac   :  { %2447 = vst.msk [vmem:[%s4078_s3 + $0x90] sm:$0xf] %vm2410_vm0, %v2953_v32  ;;  %v2643_v35 = vadd.f32 %v2642_v23, %v2580_v33  ;;  %v2954_v36 = vpack.c.bf16 %v2127_v34, %v2127_v34  ;;  %v2511_v37 = vadd.f32 %v2510_v0, %v2127_v34  ;;  %v2581_v38 = vmul.f32 %v2127_v34, %v2127_v34  ;;  %v1496_v39 = vpop.f32.mrb[76].mxu0 }
 0x1ad   :  { %v1785_v40 = vpop.f32.mrb[76].mxu1  ;;  %v1498_v41 = vpop.f32.mrb[77].mxu0 }
 0x1ae   :  { %2448 = vst.msk [vmem:[%s4078_s3 + $0x94] sm:$0xf] %vm2410_vm0, %v2954_v36  ;;  %v2644_v42 = vadd.f32 %v2643_v35, %v2581_v38  ;;  %v1786_v43 = vadd.f32 %v1785_v40, %v1496_v39  ;;  %v1787_v44 = vpop.f32.mrb[77].mxu1  ;;  %v1499_v45 = vpop.f32.mrb[78].mxu0 }
 0x1af   :  { %v1788_v46 = vpop.f32.mrb[78].mxu1  ;;  %v1501_v47 = vpop.f32.mrb[79].mxu0 }
 0x1b0   :  { %v2128_v48 = vadd.f32 %v3659_v62, %v1786_v43  ;;  %v1789_v49 = vadd.f32 %v1788_v46, %v1499_v45  ;;  %v1790_v50 = vpop.f32.mrb[79].mxu1 }
 0x1b2   :  { %v2955_v51 = vpack.c.bf16 %v2128_v48, %v2128_v48  ;;  %v2512_v52 = vadd.f32 %v2511_v37, %v2128_v48  ;;  %v2582_v53 = vmul.f32 %v2128_v48, %v2128_v48  ;;  %v2129_v54 = vadd.f32 %v3659_v62, %v1789_v49 }
 0x1b4   :  { %2449 = vst.msk [vmem:[%s4078_s3 + $0x98] sm:$0xf] %vm2410_vm0, %v2955_v51  ;;  %v2645_v55 = vadd.f32 %v2644_v42, %v2582_v53  ;;  %v2956_v56 = vpack.c.bf16 %v2129_v54, %v2129_v54  ;;  %v2513_v57 = vadd.f32 %v2512_v52, %v2129_v54  ;;  %v2583_v58 = vmul.f32 %v2129_v54, %v2129_v54  ;;  %v1504_v59 = vpop.f32.mrb[80].mxu0 }
 0x1b5   :  { %v1793_v60 = vpop.f32.mrb[80].mxu1  ;;  %v1506_v61 = vpop.f32.mrb[81].mxu0 }
 0x1b6   :  { %2450 = vst.msk [vmem:[%s4078_s3 + $0x9c] sm:$0xf] %vm2410_vm0, %v2956_v56  ;;  %v2646_v63 = vadd.f32 %v2645_v55, %v2583_v58  ;;  %v1794_v1 = vadd.f32 %v1793_v60, %v1504_v59  ;;  %v1795_v2 = vpop.f32.mrb[81].mxu1  ;;  %v1507_v3 = vpop.f32.mrb[82].mxu0 }
 0x1b7   :  { %v1796_v4 = vpop.f32.mrb[82].mxu1  ;;  %v1509_v5 = vpop.f32.mrb[83].mxu0 }
 0x1b8   :  { %v2130_v6 = vadd.f32 %v3659_v62, %v1794_v1  ;;  %v1797_v7 = vadd.f32 %v1796_v4, %v1507_v3  ;;  %v1798_v8 = vpop.f32.mrb[83].mxu1 }
 0x1ba   :  { %v2957_v9 = vpack.c.bf16 %v2130_v6, %v2130_v6  ;;  %v2514_v10 = vadd.f32 %v2513_v57, %v2130_v6  ;;  %v2584_v11 = vmul.f32 %v2130_v6, %v2130_v6  ;;  %v2131_v13 = vadd.f32 %v3951_v12, %v1797_v7 }
 0x1bc   :  { %2451 = vst.msk [vmem:[%s4078_s3 + $0xa0] sm:$0xf] %vm2410_vm0, %v2957_v9  ;;  %v2647_v14 = vadd.f32 %v2646_v63, %v2584_v11  ;;  %v2958_v15 = vpack.c.bf16 %v2131_v13, %v2131_v13  ;;  %v2515_v62 = vadd.f32 %v2514_v10, %v2131_v13  ;;  %v2585_v16 = vmul.f32 %v2131_v13, %v2131_v13  ;;  %v1512_v17 = vpop.f32.mrb[84].mxu0 }
 0x1bd   :  { %v1801_v18 = vpop.f32.mrb[84].mxu1  ;;  %v1514_v19 = vpop.f32.mrb[85].mxu0 }
 0x1be   :  { %2452 = vst.msk [vmem:[%s4078_s3 + $0xa4] sm:$0xf] %vm2410_vm0, %v2958_v15  ;;  %v2648_v20 = vadd.f32 %v2647_v14, %v2585_v16  ;;  %v1802_v21 = vadd.f32 %v1801_v18, %v1512_v17  ;;  %v1803_v22 = vpop.f32.mrb[85].mxu1  ;;  %v1515_v23 = vpop.f32.mrb[86].mxu0 }
 0x1bf   :  { %v1804_v24 = vpop.f32.mrb[86].mxu1  ;;  %v1517_v25 = vpop.f32.mrb[87].mxu0 }
 0x1c0   :  { %v2132_v26 = vadd.f32 %v3951_v12, %v1802_v21  ;;  %v1805_v27 = vadd.f32 %v1804_v24, %v1515_v23  ;;  %v1806_v28 = vpop.f32.mrb[87].mxu1 }
 0x1c2   :  { %v2959_v29 = vpack.c.bf16 %v2132_v26, %v2132_v26  ;;  %v2516_v30 = vadd.f32 %v2515_v62, %v2132_v26  ;;  %v2586_v31 = vmul.f32 %v2132_v26, %v2132_v26  ;;  %v2133_v32 = vadd.f32 %v3951_v12, %v1805_v27 }
 0x1c4   :  { %2453 = vst.msk [vmem:[%s4078_s3 + $0xa8] sm:$0xf] %vm2410_vm0, %v2959_v29  ;;  %v2649_v0 = vadd.f32 %v2648_v20, %v2586_v31  ;;  %v2960_v33 = vpack.c.bf16 %v2133_v32, %v2133_v32  ;;  %v2517_v34 = vadd.f32 %v2516_v30, %v2133_v32  ;;  %v2587_v35 = vmul.f32 %v2133_v32, %v2133_v32  ;;  %v1520_v36 = vpop.f32.mrb[88].mxu0 }
 0x1c5   :  { %v1809_v37 = vpop.f32.mrb[88].mxu1  ;;  %v1522_v38 = vpop.f32.mrb[89].mxu0 }
 0x1c6   :  { %2454 = vst.msk [vmem:[%s4078_s3 + $0xac] sm:$0xf] %vm2410_vm0, %v2960_v33  ;;  %v2650_v39 = vadd.f32 %v2649_v0, %v2587_v35  ;;  %v1810_v40 = vadd.f32 %v1809_v37, %v1520_v36  ;;  %v1811_v41 = vpop.f32.mrb[89].mxu1  ;;  %v1523_v42 = vpop.f32.mrb[90].mxu0 }
 0x1c7   :  { %v1812_v43 = vpop.f32.mrb[90].mxu1  ;;  %v1525_v44 = vpop.f32.mrb[91].mxu0 }
 0x1c8   :  { %v2134_v45 = vadd.f32 %v3951_v12, %v1810_v40  ;;  %v1813_v46 = vadd.f32 %v1812_v43, %v1523_v42  ;;  %v1814_v47 = vpop.f32.mrb[91].mxu1 }
 0x1ca   :  { %v2961_v48 = vpack.c.bf16 %v2134_v45, %v2134_v45  ;;  %v2518_v49 = vadd.f32 %v2517_v34, %v2134_v45  ;;  %v2588_v50 = vmul.f32 %v2134_v45, %v2134_v45  ;;  %v2135_v51 = vadd.f32 %v3951_v12, %v1813_v46 }
 0x1cc   :  { %2455 = vst.msk [vmem:[%s4078_s3 + $0xb0] sm:$0xf] %vm2410_vm0, %v2961_v48  ;;  %v2651_v52 = vadd.f32 %v2650_v39, %v2588_v50  ;;  %v2962_v53 = vpack.c.bf16 %v2135_v51, %v2135_v51  ;;  %v2519_v54 = vadd.f32 %v2518_v49, %v2135_v51  ;;  %v2589_v55 = vmul.f32 %v2135_v51, %v2135_v51  ;;  %v1528_v56 = vpop.f32.mrb[92].mxu0 }
 0x1cd   :  { %v1817_v57 = vpop.f32.mrb[92].mxu1  ;;  %v1530_v58 = vpop.f32.mrb[93].mxu0 }
 0x1ce   :  { %2456 = vst.msk [vmem:[%s4078_s3 + $0xb4] sm:$0xf] %vm2410_vm0, %v2962_v53  ;;  %v2652_v59 = vadd.f32 %v2651_v52, %v2589_v55  ;;  %v1818_v60 = vadd.f32 %v1817_v57, %v1528_v56  ;;  %v1819_v61 = vpop.f32.mrb[93].mxu1  ;;  %v1531_v63 = vpop.f32.mrb[94].mxu0 }
 0x1cf   :  { %v1820_v1 = vpop.f32.mrb[94].mxu1  ;;  %v1533_v2 = vpop.f32.mrb[95].mxu0 }
 0x1d0   :  { %v2136_v3 = vadd.f32 %v3951_v12, %v1818_v60  ;;  %v1821_v4 = vadd.f32 %v1820_v1, %v1531_v63  ;;  %v1822_v5 = vpop.f32.mrb[95].mxu1 }
 0x1d2   :  { %v2963_v6 = vpack.c.bf16 %v2136_v3, %v2136_v3  ;;  %v2520_v7 = vadd.f32 %v2519_v54, %v2136_v3  ;;  %v2590_v8 = vmul.f32 %v2136_v3, %v2136_v3  ;;  %v2137_v9 = vadd.f32 %v3951_v12, %v1821_v4 }
 0x1d4   :  { %2457 = vst.msk [vmem:[%s4078_s3 + $0xb8] sm:$0xf] %vm2410_vm0, %v2963_v6  ;;  %v2653_v10 = vadd.f32 %v2652_v59, %v2590_v8  ;;  %v2964_v11 = vpack.c.bf16 %v2137_v9, %v2137_v9  ;;  %v2521_v13 = vadd.f32 %v2520_v7, %v2137_v9  ;;  %v2591_v14 = vmul.f32 %v2137_v9, %v2137_v9  ;;  %v1536_v15 = vpop.f32.mrb[96].mxu0 }
 0x1d5   :  { %v1825_v62 = vpop.f32.mrb[96].mxu1  ;;  %v1538_v16 = vpop.f32.mrb[97].mxu0 }
 0x1d6   :  { %2458 = vst.msk [vmem:[%s4078_s3 + $0xbc] sm:$0xf] %vm2410_vm0, %v2964_v11  ;;  %v2654_v17 = vadd.f32 %v2653_v10, %v2591_v14  ;;  %v1826_v18 = vadd.f32 %v1825_v62, %v1536_v15  ;;  %v1827_v19 = vpop.f32.mrb[97].mxu1  ;;  %v1539_v20 = vpop.f32.mrb[98].mxu0 }
 0x1d7   :  { %v1828_v21 = vpop.f32.mrb[98].mxu1  ;;  %v1541_v22 = vpop.f32.mrb[99].mxu0 }
 0x1d8   :  { %v2138_v23 = vadd.f32 %v3951_v12, %v1826_v18  ;;  %v1829_v24 = vadd.f32 %v1828_v21, %v1539_v20  ;;  %v1830_v25 = vpop.f32.mrb[99].mxu1 }
 0x1da   :  { %v2965_v26 = vpack.c.bf16 %v2138_v23, %v2138_v23  ;;  %v2522_v27 = vadd.f32 %v2521_v13, %v2138_v23  ;;  %v2592_v28 = vmul.f32 %v2138_v23, %v2138_v23  ;;  %v2139_v29 = vadd.f32 %v3951_v12, %v1829_v24 }
 0x1dc   :  { %2459 = vst.msk [vmem:[%s4078_s3 + $0xc0] sm:$0xf] %vm2410_vm0, %v2965_v26  ;;  %v2655_v30 = vadd.f32 %v2654_v17, %v2592_v28  ;;  %v2966_v31 = vpack.c.bf16 %v2139_v29, %v2139_v29  ;;  %v2523_v32 = vadd.f32 %v2522_v27, %v2139_v29  ;;  %v2593_v0 = vmul.f32 %v2139_v29, %v2139_v29  ;;  %v1544_v33 = vpop.f32.mrb[100].mxu0 }
 0x1dd   :  { %v1833_v34 = vpop.f32.mrb[100].mxu1  ;;  %v1546_v35 = vpop.f32.mrb[101].mxu0 }
 0x1de   :  { %2460 = vst.msk [vmem:[%s4078_s3 + $0xc4] sm:$0xf] %vm2410_vm0, %v2966_v31  ;;  %v2656_v36 = vadd.f32 %v2655_v30, %v2593_v0  ;;  %v1834_v37 = vadd.f32 %v1833_v34, %v1544_v33  ;;  %v1835_v38 = vpop.f32.mrb[101].mxu1  ;;  %v1547_v39 = vpop.f32.mrb[102].mxu0 }
 0x1df   :  { %v1836_v40 = vpop.f32.mrb[102].mxu1  ;;  %v1549_v41 = vpop.f32.mrb[103].mxu0 }
 0x1e0   :  { %v2140_v42 = vadd.f32 %v3951_v12, %v1834_v37  ;;  %v1837_v43 = vadd.f32 %v1836_v40, %v1547_v39  ;;  %v1838_v44 = vpop.f32.mrb[103].mxu1 }
 0x1e2   :  { %v2967_v45 = vpack.c.bf16 %v2140_v42, %v2140_v42  ;;  %v2524_v46 = vadd.f32 %v2523_v32, %v2140_v42  ;;  %v2594_v47 = vmul.f32 %v2140_v42, %v2140_v42  ;;  %v2141_v48 = vadd.f32 %v3951_v12, %v1837_v43 }
 0x1e4   :  { %2461 = vst.msk [vmem:[%s4078_s3 + $0xc8] sm:$0xf] %vm2410_vm0, %v2967_v45  ;;  %v2657_v49 = vadd.f32 %v2656_v36, %v2594_v47  ;;  %v2968_v50 = vpack.c.bf16 %v2141_v48, %v2141_v48  ;;  %v2525_v51 = vadd.f32 %v2524_v46, %v2141_v48  ;;  %v2595_v52 = vmul.f32 %v2141_v48, %v2141_v48  ;;  %v1552_v53 = vpop.f32.mrb[104].mxu0 }
 0x1e5   :  { %v1841_v54 = vpop.f32.mrb[104].mxu1  ;;  %v1554_v55 = vpop.f32.mrb[105].mxu0 }
 0x1e6   :  { %2462 = vst.msk [vmem:[%s4078_s3 + $0xcc] sm:$0xf] %vm2410_vm0, %v2968_v50  ;;  %v2658_v56 = vadd.f32 %v2657_v49, %v2595_v52  ;;  %v1842_v57 = vadd.f32 %v1841_v54, %v1552_v53  ;;  %v1843_v58 = vpop.f32.mrb[105].mxu1  ;;  %v1555_v59 = vpop.f32.mrb[106].mxu0 }
 0x1e7   :  { %v1844_v60 = vpop.f32.mrb[106].mxu1  ;;  %v1557_v61 = vpop.f32.mrb[107].mxu0 }
 0x1e8   :  { %v2142_v63 = vadd.f32 %v3951_v12, %v1842_v57  ;;  %v1845_v1 = vadd.f32 %v1844_v60, %v1555_v59  ;;  %v1846_v2 = vpop.f32.mrb[107].mxu1 }
 0x1ea   :  { %v2969_v3 = vpack.c.bf16 %v2142_v63, %v2142_v63  ;;  %v2526_v4 = vadd.f32 %v2525_v51, %v2142_v63  ;;  %v2596_v5 = vmul.f32 %v2142_v63, %v2142_v63  ;;  %v2143_v6 = vadd.f32 %v3951_v12, %v1845_v1 }
 0x1ec   :  { %2463 = vst.msk [vmem:[%s4078_s3 + $0xd0] sm:$0xf] %vm2410_vm0, %v2969_v3  ;;  %v2659_v7 = vadd.f32 %v2658_v56, %v2596_v5  ;;  %v2970_v8 = vpack.c.bf16 %v2143_v6, %v2143_v6  ;;  %v2527_v9 = vadd.f32 %v2526_v4, %v2143_v6  ;;  %v2597_v10 = vmul.f32 %v2143_v6, %v2143_v6  ;;  %v1560_v11 = vpop.f32.mrb[108].mxu0 }
 0x1ed   :  { %v1849_v13 = vpop.f32.mrb[108].mxu1  ;;  %v1562_v14 = vpop.f32.mrb[109].mxu0 }
 0x1ee   :  { %2464 = vst.msk [vmem:[%s4078_s3 + $0xd4] sm:$0xf] %vm2410_vm0, %v2970_v8  ;;  %v2660_v15 = vadd.f32 %v2659_v7, %v2597_v10  ;;  %v1850_v62 = vadd.f32 %v1849_v13, %v1560_v11  ;;  %v1851_v16 = vpop.f32.mrb[109].mxu1  ;;  %v1563_v17 = vpop.f32.mrb[110].mxu0 }
 0x1ef   :  { %v1852_v18 = vpop.f32.mrb[110].mxu1  ;;  %v1565_v19 = vpop.f32.mrb[111].mxu0 }
 0x1f0   :  { %v2144_v20 = vadd.f32 %v3951_v12, %v1850_v62  ;;  %v1853_v21 = vadd.f32 %v1852_v18, %v1563_v17  ;;  %v1854_v22 = vpop.f32.mrb[111].mxu1 }
 0x1f2   :  { %v2971_v23 = vpack.c.bf16 %v2144_v20, %v2144_v20  ;;  %v2528_v24 = vadd.f32 %v2527_v9, %v2144_v20  ;;  %v2598_v25 = vmul.f32 %v2144_v20, %v2144_v20  ;;  %v2145_v26 = vadd.f32 %v3951_v12, %v1853_v21 }
 0x1f4   :  { %2465 = vst.msk [vmem:[%s4078_s3 + $0xd8] sm:$0xf] %vm2410_vm0, %v2971_v23  ;;  %v2661_v27 = vadd.f32 %v2660_v15, %v2598_v25  ;;  %v2972_v28 = vpack.c.bf16 %v2145_v26, %v2145_v26  ;;  %v2529_v29 = vadd.f32 %v2528_v24, %v2145_v26  ;;  %v2599_v30 = vmul.f32 %v2145_v26, %v2145_v26  ;;  %v1568_v31 = vpop.f32.mrb[112].mxu0 }
 0x1f5   :  { %v1857_v32 = vpop.f32.mrb[112].mxu1  ;;  %v1570_v0 = vpop.f32.mrb[113].mxu0 }
 0x1f6   :  { %2466 = vst.msk [vmem:[%s4078_s3 + $0xdc] sm:$0xf] %vm2410_vm0, %v2972_v28  ;;  %v2662_v33 = vadd.f32 %v2661_v27, %v2599_v30  ;;  %v1858_v34 = vadd.f32 %v1857_v32, %v1568_v31  ;;  %v1859_v35 = vpop.f32.mrb[113].mxu1  ;;  %v1571_v36 = vpop.f32.mrb[114].mxu0 }
 0x1f7   :  { %v1860_v37 = vpop.f32.mrb[114].mxu1  ;;  %v1573_v38 = vpop.f32.mrb[115].mxu0 }
 0x1f8   :  { %v2146_v39 = vadd.f32 %v3951_v12, %v1858_v34  ;;  %v1861_v40 = vadd.f32 %v1860_v37, %v1571_v36  ;;  %v1862_v41 = vpop.f32.mrb[115].mxu1 }
 0x1fa   :  { %v2973_v42 = vpack.c.bf16 %v2146_v39, %v2146_v39  ;;  %v2530_v43 = vadd.f32 %v2529_v29, %v2146_v39  ;;  %v2600_v44 = vmul.f32 %v2146_v39, %v2146_v39  ;;  %v2147_v45 = vadd.f32 %v3951_v12, %v1861_v40 }
 0x1fc   :  { %2467 = vst.msk [vmem:[%s4078_s3 + $0xe0] sm:$0xf] %vm2410_vm0, %v2973_v42  ;;  %v2663_v46 = vadd.f32 %v2662_v33, %v2600_v44  ;;  %v2974_v47 = vpack.c.bf16 %v2147_v45, %v2147_v45  ;;  %v2531_v48 = vadd.f32 %v2530_v43, %v2147_v45  ;;  %v2601_v49 = vmul.f32 %v2147_v45, %v2147_v45  ;;  %v1576_v50 = vpop.f32.mrb[116].mxu0 }
 0x1fd   :  { %v1865_v51 = vpop.f32.mrb[116].mxu1  ;;  %v1578_v52 = vpop.f32.mrb[117].mxu0 }
 0x1fe   :  { %2468 = vst.msk [vmem:[%s4078_s3 + $0xe4] sm:$0xf] %vm2410_vm0, %v2974_v47  ;;  %v2664_v53 = vadd.f32 %v2663_v46, %v2601_v49  ;;  %v1866_v54 = vadd.f32 %v1865_v51, %v1576_v50  ;;  %v1867_v55 = vpop.f32.mrb[117].mxu1  ;;  %v1579_v56 = vpop.f32.mrb[118].mxu0 }
 0x1ff   :  { %v1868_v57 = vpop.f32.mrb[118].mxu1  ;;  %v1581_v58 = vpop.f32.mrb[119].mxu0 }
 0x200   :  { %v2148_v59 = vadd.f32 %v3951_v12, %v1866_v54  ;;  %v1869_v60 = vadd.f32 %v1868_v57, %v1579_v56  ;;  %v1870_v61 = vpop.f32.mrb[119].mxu1 }
 0x202   :  { %v2975_v63 = vpack.c.bf16 %v2148_v59, %v2148_v59  ;;  %v2532_v1 = vadd.f32 %v2531_v48, %v2148_v59  ;;  %v2602_v2 = vmul.f32 %v2148_v59, %v2148_v59  ;;  %v2149_v3 = vadd.f32 %v3951_v12, %v1869_v60 }
 0x204   :  { %2469 = vst.msk [vmem:[%s4078_s3 + $0xe8] sm:$0xf] %vm2410_vm0, %v2975_v63  ;;  %v2665_v4 = vadd.f32 %v2664_v53, %v2602_v2  ;;  %v2976_v5 = vpack.c.bf16 %v2149_v3, %v2149_v3  ;;  %v2533_v6 = vadd.f32 %v2532_v1, %v2149_v3  ;;  %v2603_v7 = vmul.f32 %v2149_v3, %v2149_v3  ;;  %v1584_v8 = vpop.f32.mrb[120].mxu0 }
 0x205   :  { %v1873_v9 = vpop.f32.mrb[120].mxu1  ;;  %v1586_v10 = vpop.f32.mrb[121].mxu0 }
 0x206   :  { %2470 = vst.msk [vmem:[%s4078_s3 + $0xec] sm:$0xf] %vm2410_vm0, %v2976_v5  ;;  %v2666_v11 = vadd.f32 %v2665_v4, %v2603_v7  ;;  %v1874_v13 = vadd.f32 %v1873_v9, %v1584_v8  ;;  %v1875_v14 = vpop.f32.mrb[121].mxu1  ;;  %v1587_v15 = vpop.f32.mrb[122].mxu0 }
 0x207   :  { %v1876_v62 = vpop.f32.mrb[122].mxu1  ;;  %v1589_v16 = vpop.f32.mrb[123].mxu0 }
 0x208   :  { %v2150_v17 = vadd.f32 %v3951_v12, %v1874_v13  ;;  %v1877_v18 = vadd.f32 %v1876_v62, %v1587_v15  ;;  %v1878_v19 = vpop.f32.mrb[123].mxu1 }
 0x20a   :  { %v2977_v20 = vpack.c.bf16 %v2150_v17, %v2150_v17  ;;  %v2534_v21 = vadd.f32 %v2533_v6, %v2150_v17  ;;  %v2604_v22 = vmul.f32 %v2150_v17, %v2150_v17  ;;  %v2151_v23 = vadd.f32 %v3951_v12, %v1877_v18 }
 0x20c   :  { %2471 = vst.msk [vmem:[%s4078_s3 + $0xf0] sm:$0xf] %vm2410_vm0, %v2977_v20  ;;  %v2667_v24 = vadd.f32 %v2666_v11, %v2604_v22  ;;  %v2978_v25 = vpack.c.bf16 %v2151_v23, %v2151_v23  ;;  %v2535_v26 = vadd.f32 %v2534_v21, %v2151_v23  ;;  %v2605_v27 = vmul.f32 %v2151_v23, %v2151_v23  ;;  %v1592_v28 = vpop.f32.mrb[124].mxu0 }
 0x20d   :  { %v1881_v29 = vpop.f32.mrb[124].mxu1  ;;  %v1594_v30 = vpop.f32.mrb[125].mxu0 }
 0x20e   :  { %2472 = vst.msk [vmem:[%s4078_s3 + $0xf4] sm:$0xf] %vm2410_vm0, %v2978_v25  ;;  %v2668_v31 = vadd.f32 %v2667_v24, %v2605_v27  ;;  %v1882_v32 = vadd.f32 %v1881_v29, %v1592_v28  ;;  %v1883_v0 = vpop.f32.mrb[125].mxu1  ;;  %v1595_v33 = vpop.f32.mrb[126].mxu0 }
 0x20f   :  { %v1884_v34 = vpop.f32.mrb[126].mxu1  ;;  %v1597_v35 = vpop.f32.mrb[127].mxu0 }
 0x210   :  { %v2152_v36 = vadd.f32 %v3951_v12, %v1882_v32  ;;  %v1885_v37 = vadd.f32 %v1884_v34, %v1595_v33  ;;  %v1886_v38 = vpop.f32.mrb[127].mxu1 }
 0x212   :  { %v2979_v39 = vpack.c.bf16 %v2152_v36, %v2152_v36  ;;  %v2536_v40 = vadd.f32 %v2535_v26, %v2152_v36  ;;  %v2606_v41 = vmul.f32 %v2152_v36, %v2152_v36  ;;  %v2153_v42 = vadd.f32 %v3951_v12, %v1885_v37 }
 0x214   :  { %2473 = vst.msk [vmem:[%s4078_s3 + $0xf8] sm:$0xf] %vm2410_vm0, %v2979_v39  ;;  %v2669_v43 = vadd.f32 %v2668_v31, %v2606_v41  ;;  %v2980_v44 = vpack.c.bf16 %v2153_v42, %v2153_v42  ;;  %v2537_v45 = vadd.f32 %v2536_v40, %v2153_v42  ;;  %v2607_v46 = vmul.f32 %v2153_v42, %v2153_v42 }
 0x216   :  { %2474 = vst.msk [vmem:[%s4078_s3 + $0xfc] sm:$0xf] %vm2410_vm0, %v2980_v44  ;;  %v2538_v47 = vrot.slane %v2537_v45, 4  ;;  %v2670_v48 = vadd.f32 %v2669_v43, %v2607_v46 }
 0x218   :  { %v2539_v49 = vadd.f32 %v2538_v47, %v2537_v45  ;;  %v2671_v50 = vrot.slane %v2670_v48, 4 }
 0x21a   :  { %v2540_v51 = vrot.slane %v2539_v49, 2  ;;  %v2672_v12 = vadd.f32 %v2671_v50, %v2670_v48 }
 0x21c   :  { %v2541_v52 = vadd.f32 %v2540_v51, %v2539_v49  ;;  %v2673_v53 = vrot.slane %v2672_v12, 2 }
 0x21e   :  { %v2542_v54 = vrot.slane %v2541_v52, 1  ;;  %v2674_v55 = vadd.f32 %v2673_v53, %v2672_v12 }
 0x220   :  { %v2675_v56 = vrot.slane %v2674_v55, 1  ;;  %v2543_v57 = vadd.f32 %v2542_v54, %v2541_v52 }
 0x222   :  { %v2676_v58 = vadd.f32 %v2675_v56, %v2674_v55 }
 0x224   :  { %v2678_v59 = vsel %vm2677_vm1, %v2543_v57, %v2676_v58 }
 0x225   :  { %v2680_v60 = vsel %vm2679_vm2, %v2678_v59, 0.0 }
 0x226   :  { %2683 = vst [vmem:[%s4079_s4] sm:$0xff] %v2680_v60 }

// kernel: _lambda_.33
= control target key start
LH: loop header
LB: loop body
LE: loop exit
PB: predicated region body
PF: predicated region fallthrough
CT: control target
= control target key end

     0   :  { %s2116_s12 = smov 0   ;;  %s2118_s13 = smov 0   ;;  %s2917_s0 = inlined_call_operand.vmem [shape: bf16[4096,256], index: 0, kind: input, shape index: {}]   ;;  %s2918_s1 = inlined_call_operand.vmem [shape: bf16[256,128], index: 1, kind: input, shape index: {}]   ;;  %s2919_s2 = inlined_call_operand.vmem [shape: f32[1,128], index: 2, kind: input, shape index: {}]   ;;  %s2920_s3 = inlined_call_operand.vmem [shape: f32[4096,8], index: 3, kind: output, shape index: {}]  }
   0x1   :  { %s2120_s14 = smov 0  }
   0x2 LB: > { %s32_s15 = sadd.s32 1, %s2089_s13  ;;  %p1780_p0 = scmp.ge.s32.totalorder %s2093_s14, 1  ;;  %s2093_s14 = sphi %s2120_s14, %s13_s14   ;;  %s2089_s13 = sphi %s2118_s13, %s3006_s13   ;;  %s2085_s12 = sphi %s2116_s12, %s3005_s12  }
   0x3   : > { %p34_p1 = scmp.ge.s32.totalorder %s32_s15, 8  ;;  %p191_p2 = scmp.lt.s32.totalorder %s2093_s14, 9 }
   0x5   : > { %s3008_s15 = smov (%p34_p1, %s32_s15), 0  ;;  %p192_p3 = pnand %p1780_p0, %p191_p2 }
   0x7   : > { %195 = sbr.rel (%p192_p3) target bundleno = 428 (0x1ac), region = 32 }
   0xe   : > { %v1927_v0 = vld [vmem:[%s2918_s1] sm:$0xff]   ;;  %v2095_v1 = vmov 0   ;;  %s1781_s18 = sshll.u32 %s2085_s12, 6  ;;  %v1928_v2 = vld [vmem:[%s2918_s1 + $0x8] sm:$0xff]   ;;  %v1929_v3 = vld [vmem:[%s2918_s1 + $0x10] sm:$0xff]   ;;  %vm1595_vm0 = vcmask 64512  }
   0xf   : > { %976 = vmatprep.subr.bf16.mxu0 %v2095_v1  ;;  %1870 = vmatprep.subr.bf16.mxu1 %v2095_v1  ;;  %p236_p4 = scmp.lt.s32.totalorder %s1781_s18, 511  ;;  %v1930_v4 = vld [vmem:[%s2918_s1 + $0x18] sm:$0xff]   ;;  %v1931_v5 = vld [vmem:[%s2918_s1 + $0x20] sm:$0xff]   ;;  %v1932_v13 = vld [vmem:[%s2918_s1 + $0x28] sm:$0xff]  }
  0x10   : > { %977 = vmatpush1.bf16.msra.mxu0 %v1927_v0  ;;  %1886 = vmatpush1.bf16.msra.mxu1 %v1927_v0  ;;  %v1933_v17 = vld [vmem:[%s2918_s1 + $0x30] sm:$0xff]   ;;  %v1934_v22 = vld [vmem:[%s2918_s1 + $0x38] sm:$0xff]   ;;  %v1935_v40 = vld [vmem:[%s2918_s1 + $0x40] sm:$0xff]  }
  0x11   : > { %978 = vmatprep.subr.bf16.mxu0 %v2095_v1  ;;  %1871 = vmatprep.subr.bf16.mxu1 %v2095_v1  ;;  %s3010_s18 = smov (!%p236_p4, %s1781_s18), 511  ;;  %v1936_v62 = vld [vmem:[%s2918_s1 + $0x48] sm:$0xff]  }
  0x12   : > { %s1869_s25 = sshll.u32 %s3010_s18, 3 }
  0x13   : > { %s2162_s28 = scalar_lea.vmem %s2917_s0, %s1869_s25  ;;  %s2720_s8 = scalar_lea.vmem %s2920_s3, %s1869_s25 }
  0x14   : > { %979 = vmatpush1.bf16.msra.mxu0 %v1928_v2  ;;  %1887 = vmatpush1.bf16.msra.mxu1 %v1928_v2  ;;  %v336_v6 = vld [vmem:[%s2162_s28] sm:$0xff]  ;;  %v337_v7 = vld [vmem:[%s2162_s28 + $0x8] sm:$0xff]  ;;  %v346_v26 = vld [vmem:[%s2162_s28 + $0x50] sm:$0xff] }
  0x15   : > { %980 = vmatprep.subr.bf16.mxu0 %v2095_v1  ;;  %1872 = vmatprep.subr.bf16.mxu1 %v2095_v1  ;;  %v368_v8 = vld [vmem:[%s2162_s28 + $0x100] sm:$0xff]  ;;  %v2173_v9 = vmax.bf16 %v2095_v1, %v336_v6  ;;  %v2176_v10 = vmax.bf16 %v2095_v1, %v337_v7  ;;  %v369_v11 = vld [vmem:[%s2162_s28 + $0x108] sm:$0xff]  ;;  %v347_v27 = vld [vmem:[%s2162_s28 + $0x58] sm:$0xff]  ;;  %v2237_v39 = vmax.bf16 %v2095_v1, %v346_v26 }
  0x16   : > { %v2180_v12 = vmax.bf16 %v2095_v1, %v368_v8  ;;  %v2186_v14 = vmax.bf16 %v2095_v1, %v369_v11  ;;  %v344_v18 = vld [vmem:[%s2162_s28 + $0x40] sm:$0xff]  ;;  %v345_v19 = vld [vmem:[%s2162_s28 + $0x48] sm:$0xff]  ;;  %v378_v29 = vld [vmem:[%s2162_s28 + $0x150] sm:$0xff]  ;;  %v2243_v41 = vmax.bf16 %v2095_v1, %v347_v27 }
  0x17   : > { %v1787_v15 = vcombine.high %v2173_v9, %v2176_v10  ;;  %v376_v20 = vld [vmem:[%s2162_s28 + $0x140] sm:$0xff]  ;;  %v377_v21 = vld [vmem:[%s2162_s28 + $0x148] sm:$0xff]  ;;  %v2207_v23 = vmax.bf16 %v2095_v1, %v344_v18  ;;  %v2210_v24 = vmax.bf16 %v2095_v1, %v345_v19  ;;  %v379_v30 = vld [vmem:[%s2162_s28 + $0x158] sm:$0xff]  ;;  %v2246_v42 = vmax.bf16 %v2095_v1, %v378_v29 }
  0x18   : > { %981 = vmatpush1.bf16.msra.mxu0 %v1929_v3  ;;  %1888 = vmatpush1.bf16.msra.mxu1 %v1929_v3  ;;  %v1819_v16 = vcombine.high %v2180_v12, %v2186_v14  ;;  %v2213_v25 = vmax.bf16 %v2095_v1, %v376_v20  ;;  %v2218_v28 = vmax.bf16 %v2095_v1, %v377_v21  ;;  %v348_v31 = vld [vmem:[%s2162_s28 + $0x60] sm:$0xff]  ;;  %v349_v33 = vld [vmem:[%s2162_s28 + $0x68] sm:$0xff]  ;;  %v350_v48 = vld [vmem:[%s2162_s28 + $0x70] sm:$0xff] }
  0x19   : > { %982 = vmatprep.subr.bf16.mxu0 %v2095_v1  ;;  %1873 = vmatprep.subr.bf16.mxu1 %v2095_v1  ;;  %v380_v34 = vld [vmem:[%s2162_s28 + $0x160] sm:$0xff]  ;;  %v381_v35 = vld [vmem:[%s2162_s28 + $0x168] sm:$0xff]  ;;  %v2249_v43 = vmax.bf16 %v2095_v1, %v379_v30  ;;  %v2252_v44 = vmax.bf16 %v2095_v1, %v348_v31  ;;  %v2255_v45 = vmax.bf16 %v2095_v1, %v349_v33  ;;  %v351_v49 = vld [vmem:[%s2162_s28 + $0x78] sm:$0xff] }
  0x1a   : > { %1008 = vmatprep.mubr.bf16.mxu0 %v1787_v15  ;;  %1136 = vmatprep.mubr.bf16.mxu1 %v1819_v16  ;;  %v2258_v46 = vmax.bf16 %v2095_v1, %v380_v34  ;;  %v2261_v47 = vmax.bf16 %v2095_v1, %v381_v35  ;;  %v382_v50 = vld [vmem:[%s2162_s28 + $0x170] sm:$0xff]  ;;  %v383_v54 = vld [vmem:[%s2162_s28 + $0x178] sm:$0xff]  ;;  %v352_v55 = vld [vmem:[%s2162_s28 + $0x80] sm:$0xff]  ;;  %v2292_v0 = vmax.bf16 %v2095_v1, %v350_v48 }
  0x1b   : > { %v353_v56 = vld [vmem:[%s2162_s28 + $0x88] sm:$0xff]  ;;  %v384_v61 = vld [vmem:[%s2162_s28 + $0x180] sm:$0xff]  ;;  %v2295_v2 = vmax.bf16 %v2095_v1, %v351_v49  ;;  %v2298_v3 = vmax.bf16 %v2095_v1, %v382_v50  ;;  %v2305_v6 = vmax.bf16 %v2095_v1, %v352_v55  ;;  %v354_v8 = vld [vmem:[%s2162_s28 + $0x90] sm:$0xff] }
  0x1c   : > { %983 = vmatpush1.bf16.msra.mxu0 %v1930_v4  ;;  %1889 = vmatpush1.bf16.msra.mxu1 %v1930_v4  ;;  %v385_v4 = vld [vmem:[%s2162_s28 + $0x188] sm:$0xff]  ;;  %v2308_v7 = vmax.bf16 %v2095_v1, %v353_v56  ;;  %v355_v11 = vld [vmem:[%s2162_s28 + $0x98] sm:$0xff]  ;;  %v1937_v19 = vld [vmem:[%s2918_s1 + $0x50] sm:$0xff]   ;;  %v2339_v30 = vmax.bf16 %v2095_v1, %v354_v8 }
  0x1d   : > { %984 = vmatprep.subr.bf16.mxu0 %v2095_v1  ;;  %1874 = vmatprep.subr.bf16.mxu1 %v2095_v1  ;;  %v387_v18 = vld [vmem:[%s2162_s28 + $0x198] sm:$0xff]  ;;  %v2333_v26 = vmax.bf16 %v2095_v1, %v385_v4  ;;  %v356_v27 = vld [vmem:[%s2162_s28 + $0xa0] sm:$0xff]  ;;  %v2342_v31 = vmax.bf16 %v2095_v1, %v355_v11  ;;  %v357_v34 = vld [vmem:[%s2162_s28 + $0xa8] sm:$0xff] }
  0x1e   : > { %v388_v35 = vld [vmem:[%s2162_s28 + $0x1a0] sm:$0xff]  ;;  %v2355_v50 = vmax.bf16 %v2095_v1, %v387_v18  ;;  %v359_v55 = vld [vmem:[%s2162_s28 + $0xb8] sm:$0xff]  ;;  %v390_v56 = vld [vmem:[%s2162_s28 + $0x1b0] sm:$0xff]  ;;  %v2367_v4 = vmax.bf16 %v2095_v1, %v356_v27  ;;  %v2375_v18 = vmax.bf16 %v2095_v1, %v357_v34 }
  0x1f   : > { %v391_v8 = vld [vmem:[%s2162_s28 + $0x1b8] sm:$0xff]  ;;  %v2393_v34 = vmax.bf16 %v2095_v1, %v390_v56  ;;  %v360_v49 = vld [vmem:[%s2162_s28 + $0xc0] sm:$0xff]  ;;  %v393_v48 = vld [vmem:[%s2162_s28 + $0x1c8] sm:$0xff] }
  0x20   : > { %985 = vmatpush1.bf16.msra.mxu0 %v1931_v5  ;;  %1890 = vmatpush1.bf16.msra.mxu1 %v1931_v5  ;;  %v2302_v5 = vmax.bf16 %v2095_v1, %v383_v54  ;;  %v358_v54 = vld [vmem:[%s2162_s28 + $0xb0] sm:$0xff]  ;;  %v1938_v27 = vld [vmem:[%s2918_s1 + $0x58] sm:$0xff]   ;;  %v2402_v29 = vmax.bf16 %v2095_v1, %v391_v8  ;;  %v2437_v16 = vmax.bf16 %v2095_v1, %v393_v48  ;;  %v365_v60 = vld [vmem:[%s2162_s28 + $0xe8] sm:$0xff] }
  0x21   : > { %986 = vmatprep.subr.bf16.mxu0 %v2095_v1  ;;  %1875 = vmatprep.subr.bf16.mxu1 %v2095_v1  ;;  %v2387_v11 = vmax.bf16 %v2095_v1, %v358_v54  ;;  %v362_v56 = vld [vmem:[%s2162_s28 + $0xd0] sm:$0xff]  ;;  %v363_v54 = vld [vmem:[%s2162_s28 + $0xd8] sm:$0xff]  ;;  %v396_v59 = vld [vmem:[%s2162_s28 + $0x1e0] sm:$0xff]  ;;  %v2477_v57 = vmax.bf16 %v2095_v1, %v365_v60 }
  0x22   : > { %v394_v21 = vld [vmem:[%s2162_s28 + $0x1d0] sm:$0xff]  ;;  %v395_v8 = vld [vmem:[%s2162_s28 + $0x1d8] sm:$0xff]  ;;  %v2440_v20 = vmax.bf16 %v2095_v1, %v362_v56  ;;  %v2480_v56 = vmax.bf16 %v2095_v1, %v396_v59  ;;  %v1940_v48 = vld [vmem:[%s2918_s1 + $0x68] sm:$0xff]  }
  0x23   : > { %2941 = vst [vmem:[#allocation5_spill] sm:$0xff] %v2477_v57  ;;  %v367_v53 = vld [vmem:[%s2162_s28 + $0xf8] sm:$0xff]  ;;  %v398_v59 = vld [vmem:[%s2162_s28 + $0x1f0] sm:$0xff] }
  0x24   : > { %987 = vmatpush1.bf16.msra.mxu0 %v1932_v13  ;;  %1891 = vmatpush1.bf16.msra.mxu1 %v1932_v13  ;;  %v386_v13 = vld [vmem:[%s2162_s28 + $0x190] sm:$0xff]  ;;  %2942 = vst [vmem:[#allocation6_spill] sm:$0xff] %v2480_v56  ;;  %v2494_v60 = vmax.bf16 %v2095_v1, %v367_v53  ;;  %v339_v51 = vld [vmem:[%s2162_s28 + $0x18] sm:$0xff] }
  0x25   : > { %988 = vmatprep.subr.bf16.mxu0 %v2095_v1  ;;  %1876 = vmatprep.subr.bf16.mxu1 %v2095_v1  ;;  %v2345_v33 = vmax.bf16 %v2095_v1, %v386_v13  ;;  %v2390_v13 = vmax.bf16 %v2095_v1, %v359_v55  ;;  %v392_v55 = vld [vmem:[%s2162_s28 + $0x1c0] sm:$0xff]  ;;  %v371_v52 = vld [vmem:[%s2162_s28 + $0x118] sm:$0xff]  ;;  %v403_v37 = vmax.bf16 %v2095_v1, %v339_v51  ;;  %v341_v51 = vld [vmem:[%s2162_s28 + $0x28] sm:$0xff] }
  0x26   : > { %v2434_v63 = vmax.bf16 %v2095_v1, %v392_v55  ;;  %v364_v55 = vld [vmem:[%s2162_s28 + $0xe0] sm:$0xff]  ;;  %2945 = vst [vmem:[#allocation9_spill] sm:$0xff] %v2494_v60  ;;  %v1942_v53 = vld [vmem:[%s2918_s1 + $0x78] sm:$0xff]   ;;  %v435_v32 = vmax.bf16 %v2095_v1, %v371_v52  ;;  %v373_v52 = vld [vmem:[%s2162_s28 + $0x128] sm:$0xff] }
  0x27   : > { %v342_v56 = vld [vmem:[%s2162_s28 + $0x30] sm:$0xff]  ;;  %v343_v57 = vld [vmem:[%s2162_s28 + $0x38] sm:$0xff] }
  0x28   : > { %989 = vmatpush1.bf16.msra.mxu0 %v1933_v17  ;;  %1892 = vmatpush1.bf16.msra.mxu1 %v1933_v17  ;;  %v2320_v17 = vmax.bf16 %v2095_v1, %v384_v61  ;;  %v2378_v61 = vmax.bf16 %v2095_v1, %v388_v35  ;;  %v361_v35 = vld [vmem:[%s2162_s28 + $0xc8] sm:$0xff] }
  0x29   : > { %990 = vmatprep.subr.bf16.mxu0 %v2095_v1  ;;  %1877 = vmatprep.subr.bf16.mxu1 %v2095_v1  ;;  %v2431_v15 = vmax.bf16 %v2095_v1, %v361_v35  ;;  %v2449_v35 = vmax.bf16 %v2095_v1, %v395_v8  ;;  %v366_v8 = vld [vmem:[%s2162_s28 + $0xf0] sm:$0xff] }
  0x2b   : > { %2939 = vst [vmem:[#allocation3_spill] sm:$0xff] %v2449_v35  ;;  %v375_v35 = vld [vmem:[%s2162_s28 + $0x138] sm:$0xff] }
  0x2c   : > { %991 = vmatpush1.bf16.msra.mxu0 %v1934_v22  ;;  %1893 = vmatpush1.bf16.msra.mxu1 %v1934_v22  ;;  %v2446_v22 = vmax.bf16 %v2095_v1, %v394_v21  ;;  %v2474_v21 = vmax.bf16 %v2095_v1, %v364_v55  ;;  %v2491_v55 = vmax.bf16 %v2095_v1, %v366_v8 }
  0x2d   : > { %992 = vmatprep.subr.bf16.mxu0 %v2095_v1  ;;  %1878 = vmatprep.subr.bf16.mxu1 %v2095_v1  ;;  %v2505_v8 = vmax.bf16 %v2095_v1, %v398_v59  ;;  %v1941_v59 = vld [vmem:[%s2918_s1 + $0x70] sm:$0xff]  }
  0x2e   : > { %2940 = vst [vmem:[#allocation4_spill] sm:$0xff] %v2474_v21  ;;  %2944 = vst [vmem:[#allocation8_spill] sm:$0xff] %v2491_v55  ;;  %v374_v21 = vld [vmem:[%s2162_s28 + $0x130] sm:$0xff] }
  0x2f   : > { %2946 = vst [vmem:[#allocation10_spill] sm:$0xff] %v2505_v8  ;;  %v340_v8 = vld [vmem:[%s2162_s28 + $0x20] sm:$0xff] }
  0x30   : > { %993 = vmatpush1.bf16.msra.mxu0 %v1935_v40  ;;  %1894 = vmatpush1.bf16.msra.mxu1 %v1935_v40  ;;  %v389_v40 = vld [vmem:[%s2162_s28 + $0x1a8] sm:$0xff]  ;;  %v404_v60 = vmax.bf16 %v2095_v1, %v340_v8  ;;  %v406_v8 = vmax.bf16 %v2095_v1, %v342_v56  ;;  %v2953_v56 = vcombine.high %v2246_v42, %v2249_v43 }
  0x31   : > { %994 = vmatprep.subr.bf16.mxu0 %v2095_v1  ;;  %1879 = vmatprep.subr.bf16.mxu1 %v2095_v1 }
  0x34   : > { %995 = vmatpush1.bf16.msra.mxu0 %v1936_v62  ;;  %1895 = vmatpush1.bf16.msra.mxu1 %v1936_v62  ;;  %v2384_v62 = vmax.bf16 %v2095_v1, %v389_v40  ;;  %v1939_v40 = vld [vmem:[%s2918_s1 + $0x60] sm:$0xff]  }
  0x35   : > { %996 = vmatprep.subr.bf16.mxu0 %v2095_v1  ;;  %1880 = vmatprep.subr.bf16.mxu1 %v2095_v1 }
  0x38   : > { %997 = vmatpush1.bf16.msra.mxu0 %v1937_v19  ;;  %1896 = vmatpush1.bf16.msra.mxu1 %v1937_v19  ;;  %v2425_v19 = vmax.bf16 %v2095_v1, %v360_v49  ;;  %v2443_v49 = vmax.bf16 %v2095_v1, %v363_v54  ;;  %v397_v54 = vld [vmem:[%s2162_s28 + $0x1e8] sm:$0xff] }
  0x39   : > { %998 = vmatprep.subr.bf16.mxu0 %v2095_v1  ;;  %1881 = vmatprep.subr.bf16.mxu1 %v2095_v1  ;;  %v2488_v58 = vmax.bf16 %v2095_v1, %v397_v54  ;;  %v338_v54 = vld [vmem:[%s2162_s28 + $0x10] sm:$0xff] }
  0x3b   : > { %2943 = vst [vmem:[#allocation7_spill] sm:$0xff] %v2488_v58 }
  0x3c   : > { %999 = vmatpush1.bf16.msra.mxu0 %v1938_v27  ;;  %1897 = vmatpush1.bf16.msra.mxu1 %v1938_v27  ;;  %v399_v27 = vld [vmem:[%s2162_s28 + $0x1f8] sm:$0xff] }
  0x3d   : > { %1000 = vmatprep.subr.bf16.mxu0 %v2095_v1  ;;  %1882 = vmatprep.subr.bf16.mxu1 %v2095_v1  ;;  %v2514_v38 = vmax.bf16 %v2095_v1, %v399_v27  ;;  %v370_v27 = vld [vmem:[%s2162_s28 + $0x110] sm:$0xff] }
  0x3e   : > { %v434_v36 = vmax.bf16 %v2095_v1, %v370_v27  ;;  %v372_v27 = vld [vmem:[%s2162_s28 + $0x120] sm:$0xff] }
  0x3f   : > { %2947 = vst [vmem:[#allocation11_spill] sm:$0xff] %v2514_v38 }
  0x40   : > { %1001 = vmatpush1.bf16.msra.mxu0 %v1939_v40  ;;  %1898 = vmatpush1.bf16.msra.mxu1 %v1939_v40  ;;  %v1821_v38 = vcombine.high %v434_v36, %v435_v32 }
  0x41   : > { %1002 = vmatprep.subr.bf16.mxu0 %v2095_v1  ;;  %1883 = vmatprep.subr.bf16.mxu1 %v2095_v1 }
  0x44   : > { %1003 = vmatpush1.bf16.msra.mxu0 %v1940_v48  ;;  %1899 = vmatpush1.bf16.msra.mxu1 %v1940_v48  ;;  %v402_v48 = vmax.bf16 %v2095_v1, %v338_v54  ;;  %v1786_v54 = vcombine.low %v2173_v9, %v2176_v10  ;;  %v405_v9 = vmax.bf16 %v2095_v1, %v341_v51 }
  0x45   : > { %1004 = vmatprep.subr.bf16.mxu0 %v2095_v1  ;;  %1884 = vmatprep.subr.bf16.mxu1 %v2095_v1  ;;  %v436_v10 = vmax.bf16 %v2095_v1, %v372_v27  ;;  %v2990_v27 = vld [vmem:[#allocation5_spill] sm:$0xff] }
  0x46   : > { %v1789_v40 = vcombine.high %v402_v48, %v403_v37  ;;  %v1791_v55 = vcombine.high %v404_v60, %v405_v9 }
  0x48   : > { %1005 = vmatpush1.bf16.msra.mxu0 %v1941_v59  ;;  %1900 = vmatpush1.bf16.msra.mxu1 %v1941_v59  ;;  %v1818_v59 = vcombine.low %v2180_v12, %v2186_v14  ;;  %v437_v12 = vmax.bf16 %v2095_v1, %v373_v52  ;;  %v1788_v14 = vcombine.low %v402_v48, %v403_v37  ;;  %v2993_v52 = vld [vmem:[#allocation7_spill] sm:$0xff] }
  0x49   : > { %1006 = vmatprep.subr.bf16.mxu0 %v2095_v1  ;;  %1885 = vmatprep.subr.bf16.mxu1 %v2095_v1  ;;  %v1790_v37 = vcombine.low %v404_v60, %v405_v9  ;;  %v2987_v60 = vcombine.low %v2440_v20, %v2443_v49 }
  0x4a   : > { %v1823_v58 = vcombine.high %v436_v10, %v437_v12 }
  0x4c   : > { %1007 = vmatpush1.bf16.msra.mxu0 %v1942_v53  ;;  %1901 = vmatpush1.bf16.msra.mxu1 %v1942_v53  ;;  %v1820_v53 = vcombine.low %v434_v36, %v435_v32  ;;  %v1822_v32 = vcombine.low %v436_v10, %v437_v12  ;;  %v2998_v12 = vld [vmem:[#allocation9_spill] sm:$0xff] }
  0x4f   : > { %1009 = vmatmul.mubr.bf16.vlgmr.msra.gmra.mrb[0].mxu0 %v1786_v54  ;;  %1137 = vmatmul.mubr.bf16.vlgmr.msra.gmra.mrb[0].mxu1 %v1818_v59  ;;  %v439_v54 = vmax.bf16 %v2095_v1, %v375_v35  ;;  %v2951_v35 = vcombine.low %v2213_v25, %v2218_v28 }
  0x50   : > { %1016 = vmatprep.mubr.bf16.mxu0 %v1789_v40  ;;  %1144 = vmatprep.mubr.bf16.mxu1 %v1821_v38  ;;  %v407_v38 = vmax.bf16 %v2095_v1, %v343_v57  ;;  %v438_v40 = vmax.bf16 %v2095_v1, %v374_v21  ;;  %v2949_v57 = vcombine.high %v2213_v25, %v2218_v28 }
  0x51   : > { %v2950_v1 = vcombine.low %v2207_v23, %v2210_v24  ;;  %v2952_v21 = vcombine.high %v2237_v39, %v2243_v41  ;;  %v2957_v25 = vcombine.high %v2258_v46, %v2261_v47  ;;  %v2958_v28 = vcombine.low %v2252_v44, %v2255_v45 }
  0x52   : > { %v1793_v36 = vcombine.high %v406_v8, %v407_v38  ;;  %v1825_v48 = vcombine.high %v438_v40, %v439_v54  ;;  %v1792_v59 = vcombine.low %v406_v8, %v407_v38  ;;  %v1824_v51 = vcombine.low %v438_v40, %v439_v54  ;;  %v2707_v54 = vld [vmem:[%s2919_s2] ss:$0 sm:$0xff] }
  0x57   : > { %1017 = vmatmul.mubr.bf16.gmra.mrb[4].mxu0 %v1788_v14  ;;  %1145 = vmatmul.mubr.bf16.gmra.mrb[4].mxu1 %v1820_v53  ;;  %v3000_v14 = vld [vmem:[#allocation10_spill] sm:$0xff]  ;;  %v3001_v53 = vld [vmem:[#allocation11_spill] sm:$0xff] }
  0x58   : > { %1024 = vmatprep.mubr.bf16.mxu0 %v1791_v55  ;;  %1152 = vmatprep.mubr.bf16.mxu1 %v1823_v58  ;;  %v2948_v58 = vcombine.high %v2207_v23, %v2210_v24  ;;  %v2954_v55 = vcombine.low %v2237_v39, %v2243_v41  ;;  %v2955_v23 = vcombine.low %v2246_v42, %v2249_v43 }
  0x59   : > { %v2956_v24 = vcombine.high %v2252_v44, %v2255_v45  ;;  %v2959_v39 = vcombine.low %v2258_v46, %v2261_v47  ;;  %v2960_v41 = vcombine.high %v2292_v0, %v2295_v2  ;;  %v2961_v42 = vcombine.high %v2298_v3, %v2302_v5 }
  0x5a   : > { %v2962_v43 = vcombine.low %v2292_v0, %v2295_v2  ;;  %v2963_v44 = vcombine.low %v2298_v3, %v2302_v5  ;;  %v2964_v45 = vcombine.high %v2305_v6, %v2308_v7  ;;  %v2965_v46 = vcombine.high %v2320_v17, %v2333_v26 }
  0x5b   : > { %v2966_v47 = vcombine.low %v2305_v6, %v2308_v7  ;;  %v2967_v0 = vcombine.low %v2320_v17, %v2333_v26  ;;  %v2968_v2 = vcombine.high %v2339_v30, %v2342_v31  ;;  %v2969_v3 = vcombine.high %v2345_v33, %v2355_v50 }
  0x5c   : > { %v2970_v5 = vcombine.low %v2339_v30, %v2342_v31  ;;  %v2971_v6 = vcombine.low %v2345_v33, %v2355_v50  ;;  %v2972_v7 = vcombine.high %v2367_v4, %v2375_v18  ;;  %v2973_v17 = vcombine.high %v2378_v61, %v2384_v62 }
  0x5d   : > { %v2974_v26 = vcombine.low %v2367_v4, %v2375_v18  ;;  %v2975_v30 = vcombine.low %v2378_v61, %v2384_v62  ;;  %v2976_v31 = vcombine.high %v2387_v11, %v2390_v13  ;;  %v2977_v33 = vcombine.high %v2393_v34, %v2402_v29 }
  0x5e   : > { %v2978_v50 = vcombine.low %v2387_v11, %v2390_v13  ;;  %v2979_v4 = vcombine.low %v2393_v34, %v2402_v29  ;;  %v2980_v61 = vcombine.high %v2425_v19, %v2431_v15  ;;  %v2981_v62 = vcombine.high %v2434_v63, %v2437_v16  ;;  %v2985_v13 = vld [vmem:[#allocation3_spill] sm:$0xff] }
  0x5f   : > { %1025 = vmatmul.mubr.bf16.gmra.mrb[8].mxu0 %v1790_v37  ;;  %1153 = vmatmul.mubr.bf16.gmra.mrb[8].mxu1 %v1822_v32  ;;  %v2982_v18 = vcombine.low %v2425_v19, %v2431_v15  ;;  %v2983_v11 = vcombine.low %v2434_v63, %v2437_v16  ;;  %v2984_v29 = vcombine.high %v2440_v20, %v2443_v49  ;;  %v2989_v19 = vld [vmem:[#allocation4_spill] sm:$0xff]  ;;  %v2992_v16 = vld [vmem:[#allocation6_spill] sm:$0xff] }
  0x60   : > { %1032 = vmatprep.mubr.bf16.mxu0 %v1793_v36  ;;  %1160 = vmatprep.mubr.bf16.mxu1 %v1825_v48  ;;  %v2986_v34 = vcombine.high %v2446_v22, %v2985_v13  ;;  %v2988_v15 = vcombine.low %v2446_v22, %v2985_v13  ;;  %v2991_v63 = vcombine.high %v2989_v19, %v2990_v27  ;;  %v2997_v49 = vld [vmem:[#allocation8_spill] sm:$0xff] }
  0x61   : > { %v2994_v9 = vcombine.high %v2992_v16, %v2993_v52  ;;  %v2995_v10 = vcombine.low %v2989_v19, %v2990_v27  ;;  %v2996_v20 = vcombine.low %v2992_v16, %v2993_v52  ;;  %v2999_v22 = vcombine.high %v2997_v49, %v2998_v12 }
  0x62   : > { %v3002_v8 = vcombine.high %v3000_v14, %v3001_v53  ;;  %v3003_v38 = vcombine.low %v2997_v49, %v2998_v12  ;;  %v3004_v40 = vcombine.low %v3000_v14, %v3001_v53 }
  0x67   : > { %1033 = vmatmul.mubr.bf16.gmra.mrb[12].mxu0 %v1792_v59  ;;  %1161 = vmatmul.mubr.bf16.gmra.mrb[12].mxu1 %v1824_v51 }
  0x68   : > { %1040 = vmatprep.mubr.bf16.mxu0 %v2948_v58  ;;  %1168 = vmatprep.mubr.bf16.mxu1 %v2949_v57 }
  0x6f   : > { %1041 = vmatmul.mubr.bf16.gmra.mrb[16].mxu0 %v2950_v1  ;;  %1169 = vmatmul.mubr.bf16.gmra.mrb[16].mxu1 %v2951_v35 }
  0x70   : > { %1048 = vmatprep.mubr.bf16.mxu0 %v2952_v21  ;;  %1176 = vmatprep.mubr.bf16.mxu1 %v2953_v56 }
  0x77   : > { %1049 = vmatmul.mubr.bf16.gmra.mrb[20].mxu0 %v2954_v55  ;;  %1177 = vmatmul.mubr.bf16.gmra.mrb[20].mxu1 %v2955_v23 }
  0x78   : > { %1056 = vmatprep.mubr.bf16.mxu0 %v2956_v24  ;;  %1184 = vmatprep.mubr.bf16.mxu1 %v2957_v25 }
  0x7f   : > { %1057 = vmatmul.mubr.bf16.gmra.mrb[24].mxu0 %v2958_v28  ;;  %1185 = vmatmul.mubr.bf16.gmra.mrb[24].mxu1 %v2959_v39 }
  0x80   : > { %1064 = vmatprep.mubr.bf16.mxu0 %v2960_v41  ;;  %1192 = vmatprep.mubr.bf16.mxu1 %v2961_v42 }
  0x87   : > { %1065 = vmatmul.mubr.bf16.gmra.mrb[28].mxu0 %v2962_v43  ;;  %1193 = vmatmul.mubr.bf16.gmra.mrb[28].mxu1 %v2963_v44 }
  0x88   : > { %1072 = vmatprep.mubr.bf16.mxu0 %v2964_v45  ;;  %1200 = vmatprep.mubr.bf16.mxu1 %v2965_v46 }
  0x8f   : > { %1073 = vmatmul.mubr.bf16.gmra.mrb[32].mxu0 %v2966_v47  ;;  %1201 = vmatmul.mubr.bf16.gmra.mrb[32].mxu1 %v2967_v0 }
  0x90   : > { %1080 = vmatprep.mubr.bf16.mxu0 %v2968_v2  ;;  %1208 = vmatprep.mubr.bf16.mxu1 %v2969_v3 }
  0x97   : > { %1081 = vmatmul.mubr.bf16.gmra.mrb[36].mxu0 %v2970_v5  ;;  %1209 = vmatmul.mubr.bf16.gmra.mrb[36].mxu1 %v2971_v6 }
  0x98   : > { %1088 = vmatprep.mubr.bf16.mxu0 %v2972_v7  ;;  %1216 = vmatprep.mubr.bf16.mxu1 %v2973_v17 }
  0x9f   : > { %1089 = vmatmul.mubr.bf16.gmra.mrb[40].mxu0 %v2974_v26  ;;  %1217 = vmatmul.mubr.bf16.gmra.mrb[40].mxu1 %v2975_v30 }
  0xa0   : > { %1096 = vmatprep.mubr.bf16.mxu0 %v2976_v31  ;;  %1224 = vmatprep.mubr.bf16.mxu1 %v2977_v33 }
  0xa7   : > { %1097 = vmatmul.mubr.bf16.gmra.mrb[44].mxu0 %v2978_v50  ;;  %1225 = vmatmul.mubr.bf16.gmra.mrb[44].mxu1 %v2979_v4 }
  0xa8   : > { %1104 = vmatprep.mubr.bf16.mxu0 %v2980_v61  ;;  %1232 = vmatprep.mubr.bf16.mxu1 %v2981_v62 }
  0xaf   : > { %1105 = vmatmul.mubr.bf16.gmra.mrb[48].mxu0 %v2982_v18  ;;  %1233 = vmatmul.mubr.bf16.gmra.mrb[48].mxu1 %v2983_v11 }
  0xb0   : > { %1112 = vmatprep.mubr.bf16.mxu0 %v2984_v29  ;;  %1240 = vmatprep.mubr.bf16.mxu1 %v2986_v34 }
  0xb7   : > { %1113 = vmatmul.mubr.bf16.gmra.mrb[52].mxu0 %v2987_v60  ;;  %1241 = vmatmul.mubr.bf16.gmra.mrb[52].mxu1 %v2988_v15 }
  0xb8   : > { %1120 = vmatprep.mubr.bf16.mxu0 %v2991_v63  ;;  %1248 = vmatprep.mubr.bf16.mxu1 %v2994_v9 }
  0xbf   : > { %1121 = vmatmul.mubr.bf16.gmra.mrb[56].mxu0 %v2995_v10  ;;  %1249 = vmatmul.mubr.bf16.gmra.mrb[56].mxu1 %v2996_v20 }
  0xc0   : > { %1128 = vmatprep.mubr.bf16.mxu0 %v2999_v22  ;;  %1256 = vmatprep.mubr.bf16.mxu1 %v3002_v8 }
  0xc7   : > { %1129 = vmatmul.mubr.bf16.gmra.mrb[60].mxu0 %v3003_v38  ;;  %1257 = vmatmul.mubr.bf16.gmra.mrb[60].mxu1 %v3004_v40 }
 0x122   : > { %v1010_v37 = vpop.f32.mrb[0].mxu0  ;;  %v1138_v32 = vpop.f32.mrb[0].mxu1 }
 0x123   : > { %v1467_v36 = vadd.f32 %v2707_v54, %v1010_v37  ;;  %v1499_v48 = vadd.f32 %v2707_v54, %v1138_v32  ;;  %v1012_v59 = vpop.f32.mrb[1].mxu0  ;;  %v1140_v51 = vpop.f32.mrb[1].mxu1 }
 0x124   : > { %v1013_v58 = vpop.f32.mrb[2].mxu0  ;;  %v1141_v57 = vpop.f32.mrb[2].mxu1 }
 0x125   : > { %1943 = vtanh.f32 %v1467_v36  ;;  %v1468_v1 = vadd.f32 %v2707_v54, %v1013_v58  ;;  %v1500_v35 = vadd.f32 %v2707_v54, %v1141_v57  ;;  %v1015_v21 = vpop.f32.mrb[3].mxu0  ;;  %v1143_v56 = vpop.f32.mrb[3].mxu1 }
 0x126   : > { %1945 = vtanh.f32 %v1499_v48 }
 0x127   : > { %1947 = vtanh.f32 %v1468_v1 }
 0x128   : > { %1949 = vtanh.f32 %v1500_v35 }
 0x12a   : > { %v1018_v55 = vpop.f32.mrb[4].mxu0  ;;  %v1146_v23 = vpop.f32.mrb[4].mxu1 }
 0x12b   : > { %v1469_v24 = vadd.f32 %v2707_v54, %v1018_v55  ;;  %v1501_v25 = vadd.f32 %v2707_v54, %v1146_v23  ;;  %v1020_v28 = vpop.f32.mrb[5].mxu0  ;;  %v1148_v39 = vpop.f32.mrb[5].mxu1 }
 0x12c   : > { %v1021_v41 = vpop.f32.mrb[6].mxu0  ;;  %v1149_v42 = vpop.f32.mrb[6].mxu1 }
 0x12d   : > { %1951 = vtanh.f32 %v1469_v24  ;;  %v1470_v43 = vadd.f32 %v2707_v54, %v1021_v41  ;;  %v1502_v44 = vadd.f32 %v2707_v54, %v1149_v42  ;;  %v1023_v45 = vpop.f32.mrb[7].mxu0  ;;  %v1151_v46 = vpop.f32.mrb[7].mxu1 }
 0x12e   : > { %1953 = vtanh.f32 %v1501_v25 }
 0x12f   : > { %v1944_v47 = vpop.eup %1943  ;;  %1955 = vtanh.f32 %v1470_v43 }
 0x130   : > { %v1946_v0 = vpop.eup %1945  ;;  %1596 = vst.msk [vmem:[%s2720_s8] sm:$0xff] %vm1595_vm0, %v1944_v47  ;;  %1957 = vtanh.f32 %v1502_v44 }
 0x131   : > { %v1948_v2 = vpop.eup %1947  ;;  %1628 = vst.msk [vmem:[%s2720_s8 + $0x100] sm:$0xff] %vm1595_vm0, %v1946_v0 }
 0x132   : > { %v1950_v3 = vpop.eup %1949  ;;  %1597 = vst.msk [vmem:[%s2720_s8 + $0x8] sm:$0xff] %vm1595_vm0, %v1948_v2  ;;  %v1026_v5 = vpop.f32.mrb[8].mxu0 }
 0x133   : > { %v1154_v6 = vpop.f32.mrb[8].mxu1  ;;  %1629 = vst.msk [vmem:[%s2720_s8 + $0x108] sm:$0xff] %vm1595_vm0, %v1950_v3  ;;  %v1471_v7 = vadd.f32 %v2707_v54, %v1026_v5  ;;  %v1028_v26 = vpop.f32.mrb[9].mxu0 }
 0x134   : > { %v1503_v17 = vadd.f32 %v2707_v54, %v1154_v6  ;;  %v1156_v30 = vpop.f32.mrb[9].mxu1  ;;  %v1029_v31 = vpop.f32.mrb[10].mxu0 }
 0x135   : > { %v1157_v33 = vpop.f32.mrb[10].mxu1  ;;  %1959 = vtanh.f32 %v1471_v7  ;;  %v1472_v50 = vadd.f32 %v2707_v54, %v1029_v31  ;;  %v1031_v61 = vpop.f32.mrb[11].mxu0 }
 0x136   : > { %v1504_v4 = vadd.f32 %v2707_v54, %v1157_v33  ;;  %v1159_v62 = vpop.f32.mrb[11].mxu1  ;;  %1961 = vtanh.f32 %v1503_v17 }
 0x137   : > { %v1952_v18 = vpop.eup %1951  ;;  %1963 = vtanh.f32 %v1472_v50 }
 0x138   : > { %v1954_v11 = vpop.eup %1953  ;;  %1598 = vst.msk [vmem:[%s2720_s8 + $0x10] sm:$0xff] %vm1595_vm0, %v1952_v18  ;;  %1965 = vtanh.f32 %v1504_v4 }
 0x139   : > { %v1956_v29 = vpop.eup %1955  ;;  %1630 = vst.msk [vmem:[%s2720_s8 + $0x110] sm:$0xff] %vm1595_vm0, %v1954_v11 }
 0x13a   : > { %v1958_v13 = vpop.eup %1957  ;;  %1599 = vst.msk [vmem:[%s2720_s8 + $0x18] sm:$0xff] %vm1595_vm0, %v1956_v29  ;;  %v1034_v34 = vpop.f32.mrb[12].mxu0 }
 0x13b   : > { %v1162_v60 = vpop.f32.mrb[12].mxu1  ;;  %1631 = vst.msk [vmem:[%s2720_s8 + $0x118] sm:$0xff] %vm1595_vm0, %v1958_v13  ;;  %v1473_v15 = vadd.f32 %v2707_v54, %v1034_v34  ;;  %v1036_v27 = vpop.f32.mrb[13].mxu0 }
 0x13c   : > { %v1505_v19 = vadd.f32 %v2707_v54, %v1162_v60  ;;  %v1164_v63 = vpop.f32.mrb[13].mxu1  ;;  %v1037_v16 = vpop.f32.mrb[14].mxu0 }
 0x13d   : > { %v1165_v52 = vpop.f32.mrb[14].mxu1  ;;  %1967 = vtanh.f32 %v1473_v15  ;;  %v1474_v9 = vadd.f32 %v2707_v54, %v1037_v16  ;;  %v1039_v20 = vpop.f32.mrb[15].mxu0 }
 0x13e   : > { %v1506_v10 = vadd.f32 %v2707_v54, %v1165_v52  ;;  %v1167_v49 = vpop.f32.mrb[15].mxu1  ;;  %1969 = vtanh.f32 %v1505_v19 }
 0x13f   : > { %v1960_v12 = vpop.eup %1959  ;;  %1971 = vtanh.f32 %v1474_v9 }
 0x140   : > { %v1962_v22 = vpop.eup %1961  ;;  %1600 = vst.msk [vmem:[%s2720_s8 + $0x20] sm:$0xff] %vm1595_vm0, %v1960_v12  ;;  %1973 = vtanh.f32 %v1506_v10 }
 0x141   : > { %v1964_v14 = vpop.eup %1963  ;;  %1632 = vst.msk [vmem:[%s2720_s8 + $0x120] sm:$0xff] %vm1595_vm0, %v1962_v22 }
 0x142   : > { %v1966_v53 = vpop.eup %1965  ;;  %1601 = vst.msk [vmem:[%s2720_s8 + $0x28] sm:$0xff] %vm1595_vm0, %v1964_v14  ;;  %v1042_v8 = vpop.f32.mrb[16].mxu0 }
 0x143   : > { %v1170_v38 = vpop.f32.mrb[16].mxu1  ;;  %1633 = vst.msk [vmem:[%s2720_s8 + $0x128] sm:$0xff] %vm1595_vm0, %v1966_v53  ;;  %v1475_v40 = vadd.f32 %v2707_v54, %v1042_v8  ;;  %v1044_v32 = vpop.f32.mrb[17].mxu0 }
 0x144   : > { %v1507_v37 = vadd.f32 %v2707_v54, %v1170_v38  ;;  %v1172_v36 = vpop.f32.mrb[17].mxu1  ;;  %v1045_v48 = vpop.f32.mrb[18].mxu0 }
 0x145   : > { %v1173_v59 = vpop.f32.mrb[18].mxu1  ;;  %1975 = vtanh.f32 %v1475_v40  ;;  %v1476_v51 = vadd.f32 %v2707_v54, %v1045_v48  ;;  %v1047_v57 = vpop.f32.mrb[19].mxu0 }
 0x146   : > { %v1508_v58 = vadd.f32 %v2707_v54, %v1173_v59  ;;  %v1175_v1 = vpop.f32.mrb[19].mxu1  ;;  %1977 = vtanh.f32 %v1507_v37 }
 0x147   : > { %v1968_v35 = vpop.eup %1967  ;;  %1979 = vtanh.f32 %v1476_v51 }
 0x148   : > { %v1970_v21 = vpop.eup %1969  ;;  %1602 = vst.msk [vmem:[%s2720_s8 + $0x30] sm:$0xff] %vm1595_vm0, %v1968_v35  ;;  %1981 = vtanh.f32 %v1508_v58 }
 0x149   : > { %v1972_v56 = vpop.eup %1971  ;;  %1634 = vst.msk [vmem:[%s2720_s8 + $0x130] sm:$0xff] %vm1595_vm0, %v1970_v21 }
 0x14a   : > { %v1974_v55 = vpop.eup %1973  ;;  %1603 = vst.msk [vmem:[%s2720_s8 + $0x38] sm:$0xff] %vm1595_vm0, %v1972_v56  ;;  %v1050_v23 = vpop.f32.mrb[20].mxu0 }
 0x14b   : > { %v1178_v24 = vpop.f32.mrb[20].mxu1  ;;  %1635 = vst.msk [vmem:[%s2720_s8 + $0x138] sm:$0xff] %vm1595_vm0, %v1974_v55  ;;  %v1477_v25 = vadd.f32 %v2707_v54, %v1050_v23  ;;  %v1052_v39 = vpop.f32.mrb[21].mxu0 }
 0x14c   : > { %v1509_v28 = vadd.f32 %v2707_v54, %v1178_v24  ;;  %v1180_v41 = vpop.f32.mrb[21].mxu1  ;;  %v1053_v42 = vpop.f32.mrb[22].mxu0 }
 0x14d   : > { %v1181_v43 = vpop.f32.mrb[22].mxu1  ;;  %1983 = vtanh.f32 %v1477_v25  ;;  %v1478_v44 = vadd.f32 %v2707_v54, %v1053_v42  ;;  %v1055_v46 = vpop.f32.mrb[23].mxu0 }
 0x14e   : > { %v1510_v45 = vadd.f32 %v2707_v54, %v1181_v43  ;;  %v1183_v47 = vpop.f32.mrb[23].mxu1  ;;  %1985 = vtanh.f32 %v1509_v28 }
 0x14f   : > { %v1976_v0 = vpop.eup %1975  ;;  %1987 = vtanh.f32 %v1478_v44 }
 0x150   : > { %v1978_v2 = vpop.eup %1977  ;;  %1604 = vst.msk [vmem:[%s2720_s8 + $0x40] sm:$0xff] %vm1595_vm0, %v1976_v0  ;;  %1989 = vtanh.f32 %v1510_v45 }
 0x151   : > { %v1980_v3 = vpop.eup %1979  ;;  %1636 = vst.msk [vmem:[%s2720_s8 + $0x140] sm:$0xff] %vm1595_vm0, %v1978_v2 }
 0x152   : > { %v1982_v5 = vpop.eup %1981  ;;  %1605 = vst.msk [vmem:[%s2720_s8 + $0x48] sm:$0xff] %vm1595_vm0, %v1980_v3  ;;  %v1058_v6 = vpop.f32.mrb[24].mxu0 }
 0x153   : > { %v1186_v7 = vpop.f32.mrb[24].mxu1  ;;  %1637 = vst.msk [vmem:[%s2720_s8 + $0x148] sm:$0xff] %vm1595_vm0, %v1982_v5  ;;  %v1479_v17 = vadd.f32 %v2707_v54, %v1058_v6  ;;  %v1060_v30 = vpop.f32.mrb[25].mxu0 }
 0x154   : > { %v1511_v26 = vadd.f32 %v2707_v54, %v1186_v7  ;;  %v1188_v31 = vpop.f32.mrb[25].mxu1  ;;  %v1061_v33 = vpop.f32.mrb[26].mxu0 }
 0x155   : > { %v1189_v50 = vpop.f32.mrb[26].mxu1  ;;  %1991 = vtanh.f32 %v1479_v17  ;;  %v1480_v4 = vadd.f32 %v2707_v54, %v1061_v33  ;;  %v1063_v62 = vpop.f32.mrb[27].mxu0 }
 0x156   : > { %v1512_v61 = vadd.f32 %v2707_v54, %v1189_v50  ;;  %v1191_v18 = vpop.f32.mrb[27].mxu1  ;;  %1993 = vtanh.f32 %v1511_v26 }
 0x157   : > { %v1984_v11 = vpop.eup %1983  ;;  %1995 = vtanh.f32 %v1480_v4 }
 0x158   : > { %v1986_v29 = vpop.eup %1985  ;;  %1606 = vst.msk [vmem:[%s2720_s8 + $0x50] sm:$0xff] %vm1595_vm0, %v1984_v11  ;;  %1997 = vtanh.f32 %v1512_v61 }
 0x159   : > { %v1988_v13 = vpop.eup %1987  ;;  %1638 = vst.msk [vmem:[%s2720_s8 + $0x150] sm:$0xff] %vm1595_vm0, %v1986_v29 }
 0x15a   : > { %v1990_v34 = vpop.eup %1989  ;;  %1607 = vst.msk [vmem:[%s2720_s8 + $0x58] sm:$0xff] %vm1595_vm0, %v1988_v13  ;;  %v1066_v60 = vpop.f32.mrb[28].mxu0 }
 0x15b   : > { %v1194_v15 = vpop.f32.mrb[28].mxu1  ;;  %1639 = vst.msk [vmem:[%s2720_s8 + $0x158] sm:$0xff] %vm1595_vm0, %v1990_v34  ;;  %v1481_v19 = vadd.f32 %v2707_v54, %v1066_v60  ;;  %v1068_v63 = vpop.f32.mrb[29].mxu0 }
 0x15c   : > { %v1513_v27 = vadd.f32 %v2707_v54, %v1194_v15  ;;  %v1196_v16 = vpop.f32.mrb[29].mxu1  ;;  %v1069_v52 = vpop.f32.mrb[30].mxu0 }
 0x15d   : > { %v1197_v9 = vpop.f32.mrb[30].mxu1  ;;  %1999 = vtanh.f32 %v1481_v19  ;;  %v1482_v10 = vadd.f32 %v2707_v54, %v1069_v52  ;;  %v1071_v49 = vpop.f32.mrb[31].mxu0 }
 0x15e   : > { %v1514_v20 = vadd.f32 %v2707_v54, %v1197_v9  ;;  %v1199_v12 = vpop.f32.mrb[31].mxu1  ;;  %2001 = vtanh.f32 %v1513_v27 }
 0x15f   : > { %v1992_v22 = vpop.eup %1991  ;;  %2003 = vtanh.f32 %v1482_v10 }
 0x160   : > { %v1994_v14 = vpop.eup %1993  ;;  %1608 = vst.msk [vmem:[%s2720_s8 + $0x60] sm:$0xff] %vm1595_vm0, %v1992_v22  ;;  %2005 = vtanh.f32 %v1514_v20 }
 0x161   : > { %v1996_v53 = vpop.eup %1995  ;;  %1640 = vst.msk [vmem:[%s2720_s8 + $0x160] sm:$0xff] %vm1595_vm0, %v1994_v14 }
 0x162   : > { %v1998_v8 = vpop.eup %1997  ;;  %1609 = vst.msk [vmem:[%s2720_s8 + $0x68] sm:$0xff] %vm1595_vm0, %v1996_v53  ;;  %v1074_v38 = vpop.f32.mrb[32].mxu0 }
 0x163   : > { %v1202_v40 = vpop.f32.mrb[32].mxu1  ;;  %1641 = vst.msk [vmem:[%s2720_s8 + $0x168] sm:$0xff] %vm1595_vm0, %v1998_v8  ;;  %v1483_v37 = vadd.f32 %v2707_v54, %v1074_v38  ;;  %v1076_v36 = vpop.f32.mrb[33].mxu0 }
 0x164   : > { %v1515_v32 = vadd.f32 %v2707_v54, %v1202_v40  ;;  %v1204_v48 = vpop.f32.mrb[33].mxu1  ;;  %v1077_v59 = vpop.f32.mrb[34].mxu0 }
 0x165   : > { %v1205_v51 = vpop.f32.mrb[34].mxu1  ;;  %2007 = vtanh.f32 %v1483_v37  ;;  %v1484_v58 = vadd.f32 %v2707_v54, %v1077_v59  ;;  %v1079_v1 = vpop.f32.mrb[35].mxu0 }
 0x166   : > { %v1516_v57 = vadd.f32 %v2707_v54, %v1205_v51  ;;  %v1207_v35 = vpop.f32.mrb[35].mxu1  ;;  %2009 = vtanh.f32 %v1515_v32 }
 0x167   : > { %v2000_v21 = vpop.eup %1999  ;;  %2011 = vtanh.f32 %v1484_v58 }
 0x168   : > { %v2002_v56 = vpop.eup %2001  ;;  %1610 = vst.msk [vmem:[%s2720_s8 + $0x70] sm:$0xff] %vm1595_vm0, %v2000_v21  ;;  %2013 = vtanh.f32 %v1516_v57 }
 0x169   : > { %v2004_v55 = vpop.eup %2003  ;;  %1642 = vst.msk [vmem:[%s2720_s8 + $0x170] sm:$0xff] %vm1595_vm0, %v2002_v56 }
 0x16a   : > { %v2006_v23 = vpop.eup %2005  ;;  %1611 = vst.msk [vmem:[%s2720_s8 + $0x78] sm:$0xff] %vm1595_vm0, %v2004_v55  ;;  %v1082_v24 = vpop.f32.mrb[36].mxu0 }
 0x16b   : > { %v1210_v25 = vpop.f32.mrb[36].mxu1  ;;  %1643 = vst.msk [vmem:[%s2720_s8 + $0x178] sm:$0xff] %vm1595_vm0, %v2006_v23  ;;  %v1485_v28 = vadd.f32 %v2707_v54, %v1082_v24  ;;  %v1084_v41 = vpop.f32.mrb[37].mxu0 }
 0x16c   : > { %v1517_v39 = vadd.f32 %v2707_v54, %v1210_v25  ;;  %v1212_v42 = vpop.f32.mrb[37].mxu1  ;;  %v1085_v43 = vpop.f32.mrb[38].mxu0 }
 0x16d   : > { %v1213_v44 = vpop.f32.mrb[38].mxu1  ;;  %2015 = vtanh.f32 %v1485_v28  ;;  %v1486_v45 = vadd.f32 %v2707_v54, %v1085_v43  ;;  %v1087_v47 = vpop.f32.mrb[39].mxu0 }
 0x16e   : > { %v1518_v46 = vadd.f32 %v2707_v54, %v1213_v44  ;;  %v1215_v0 = vpop.f32.mrb[39].mxu1  ;;  %2017 = vtanh.f32 %v1517_v39 }
 0x16f   : > { %v2008_v2 = vpop.eup %2007  ;;  %2019 = vtanh.f32 %v1486_v45 }
 0x170   : > { %v2010_v3 = vpop.eup %2009  ;;  %1612 = vst.msk [vmem:[%s2720_s8 + $0x80] sm:$0xff] %vm1595_vm0, %v2008_v2  ;;  %2021 = vtanh.f32 %v1518_v46 }
 0x171   : > { %v2012_v5 = vpop.eup %2011  ;;  %1644 = vst.msk [vmem:[%s2720_s8 + $0x180] sm:$0xff] %vm1595_vm0, %v2010_v3 }
 0x172   : > { %v2014_v6 = vpop.eup %2013  ;;  %1613 = vst.msk [vmem:[%s2720_s8 + $0x88] sm:$0xff] %vm1595_vm0, %v2012_v5  ;;  %v1090_v7 = vpop.f32.mrb[40].mxu0 }
 0x173   : > { %v1218_v17 = vpop.f32.mrb[40].mxu1  ;;  %1645 = vst.msk [vmem:[%s2720_s8 + $0x188] sm:$0xff] %vm1595_vm0, %v2014_v6  ;;  %v1487_v26 = vadd.f32 %v2707_v54, %v1090_v7  ;;  %v1092_v31 = vpop.f32.mrb[41].mxu0 }
 0x174   : > { %v1519_v30 = vadd.f32 %v2707_v54, %v1218_v17  ;;  %v1220_v33 = vpop.f32.mrb[41].mxu1  ;;  %v1093_v50 = vpop.f32.mrb[42].mxu0 }
 0x175   : > { %v1221_v4 = vpop.f32.mrb[42].mxu1  ;;  %2023 = vtanh.f32 %v1487_v26  ;;  %v1488_v61 = vadd.f32 %v2707_v54, %v1093_v50  ;;  %v1095_v18 = vpop.f32.mrb[43].mxu0 }
 0x176   : > { %v1520_v62 = vadd.f32 %v2707_v54, %v1221_v4  ;;  %v1223_v11 = vpop.f32.mrb[43].mxu1  ;;  %2025 = vtanh.f32 %v1519_v30 }
 0x177   : > { %v2016_v29 = vpop.eup %2015  ;;  %2027 = vtanh.f32 %v1488_v61 }
 0x178   : > { %v2018_v13 = vpop.eup %2017  ;;  %1614 = vst.msk [vmem:[%s2720_s8 + $0x90] sm:$0xff] %vm1595_vm0, %v2016_v29  ;;  %2029 = vtanh.f32 %v1520_v62 }
 0x179   : > { %v2020_v34 = vpop.eup %2019  ;;  %1646 = vst.msk [vmem:[%s2720_s8 + $0x190] sm:$0xff] %vm1595_vm0, %v2018_v13 }
 0x17a   : > { %v2022_v60 = vpop.eup %2021  ;;  %1615 = vst.msk [vmem:[%s2720_s8 + $0x98] sm:$0xff] %vm1595_vm0, %v2020_v34  ;;  %v1098_v15 = vpop.f32.mrb[44].mxu0 }
 0x17b   : > { %v1226_v19 = vpop.f32.mrb[44].mxu1  ;;  %1647 = vst.msk [vmem:[%s2720_s8 + $0x198] sm:$0xff] %vm1595_vm0, %v2022_v60  ;;  %v1489_v27 = vadd.f32 %v2707_v54, %v1098_v15  ;;  %v1100_v16 = vpop.f32.mrb[45].mxu0 }
 0x17c   : > { %v1521_v63 = vadd.f32 %v2707_v54, %v1226_v19  ;;  %v1228_v52 = vpop.f32.mrb[45].mxu1  ;;  %v1101_v9 = vpop.f32.mrb[46].mxu0 }
 0x17d   : > { %v1229_v10 = vpop.f32.mrb[46].mxu1  ;;  %2031 = vtanh.f32 %v1489_v27  ;;  %v1490_v20 = vadd.f32 %v2707_v54, %v1101_v9  ;;  %v1103_v12 = vpop.f32.mrb[47].mxu0 }
 0x17e   : > { %v1522_v49 = vadd.f32 %v2707_v54, %v1229_v10  ;;  %v1231_v22 = vpop.f32.mrb[47].mxu1  ;;  %2033 = vtanh.f32 %v1521_v63 }
 0x17f   : > { %v2024_v14 = vpop.eup %2023  ;;  %2035 = vtanh.f32 %v1490_v20 }
 0x180   : > { %v2026_v53 = vpop.eup %2025  ;;  %1616 = vst.msk [vmem:[%s2720_s8 + $0xa0] sm:$0xff] %vm1595_vm0, %v2024_v14  ;;  %2037 = vtanh.f32 %v1522_v49 }
 0x181   : > { %v2028_v8 = vpop.eup %2027  ;;  %1648 = vst.msk [vmem:[%s2720_s8 + $0x1a0] sm:$0xff] %vm1595_vm0, %v2026_v53 }
 0x182   : > { %v2030_v38 = vpop.eup %2029  ;;  %1617 = vst.msk [vmem:[%s2720_s8 + $0xa8] sm:$0xff] %vm1595_vm0, %v2028_v8  ;;  %v1106_v40 = vpop.f32.mrb[48].mxu0 }
 0x183   : > { %v1234_v37 = vpop.f32.mrb[48].mxu1  ;;  %1649 = vst.msk [vmem:[%s2720_s8 + $0x1a8] sm:$0xff] %vm1595_vm0, %v2030_v38  ;;  %v1491_v32 = vadd.f32 %v2707_v54, %v1106_v40  ;;  %v1108_v48 = vpop.f32.mrb[49].mxu0 }
 0x184   : > { %v1523_v36 = vadd.f32 %v2707_v54, %v1234_v37  ;;  %v1236_v59 = vpop.f32.mrb[49].mxu1  ;;  %v1109_v51 = vpop.f32.mrb[50].mxu0 }
 0x185   : > { %v1237_v58 = vpop.f32.mrb[50].mxu1  ;;  %2039 = vtanh.f32 %v1491_v32  ;;  %v1492_v57 = vadd.f32 %v2707_v54, %v1109_v51  ;;  %v1111_v35 = vpop.f32.mrb[51].mxu0 }
 0x186   : > { %v1524_v1 = vadd.f32 %v2707_v54, %v1237_v58  ;;  %v1239_v21 = vpop.f32.mrb[51].mxu1  ;;  %2041 = vtanh.f32 %v1523_v36 }
 0x187   : > { %v2032_v56 = vpop.eup %2031  ;;  %2043 = vtanh.f32 %v1492_v57 }
 0x188   : > { %v2034_v55 = vpop.eup %2033  ;;  %1618 = vst.msk [vmem:[%s2720_s8 + $0xb0] sm:$0xff] %vm1595_vm0, %v2032_v56  ;;  %2045 = vtanh.f32 %v1524_v1 }
 0x189   : > { %v2036_v23 = vpop.eup %2035  ;;  %1650 = vst.msk [vmem:[%s2720_s8 + $0x1b0] sm:$0xff] %vm1595_vm0, %v2034_v55 }
 0x18a   : > { %v2038_v24 = vpop.eup %2037  ;;  %1619 = vst.msk [vmem:[%s2720_s8 + $0xb8] sm:$0xff] %vm1595_vm0, %v2036_v23  ;;  %v1114_v25 = vpop.f32.mrb[52].mxu0 }
 0x18b   : > { %v1242_v28 = vpop.f32.mrb[52].mxu1  ;;  %1651 = vst.msk [vmem:[%s2720_s8 + $0x1b8] sm:$0xff] %vm1595_vm0, %v2038_v24  ;;  %v1493_v39 = vadd.f32 %v2707_v54, %v1114_v25  ;;  %v1116_v42 = vpop.f32.mrb[53].mxu0 }
 0x18c   : > { %v1525_v41 = vadd.f32 %v2707_v54, %v1242_v28  ;;  %v1244_v43 = vpop.f32.mrb[53].mxu1  ;;  %v1117_v44 = vpop.f32.mrb[54].mxu0 }
 0x18d   : > { %v1245_v45 = vpop.f32.mrb[54].mxu1  ;;  %2047 = vtanh.f32 %v1493_v39  ;;  %v1494_v46 = vadd.f32 %v2707_v54, %v1117_v44  ;;  %v1119_v0 = vpop.f32.mrb[55].mxu0 }
 0x18e   : > { %v1526_v47 = vadd.f32 %v2707_v54, %v1245_v45  ;;  %v1247_v2 = vpop.f32.mrb[55].mxu1  ;;  %2049 = vtanh.f32 %v1525_v41 }
 0x18f   : > { %v2040_v3 = vpop.eup %2039  ;;  %2051 = vtanh.f32 %v1494_v46 }
 0x190   : > { %v2042_v5 = vpop.eup %2041  ;;  %1620 = vst.msk [vmem:[%s2720_s8 + $0xc0] sm:$0xff] %vm1595_vm0, %v2040_v3  ;;  %2053 = vtanh.f32 %v1526_v47 }
 0x191   : > { %v2044_v6 = vpop.eup %2043  ;;  %1652 = vst.msk [vmem:[%s2720_s8 + $0x1c0] sm:$0xff] %vm1595_vm0, %v2042_v5 }
 0x192   : > { %v2046_v7 = vpop.eup %2045  ;;  %1621 = vst.msk [vmem:[%s2720_s8 + $0xc8] sm:$0xff] %vm1595_vm0, %v2044_v6  ;;  %v1122_v17 = vpop.f32.mrb[56].mxu0 }
 0x193   : > { %v1250_v26 = vpop.f32.mrb[56].mxu1  ;;  %1653 = vst.msk [vmem:[%s2720_s8 + $0x1c8] sm:$0xff] %vm1595_vm0, %v2046_v7  ;;  %v1495_v30 = vadd.f32 %v2707_v54, %v1122_v17  ;;  %v1124_v33 = vpop.f32.mrb[57].mxu0 }
 0x194   : > { %v1527_v31 = vadd.f32 %v2707_v54, %v1250_v26  ;;  %v1252_v50 = vpop.f32.mrb[57].mxu1  ;;  %v1125_v4 = vpop.f32.mrb[58].mxu0 }
 0x195   : > { %v1253_v61 = vpop.f32.mrb[58].mxu1  ;;  %2055 = vtanh.f32 %v1495_v30  ;;  %v1496_v62 = vadd.f32 %v2707_v54, %v1125_v4  ;;  %v1127_v11 = vpop.f32.mrb[59].mxu0 }
 0x196   : > { %v1528_v18 = vadd.f32 %v2707_v54, %v1253_v61  ;;  %v1255_v29 = vpop.f32.mrb[59].mxu1  ;;  %2057 = vtanh.f32 %v1527_v31 }
 0x197   : > { %v2048_v13 = vpop.eup %2047  ;;  %2059 = vtanh.f32 %v1496_v62 }
 0x198   : > { %v2050_v34 = vpop.eup %2049  ;;  %1622 = vst.msk [vmem:[%s2720_s8 + $0xd0] sm:$0xff] %vm1595_vm0, %v2048_v13  ;;  %2061 = vtanh.f32 %v1528_v18 }
 0x199   : > { %v2052_v60 = vpop.eup %2051  ;;  %1654 = vst.msk [vmem:[%s2720_s8 + $0x1d0] sm:$0xff] %vm1595_vm0, %v2050_v34 }
 0x19a   : > { %v2054_v15 = vpop.eup %2053  ;;  %1623 = vst.msk [vmem:[%s2720_s8 + $0xd8] sm:$0xff] %vm1595_vm0, %v2052_v60  ;;  %v1130_v19 = vpop.f32.mrb[60].mxu0 }
 0x19b   : > { %v1258_v27 = vpop.f32.mrb[60].mxu1  ;;  %1655 = vst.msk [vmem:[%s2720_s8 + $0x1d8] sm:$0xff] %vm1595_vm0, %v2054_v15  ;;  %v1497_v63 = vadd.f32 %v2707_v54, %v1130_v19  ;;  %v1132_v52 = vpop.f32.mrb[61].mxu0 }
 0x19c   : > { %v1529_v16 = vadd.f32 %v2707_v54, %v1258_v27  ;;  %v1260_v9 = vpop.f32.mrb[61].mxu1  ;;  %v1133_v10 = vpop.f32.mrb[62].mxu0 }
 0x19d   : > { %v1261_v20 = vpop.f32.mrb[62].mxu1  ;;  %2063 = vtanh.f32 %v1497_v63  ;;  %v1498_v49 = vadd.f32 %v2707_v54, %v1133_v10  ;;  %v1135_v22 = vpop.f32.mrb[63].mxu0 }
 0x19e   : > { %v1530_v12 = vadd.f32 %v2707_v54, %v1261_v20  ;;  %v1263_v14 = vpop.f32.mrb[63].mxu1  ;;  %2065 = vtanh.f32 %v1529_v16 }
 0x19f   : > { %v2056_v53 = vpop.eup %2055  ;;  %2067 = vtanh.f32 %v1498_v49 }
 0x1a0   : > { %v2058_v8 = vpop.eup %2057  ;;  %1624 = vst.msk [vmem:[%s2720_s8 + $0xe0] sm:$0xff] %vm1595_vm0, %v2056_v53  ;;  %2069 = vtanh.f32 %v1530_v12 }
 0x1a1   : > { %v2060_v38 = vpop.eup %2059  ;;  %1656 = vst.msk [vmem:[%s2720_s8 + $0x1e0] sm:$0xff] %vm1595_vm0, %v2058_v8 }
 0x1a2   : > { %v2062_v40 = vpop.eup %2061  ;;  %1625 = vst.msk [vmem:[%s2720_s8 + $0xe8] sm:$0xff] %vm1595_vm0, %v2060_v38 }
 0x1a3   : > { %1657 = vst.msk [vmem:[%s2720_s8 + $0x1e8] sm:$0xff] %vm1595_vm0, %v2062_v40 }
 0x1a7   : > { %v2064_v54 = vpop.eup %2063 }
 0x1a8   : > { %v2066_v37 = vpop.eup %2065  ;;  %1626 = vst.msk [vmem:[%s2720_s8 + $0xf0] sm:$0xff] %vm1595_vm0, %v2064_v54 }
 0x1a9   : > { %v2068_v32 = vpop.eup %2067  ;;  %1658 = vst.msk [vmem:[%s2720_s8 + $0x1f0] sm:$0xff] %vm1595_vm0, %v2066_v37 }
 0x1aa   : > { %v2070_v36 = vpop.eup %2069  ;;  %1627 = vst.msk [vmem:[%s2720_s8 + $0xf8] sm:$0xff] %vm1595_vm0, %v2068_v32 }
 0x1ab   : > { %1659 = vst.msk [vmem:[%s2720_s8 + $0x1f8] sm:$0xff] %vm1595_vm0, %v2070_v36 }
 0x1ac PF: > { %s13_s14 = sadd.s32 1, %s2093_s14   ;;  %s3005_s12 = smov %s2089_s13 }
 0x1ad   : > { %p10_p5 = scmp.ge.s32.totalorder %s13_s14, 10   ;;  %s3006_s13 = smov %s3008_s15 }
 0x1af   :  { %12 = sbr.rel (!%p10_p5) target bundleno = 2 (0x2), region = 76 }

</bundles_post_ra>
